<compile_context>
chip_gen: v5e
topology: v5e:2x2
jax: 0.10.0
libtpu: 0.0.40
codegen_flags: <defaults>
</compile_context>

<pallas_src>
import jax
import jax.numpy as jnp
import numpy as np
from jax.experimental import pallas as pl
from jax.experimental.pallas import tpu as pltpu  # noqa: F401  (TPU tuning hooks)

# ---------------- static (small) model configuration ----------------
B, S, NF = 2, 8, 4                       # batch, seq_len, n_features
V = 32                                   # vocab_size
H, NL = 4, 2                             # n_heads, n_layers
D = (32 // NF // H) * NF * H             # d_model rounding rule from __init__ -> 32
FD = D // NF                             # per-feature embedding dim
DH = D // H                              # head dim
P = 2 * S                                # relative-position table length (klen + qlen)
DI = 3072                                # d_inner from pretrained xlnet-base-cased config
DHALF = D // 2
BS = B * S
HBS = H * BS
MAX_LEN = 64
SCALE = 1.0 / (DH ** 0.5)
LN_EPS_XLNET = 1e-12
LN_EPS_HEAD = 1e-5
CW = 128                                 # width of the packed constant/parameter table

# ---------------- packed constant-table layout (static row offsets) ----------------
def _pad8(n):
    return ((n + 7) // 8) * 8

_SECTIONS = [('emb', NF * V), ('pos', BS), ('rels', S * S), ('hmask', HBS), ('bsel', HBS),
             ('cj', BS), ('rsel', HBS), ('cj2', S * S), ('rw1', D), ('rw2', DHALF),
             ('hbias', 8)]
OFF = {}
_r = 0
for _name, _n in _SECTIONS:
    OFF[_name] = _r
    _r += _pad8(_n)
LOFF = _r                                # start of per-layer 8-row parameter blocks
CONST_ROWS = LOFF + 8 * NL

# ---------------- host-side 0/1 selector / mask constants (numpy, built once) ----------------
# Attention rows are ordered r = h*B*S + b*S + i  (head-major).
_rr = np.arange(HBS)
_dd = np.arange(D)
HEADMASK = (_dd[None, :] // DH == _rr[:, None] // BS).astype(np.float32)        # (64, 32)
_cb = np.arange(BS)
BSEL = ((_cb[None, :] // S) == ((_rr[:, None] // S) % B)).astype(np.float32)    # (64, 16)
CJ = np.tile(np.eye(S, dtype=np.float32), (B, 1))                               # (16, 8)
_c2 = np.arange(S * S)
RSEL = ((_c2[None, :] // S) == (_rr[:, None] % S)).astype(np.float32)           # (64, 64)
CJ2 = np.tile(np.eye(S, dtype=np.float32), (S, 1))                              # (64, 8)


def _rel_pos_encoding_np():
    # XLNet relative_positional_encoding (attn_type='bi', no mems): positions S .. -S+1
    inv_freq = 1.0 / (10000.0 ** (np.arange(0, D, 2, dtype=np.float64) / D))
    pos_seq = np.arange(S, -S, -1, dtype=np.float64)
    sinusoid = pos_seq[:, None] * inv_freq[None, :]
    return np.concatenate([np.sin(sinusoid), np.cos(sinusoid)], axis=-1).astype(np.float32)


_REL = _rel_pos_encoding_np()                                                    # (P, D)
_ii = np.arange(S)[:, None]
_jj = np.arange(S)[None, :]
# rel-shift done host-side: row (i*S + j) holds rel[S + j - i]  (Transformer-XL rel_shift_bnij)
REL_SHIFTED = _REL[(S + _jj - _ii).reshape(-1)]                                  # (S*S, D)


# ---------------- in-kernel math helpers ----------------
def _layer_norm(x, gamma, beta, eps):
    mu = jnp.mean(x, axis=-1, keepdims=True)
    var = jnp.mean((x - mu) ** 2, axis=-1, keepdims=True)
    return (x - mu) * jax.lax.rsqrt(var + eps) * gamma + beta


def _gelu_tanh(x):
    # tanh-approx GELU (EUP slot); ~1e-3 max drift vs exact-erf torch GELU.
    c = 0.7978845608028654
    return 0.5 * x * (1.0 + jnp.tanh(c * (x + 0.044715 * x * x * x)))


# ---------------- the single fused Pallas kernel ----------------
def fused_forward_kernel(tok_ref, cref, wproj_ref, wob_ref, wf1_ref, bf1_ref, wf2t_ref, out_ref):
    f32 = jnp.float32
    bf16 = jnp.bfloat16
    dn_t = (((1,), (1,)), ((), ()))      # contract last dims:  A (m,k) x B (n,k) -> (m,n)

    # ---- constants / small params from the packed table (static slices) ----
    emb = cref[OFF['emb']:OFF['emb'] + NF * V, 0:D]            # (128, 32) block-diag embedding
    pos = cref[OFF['pos']:OFF['pos'] + BS, 0:D]                # (16, 32)
    rels = cref[OFF['rels']:OFF['rels'] + S * S, 0:D]          # (64, 32) rel[S+j-i]
    hmask = cref[OFF['hmask']:OFF['hmask'] + HBS, 0:D]         # (64, 32) head selector
    bsel = cref[OFF['bsel']:OFF['bsel'] + HBS, 0:BS]           # (64, 16) batch selector
    cj = cref[OFF['cj']:OFF['cj'] + BS, 0:S]                   # (16, 8)  column collapse
    rsel = cref[OFF['rsel']:OFF['rsel'] + HBS, 0:S * S]        # (64, 64) i'==i selector
    cj2 = cref[OFF['cj2']:OFF['cj2'] + S * S, 0:S]             # (64, 8)  column collapse

    # ---- embedding: block-diagonal one-hot matmul (K = NF*V = 128) + positional add ----
    toks = tok_ref[...]                                        # (BS, NF) int32
    cols = jax.lax.broadcasted_iota(jnp.int32, (BS, NF * V), 1)
    onehot = jnp.zeros((BS, NF * V), f32)
    for f in range(NF):                                        # NF tiny vreg-sized compares
        onehot = onehot + (cols == (toks[:, f:f + 1] + f * V)).astype(f32)
    h = jnp.dot(onehot, emb, preferred_element_type=f32) + pos  # (BS, D)

    # ---- XLNet layers (statically unrolled, weights stay resident in VMEM) ----
    for l in range(NL):
        base = LOFF + 8 * l
        rwb = cref[base + 0:base + 1, 0:D]
        rrb = cref[base + 1:base + 2, 0:D]
        g1 = cref[base + 2:base + 3, 0:D]
        b1 = cref[base + 3:base + 4, 0:D]
        bf2 = cref[base + 4:base + 5, 0:D]
        g2 = cref[base + 5:base + 6, 0:D]
        b2 = cref[base + 6:base + 7, 0:D]

        wq = wproj_ref[4 * l + 0]
        wk = wproj_ref[4 * l + 1]
        wv = wproj_ref[4 * l + 2]
        wr = wproj_ref[4 * l + 3]

        qW = jnp.dot(h, wq, preferred_element_type=f32)        # (16, 32)
        kW = jnp.dot(h, wk, preferred_element_type=f32)        # (16, 32)
        vW = jnp.dot(h, wv, preferred_element_type=f32)        # (16, 32)
        krs = jnp.dot(rels, wr, preferred_element_type=f32)    # (64, 32) shifted k_head_r

        # head separation via replication + 0/1 mask; rows ordered (h, b, i)
        q_rep = jnp.concatenate([qW] * H, axis=0)              # (64, 32)
        q_rw = (q_rep + rwb) * hmask
        q_rr = (q_rep + rrb) * hmask

        # content term  ac[(h,b,i), j] = sum_{d in head h} (q+rwb)[b,i,d] * k[b,j,d]
        ac_full = jax.lax.dot_general(q_rw, kW, dn_t, preferred_element_type=f32)   # (64, 16)
        ac = jnp.dot(ac_full * bsel, cj, preferred_element_type=f32)                # (64, 8)

        # positional term bd[(h,b,i), j] = sum_{d in head h} (q+rrb)[b,i,d] * krs[(i,j),d]
        bd_full = jax.lax.dot_general(q_rr, krs, dn_t, preferred_element_type=f32)  # (64, 64)
        bd = jnp.dot(bd_full * rsel, cj2, preferred_element_type=f32)               # (64, 8)

        # attention_mask is all-ones in the reference forward -> no additive mask
        score = (ac + bd) * SCALE
        score = score - jnp.max(score, axis=-1, keepdims=True)
        prob = jnp.exp(score)
        prob = prob * pl.reciprocal(jnp.sum(prob, axis=-1, keepdims=True), approx=True)

        # context: expand prob back to (b', j) columns with the batch selector
        p_big = jnp.concatenate([prob] * B, axis=1) * bsel      # (64, 16)
        ctx = jnp.dot(p_big, vW, preferred_element_type=f32)    # (64, 32)
        # reassemble heads along lanes: (16, H*D) with head n in column block n
        ctx_wide = jnp.concatenate(
            [ctx[n * BS:(n + 1) * BS, :] for n in range(H)], axis=1)                # (16, 128)
        attn_out = jnp.dot(ctx_wide, wob_ref[l], preferred_element_type=f32)        # (16, 32)

        y1 = _layer_norm(attn_out + h, g1, b1, LN_EPS_XLNET)

        # FFN: bf16 weights, f32 accumulation
        ffh = jnp.dot(y1.astype(bf16), wf1_ref[l], preferred_element_type=f32) + bf1_ref[l]
        ffh = _gelu_tanh(ffh)
        ff = jax.lax.dot_general(ffh.astype(bf16), wf2t_ref[l], dn_t,
                                 preferred_element_type=f32) + bf2
        h = _layer_norm(ff + y1, g2, b2, LN_EPS_XLNET)

    # ---- reconstruction head: Linear -> LayerNorm -> ReLU -> (Dropout=id) -> Linear ----
    rw1 = cref[OFF['rw1']:OFF['rw1'] + D, 0:DHALF]             # (32, 16)
    rw2p = cref[OFF['rw2']:OFF['rw2'] + DHALF, :]              # (16, 128) zero-padded
    hb = OFF['hbias']
    rb1 = cref[hb + 0:hb + 1, 0:DHALF]
    rg = cref[hb + 1:hb + 2, 0:DHALF]
    rbe = cref[hb + 2:hb + 3, 0:DHALF]
    rb2p = cref[hb + 3:hb + 4, :]                              # (1, 128) zero-padded

    x = jnp.dot(h, rw1, preferred_element_type=f32) + rb1
    x = _layer_norm(x, rg, rbe, LN_EPS_HEAD)
    x = jnp.maximum(x, 0.0)
    out_ref[...] = jnp.dot(x, rw2p, preferred_element_type=f32) + rb2p   # lane-dense (16,128)


# ---------------- host-side parameter packing ----------------
def block_diag_embedding(tables):
    # (NF, V, FD) -> block-diagonal (NF*V, D); feature f occupies rows f*V:(f+1)*V
    # and columns f*FD:(f+1)*FD (matches torch.cat(embeddings, dim=-1)).
    rows = []
    for f in range(NF):
        blocks = [jnp.zeros((V, FD), jnp.float32)] * NF
        blocks[f] = tables[f]
        rows.append(jnp.concatenate(blocks, axis=1))
    return jnp.concatenate(rows, axis=0)                       # (NF*V, D)


def _put(tab, name, block):
    block = jnp.asarray(block, jnp.float32)
    r0 = OFF[name]
    return tab.at[r0:r0 + block.shape[0], 0:block.shape[1]].set(block)


def pack_consts(params):
    tab = jnp.zeros((CONST_ROWS, CW), jnp.float32)
    tab = _put(tab, 'emb', block_diag_embedding(params['emb_tables']))
    tab = _put(tab, 'pos', jnp.tile(params['pos_param'][:S], (B, 1)))    # pos_embedding[:, :S, :]
    tab = _put(tab, 'rels', REL_SHIFTED)
    tab = _put(tab, 'hmask', HEADMASK)
    tab = _put(tab, 'bsel', BSEL)
    tab = _put(tab, 'cj', CJ)
    tab = _put(tab, 'rsel', RSEL)
    tab = _put(tab, 'cj2', CJ2)
    tab = _put(tab, 'rw1', params['rw1'])
    tab = _put(tab, 'rw2', params['rw2'])
    hb = OFF['hbias']
    tab = tab.at[hb + 0, 0:DHALF].set(params['rb1'][0])
    tab = tab.at[hb + 1, 0:DHALF].set(params['rg'][0])
    tab = tab.at[hb + 2, 0:DHALF].set(params['rbe'][0])
    tab = tab.at[hb + 3, 0:NF].set(params['rb2'][0])
    for l in range(NL):
        base = LOFF + 8 * l
        tab = tab.at[base + 0, 0:D].set(params['rwb'][l, 0])
        tab = tab.at[base + 1, 0:D].set(params['rrb'][l, 0])
        tab = tab.at[base + 2, 0:D].set(params['g1'][l, 0])
        tab = tab.at[base + 3, 0:D].set(params['b1'][l, 0])
        tab = tab.at[base + 4, 0:D].set(params['bf2'][l, 0])
        tab = tab.at[base + 5, 0:D].set(params['g2'][l, 0])
        tab = tab.at[base + 6, 0:D].set(params['b2'][l, 0])
    return tab


def make_wo_big(wo):
    # Wo (NL, D, D) -> (NL, H*D, D): block n keeps only rows d in head n (so the per-head
    # context columns of ctx_wide contract with the right rows of the output projection).
    d = np.arange(D)
    blocks = []
    for n in range(H):
        m = jnp.asarray((d // DH == n).astype(np.float32))
        blocks.append(wo * m[None, :, None])
    return jnp.concatenate(blocks, axis=1)                     # (NL, H*D, D)


# ---------------- parameters / forward ----------------
def init_params(key):
    keys = iter(jax.random.split(key, 12))

    def nrm(shape, std=0.02):
        return (std * jax.random.normal(next(keys), shape)).astype(jnp.float32)

    return {
        'emb_tables': nrm((NF, V, FD)),
        'pos_param': jax.random.normal(next(keys), (MAX_LEN, D)).astype(jnp.float32),
        'wproj': nrm((NL, 4, D, D)),                 # [Wq, Wk, Wv, Wr] per layer
        'rwb': nrm((NL, 1, D)),                      # r_w_bias (flattened heads)
        'rrb': nrm((NL, 1, D)),                      # r_r_bias
        'wo': nrm((NL, D, D)),
        'g1': jnp.ones((NL, 1, D), jnp.float32), 'b1': jnp.zeros((NL, 1, D), jnp.float32),
        'wf1': nrm((NL, D, DI)).astype(jnp.bfloat16),     # FFN weights in bf16 (f32 accum)
        'bf1': jnp.zeros((NL, 1, DI), jnp.float32),
        'wf2t': nrm((NL, D, DI)).astype(jnp.bfloat16),    # layer_2 weight, stored (D, DI)
        'bf2': jnp.zeros((NL, 1, D), jnp.float32),
        'g2': jnp.ones((NL, 1, D), jnp.float32), 'b2': jnp.zeros((NL, 1, D), jnp.float32),
        'rw1': nrm((D, DHALF)), 'rb1': jnp.zeros((1, DHALF), jnp.float32),
        'rg': jnp.ones((1, DHALF), jnp.float32), 'rbe': jnp.zeros((1, DHALF), jnp.float32),
        'rw2': nrm((DHALF, NF)), 'rb2': jnp.zeros((1, NF), jnp.float32),
    }


@jax.jit
def forward(params, tokens):
    tok2 = tokens.reshape(BS, NF).astype(jnp.int32)
    consts = pack_consts(params)
    wproj = params['wproj'].reshape(NL * 4, D, D)
    wo_big = make_wo_big(params['wo'])
    out = pl.pallas_call(
        fused_forward_kernel,
        out_shape=jax.ShapeDtypeStruct((BS, CW), jnp.float32),
    )(tok2, consts, wproj, wo_big, params['wf1'], params['bf1'], params['wf2t'])
    return out[:, :NF].reshape(B, S, NF)


if __name__ == "__main__":
    key = jax.random.PRNGKey(0)
    pkey, tkey = jax.random.split(key)
    params = init_params(pkey)
    tokens = jax.random.randint(tkey, (B, S, NF), 0, V, dtype=jnp.int32)
    out = forward(params, tokens)
    jax.block_until_ready(out)
    assert out.shape == (B, S, NF) and out.dtype == jnp.float32
    assert bool(jnp.all(jnp.isfinite(out)))
    print("KERNEL_OK")
</pallas_src>

<mosaic_0001>
module attributes {stable_mosaic.version = 11 : i64} {
  func.func @fused_forward_kernel(%arg0: memref<16x4xi32, #tpu.memory_space<vmem>>, %arg1: memref<552x128xf32, #tpu.memory_space<vmem>>, %arg2: memref<8x32x32xf32, #tpu.memory_space<vmem>>, %arg3: memref<2x128x32xf32, #tpu.memory_space<vmem>>, %arg4: memref<2x32x3072xbf16, #tpu.memory_space<vmem>>, %arg5: memref<2x1x3072xf32, #tpu.memory_space<vmem>>, %arg6: memref<2x32x3072xbf16, #tpu.memory_space<vmem>>, %arg7: memref<16x128xf32, #tpu.memory_space<vmem>>) attributes {dimension_semantics = [], scalar_prefetch = 0 : i64, scratch_operands = 0 : i64, tpu.core_type = #tpu.core_type<tc>} {
    %c0 = arith.constant 0 : index
    %c0_0 = arith.constant 0 : index
    %0 = vector.load %arg1[%c0, %c0_0] : memref<552x128xf32, #tpu.memory_space<vmem>>, vector<128x32xf32>
    %c128 = arith.constant 128 : index
    %c0_1 = arith.constant 0 : index
    %1 = vector.load %arg1[%c128, %c0_1] : memref<552x128xf32, #tpu.memory_space<vmem>>, vector<16x32xf32>
    %c144 = arith.constant 144 : index
    %c0_2 = arith.constant 0 : index
    %2 = vector.load %arg1[%c144, %c0_2] : memref<552x128xf32, #tpu.memory_space<vmem>>, vector<64x32xf32>
    %c208 = arith.constant 208 : index
    %c0_3 = arith.constant 0 : index
    %3 = vector.load %arg1[%c208, %c0_3] : memref<552x128xf32, #tpu.memory_space<vmem>>, vector<64x32xf32>
    %c272 = arith.constant 272 : index
    %c0_4 = arith.constant 0 : index
    %4 = vector.load %arg1[%c272, %c0_4] : memref<552x128xf32, #tpu.memory_space<vmem>>, vector<64x16xf32>
    %c336 = arith.constant 336 : index
    %c0_5 = arith.constant 0 : index
    %5 = vector.load %arg1[%c336, %c0_5] : memref<552x128xf32, #tpu.memory_space<vmem>>, vector<16x8xf32>
    %c352 = arith.constant 352 : index
    %c0_6 = arith.constant 0 : index
    %6 = vector.load %arg1[%c352, %c0_6] : memref<552x128xf32, #tpu.memory_space<vmem>>, vector<64x64xf32>
    %c416 = arith.constant 416 : index
    %c0_7 = arith.constant 0 : index
    %7 = vector.load %arg1[%c416, %c0_7] : memref<552x128xf32, #tpu.memory_space<vmem>>, vector<64x8xf32>
    %c0_8 = arith.constant 0 : index
    %c0_9 = arith.constant 0 : index
    %8 = vector.load %arg0[%c0_8, %c0_9] : memref<16x4xi32, #tpu.memory_space<vmem>>, vector<16x4xi32>
    %9 = tpu.iota {dimensions = array<i32: 1>} : vector<16x128xi32>
    %cst = arith.constant 0.000000e+00 : f32
    %10 = vector.broadcast %cst : f32 to vector<16x128xf32>
    %11 = vector.extract_strided_slice %8 {offsets = [0, 0], sizes = [16, 1], strides = [1, 1]} : vector<16x4xi32> to vector<16x1xi32>
    %c0_i32 = arith.constant 0 : i32
    %12 = vector.broadcast %c0_i32 : i32 to vector<16x1xi32>
    %13 = arith.addi %11, %12 : vector<16x1xi32>
    %14 = vector.broadcast %13 : vector<16x1xi32> to vector<16x128xi32>
    %15 = arith.cmpi eq, %9, %14 : vector<16x128xi32>
    %16 = arith.extui %15 : vector<16x128xi1> to vector<16x128xi32>
    %17 = arith.sitofp %16 : vector<16x128xi32> to vector<16x128xf32>
    %18 = arith.addf %10, %17 : vector<16x128xf32>
    %19 = vector.extract_strided_slice %8 {offsets = [0, 1], sizes = [16, 1], strides = [1, 1]} : vector<16x4xi32> to vector<16x1xi32>
    %c32_i32 = arith.constant 32 : i32
    %20 = vector.broadcast %c32_i32 : i32 to vector<16x1xi32>
    %21 = arith.addi %19, %20 : vector<16x1xi32>
    %22 = vector.broadcast %21 : vector<16x1xi32> to vector<16x128xi32>
    %23 = arith.cmpi eq, %9, %22 : vector<16x128xi32>
    %24 = arith.extui %23 : vector<16x128xi1> to vector<16x128xi32>
    %25 = arith.sitofp %24 : vector<16x128xi32> to vector<16x128xf32>
    %26 = arith.addf %18, %25 : vector<16x128xf32>
    %27 = vector.extract_strided_slice %8 {offsets = [0, 2], sizes = [16, 1], strides = [1, 1]} : vector<16x4xi32> to vector<16x1xi32>
    %c64_i32 = arith.constant 64 : i32
    %28 = vector.broadcast %c64_i32 : i32 to vector<16x1xi32>
    %29 = arith.addi %27, %28 : vector<16x1xi32>
    %30 = vector.broadcast %29 : vector<16x1xi32> to vector<16x128xi32>
    %31 = arith.cmpi eq, %9, %30 : vector<16x128xi32>
    %32 = arith.extui %31 : vector<16x128xi1> to vector<16x128xi32>
    %33 = arith.sitofp %32 : vector<16x128xi32> to vector<16x128xf32>
    %34 = arith.addf %26, %33 : vector<16x128xf32>
    %35 = vector.extract_strided_slice %8 {offsets = [0, 3], sizes = [16, 1], strides = [1, 1]} : vector<16x4xi32> to vector<16x1xi32>
    %c96_i32 = arith.constant 96 : i32
    %36 = vector.broadcast %c96_i32 : i32 to vector<16x1xi32>
    %37 = arith.addi %35, %36 : vector<16x1xi32>
    %38 = vector.broadcast %37 : vector<16x1xi32> to vector<16x128xi32>
    %39 = arith.cmpi eq, %9, %38 : vector<16x128xi32>
    %40 = arith.extui %39 : vector<16x128xi1> to vector<16x128xi32>
    %41 = arith.sitofp %40 : vector<16x128xi32> to vector<16x128xf32>
    %42 = arith.addf %34, %41 : vector<16x128xf32>
    %cst_10 = arith.constant dense<0.000000e+00> : vector<16x32xf32>
    %43 = tpu.matmul %42, %0, %cst_10 {dimension_numbers = #tpu.dot_dimension_numbers<[1], [0], [0], [1], [0, 0, 1, 1], [], []>} : vector<16x128xf32>, vector<128x32xf32>, vector<16x32xf32> -> vector<16x32xf32>
    %44 = arith.addf %43, %1 : vector<16x32xf32>
    %c536 = arith.constant 536 : index
    %c0_11 = arith.constant 0 : index
    %45 = vector.load %arg1[%c536, %c0_11] : memref<552x128xf32, #tpu.memory_space<vmem>>, vector<1x32xf32>
    %c537 = arith.constant 537 : index
    %c0_12 = arith.constant 0 : index
    %46 = vector.load %arg1[%c537, %c0_12] : memref<552x128xf32, #tpu.memory_space<vmem>>, vector<1x32xf32>
    %c538 = arith.constant 538 : index
    %c0_13 = arith.constant 0 : index
    %47 = vector.load %arg1[%c538, %c0_13] : memref<552x128xf32, #tpu.memory_space<vmem>>, vector<1x32xf32>
    %c539 = arith.constant 539 : index
    %c0_14 = arith.constant 0 : index
    %48 = vector.load %arg1[%c539, %c0_14] : memref<552x128xf32, #tpu.memory_space<vmem>>, vector<1x32xf32>
    %c540 = arith.constant 540 : index
    %c0_15 = arith.constant 0 : index
    %49 = vector.load %arg1[%c540, %c0_15] : memref<552x128xf32, #tpu.memory_space<vmem>>, vector<1x32xf32>
    %c541 = arith.constant 541 : index
    %c0_16 = arith.constant 0 : index
    %50 = vector.load %arg1[%c541, %c0_16] : memref<552x128xf32, #tpu.memory_space<vmem>>, vector<1x32xf32>
    %c542 = arith.constant 542 : index
    %c0_17 = arith.constant 0 : index
    %51 = vector.load %arg1[%c542, %c0_17] : memref<552x128xf32, #tpu.memory_space<vmem>>, vector<1x32xf32>
    %c0_18 = arith.constant 0 : index
    %c0_19 = arith.constant 0 : index
    %c0_20 = arith.constant 0 : index
    %52 = vector.load %arg2[%c0_18, %c0_19, %c0_20] : memref<8x32x32xf32, #tpu.memory_space<vmem>>, vector<1x32x32xf32>
    %53 = vector.shape_cast %52 : vector<1x32x32xf32> to vector<32x32xf32>
    %c1 = arith.constant 1 : index
    %c0_21 = arith.constant 0 : index
    %c0_22 = arith.constant 0 : index
    %54 = vector.load %arg2[%c1, %c0_21, %c0_22] : memref<8x32x32xf32, #tpu.memory_space<vmem>>, vector<1x32x32xf32>
    %55 = vector.shape_cast %54 : vector<1x32x32xf32> to vector<32x32xf32>
    %c2 = arith.constant 2 : index
    %c0_23 = arith.constant 0 : index
    %c0_24 = arith.constant 0 : index
    %56 = vector.load %arg2[%c2, %c0_23, %c0_24] : memref<8x32x32xf32, #tpu.memory_space<vmem>>, vector<1x32x32xf32>
    %57 = vector.shape_cast %56 : vector<1x32x32xf32> to vector<32x32xf32>
    %c3 = arith.constant 3 : index
    %c0_25 = arith.constant 0 : index
    %c0_26 = arith.constant 0 : index
    %58 = vector.load %arg2[%c3, %c0_25, %c0_26] : memref<8x32x32xf32, #tpu.memory_space<vmem>>, vector<1x32x32xf32>
    %59 = vector.shape_cast %58 : vector<1x32x32xf32> to vector<32x32xf32>
    %cst_27 = arith.constant dense<0.000000e+00> : vector<16x32xf32>
    %60 = tpu.matmul %44, %53, %cst_27 {dimension_numbers = #tpu.dot_dimension_numbers<[1], [0], [0], [1], [0, 0, 1, 1], [], []>} : vector<16x32xf32>, vector<32x32xf32>, vector<16x32xf32> -> vector<16x32xf32>
    %cst_28 = arith.constant dense<0.000000e+00> : vector<16x32xf32>
    %61 = tpu.matmul %44, %55, %cst_28 {dimension_numbers = #tpu.dot_dimension_numbers<[1], [0], [0], [1], [0, 0, 1, 1], [], []>} : vector<16x32xf32>, vector<32x32xf32>, vector<16x32xf32> -> vector<16x32xf32>
    %cst_29 = arith.constant dense<0.000000e+00> : vector<16x32xf32>
    %62 = tpu.matmul %44, %57, %cst_29 {dimension_numbers = #tpu.dot_dimension_numbers<[1], [0], [0], [1], [0, 0, 1, 1], [], []>} : vector<16x32xf32>, vector<32x32xf32>, vector<16x32xf32> -> vector<16x32xf32>
    %cst_30 = arith.constant dense<0.000000e+00> : vector<64x32xf32>
    %63 = tpu.matmul %2, %59, %cst_30 {dimension_numbers = #tpu.dot_dimension_numbers<[1], [0], [0], [1], [0, 0, 1, 1], [], []>} : vector<64x32xf32>, vector<32x32xf32>, vector<64x32xf32> -> vector<64x32xf32>
    %64 = tpu.concatenate %60, %60, %60, %60 in 0 : vector<16x32xf32>, vector<16x32xf32>, vector<16x32xf32>, vector<16x32xf32> -> vector<64x32xf32>
    %65 = vector.broadcast %45 : vector<1x32xf32> to vector<64x32xf32>
    %66 = arith.addf %64, %65 : vector<64x32xf32>
    %67 = arith.mulf %66, %3 : vector<64x32xf32>
    %68 = vector.broadcast %46 : vector<1x32xf32> to vector<64x32xf32>
    %69 = arith.addf %64, %68 : vector<64x32xf32>
    %70 = arith.mulf %69, %3 : vector<64x32xf32>
    %cst_31 = arith.constant dense<0.000000e+00> : vector<64x16xf32>
    %71 = tpu.matmul %67, %61, %cst_31 {dimension_numbers = #tpu.dot_dimension_numbers<[1], [1], [0], [0], [0, 0, 1, 0], [], []>} : vector<64x32xf32>, vector<16x32xf32>, vector<64x16xf32> -> vector<64x16xf32>
    %72 = arith.mulf %71, %4 : vector<64x16xf32>
    %cst_32 = arith.constant dense<0.000000e+00> : vector<64x8xf32>
    %73 = tpu.matmul %72, %5, %cst_32 {dimension_numbers = #tpu.dot_dimension_numbers<[1], [0], [0], [1], [0, 0, 1, 1], [], []>} : vector<64x16xf32>, vector<16x8xf32>, vector<64x8xf32> -> vector<64x8xf32>
    %cst_33 = arith.constant dense<0.000000e+00> : vector<64x64xf32>
    %74 = tpu.matmul %70, %63, %cst_33 {dimension_numbers = #tpu.dot_dimension_numbers<[1], [1], [0], [0], [0, 0, 1, 0], [], []>} : vector<64x32xf32>, vector<64x32xf32>, vector<64x64xf32> -> vector<64x64xf32>
    %75 = arith.mulf %74, %6 : vector<64x64xf32>
    %cst_34 = arith.constant dense<0.000000e+00> : vector<64x8xf32>
    %76 = tpu.matmul %75, %7, %cst_34 {dimension_numbers = #tpu.dot_dimension_numbers<[1], [0], [0], [1], [0, 0, 1, 1], [], []>} : vector<64x64xf32>, vector<64x8xf32>, vector<64x8xf32> -> vector<64x8xf32>
    %77 = arith.addf %73, %76 : vector<64x8xf32>
    %cst_35 = arith.constant 0.353553385 : f32
    %78 = vector.broadcast %cst_35 : f32 to vector<64x8xf32>
    %79 = arith.mulf %77, %78 : vector<64x8xf32>
    %cst_36 = arith.constant dense<0xFF800000> : vector<64xf32>
    %80 = vector.multi_reduction <maximumf>, %79, %cst_36 [1] : vector<64x8xf32> to vector<64xf32>
    %81 = vector.shape_cast %80 : vector<64xf32> to vector<64x1xf32>
    %82 = vector.broadcast %81 : vector<64x1xf32> to vector<64x8xf32>
    %83 = arith.subf %79, %82 : vector<64x8xf32>
    %84 = math.exp %83 : vector<64x8xf32>
    %cst_37 = arith.constant dense<0.000000e+00> : vector<64xf32>
    %85 = vector.multi_reduction <add>, %84, %cst_37 [1] : vector<64x8xf32> to vector<64xf32>
    %86 = vector.shape_cast %85 : vector<64xf32> to vector<64x1xf32>
    %87 = tpu.reciprocal %86 {approx = true} : vector<64x1xf32> -> vector<64x1xf32>
    %88 = vector.broadcast %87 : vector<64x1xf32> to vector<64x8xf32>
    %89 = arith.mulf %84, %88 : vector<64x8xf32>
    %90 = tpu.concatenate %89, %89 in 1 : vector<64x8xf32>, vector<64x8xf32> -> vector<64x16xf32>
    %91 = arith.mulf %90, %4 : vector<64x16xf32>
    %cst_38 = arith.constant dense<0.000000e+00> : vector<64x32xf32>
    %92 = tpu.matmul %91, %62, %cst_38 {dimension_numbers = #tpu.dot_dimension_numbers<[1], [0], [0], [1], [0, 0, 1, 1], [], []>} : vector<64x16xf32>, vector<16x32xf32>, vector<64x32xf32> -> vector<64x32xf32>
    %93 = vector.extract_strided_slice %92 {offsets = [0, 0], sizes = [16, 32], strides = [1, 1]} : vector<64x32xf32> to vector<16x32xf32>
    %94 = vector.extract_strided_slice %92 {offsets = [16, 0], sizes = [16, 32], strides = [1, 1]} : vector<64x32xf32> to vector<16x32xf32>
    %95 = vector.extract_strided_slice %92 {offsets = [32, 0], sizes = [16, 32], strides = [1, 1]} : vector<64x32xf32> to vector<16x32xf32>
    %96 = vector.extract_strided_slice %92 {offsets = [48, 0], sizes = [16, 32], strides = [1, 1]} : vector<64x32xf32> to vector<16x32xf32>
    %97 = tpu.concatenate %93, %94, %95, %96 in 1 : vector<16x32xf32>, vector<16x32xf32>, vector<16x32xf32>, vector<16x32xf32> -> vector<16x128xf32>
    %c0_39 = arith.constant 0 : index
    %c0_40 = arith.constant 0 : index
    %c0_41 = arith.constant 0 : index
    %98 = vector.load %arg3[%c0_39, %c0_40, %c0_41] : memref<2x128x32xf32, #tpu.memory_space<vmem>>, vector<1x128x32xf32>
    %99 = vector.shape_cast %98 : vector<1x128x32xf32> to vector<128x32xf32>
    %cst_42 = arith.constant dense<0.000000e+00> : vector<16x32xf32>
    %100 = tpu.matmul %97, %99, %cst_42 {dimension_numbers = #tpu.dot_dimension_numbers<[1], [0], [0], [1], [0, 0, 1, 1], [], []>} : vector<16x128xf32>, vector<128x32xf32>, vector<16x32xf32> -> vector<16x32xf32>
    %101 = arith.addf %100, %44 : vector<16x32xf32>
    %cst_43 = arith.constant dense<0.000000e+00> : vector<16xf32>
    %102 = vector.multi_reduction <add>, %101, %cst_43 [1] : vector<16x32xf32> to vector<16xf32>
    %103 = vector.shape_cast %102 : vector<16xf32> to vector<16x1xf32>
    %cst_44 = arith.constant 3.200000e+01 : f32
    %104 = vector.broadcast %cst_44 : f32 to vector<16x1xf32>
    %105 = arith.divf %103, %104 : vector<16x1xf32>
    %106 = vector.broadcast %105 : vector<16x1xf32> to vector<16x32xf32>
    %107 = arith.subf %101, %106 : vector<16x32xf32>
    %108 = arith.mulf %107, %107 : vector<16x32xf32>
    %cst_45 = arith.constant dense<0.000000e+00> : vector<16xf32>
    %109 = vector.multi_reduction <add>, %108, %cst_45 [1] : vector<16x32xf32> to vector<16xf32>
    %110 = vector.shape_cast %109 : vector<16xf32> to vector<16x1xf32>
    %cst_46 = arith.constant 3.200000e+01 : f32
    %111 = vector.broadcast %cst_46 : f32 to vector<16x1xf32>
    %112 = arith.divf %110, %111 : vector<16x1xf32>
    %113 = vector.broadcast %105 : vector<16x1xf32> to vector<16x32xf32>
    %114 = arith.subf %101, %113 : vector<16x32xf32>
    %cst_47 = arith.constant 9.99999996E-13 : f32
    %115 = vector.broadcast %cst_47 : f32 to vector<16x1xf32>
    %116 = arith.addf %112, %115 : vector<16x1xf32>
    %117 = math.rsqrt %116 : vector<16x1xf32>
    %118 = vector.broadcast %117 : vector<16x1xf32> to vector<16x32xf32>
    %119 = arith.mulf %114, %118 : vector<16x32xf32>
    %120 = vector.broadcast %47 : vector<1x32xf32> to vector<16x32xf32>
    %121 = arith.mulf %119, %120 : vector<16x32xf32>
    %122 = vector.broadcast %48 : vector<1x32xf32> to vector<16x32xf32>
    %123 = arith.addf %121, %122 : vector<16x32xf32>
    %124 = arith.truncf %123 : vector<16x32xf32> to vector<16x32xbf16>
    %c0_48 = arith.constant 0 : index
    %c0_49 = arith.constant 0 : index
    %c0_50 = arith.constant 0 : index
    %125 = vector.load %arg4[%c0_48, %c0_49, %c0_50] : memref<2x32x3072xbf16, #tpu.memory_space<vmem>>, vector<1x32x3072xbf16>
    %126 = vector.shape_cast %125 : vector<1x32x3072xbf16> to vector<32x3072xbf16>
    %cst_51 = arith.constant dense<0.000000e+00> : vector<16x3072xf32>
    %127 = tpu.matmul %124, %126, %cst_51 {dimension_numbers = #tpu.dot_dimension_numbers<[1], [0], [0], [1], [0, 0, 1, 1], [], []>} : vector<16x32xbf16>, vector<32x3072xbf16>, vector<16x3072xf32> -> vector<16x3072xf32>
    %c0_52 = arith.constant 0 : index
    %c0_53 = arith.constant 0 : index
    %c0_54 = arith.constant 0 : index
    %128 = vector.load %arg5[%c0_52, %c0_53, %c0_54] : memref<2x1x3072xf32, #tpu.memory_space<vmem>>, vector<1x1x3072xf32>
    %129 = vector.shape_cast %128 : vector<1x1x3072xf32> to vector<1x3072xf32>
    %130 = vector.broadcast %129 : vector<1x3072xf32> to vector<16x3072xf32>
    %131 = arith.addf %127, %130 : vector<16x3072xf32>
    %cst_55 = arith.constant 5.000000e-01 : f32
    %132 = vector.broadcast %cst_55 : f32 to vector<16x3072xf32>
    %133 = arith.mulf %132, %131 : vector<16x3072xf32>
    %cst_56 = arith.constant 4.471500e-02 : f32
    %134 = vector.broadcast %cst_56 : f32 to vector<16x3072xf32>
    %135 = arith.mulf %134, %131 : vector<16x3072xf32>
    %136 = arith.mulf %135, %131 : vector<16x3072xf32>
    %137 = arith.mulf %136, %131 : vector<16x3072xf32>
    %138 = arith.addf %131, %137 : vector<16x3072xf32>
    %cst_57 = arith.constant 0.797884583 : f32
    %139 = vector.broadcast %cst_57 : f32 to vector<16x3072xf32>
    %140 = arith.mulf %139, %138 : vector<16x3072xf32>
    %141 = math.tanh %140 : vector<16x3072xf32>
    %cst_58 = arith.constant 1.000000e+00 : f32
    %142 = vector.broadcast %cst_58 : f32 to vector<16x3072xf32>
    %143 = arith.addf %142, %141 : vector<16x3072xf32>
    %144 = arith.mulf %133, %143 : vector<16x3072xf32>
    %145 = arith.truncf %144 : vector<16x3072xf32> to vector<16x3072xbf16>
    %c0_59 = arith.constant 0 : index
    %c0_60 = arith.constant 0 : index
    %c0_61 = arith.constant 0 : index
    %146 = vector.load %arg6[%c0_59, %c0_60, %c0_61] : memref<2x32x3072xbf16, #tpu.memory_space<vmem>>, vector<1x32x3072xbf16>
    %147 = vector.shape_cast %146 : vector<1x32x3072xbf16> to vector<32x3072xbf16>
    %cst_62 = arith.constant dense<0.000000e+00> : vector<16x32xf32>
    %148 = tpu.matmul %145, %147, %cst_62 {dimension_numbers = #tpu.dot_dimension_numbers<[1], [1], [0], [0], [0, 0, 1, 0], [], []>} : vector<16x3072xbf16>, vector<32x3072xbf16>, vector<16x32xf32> -> vector<16x32xf32>
    %149 = vector.broadcast %49 : vector<1x32xf32> to vector<16x32xf32>
    %150 = arith.addf %148, %149 : vector<16x32xf32>
    %151 = arith.addf %150, %123 : vector<16x32xf32>
    %cst_63 = arith.constant dense<0.000000e+00> : vector<16xf32>
    %152 = vector.multi_reduction <add>, %151, %cst_63 [1] : vector<16x32xf32> to vector<16xf32>
    %153 = vector.shape_cast %152 : vector<16xf32> to vector<16x1xf32>
    %cst_64 = arith.constant 3.200000e+01 : f32
    %154 = vector.broadcast %cst_64 : f32 to vector<16x1xf32>
    %155 = arith.divf %153, %154 : vector<16x1xf32>
    %156 = vector.broadcast %155 : vector<16x1xf32> to vector<16x32xf32>
    %157 = arith.subf %151, %156 : vector<16x32xf32>
    %158 = arith.mulf %157, %157 : vector<16x32xf32>
    %cst_65 = arith.constant dense<0.000000e+00> : vector<16xf32>
    %159 = vector.multi_reduction <add>, %158, %cst_65 [1] : vector<16x32xf32> to vector<16xf32>
    %160 = vector.shape_cast %159 : vector<16xf32> to vector<16x1xf32>
    %cst_66 = arith.constant 3.200000e+01 : f32
    %161 = vector.broadcast %cst_66 : f32 to vector<16x1xf32>
    %162 = arith.divf %160, %161 : vector<16x1xf32>
    %163 = vector.broadcast %155 : vector<16x1xf32> to vector<16x32xf32>
    %164 = arith.subf %151, %163 : vector<16x32xf32>
    %cst_67 = arith.constant 9.99999996E-13 : f32
    %165 = vector.broadcast %cst_67 : f32 to vector<16x1xf32>
    %166 = arith.addf %162, %165 : vector<16x1xf32>
    %167 = math.rsqrt %166 : vector<16x1xf32>
    %168 = vector.broadcast %167 : vector<16x1xf32> to vector<16x32xf32>
    %169 = arith.mulf %164, %168 : vector<16x32xf32>
    %170 = vector.broadcast %50 : vector<1x32xf32> to vector<16x32xf32>
    %171 = arith.mulf %169, %170 : vector<16x32xf32>
    %172 = vector.broadcast %51 : vector<1x32xf32> to vector<16x32xf32>
    %173 = arith.addf %171, %172 : vector<16x32xf32>
    %c544 = arith.constant 544 : index
    %c0_68 = arith.constant 0 : index
    %174 = vector.load %arg1[%c544, %c0_68] : memref<552x128xf32, #tpu.memory_space<vmem>>, vector<1x32xf32>
    %c545 = arith.constant 545 : index
    %c0_69 = arith.constant 0 : index
    %175 = vector.load %arg1[%c545, %c0_69] : memref<552x128xf32, #tpu.memory_space<vmem>>, vector<1x32xf32>
    %c546 = arith.constant 546 : index
    %c0_70 = arith.constant 0 : index
    %176 = vector.load %arg1[%c546, %c0_70] : memref<552x128xf32, #tpu.memory_space<vmem>>, vector<1x32xf32>
    %c547 = arith.constant 547 : index
    %c0_71 = arith.constant 0 : index
    %177 = vector.load %arg1[%c547, %c0_71] : memref<552x128xf32, #tpu.memory_space<vmem>>, vector<1x32xf32>
    %c548 = arith.constant 548 : index
    %c0_72 = arith.constant 0 : index
    %178 = vector.load %arg1[%c548, %c0_72] : memref<552x128xf32, #tpu.memory_space<vmem>>, vector<1x32xf32>
    %c549 = arith.constant 549 : index
    %c0_73 = arith.constant 0 : index
    %179 = vector.load %arg1[%c549, %c0_73] : memref<552x128xf32, #tpu.memory_space<vmem>>, vector<1x32xf32>
    %c550 = arith.constant 550 : index
    %c0_74 = arith.constant 0 : index
    %180 = vector.load %arg1[%c550, %c0_74] : memref<552x128xf32, #tpu.memory_space<vmem>>, vector<1x32xf32>
    %c4 = arith.constant 4 : index
    %c0_75 = arith.constant 0 : index
    %c0_76 = arith.constant 0 : index
    %181 = vector.load %arg2[%c4, %c0_75, %c0_76] : memref<8x32x32xf32, #tpu.memory_space<vmem>>, vector<1x32x32xf32>
    %182 = vector.shape_cast %181 : vector<1x32x32xf32> to vector<32x32xf32>
    %c5 = arith.constant 5 : index
    %c0_77 = arith.constant 0 : index
    %c0_78 = arith.constant 0 : index
    %183 = vector.load %arg2[%c5, %c0_77, %c0_78] : memref<8x32x32xf32, #tpu.memory_space<vmem>>, vector<1x32x32xf32>
    %184 = vector.shape_cast %183 : vector<1x32x32xf32> to vector<32x32xf32>
    %c6 = arith.constant 6 : index
    %c0_79 = arith.constant 0 : index
    %c0_80 = arith.constant 0 : index
    %185 = vector.load %arg2[%c6, %c0_79, %c0_80] : memref<8x32x32xf32, #tpu.memory_space<vmem>>, vector<1x32x32xf32>
    %186 = vector.shape_cast %185 : vector<1x32x32xf32> to vector<32x32xf32>
    %c7 = arith.constant 7 : index
    %c0_81 = arith.constant 0 : index
    %c0_82 = arith.constant 0 : index
    %187 = vector.load %arg2[%c7, %c0_81, %c0_82] : memref<8x32x32xf32, #tpu.memory_space<vmem>>, vector<1x32x32xf32>
    %188 = vector.shape_cast %187 : vector<1x32x32xf32> to vector<32x32xf32>
    %cst_83 = arith.constant dense<0.000000e+00> : vector<16x32xf32>
    %189 = tpu.matmul %173, %182, %cst_83 {dimension_numbers = #tpu.dot_dimension_numbers<[1], [0], [0], [1], [0, 0, 1, 1], [], []>} : vector<16x32xf32>, vector<32x32xf32>, vector<16x32xf32> -> vector<16x32xf32>
    %cst_84 = arith.constant dense<0.000000e+00> : vector<16x32xf32>
    %190 = tpu.matmul %173, %184, %cst_84 {dimension_numbers = #tpu.dot_dimension_numbers<[1], [0], [0], [1], [0, 0, 1, 1], [], []>} : vector<16x32xf32>, vector<32x32xf32>, vector<16x32xf32> -> vector<16x32xf32>
    %cst_85 = arith.constant dense<0.000000e+00> : vector<16x32xf32>
    %191 = tpu.matmul %173, %186, %cst_85 {dimension_numbers = #tpu.dot_dimension_numbers<[1], [0], [0], [1], [0, 0, 1, 1], [], []>} : vector<16x32xf32>, vector<32x32xf32>, vector<16x32xf32> -> vector<16x32xf32>
    %cst_86 = arith.constant dense<0.000000e+00> : vector<64x32xf32>
    %192 = tpu.matmul %2, %188, %cst_86 {dimension_numbers = #tpu.dot_dimension_numbers<[1], [0], [0], [1], [0, 0, 1, 1], [], []>} : vector<64x32xf32>, vector<32x32xf32>, vector<64x32xf32> -> vector<64x32xf32>
    %193 = tpu.concatenate %189, %189, %189, %189 in 0 : vector<16x32xf32>, vector<16x32xf32>, vector<16x32xf32>, vector<16x32xf32> -> vector<64x32xf32>
    %194 = vector.broadcast %174 : vector<1x32xf32> to vector<64x32xf32>
    %195 = arith.addf %193, %194 : vector<64x32xf32>
    %196 = arith.mulf %195, %3 : vector<64x32xf32>
    %197 = vector.broadcast %175 : vector<1x32xf32> to vector<64x32xf32>
    %198 = arith.addf %193, %197 : vector<64x32xf32>
    %199 = arith.mulf %198, %3 : vector<64x32xf32>
    %cst_87 = arith.constant dense<0.000000e+00> : vector<64x16xf32>
    %200 = tpu.matmul %196, %190, %cst_87 {dimension_numbers = #tpu.dot_dimension_numbers<[1], [1], [0], [0], [0, 0, 1, 0], [], []>} : vector<64x32xf32>, vector<16x32xf32>, vector<64x16xf32> -> vector<64x16xf32>
    %201 = arith.mulf %200, %4 : vector<64x16xf32>
    %cst_88 = arith.constant dense<0.000000e+00> : vector<64x8xf32>
    %202 = tpu.matmul %201, %5, %cst_88 {dimension_numbers = #tpu.dot_dimension_numbers<[1], [0], [0], [1], [0, 0, 1, 1], [], []>} : vector<64x16xf32>, vector<16x8xf32>, vector<64x8xf32> -> vector<64x8xf32>
    %cst_89 = arith.constant dense<0.000000e+00> : vector<64x64xf32>
    %203 = tpu.matmul %199, %192, %cst_89 {dimension_numbers = #tpu.dot_dimension_numbers<[1], [1], [0], [0], [0, 0, 1, 0], [], []>} : vector<64x32xf32>, vector<64x32xf32>, vector<64x64xf32> -> vector<64x64xf32>
    %204 = arith.mulf %203, %6 : vector<64x64xf32>
    %cst_90 = arith.constant dense<0.000000e+00> : vector<64x8xf32>
    %205 = tpu.matmul %204, %7, %cst_90 {dimension_numbers = #tpu.dot_dimension_numbers<[1], [0], [0], [1], [0, 0, 1, 1], [], []>} : vector<64x64xf32>, vector<64x8xf32>, vector<64x8xf32> -> vector<64x8xf32>
    %206 = arith.addf %202, %205 : vector<64x8xf32>
    %cst_91 = arith.constant 0.353553385 : f32
    %207 = vector.broadcast %cst_91 : f32 to vector<64x8xf32>
    %208 = arith.mulf %206, %207 : vector<64x8xf32>
    %cst_92 = arith.constant dense<0xFF800000> : vector<64xf32>
    %209 = vector.multi_reduction <maximumf>, %208, %cst_92 [1] : vector<64x8xf32> to vector<64xf32>
    %210 = vector.shape_cast %209 : vector<64xf32> to vector<64x1xf32>
    %211 = vector.broadcast %210 : vector<64x1xf32> to vector<64x8xf32>
    %212 = arith.subf %208, %211 : vector<64x8xf32>
    %213 = math.exp %212 : vector<64x8xf32>
    %cst_93 = arith.constant dense<0.000000e+00> : vector<64xf32>
    %214 = vector.multi_reduction <add>, %213, %cst_93 [1] : vector<64x8xf32> to vector<64xf32>
    %215 = vector.shape_cast %214 : vector<64xf32> to vector<64x1xf32>
    %216 = tpu.reciprocal %215 {approx = true} : vector<64x1xf32> -> vector<64x1xf32>
    %217 = vector.broadcast %216 : vector<64x1xf32> to vector<64x8xf32>
    %218 = arith.mulf %213, %217 : vector<64x8xf32>
    %219 = tpu.concatenate %218, %218 in 1 : vector<64x8xf32>, vector<64x8xf32> -> vector<64x16xf32>
    %220 = arith.mulf %219, %4 : vector<64x16xf32>
    %cst_94 = arith.constant dense<0.000000e+00> : vector<64x32xf32>
    %221 = tpu.matmul %220, %191, %cst_94 {dimension_numbers = #tpu.dot_dimension_numbers<[1], [0], [0], [1], [0, 0, 1, 1], [], []>} : vector<64x16xf32>, vector<16x32xf32>, vector<64x32xf32> -> vector<64x32xf32>
    %222 = vector.extract_strided_slice %221 {offsets = [0, 0], sizes = [16, 32], strides = [1, 1]} : vector<64x32xf32> to vector<16x32xf32>
    %223 = vector.extract_strided_slice %221 {offsets = [16, 0], sizes = [16, 32], strides = [1, 1]} : vector<64x32xf32> to vector<16x32xf32>
    %224 = vector.extract_strided_slice %221 {offsets = [32, 0], sizes = [16, 32], strides = [1, 1]} : vector<64x32xf32> to vector<16x32xf32>
    %225 = vector.extract_strided_slice %221 {offsets = [48, 0], sizes = [16, 32], strides = [1, 1]} : vector<64x32xf32> to vector<16x32xf32>
    %226 = tpu.concatenate %222, %223, %224, %225 in 1 : vector<16x32xf32>, vector<16x32xf32>, vector<16x32xf32>, vector<16x32xf32> -> vector<16x128xf32>
    %c1_95 = arith.constant 1 : index
    %c0_96 = arith.constant 0 : index
    %c0_97 = arith.constant 0 : index
    %227 = vector.load %arg3[%c1_95, %c0_96, %c0_97] : memref<2x128x32xf32, #tpu.memory_space<vmem>>, vector<1x128x32xf32>
    %228 = vector.shape_cast %227 : vector<1x128x32xf32> to vector<128x32xf32>
    %cst_98 = arith.constant dense<0.000000e+00> : vector<16x32xf32>
    %229 = tpu.matmul %226, %228, %cst_98 {dimension_numbers = #tpu.dot_dimension_numbers<[1], [0], [0], [1], [0, 0, 1, 1], [], []>} : vector<16x128xf32>, vector<128x32xf32>, vector<16x32xf32> -> vector<16x32xf32>
    %230 = arith.addf %229, %173 : vector<16x32xf32>
    %cst_99 = arith.constant dense<0.000000e+00> : vector<16xf32>
    %231 = vector.multi_reduction <add>, %230, %cst_99 [1] : vector<16x32xf32> to vector<16xf32>
    %232 = vector.shape_cast %231 : vector<16xf32> to vector<16x1xf32>
    %cst_100 = arith.constant 3.200000e+01 : f32
    %233 = vector.broadcast %cst_100 : f32 to vector<16x1xf32>
    %234 = arith.divf %232, %233 : vector<16x1xf32>
    %235 = vector.broadcast %234 : vector<16x1xf32> to vector<16x32xf32>
    %236 = arith.subf %230, %235 : vector<16x32xf32>
    %237 = arith.mulf %236, %236 : vector<16x32xf32>
    %cst_101 = arith.constant dense<0.000000e+00> : vector<16xf32>
    %238 = vector.multi_reduction <add>, %237, %cst_101 [1] : vector<16x32xf32> to vector<16xf32>
    %239 = vector.shape_cast %238 : vector<16xf32> to vector<16x1xf32>
    %cst_102 = arith.constant 3.200000e+01 : f32
    %240 = vector.broadcast %cst_102 : f32 to vector<16x1xf32>
    %241 = arith.divf %239, %240 : vector<16x1xf32>
    %242 = vector.broadcast %234 : vector<16x1xf32> to vector<16x32xf32>
    %243 = arith.subf %230, %242 : vector<16x32xf32>
    %cst_103 = arith.constant 9.99999996E-13 : f32
    %244 = vector.broadcast %cst_103 : f32 to vector<16x1xf32>
    %245 = arith.addf %241, %244 : vector<16x1xf32>
    %246 = math.rsqrt %245 : vector<16x1xf32>
    %247 = vector.broadcast %246 : vector<16x1xf32> to vector<16x32xf32>
    %248 = arith.mulf %243, %247 : vector<16x32xf32>
    %249 = vector.broadcast %176 : vector<1x32xf32> to vector<16x32xf32>
    %250 = arith.mulf %248, %249 : vector<16x32xf32>
    %251 = vector.broadcast %177 : vector<1x32xf32> to vector<16x32xf32>
    %252 = arith.addf %250, %251 : vector<16x32xf32>
    %253 = arith.truncf %252 : vector<16x32xf32> to vector<16x32xbf16>
    %c1_104 = arith.constant 1 : index
    %c0_105 = arith.constant 0 : index
    %c0_106 = arith.constant 0 : index
    %254 = vector.load %arg4[%c1_104, %c0_105, %c0_106] : memref<2x32x3072xbf16, #tpu.memory_space<vmem>>, vector<1x32x3072xbf16>
    %255 = vector.shape_cast %254 : vector<1x32x3072xbf16> to vector<32x3072xbf16>
    %cst_107 = arith.constant dense<0.000000e+00> : vector<16x3072xf32>
    %256 = tpu.matmul %253, %255, %cst_107 {dimension_numbers = #tpu.dot_dimension_numbers<[1], [0], [0], [1], [0, 0, 1, 1], [], []>} : vector<16x32xbf16>, vector<32x3072xbf16>, vector<16x3072xf32> -> vector<16x3072xf32>
    %c1_108 = arith.constant 1 : index
    %c0_109 = arith.constant 0 : index
    %c0_110 = arith.constant 0 : index
    %257 = vector.load %arg5[%c1_108, %c0_109, %c0_110] : memref<2x1x3072xf32, #tpu.memory_space<vmem>>, vector<1x1x3072xf32>
    %258 = vector.shape_cast %257 : vector<1x1x3072xf32> to vector<1x3072xf32>
    %259 = vector.broadcast %258 : vector<1x3072xf32> to vector<16x3072xf32>
    %260 = arith.addf %256, %259 : vector<16x3072xf32>
    %cst_111 = arith.constant 5.000000e-01 : f32
    %261 = vector.broadcast %cst_111 : f32 to vector<16x3072xf32>
    %262 = arith.mulf %261, %260 : vector<16x3072xf32>
    %cst_112 = arith.constant 4.471500e-02 : f32
    %263 = vector.broadcast %cst_112 : f32 to vector<16x3072xf32>
    %264 = arith.mulf %263, %260 : vector<16x3072xf32>
    %265 = arith.mulf %264, %260 : vector<16x3072xf32>
    %266 = arith.mulf %265, %260 : vector<16x3072xf32>
    %267 = arith.addf %260, %266 : vector<16x3072xf32>
    %cst_113 = arith.constant 0.797884583 : f32
    %268 = vector.broadcast %cst_113 : f32 to vector<16x3072xf32>
    %269 = arith.mulf %268, %267 : vector<16x3072xf32>
    %270 = math.tanh %269 : vector<16x3072xf32>
    %cst_114 = arith.constant 1.000000e+00 : f32
    %271 = vector.broadcast %cst_114 : f32 to vector<16x3072xf32>
    %272 = arith.addf %271, %270 : vector<16x3072xf32>
    %273 = arith.mulf %262, %272 : vector<16x3072xf32>
    %274 = arith.truncf %273 : vector<16x3072xf32> to vector<16x3072xbf16>
    %c1_115 = arith.constant 1 : index
    %c0_116 = arith.constant 0 : index
    %c0_117 = arith.constant 0 : index
    %275 = vector.load %arg6[%c1_115, %c0_116, %c0_117] : memref<2x32x3072xbf16, #tpu.memory_space<vmem>>, vector<1x32x3072xbf16>
    %276 = vector.shape_cast %275 : vector<1x32x3072xbf16> to vector<32x3072xbf16>
    %cst_118 = arith.constant dense<0.000000e+00> : vector<16x32xf32>
    %277 = tpu.matmul %274, %276, %cst_118 {dimension_numbers = #tpu.dot_dimension_numbers<[1], [1], [0], [0], [0, 0, 1, 0], [], []>} : vector<16x3072xbf16>, vector<32x3072xbf16>, vector<16x32xf32> -> vector<16x32xf32>
    %278 = vector.broadcast %178 : vector<1x32xf32> to vector<16x32xf32>
    %279 = arith.addf %277, %278 : vector<16x32xf32>
    %280 = arith.addf %279, %252 : vector<16x32xf32>
    %cst_119 = arith.constant dense<0.000000e+00> : vector<16xf32>
    %281 = vector.multi_reduction <add>, %280, %cst_119 [1] : vector<16x32xf32> to vector<16xf32>
    %282 = vector.shape_cast %281 : vector<16xf32> to vector<16x1xf32>
    %cst_120 = arith.constant 3.200000e+01 : f32
    %283 = vector.broadcast %cst_120 : f32 to vector<16x1xf32>
    %284 = arith.divf %282, %283 : vector<16x1xf32>
    %285 = vector.broadcast %284 : vector<16x1xf32> to vector<16x32xf32>
    %286 = arith.subf %280, %285 : vector<16x32xf32>
    %287 = arith.mulf %286, %286 : vector<16x32xf32>
    %cst_121 = arith.constant dense<0.000000e+00> : vector<16xf32>
    %288 = vector.multi_reduction <add>, %287, %cst_121 [1] : vector<16x32xf32> to vector<16xf32>
    %289 = vector.shape_cast %288 : vector<16xf32> to vector<16x1xf32>
    %cst_122 = arith.constant 3.200000e+01 : f32
    %290 = vector.broadcast %cst_122 : f32 to vector<16x1xf32>
    %291 = arith.divf %289, %290 : vector<16x1xf32>
    %292 = vector.broadcast %284 : vector<16x1xf32> to vector<16x32xf32>
    %293 = arith.subf %280, %292 : vector<16x32xf32>
    %cst_123 = arith.constant 9.99999996E-13 : f32
    %294 = vector.broadcast %cst_123 : f32 to vector<16x1xf32>
    %295 = arith.addf %291, %294 : vector<16x1xf32>
    %296 = math.rsqrt %295 : vector<16x1xf32>
    %297 = vector.broadcast %296 : vector<16x1xf32> to vector<16x32xf32>
    %298 = arith.mulf %293, %297 : vector<16x32xf32>
    %299 = vector.broadcast %179 : vector<1x32xf32> to vector<16x32xf32>
    %300 = arith.mulf %298, %299 : vector<16x32xf32>
    %301 = vector.broadcast %180 : vector<1x32xf32> to vector<16x32xf32>
    %302 = arith.addf %300, %301 : vector<16x32xf32>
    %c480 = arith.constant 480 : index
    %c0_124 = arith.constant 0 : index
    %303 = vector.load %arg1[%c480, %c0_124] : memref<552x128xf32, #tpu.memory_space<vmem>>, vector<32x16xf32>
    %c512 = arith.constant 512 : index
    %c0_125 = arith.constant 0 : index
    %304 = vector.load %arg1[%c512, %c0_125] : memref<552x128xf32, #tpu.memory_space<vmem>>, vector<16x128xf32>
    %c528 = arith.constant 528 : index
    %c0_126 = arith.constant 0 : index
    %305 = vector.load %arg1[%c528, %c0_126] : memref<552x128xf32, #tpu.memory_space<vmem>>, vector<1x16xf32>
    %c529 = arith.constant 529 : index
    %c0_127 = arith.constant 0 : index
    %306 = vector.load %arg1[%c529, %c0_127] : memref<552x128xf32, #tpu.memory_space<vmem>>, vector<1x16xf32>
    %c530 = arith.constant 530 : index
    %c0_128 = arith.constant 0 : index
    %307 = vector.load %arg1[%c530, %c0_128] : memref<552x128xf32, #tpu.memory_space<vmem>>, vector<1x16xf32>
    %c531 = arith.constant 531 : index
    %c0_129 = arith.constant 0 : index
    %308 = vector.load %arg1[%c531, %c0_129] : memref<552x128xf32, #tpu.memory_space<vmem>>, vector<1x128xf32>
    %cst_130 = arith.constant dense<0.000000e+00> : vector<16x16xf32>
    %309 = tpu.matmul %302, %303, %cst_130 {dimension_numbers = #tpu.dot_dimension_numbers<[1], [0], [0], [1], [0, 0, 1, 1], [], []>} : vector<16x32xf32>, vector<32x16xf32>, vector<16x16xf32> -> vector<16x16xf32>
    %310 = vector.broadcast %305 : vector<1x16xf32> to vector<16x16xf32>
    %311 = arith.addf %309, %310 : vector<16x16xf32>
    %cst_131 = arith.constant dense<0.000000e+00> : vector<16xf32>
    %312 = vector.multi_reduction <add>, %311, %cst_131 [1] : vector<16x16xf32> to vector<16xf32>
    %313 = vector.shape_cast %312 : vector<16xf32> to vector<16x1xf32>
    %cst_132 = arith.constant 1.600000e+01 : f32
    %314 = vector.broadcast %cst_132 : f32 to vector<16x1xf32>
    %315 = arith.divf %313, %314 : vector<16x1xf32>
    %316 = vector.broadcast %315 : vector<16x1xf32> to vector<16x16xf32>
    %317 = arith.subf %311, %316 : vector<16x16xf32>
    %318 = arith.mulf %317, %317 : vector<16x16xf32>
    %cst_133 = arith.constant dense<0.000000e+00> : vector<16xf32>
    %319 = vector.multi_reduction <add>, %318, %cst_133 [1] : vector<16x16xf32> to vector<16xf32>
    %320 = vector.shape_cast %319 : vector<16xf32> to vector<16x1xf32>
    %cst_134 = arith.constant 1.600000e+01 : f32
    %321 = vector.broadcast %cst_134 : f32 to vector<16x1xf32>
    %322 = arith.divf %320, %321 : vector<16x1xf32>
    %323 = vector.broadcast %315 : vector<16x1xf32> to vector<16x16xf32>
    %324 = arith.subf %311, %323 : vector<16x16xf32>
    %cst_135 = arith.constant 9.99999974E-6 : f32
    %325 = vector.broadcast %cst_135 : f32 to vector<16x1xf32>
    %326 = arith.addf %322, %325 : vector<16x1xf32>
    %327 = math.rsqrt %326 : vector<16x1xf32>
    %328 = vector.broadcast %327 : vector<16x1xf32> to vector<16x16xf32>
    %329 = arith.mulf %324, %328 : vector<16x16xf32>
    %330 = vector.broadcast %306 : vector<1x16xf32> to vector<16x16xf32>
    %331 = arith.mulf %329, %330 : vector<16x16xf32>
    %332 = vector.broadcast %307 : vector<1x16xf32> to vector<16x16xf32>
    %333 = arith.addf %331, %332 : vector<16x16xf32>
    %cst_136 = arith.constant 0.000000e+00 : f32
    %334 = vector.broadcast %cst_136 : f32 to vector<16x16xf32>
    %335 = arith.maximumf %333, %334 : vector<16x16xf32>
    %cst_137 = arith.constant dense<0.000000e+00> : vector<16x128xf32>
    %336 = tpu.matmul %335, %304, %cst_137 {dimension_numbers = #tpu.dot_dimension_numbers<[1], [0], [0], [1], [0, 0, 1, 1], [], []>} : vector<16x16xf32>, vector<16x128xf32>, vector<16x128xf32> -> vector<16x128xf32>
    %337 = vector.broadcast %308 : vector<1x128xf32> to vector<16x128xf32>
    %338 = arith.addf %336, %337 : vector<16x128xf32>
    %c0_138 = arith.constant 0 : index
    %c0_139 = arith.constant 0 : index
    %339 = vector.load %arg7[%c0_138, %c0_139] : memref<16x128xf32, #tpu.memory_space<vmem>>, vector<16x128xf32>
    tpu.vector_store %arg7[%c0_138, %c0_139], %338 {strides = array<i32>} : memref<16x128xf32, #tpu.memory_space<vmem>>, vector<16x128xf32>,
    return
  }
}

</mosaic_0001>

<bundles_post_ra>
// kernel: forward.1
= control target key start
LH: loop header
LB: loop body
LE: loop exit
PB: predicated region body
PF: predicated region fallthrough
CT: control target
= control target key end

     0   :  { %v7233_v0 = vmov 0   ;;  %v7234_v2 = vmov 2   ;;  %v7235_v12 = vmov 1   ;;  %v7236_v14 = vmov 3   ;;  %s7238_s16 = smov 8   ;;  %s7239_s17 = smov 32   ;;  %s10710_s0 = inlined_call_operand.vmem [shape: s32[16,4], index: 0, kind: input, shape index: {}]   ;;  %s10711_s1 = inlined_call_operand.vmem [shape: f32[552,128], index: 1, kind: input, shape index: {}]   ;;  %s10712_s2 = inlined_call_operand.vmem [shape: f32[8,32,32], index: 2, kind: input, shape index: {}]   ;;  %s10713_s3 = inlined_call_operand.vmem [shape: f32[2,128,32], index: 3, kind: input, shape index: {}]   ;;  %s10714_s4 = inlined_call_operand.vmem [shape: bf16[2,32,3072], index: 4, kind: input, shape index: {}]   ;;  %s10715_s6 = inlined_call_operand.vmem [shape: bf16[2,32,3072], index: 6, kind: input, shape index: {}]   ;;  %s10716_s5 = inlined_call_operand.vmem [shape: f32[2,1,3072], index: 5, kind: input, shape index: {}]   ;;  %s10717_s7 = inlined_call_operand.vmem [shape: f32[16,128], index: 7, kind: output, shape index: {}]  }
   0x1   :  { %6884 = vset.pattern.permute.xlu0 %v7233_v0  ;;  %v87_v1 = vld [vmem:[%s10710_s0] sm:$0xff]  ;;  %6886 = vset.pattern.permute.xlu1 %v7234_v2  ;;  %v42_v3 = vld [vmem:[%s10711_s1 + $0x78] sm:$0xff]  ;;  %v88_v4 = vld [vmem:[%s10710_s0 + $0x8] sm:$0xff]  ;;  %v89_v33 = vlaneseq  ;;  %v7237_v39 = vmov 0.0   ;;  %vm202_vm8 = vcmask 261120   ;;  %vm607_vm9 = vcmask 130048  }
   0x2   :  { %92 = vperm.xlu0 %6884, %v87_v1   ;;  %v121_v5 = vadd.s32 64, %v87_v1  ;;  %6888 = vset.pattern.permute.xlu2 %v7233_v0  ;;  %v41_v6 = vld [vmem:[%s10711_s1 + $0x70] sm:$0xff]  ;;  %v105_v7 = vadd.s32 32, %v87_v1  ;;  %v137_v8 = vadd.s32 96, %v87_v1  ;;  %v40_v9 = vld [vmem:[%s10711_s1 + $0x68] sm:$0xff]  ;;  %v106_v10 = vadd.s32 32, %v88_v4 }
   0x3   :  { %95 = vperm.xlu2 %6888, %v88_v4   ;;  %153 = vmatpush.msra.mxu0 %v42_v3  ;;  %v39_v11 = vld [vmem:[%s10711_s1 + $0x60] sm:$0xff]  ;;  %v38_v13 = vld [vmem:[%s10711_s1 + $0x58] sm:$0xff]  ;;  %v37_v15 = vld [vmem:[%s10711_s1 + $0x50] sm:$0xff]  ;;  %v138_v17 = vadd.s32 96, %v88_v4  ;;  %v122_v18 = vadd.s32 64, %v88_v4  ;;  %v90_v36 = vand.u32 127, %v89_v33 }
   0x4   :  { %124 = vperm.xlu1 %6886, %v121_v5   ;;  %v36_v16 = vld [vmem:[%s10711_s1 + $0x48] sm:$0xff]  ;;  %v35_v19 = vld [vmem:[%s10711_s1 + $0x40] sm:$0xff]  ;;  %v34_v20 = vld [vmem:[%s10711_s1 + $0x38] sm:$0xff]  ;;  %vm541_vm10 = vcmask 523264   ;;  %vm681_vm11 = vcmask 64512   ;;  %s7240_s26 = smov 64  }
   0x5   :  { %154 = vmatpush.msra.mxu0 %v41_v6  ;;  %v33_v21 = vld [vmem:[%s10711_s1 + $0x30] sm:$0xff]  ;;  %v32_v22 = vld [vmem:[%s10711_s1 + $0x28] sm:$0xff]  ;;  %v31_v23 = vld [vmem:[%s10711_s1 + $0x20] sm:$0xff]  ;;  %s7241_s27 = smov 96   ;;  %vm911_vm12 = vcmask 785408  }
   0x6   :  { %v30_v24 = vld [vmem:[%s10711_s1 + $0x18] sm:$0xff]  ;;  %v29_v25 = vld [vmem:[%s10711_s1 + $0x10] sm:$0xff]  ;;  %v28_v26 = vld [vmem:[%s10711_s1 + $0x8] sm:$0xff] }
   0x7   :  { %155 = vmatpush.msra.mxu0 %v40_v9  ;;  %v27_v27 = vld [vmem:[%s10711_s1] sm:$0xff]  ;;  %v186_v28 = vld [vmem:[%s10712_s2 + $0x18] sm:$0xff]  ;;  %v185_v30 = vld [vmem:[%s10712_s2 + $0x10] sm:$0xff] }
   0x8   :  { %v5589_v29 = vld [vmem:[%s10712_s2 + $0x38] sm:$0xff]  ;;  %221 = vmatpush.msra.mxu1 %v186_v28  ;;  %v5588_v32 = vld [vmem:[%s10712_s2 + $0x30] sm:$0xff]  ;;  %6869 = vmatpush.msra.mxu3 %v186_v28  ;;  %v184_v57 = vld [vmem:[%s10712_s2 + $0x8] sm:$0xff] }
   0x9   :  { %156 = vmatpush.msra.mxu0 %v39_v11  ;;  %244 = vmatpush.msra.mxu2 %v5589_v29  ;;  %v5587_v58 = vld [vmem:[%s10712_s2 + $0x28] sm:$0xff]  ;;  %v183_v59 = vld [vmem:[%s10712_s2] sm:$0xff]  ;;  %v5597_v61 = vld [vmem:[%s10712_s2 + $0x78] sm:$0xff] }
   0xa   :  { %6885 = vset.pattern.permute.xlu0 %v7235_v12  ;;  %222 = vmatpush.msra.mxu1 %v185_v30  ;;  %v5586_v60 = vld [vmem:[%s10712_s2 + $0x20] sm:$0xff]  ;;  %v5596_v62 = vld [vmem:[%s10712_s2 + $0x70] sm:$0xff]  ;;  %v5595_v63 = vld [vmem:[%s10712_s2 + $0x68] sm:$0xff] }
   0xb   :  { %108 = vperm.xlu0 %6885, %v105_v7   ;;  %6889 = vset.pattern.permute.xlu2 %v7235_v12  ;;  %v5594_v0 = vld [vmem:[%s10712_s2 + $0x60] sm:$0xff]  ;;  %v5593_v1 = vld [vmem:[%s10712_s2 + $0x58] sm:$0xff]  ;;  %v5591_v3 = vld [vmem:[%s10712_s2 + $0x48] sm:$0xff] }
   0xc   :  { %6887 = vset.pattern.permute.xlu1 %v7236_v14  ;;  %111 = vperm.xlu2 %6889, %v106_v10   ;;  %v5590_v4 = vld [vmem:[%s10712_s2 + $0x40] sm:$0xff]  ;;  %v45_v9 = vld [vmem:[%s10711_s1 + $0x90] sm:$0xff]  ;;  %v46_v12 = vld [vmem:[%s10711_s1 + $0x98] sm:$0xff] }
   0xd   :  { %140 = vperm.xlu1 %6887, %v137_v8   ;;  %157 = vmatpush.msra.mxu0 %v38_v13  ;;  %v43_v5 = vld [vmem:[%s10711_s1 + $0x80] sm:$0xff]  ;;  %v44_v8 = vld [vmem:[%s10711_s1 + $0x88] sm:$0xff] }
   0xe   :  { %245 = vmatpush.msra.mxu2 %v5588_v32  ;;  %6870 = vmatpush.msra.mxu3 %v185_v30  ;;  %v47_v13 = vld [vmem:[%s10711_s1 + $0xa0] sm:$0xff]  ;;  %v54_v32 = vld [vmem:[%s10711_s1 + $0xd8] sm:$0xff] }
   0xf   :  { %158 = vmatpush.msra.mxu0 %v37_v15  ;;  %223 = vmatpush.msra.mxu1 %v184_v57  ;;  %v49_v15 = vld [vmem:[%s10711_s1 + $0xb0] sm:$0xff] }
  0x10   :  { %246 = vmatpush.msra.mxu2 %v5587_v58  ;;  %6871 = vmatpush.msra.mxu3 %v184_v57 }
  0x11   :  { %159 = vmatpush.msra.mxu0 %v36_v16  ;;  %224 = vmatpush.msra.mxu1 %v183_v59  ;;  %v50_v16 = vld [vmem:[%s10711_s1 + $0xb8] sm:$0xff] }
  0x12   :  { %247 = vmatpush.msra.mxu2 %v5586_v60  ;;  %6872 = vmatpush.msra.mxu3 %v183_v59  ;;  %v70_v59 = vld [vmem:[%s10711_s1 + $0x158] sm:$0xff]  ;;  %v69_v60 = vld [vmem:[%s10711_s1 + $0x150] sm:$0xff] }
  0x13   :  { %6892 = vset.pattern.permute.xlu0 %v7236_v14  ;;  %160 = vmatpush.msra.mxu0 %v35_v19 }
  0x14   :  { %6891 = vset.pattern.permute.xlu2 %v7236_v14  ;;  %314 = vmatpush.msrb.mxu1 %v5597_v61  ;;  %v48_v14 = vld [vmem:[%s10711_s1 + $0xa8] sm:$0xff] }
  0x15   :  { %6890 = vset.pattern.permute.xlu1 %v7234_v2  ;;  %143 = vperm.xlu2 %6891, %v138_v17   ;;  %v5592_v2 = vld [vmem:[%s10712_s2 + $0x50] sm:$0xff]  ;;  %v51_v17 = vld [vmem:[%s10711_s1 + $0xc0] sm:$0xff] }
  0x16   :  { %127 = vperm.xlu1 %6890, %v122_v18   ;;  %161 = vmatpush.msra.mxu0 %v34_v20  ;;  %v52_v18 = vld [vmem:[%s10711_s1 + $0xc8] sm:$0xff] }
  0x17   :  { %315 = vmatpush.msrb.mxu1 %v5596_v62  ;;  %267 = vmatpush.msrb.mxu3 %v5593_v1  ;;  %v7505_v1 = vld [vmem:[%s10711_s1 + $0x110] sm:$0xff] }
  0x18   :  { %162 = vmatpush.msra.mxu0 %v33_v21 }
  0x19   :  { %316 = vmatpush.msrb.mxu1 %v5595_v63  ;;  %268 = vmatpush.msrb.mxu3 %v5592_v2 }
  0x1a   :  { %163 = vmatpush.msra.mxu0 %v32_v22  ;;  %v6893_v22 = vld [vmem:[%s10711_s1 + $0x218] ss:$0 sm:$0xff] }
  0x1b   :  { %317 = vmatpush.msrb.mxu1 %v5594_v0  ;;  %269 = vmatpush.msrb.mxu3 %v5591_v3 }
  0x1c   :  { %164 = vmatpush.msra.mxu0 %v31_v23 }
  0x1d   :  { %270 = vmatpush.msrb.mxu3 %v5590_v4  ;;  %v7512_v4 = vld [vmem:[%s10711_s1 + $0x118] sm:$0xff] }
  0x1e   :  { %165 = vmatpush.msra.mxu0 %v30_v24 }
  0x20   :  { %166 = vmatpush.msra.mxu0 %v29_v25 }
  0x22   :  { %167 = vmatpush.msra.mxu0 %v28_v26 }
  0x24   :  { %168 = vmatpush.msra.mxu0 %v27_v27  ;;  %v53_v27 = vld [vmem:[%s10711_s1 + $0xd0] sm:$0xff] }
  0x5d   :  { %v96_v31 = vpop.permute.xlu2 %95 }
  0x5e   :  { %vm98_vm4 = vcmp.eq.s32.totalorder %v90_v36, %v96_v31 }
  0x5f   :  { %v5579_v47 = vsel %vm98_vm4, 1.0, %v7237_v39 }
  0x66   :  { %v112_v37 = vpop.permute.xlu2 %111 }
  0x67   :  { %vm114_vm5 = vcmp.eq.s32.totalorder %v90_v36, %v112_v37 }
  0x68   :  { %v5581_v48 = vsel %vm114_vm5, 1.0, %v7237_v39 }
  0x69   :  { %v120_v51 = vadd.f32 %v5581_v48, %v5579_v47  ;;  %v59_v48 = vld [vmem:[%s10711_s1 + $0x100] sm:$0xff] }
  0x6f   :  { %v144_v50 = vpop.permute.xlu2 %143 }
  0x70   :  { %vm146_vm6 = vcmp.eq.s32.totalorder %v90_v36, %v144_v50  ;;  %v60_v50 = vld [vmem:[%s10711_s1 + $0x108] sm:$0xff] }
  0x71   :  { %v5585_v54 = vsel %vm146_vm6, 1.0, %v7237_v39 }
  0x74   :  { %v93_v34 = vpop.permute.xlu0 %92 }
  0x75   :  { %vm97_vm0 = vcmp.eq.s32.totalorder %v90_v36, %v93_v34 }
  0x76   :  { %v125_v35 = vpop.permute.xlu1 %124  ;;  %v5578_v40 = vsel %vm97_vm0, 1.0, %v7237_v39 }
  0x77   :  { %vm129_vm1 = vcmp.eq.s32.totalorder %v90_v36, %v125_v35 }
  0x78   :  { %v5582_v44 = vsel %vm129_vm1, 1.0, %v7237_v39 }
  0x7d   :  { %v109_v38 = vpop.permute.xlu0 %108 }
  0x7e   :  { %vm113_vm2 = vcmp.eq.s32.totalorder %v90_v36, %v109_v38 }
  0x7f   :  { %v5580_v41 = vsel %vm113_vm2, 1.0, %v7237_v39  ;;  %v141_v42 = vpop.permute.xlu1 %140 }
  0x80   :  { %v119_v43 = vadd.f32 %v5580_v41, %v5578_v40  ;;  %vm145_vm3 = vcmp.eq.s32.totalorder %v90_v36, %v141_v42  ;;  %v57_v42 = vld [vmem:[%s10711_s1 + $0xf0] sm:$0xff] }
  0x81   :  { %v5584_v45 = vsel %vm145_vm3, 1.0, %v7237_v39 }
  0x82   :  { %v135_v46 = vadd.f32 %v5582_v44, %v119_v43 }
  0x84   :  { %v151_v49 = vadd.f32 %v5584_v45, %v135_v46  ;;  %v58_v45 = vld [vmem:[%s10711_s1 + $0xf8] sm:$0xff] }
  0x86   :  { %169 = vmatmul.f32.vlgmr.msra.gmra.mxu0 %v151_v49 }
  0x88   :  { %v128_v52 = vpop.permute.xlu1 %127 }
  0x89   :  { %vm130_vm7 = vcmp.eq.s32.totalorder %v90_v36, %v128_v52  ;;  %v55_v36 = vld [vmem:[%s10711_s1 + $0xe0] sm:$0xff]  ;;  %v6894_v52 = vld [vmem:[%s10711_s1 + $0x219] ss:$0 sm:$0xff] }
  0x8a   :  { %v5583_v53 = vsel %vm130_vm7, 1.0, %v7237_v39  ;;  %v56_v39 = vld [vmem:[%s10711_s1 + $0xe8] sm:$0xff] }
  0x8b   :  { %v136_v55 = vadd.f32 %v5583_v53, %v120_v51 }
  0x8d   :  { %v152_v56 = vadd.f32 %v5585_v54, %v136_v55 }
  0x8f   :  { %172 = vmatmul.f32.gmra.mxu0 %v152_v56 }
 0x103   :  { %v170_v6 = vpop.f32.mrf.mxu0 }
 0x104   :  { %v7389_v7 = vadd.f32 %v170_v6, %v43_v5 }
 0x106   :  { %5598 = vmatmul.msk.f32.vlgmr.msra.gmra.mxu1 %vm202_vm8, %v7389_v7  ;;  %5600 = vmatmul.msk.f32.vlgmr.msra.gmra.mxu2 %vm202_vm8, %v7389_v7 }
 0x107   :  { %646 = vmatpush.msra.mxu1 %v70_v59 }
 0x109   :  { %647 = vmatpush.msra.mxu1 %v69_v60 }
 0x10c   :  { %v173_v10 = vpop.f32.mrf.mxu0 }
 0x10d   :  { %v7401_v11 = vadd.f32 %v173_v10, %v44_v8  ;;  %v7519_v8 = vld [vmem:[%s10711_s1 + $0x120] sm:$0xff] }
 0x10e   :  { %5604 = vmatmul.msk.f32.vlgmr.msrb.gmra.mxu1 %vm202_vm8, %v45_v9 }
 0x10f   :  { %5599 = vmatmul.msk.f32.vlgmr.msra.gmra.mxu3 %vm202_vm8, %v7401_v11  ;;  %5601 = vmatmul.msk.f32.gmra.mxu2 %vm202_vm8, %v7401_v11 }
 0x116   :  { %5605 = vmatmul.msk.f32.gmra.mxu1 %vm202_vm8, %v46_v12  ;;  %v7526_v12 = vld [vmem:[%s10711_s1 + $0x128] sm:$0xff] }
 0x117   :  { %5602 = vmatmul.msk.f32.vlgmr.msrb.gmra.mxu3 %vm202_vm8, %v7389_v7 }
 0x11e   :  { %5606 = vmatmul.msk.f32.gmra.mxu1 %vm202_vm8, %v47_v13 }
 0x11f   :  { %5603 = vmatmul.msk.f32.gmra.mxu3 %vm202_vm8, %v7401_v11 }
 0x126   :  { %5607 = vmatmul.msk.f32.gmra.mxu1 %vm202_vm8, %v48_v14 }
 0x12e   :  { %5608 = vmatmul.msk.f32.gmra.mxu1 %vm202_vm8, %v49_v15  ;;  %v86_v15 = vld [vmem:[%s10711_s1 + $0x1d8] sm:$0xff] }
 0x12f   :  { %574 = vmatpush.msrb.mxu0 %v86_v15 }
 0x136   :  { %5609 = vmatmul.msk.f32.gmra.mxu1 %vm202_vm8, %v50_v16  ;;  %v85_v16 = vld [vmem:[%s10711_s1 + $0x1d0] sm:$0xff] }
 0x137   :  { %575 = vmatpush.msrb.mxu0 %v85_v16 }
 0x13e   :  { %5610 = vmatmul.msk.f32.gmra.mxu1 %vm202_vm8, %v51_v17  ;;  %v84_v17 = vld [vmem:[%s10711_s1 + $0x1c8] sm:$0xff] }
 0x13f   :  { %576 = vmatpush.msrb.mxu0 %v84_v17 }
 0x146   :  { %5611 = vmatmul.msk.f32.gmra.mxu1 %vm202_vm8, %v52_v18  ;;  %v7542_v18 = vld [vmem:[%s10711_s1 + $0x130] sm:$0xff] }
 0x183   :  { %v226_v19 = vpop.f32.mrf.mxu1 }
 0x184   :  { %v344_v26 = vadd.f32 %v6893_v22, %v226_v19  ;;  %v355_v53 = vadd.f32 %v6894_v52, %v226_v19  ;;  %v83_v19 = vld [vmem:[%s10711_s1 + $0x1c0] sm:$0xff] }
 0x185   :  { %577 = vmatpush.msrb.mxu0 %v83_v19 }
 0x186   :  { %v346_v28 = vmul.f32 %v344_v26, %v53_v27  ;;  %v348_v37 = vmul.f32 %v344_v26, %v55_v36  ;;  %v350_v43 = vmul.f32 %v344_v26, %v57_v42  ;;  %v352_v49 = vmul.f32 %v344_v26, %v59_v48 }
 0x187   :  { %v357_v54 = vmul.f32 %v355_v53, %v53_v27  ;;  %v359_v57 = vmul.f32 %v355_v53, %v55_v36  ;;  %v361_v61 = vmul.f32 %v355_v53, %v57_v42  ;;  %v363_v63 = vmul.f32 %v355_v53, %v59_v48  ;;  %v80_v27 = vld [vmem:[%s10711_s1 + $0x1a8] sm:$0xff]  ;;  %v77_v53 = vld [vmem:[%s10711_s1 + $0x190] sm:$0xff] }
 0x189   :  { %v249_v20 = vpop.f32.mrf.mxu2 }
 0x18b   :  { %v319_v21 = vpop.f32.mrf.mxu1 }
 0x192   :  { %v229_v23 = vpop.f32.mrf.mxu3  ;;  %v252_v24 = vpop.f32.mrf.mxu2 }
 0x193   :  { %v322_v25 = vpop.f32.mrf.mxu1  ;;  %5612 = vmatpush.xpose.msk.msrb.mxu2 %vm202_vm8, %v252_v24  ;;  %v345_v29 = vadd.f32 %v6893_v22, %v229_v23  ;;  %v356_v55 = vadd.f32 %v6894_v52, %v229_v23  ;;  %v82_v22 = vld [vmem:[%s10711_s1 + $0x1b8] sm:$0xff]  ;;  %v81_v23 = vld [vmem:[%s10711_s1 + $0x1b0] sm:$0xff] }
 0x194   :  { %578 = vmatpush.msrb.mxu0 %v82_v22  ;;  %v7558_v24 = vld [vmem:[%s10711_s1 + $0x138] sm:$0xff] }
 0x195   :  { %v347_v33 = vmul.f32 %v345_v29, %v54_v32  ;;  %v349_v40 = vmul.f32 %v345_v29, %v56_v39  ;;  %v351_v46 = vmul.f32 %v345_v29, %v58_v45  ;;  %v353_v51 = vmul.f32 %v345_v29, %v60_v50  ;;  %v7571_v29 = vld [vmem:[%s10711_s1 + $0x140] sm:$0xff] }
 0x196   :  { %v358_v56 = vmul.f32 %v356_v55, %v54_v32  ;;  %v360_v58 = vmul.f32 %v356_v55, %v56_v39  ;;  %v362_v62 = vmul.f32 %v356_v55, %v58_v45  ;;  %v364_v0 = vmul.f32 %v356_v55, %v60_v50  ;;  %579 = vmatpush.msrb.mxu0 %v81_v23  ;;  %v7578_v32 = vld [vmem:[%s10711_s1 + $0x148] sm:$0xff] }
 0x197   :  { %5613 = vmatpush.xpose.msk.msrb.mxu2 %vm202_vm8, %v249_v20  ;;  %v76_v50 = vld [vmem:[%s10711_s1 + $0x188] sm:$0xff] }
 0x198   :  { %580 = vmatpush.msrb.mxu0 %v80_v27 }
 0x19a   :  { %v272_v30 = vpop.f32.mrf.mxu3  ;;  %5614 = vmatmul.msk.f32.vlgmr.msrb.gmra.mxu2 %vm202_vm8, %v346_v28  ;;  %v79_v28 = vld [vmem:[%s10711_s1 + $0x1a0] sm:$0xff] }
 0x19b   :  { %v325_v31 = vpop.f32.mrf.mxu1  ;;  %581 = vmatpush.msrb.mxu0 %v79_v28 }
 0x1a2   :  { %v275_v34 = vpop.f32.mrf.mxu3  ;;  %5615 = vmatmul.msk.f32.gmra.mxu2 %vm202_vm8, %v347_v33 }
 0x1a3   :  { %v328_v35 = vpop.f32.mrf.mxu1  ;;  %856 = vmatpush.msra.mxu2 %v275_v34 }
 0x1a5   :  { %857 = vmatpush.msra.mxu2 %v272_v30 }
 0x1aa   :  { %5616 = vmatmul.msk.f32.gmra.mxu2 %vm202_vm8, %v348_v37 }
 0x1ab   :  { %v331_v38 = vpop.f32.mrf.mxu1 }
 0x1b2   :  { %5617 = vmatmul.msk.f32.gmra.mxu2 %vm202_vm8, %v349_v40 }
 0x1b3   :  { %v334_v41 = vpop.f32.mrf.mxu1 }
 0x1ba   :  { %5618 = vmatmul.msk.f32.gmra.mxu2 %vm202_vm8, %v350_v43 }
 0x1bb   :  { %v337_v44 = vpop.f32.mrf.mxu1 }
 0x1c2   :  { %5619 = vmatmul.msk.f32.gmra.mxu2 %vm202_vm8, %v351_v46 }
 0x1c3   :  { %v340_v47 = vpop.f32.mrf.mxu1 }
 0x1c4   :  { %5622 = vmatpush.xpose.msk.msra.mxu3 %vm202_vm8, %v340_v47  ;;  %v75_v47 = vld [vmem:[%s10711_s1 + $0x180] sm:$0xff] }
 0x1c8   :  { %5623 = vmatpush.xpose.msk.msra.mxu3 %vm202_vm8, %v337_v44  ;;  %v74_v44 = vld [vmem:[%s10711_s1 + $0x178] sm:$0xff] }
 0x1ca   :  { %5620 = vmatmul.msk.f32.gmra.mxu2 %vm202_vm8, %v352_v49 }
 0x1cc   :  { %5624 = vmatpush.xpose.msk.msra.mxu3 %vm202_vm8, %v334_v41  ;;  %v73_v41 = vld [vmem:[%s10711_s1 + $0x170] sm:$0xff] }
 0x1d0   :  { %5625 = vmatpush.xpose.msk.msra.mxu3 %vm202_vm8, %v331_v38  ;;  %v72_v38 = vld [vmem:[%s10711_s1 + $0x168] sm:$0xff] }
 0x1d2   :  { %5621 = vmatmul.msk.f32.gmra.mxu2 %vm202_vm8, %v353_v51 }
 0x1d4   :  { %5626 = vmatpush.xpose.msk.msra.mxu3 %vm202_vm8, %v328_v35  ;;  %v71_v35 = vld [vmem:[%s10711_s1 + $0x160] sm:$0xff] }
 0x1d8   :  { %5627 = vmatpush.xpose.msk.msra.mxu3 %vm202_vm8, %v325_v31 }
 0x1dc   :  { %5628 = vmatpush.xpose.msk.msra.mxu3 %vm202_vm8, %v322_v25 }
 0x1e0   :  { %5629 = vmatpush.xpose.msk.msra.mxu3 %vm202_vm8, %v319_v21 }
 0x1e3   :  { %5630 = vmatmul.msk.f32.vlgmr.msra.gmra.mxu3 %vm202_vm8, %v357_v54 }
 0x1eb   :  { %5631 = vmatmul.msk.f32.gmra.mxu3 %vm202_vm8, %v358_v56  ;;  %v78_v56 = vld [vmem:[%s10711_s1 + $0x198] sm:$0xff] }
 0x1f3   :  { %5632 = vmatmul.msk.f32.gmra.mxu3 %vm202_vm8, %v359_v57 }
 0x1fb   :  { %5633 = vmatmul.msk.f32.gmra.mxu3 %vm202_vm8, %v360_v58 }
 0x203   :  { %5634 = vmatmul.msk.f32.gmra.mxu3 %vm202_vm8, %v361_v61 }
 0x20b   :  { %5635 = vmatmul.msk.f32.gmra.mxu3 %vm202_vm8, %v362_v62 }
 0x213   :  { %5636 = vmatmul.msk.f32.gmra.mxu3 %vm202_vm8, %v363_v63 }
 0x21b   :  { %5637 = vmatmul.msk.f32.gmra.mxu3 %vm202_vm8, %v364_v0 }
 0x21d   :  { %v412_v2 = vpop.f32.mrf.mxu2 }
 0x21e   :  { %v436_v3 = vmul.f32 %v412_v2, %v7505_v1 }
 0x220   :  { %5646 = vmatmul.msk.f32.vlgmr.msra.gmra.mxu1 %vm607_vm9, %v436_v3 }
 0x225   :  { %v415_v5 = vpop.f32.mrf.mxu2 }
 0x226   :  { %v437_v6 = vmul.f32 %v415_v5, %v7512_v4 }
 0x228   :  { %5647 = vmatmul.msk.f32.gmra.mxu1 %vm607_vm9, %v437_v6 }
 0x22d   :  { %v418_v9 = vpop.f32.mrf.mxu2 }
 0x22e   :  { %v438_v10 = vmul.f32 %v418_v9, %v7519_v8 }
 0x230   :  { %5648 = vmatmul.msk.f32.gmra.mxu1 %vm607_vm9, %v438_v10 }
 0x235   :  { %v421_v13 = vpop.f32.mrf.mxu2 }
 0x236   :  { %v439_v14 = vmul.f32 %v421_v13, %v7526_v12 }
 0x238   :  { %5649 = vmatmul.msk.f32.gmra.mxu1 %vm607_vm9, %v439_v14 }
 0x23d   :  { %v424_v20 = vpop.f32.mrf.mxu2 }
 0x23e   :  { %v440_v21 = vmul.f32 %v424_v20, %v7542_v18 }
 0x240   :  { %5650 = vmatmul.msk.f32.gmra.mxu1 %vm607_vm9, %v440_v21 }
 0x245   :  { %v427_v25 = vpop.f32.mrf.mxu2 }
 0x246   :  { %v441_v26 = vmul.f32 %v427_v25, %v7558_v24 }
 0x248   :  { %5651 = vmatmul.msk.f32.gmra.mxu1 %vm607_vm9, %v441_v26 }
 0x24d   :  { %v430_v30 = vpop.f32.mrf.mxu2 }
 0x24e   :  { %v442_v31 = vmul.f32 %v430_v30, %v7571_v29 }
 0x250   :  { %5652 = vmatmul.msk.f32.gmra.mxu1 %vm607_vm9, %v442_v31 }
 0x255   :  { %v433_v33 = vpop.f32.mrf.mxu2 }
 0x256   :  { %v443_v34 = vmul.f32 %v433_v33, %v7578_v32 }
 0x258   :  { %5653 = vmatmul.msk.f32.gmra.mxu1 %vm607_vm9, %v443_v34 }
 0x266   :  { %v509_v36 = vpop.f32.mrf.mxu3 }
 0x267   :  { %v533_v37 = vmul.f32 %v509_v36, %v71_v35 }
 0x269   :  { %5638 = vmatmul.msk.f32.vlgmr.msrb.gmra.mxu0 %vm541_vm10, %v533_v37 }
 0x26e   :  { %v512_v39 = vpop.f32.mrf.mxu3 }
 0x26f   :  { %v534_v40 = vmul.f32 %v512_v39, %v72_v38 }
 0x271   :  { %5639 = vmatmul.msk.f32.gmra.mxu0 %vm541_vm10, %v534_v40 }
 0x276   :  { %v515_v42 = vpop.f32.mrf.mxu3 }
 0x277   :  { %v535_v43 = vmul.f32 %v515_v42, %v73_v41 }
 0x279   :  { %5640 = vmatmul.msk.f32.gmra.mxu0 %vm541_vm10, %v535_v43 }
 0x27e   :  { %v518_v45 = vpop.f32.mrf.mxu3 }
 0x27f   :  { %v536_v46 = vmul.f32 %v518_v45, %v74_v44 }
 0x281   :  { %5641 = vmatmul.msk.f32.gmra.mxu0 %vm541_vm10, %v536_v46 }
 0x286   :  { %v521_v48 = vpop.f32.mrf.mxu3 }
 0x287   :  { %v537_v49 = vmul.f32 %v521_v48, %v75_v47 }
 0x289   :  { %5642 = vmatmul.msk.f32.gmra.mxu0 %vm541_vm10, %v537_v49 }
 0x28e   :  { %v524_v51 = vpop.f32.mrf.mxu3 }
 0x28f   :  { %v538_v52 = vmul.f32 %v524_v51, %v76_v50 }
 0x291   :  { %5643 = vmatmul.msk.f32.gmra.mxu0 %vm541_vm10, %v538_v52 }
 0x296   :  { %v527_v54 = vpop.f32.mrf.mxu3 }
 0x297   :  { %v539_v55 = vmul.f32 %v527_v54, %v77_v53 }
 0x299   :  { %5644 = vmatmul.msk.f32.gmra.mxu0 %vm541_vm10, %v539_v55 }
 0x29d   :  { %v649_v59 = vpop.f32.mrf.mxu1 }
 0x29e   :  { %v530_v57 = vpop.f32.mrf.mxu3 }
 0x29f   :  { %v540_v58 = vmul.f32 %v530_v57, %v78_v56 }
 0x2a1   :  { %5645 = vmatmul.msk.f32.gmra.mxu0 %vm541_vm10, %v540_v58 }
 0x2a5   :  { %v652_v60 = vpop.f32.mrf.mxu1 }
 0x2ad   :  { %v655_v2 = vpop.f32.mrf.mxu1 }
 0x2b5   :  { %v658_v10 = vpop.f32.mrf.mxu1 }
 0x2bd   :  { %v661_v20 = vpop.f32.mrf.mxu1 }
 0x2c5   :  { %v664_v27 = vpop.f32.mrf.mxu1 }
 0x2cd   :  { %v667_v35 = vpop.f32.mrf.mxu1 }
 0x2d5   :  { %v670_v40 = vpop.f32.mrf.mxu1 }
 0x2e6   :  { %v583_v61 = vpop.f32.mrf.mxu0 }
 0x2e7   :  { %v650_v62 = vadd.f32 %v649_v59, %v583_v61 }
 0x2e9   :  { %v673_v63 = vmul.f32 0.35355338, %v650_v62 }
 0x2eb   :  { %v682_v0 = vsel %vm681_vm11, %v673_v63, -inf }
 0x2ec   :  { %683 = vmax.xlane.f32.xlu0 %v682_v0 }
 0x2ee   :  { %v586_v3 = vpop.f32.mrf.mxu0 }
 0x2ef   :  { %v653_v5 = vadd.f32 %v652_v60, %v586_v3 }
 0x2f1   :  { %v674_v6 = vmul.f32 0.35355338, %v653_v5 }
 0x2f3   :  { %v685_v9 = vsel %vm681_vm11, %v674_v6, -inf }
 0x2f4   :  { %686 = vmax.xlane.f32.xlu1 %v685_v9 }
 0x2f6   :  { %v589_v13 = vpop.f32.mrf.mxu0 }
 0x2f7   :  { %v656_v14 = vadd.f32 %v655_v2, %v589_v13 }
 0x2f9   :  { %v675_v15 = vmul.f32 0.35355338, %v656_v14 }
 0x2fb   :  { %v688_v16 = vsel %vm681_vm11, %v675_v15, -inf }
 0x2fc   :  { %689 = vmax.xlane.f32.xlu2 %v688_v16 }
 0x2fe   :  { %v592_v17 = vpop.f32.mrf.mxu0 }
 0x2ff   :  { %v659_v19 = vadd.f32 %v658_v10, %v592_v17 }
 0x301   :  { %v676_v21 = vmul.f32 0.35355338, %v659_v19 }
 0x303   :  { %v691_v22 = vsel %vm681_vm11, %v676_v21, -inf }
 0x304   :  { %692 = vmax.xlane.f32.xlu2 %v691_v22 }
 0x306   :  { %v595_v23 = vpop.f32.mrf.mxu0 }
 0x307   :  { %v662_v25 = vadd.f32 %v661_v20, %v595_v23 }
 0x309   :  { %v677_v26 = vmul.f32 0.35355338, %v662_v25 }
 0x30b   :  { %v694_v28 = vsel %vm681_vm11, %v677_v26, -inf }
 0x30c   :  { %695 = vmax.xlane.f32.xlu0 %v694_v28 }
 0x30e   :  { %v598_v30 = vpop.f32.mrf.mxu0 }
 0x30f   :  { %v665_v31 = vadd.f32 %v664_v27, %v598_v30 }
 0x311   :  { %v678_v33 = vmul.f32 0.35355338, %v665_v31 }
 0x313   :  { %v697_v34 = vsel %vm681_vm11, %v678_v33, -inf }
 0x314   :  { %698 = vmax.xlane.f32.xlu1 %v697_v34 }
 0x316   :  { %v601_v36 = vpop.f32.mrf.mxu0 }
 0x317   :  { %v668_v37 = vadd.f32 %v667_v35, %v601_v36 }
 0x319   :  { %v679_v38 = vmul.f32 0.35355338, %v668_v37 }
 0x31b   :  { %v700_v39 = vsel %vm681_vm11, %v679_v38, -inf }
 0x31c   :  { %701 = vmax.xlane.f32.xlu2 %v700_v39 }
 0x31e   :  { %v604_v41 = vpop.f32.mrf.mxu0 }
 0x31f   :  { %v671_v42 = vadd.f32 %v670_v40, %v604_v41 }
 0x321   :  { %v680_v43 = vmul.f32 0.35355338, %v671_v42 }
 0x323   :  { %v703_v44 = vsel %vm681_vm11, %v680_v43, -inf }
 0x324   :  { %704 = vmax.xlane.f32.xlu1 %v703_v44 }
 0x35f   :  { %v684_v45 = vpop.xlane.xlu0 %683 }
 0x360   :  { %v706_v46 = vsub.f32 %v673_v63, %v684_v45 }
 0x362   :  { %v714_v47 = vmul.f32 1.442695, %v706_v46 }
 0x364   :  { %6911 = vpow2.f32 %v714_v47 }
 0x367   :  { %v687_v48 = vpop.xlane.xlu1 %686 }
 0x368   :  { %v707_v49 = vsub.f32 %v674_v6, %v687_v48 }
 0x36a   :  { %v6912_v50 = vpop.eup %6911  ;;  %v716_v51 = vmul.f32 1.442695, %v707_v49 }
 0x36b   :  { %v730_v52 = vsel %vm681_vm11, %v6912_v50, 0.0 }
 0x36c   :  { %6913 = vpow2.f32 %v716_v51  ;;  %731 = vadd.xlane.f32.xlu0 %v730_v52 }
 0x36f   :  { %v690_v53 = vpop.xlane.xlu2 %689 }
 0x370   :  { %v708_v54 = vsub.f32 %v675_v15, %v690_v53 }
 0x372   :  { %v6914_v55 = vpop.eup %6913  ;;  %v718_v56 = vmul.f32 1.442695, %v708_v54 }
 0x373   :  { %v733_v57 = vsel %vm681_vm11, %v6914_v55, 0.0 }
 0x374   :  { %6915 = vpow2.f32 %v718_v56  ;;  %734 = vadd.xlane.f32.xlu2 %v733_v57 }
 0x377   :  { %v693_v58 = vpop.xlane.xlu2 %692 }
 0x378   :  { %v709_v59 = vsub.f32 %v676_v21, %v693_v58 }
 0x37a   :  { %v6916_v60 = vpop.eup %6915  ;;  %v720_v61 = vmul.f32 1.442695, %v709_v59 }
 0x37b   :  { %v736_v62 = vsel %vm681_vm11, %v6916_v60, 0.0 }
 0x37c   :  { %6917 = vpow2.f32 %v720_v61  ;;  %737 = vadd.xlane.f32.xlu0 %v736_v62 }
 0x37f   :  { %v696_v63 = vpop.xlane.xlu0 %695 }
 0x380   :  { %v710_v0 = vsub.f32 %v677_v26, %v696_v63 }
 0x382   :  { %v6918_v2 = vpop.eup %6917  ;;  %v722_v3 = vmul.f32 1.442695, %v710_v0 }
 0x383   :  { %v739_v5 = vsel %vm681_vm11, %v6918_v2, 0.0 }
 0x384   :  { %6919 = vpow2.f32 %v722_v3  ;;  %740 = vadd.xlane.f32.xlu1 %v739_v5 }
 0x387   :  { %v699_v6 = vpop.xlane.xlu1 %698 }
 0x388   :  { %v711_v9 = vsub.f32 %v678_v33, %v699_v6 }
 0x38a   :  { %v6920_v10 = vpop.eup %6919  ;;  %v724_v13 = vmul.f32 1.442695, %v711_v9 }
 0x38b   :  { %v742_v14 = vsel %vm681_vm11, %v6920_v10, 0.0 }
 0x38c   :  { %6921 = vpow2.f32 %v724_v13  ;;  %743 = vadd.xlane.f32.xlu2 %v742_v14 }
 0x38f   :  { %v702_v15 = vpop.xlane.xlu2 %701 }
 0x390   :  { %v712_v16 = vsub.f32 %v679_v38, %v702_v15 }
 0x392   :  { %v6922_v17 = vpop.eup %6921  ;;  %v726_v19 = vmul.f32 1.442695, %v712_v16 }
 0x393   :  { %v745_v20 = vsel %vm681_vm11, %v6922_v17, 0.0 }
 0x394   :  { %6923 = vpow2.f32 %v726_v19  ;;  %746 = vadd.xlane.f32.xlu0 %v745_v20  ;;  %v928_v20 = vld [vmem:[%s10713_s3 + $0x70] sm:$0xff] }
 0x397   :  { %v705_v21 = vpop.xlane.xlu1 %704 }
 0x398   :  { %v713_v22 = vsub.f32 %v680_v43, %v705_v21  ;;  %v926_v21 = vld [vmem:[%s10713_s3 + $0x60] sm:$0xff] }
 0x39a   :  { %v6924_v23 = vpop.eup %6923  ;;  %v728_v25 = vmul.f32 1.442695, %v713_v22 }
 0x39b   :  { %v748_v26 = vsel %vm681_vm11, %v6924_v23, 0.0 }
 0x39c   :  { %6925 = vpow2.f32 %v728_v25  ;;  %749 = vadd.xlane.f32.xlu1 %v748_v26 }
 0x3a2   :  { %v6926_v27 = vpop.eup %6925 }
 0x3a3   :  { %v751_v28 = vsel %vm681_vm11, %v6926_v27, 0.0 }
 0x3a4   :  { %752 = vadd.xlane.f32.xlu0 %v751_v28  ;;  %v924_v28 = vld [vmem:[%s10713_s3 + $0x50] sm:$0xff] }
 0x3df   :  { %v732_v30 = vpop.xlane.xlu0 %731 }
 0x3e0   :  { %6927 = vrcp.f32 %v732_v30  ;;  %v923_v30 = vld [vmem:[%s10713_s3 + $0x48] sm:$0xff] }
 0x3e6   :  { %v6928_v31 = vpop.eup %6927 }
 0x3e7   :  { %v735_v33 = vpop.xlane.xlu2 %734  ;;  %v762_v34 = vmul.f32 %v6928_v31, %v6912_v50  ;;  %v922_v31 = vld [vmem:[%s10713_s3 + $0x40] sm:$0xff] }
 0x3e8   :  { %6929 = vrcp.f32 %v735_v33  ;;  %v921_v33 = vld [vmem:[%s10713_s3 + $0x38] sm:$0xff] }
 0x3e9   :  { %778 = vrot.lane.b32.xlu2 %v762_v34, %s7238_s16 }
 0x3ee   :  { %v6930_v35 = vpop.eup %6929 }
 0x3ef   :  { %v738_v36 = vpop.xlane.xlu0 %737  ;;  %v763_v37 = vmul.f32 %v6930_v35, %v6914_v55  ;;  %v919_v35 = vld [vmem:[%s10713_s3 + $0x28] sm:$0xff] }
 0x3f0   :  { %6931 = vrcp.f32 %v738_v36  ;;  %v918_v36 = vld [vmem:[%s10713_s3 + $0x20] sm:$0xff] }
 0x3f1   :  { %780 = vrot.lane.b32.xlu1 %v763_v37, %s7238_s16 }
 0x3f6   :  { %v6932_v38 = vpop.eup %6931 }
 0x3f7   :  { %v741_v39 = vpop.xlane.xlu1 %740  ;;  %v764_v40 = vmul.f32 %v6932_v38, %v6916_v60  ;;  %v916_v38 = vld [vmem:[%s10713_s3 + $0x10] sm:$0xff] }
 0x3f8   :  { %6933 = vrcp.f32 %v741_v39  ;;  %v915_v39 = vld [vmem:[%s10713_s3 + $0x8] sm:$0xff] }
 0x3f9   :  { %782 = vrot.lane.b32.xlu0 %v764_v40, %s7238_s16 }
 0x3fe   :  { %v6934_v41 = vpop.eup %6933 }
 0x3ff   :  { %v744_v42 = vpop.xlane.xlu2 %743  ;;  %v765_v43 = vmul.f32 %v6934_v41, %v6918_v2 }
 0x400   :  { %6935 = vrcp.f32 %v744_v42 }
 0x401   :  { %784 = vrot.lane.b32.xlu2 %v765_v43, %s7238_s16 }
 0x406   :  { %v6936_v44 = vpop.eup %6935 }
 0x407   :  { %v747_v45 = vpop.xlane.xlu0 %746  ;;  %v766_v46 = vmul.f32 %v6936_v44, %v6920_v10 }
 0x408   :  { %6937 = vrcp.f32 %v747_v45 }
 0x409   :  { %786 = vrot.lane.b32.xlu1 %v766_v46, %s7238_s16 }
 0x40e   :  { %v6938_v47 = vpop.eup %6937 }
 0x40f   :  { %v750_v48 = vpop.xlane.xlu1 %749  ;;  %v767_v49 = vmul.f32 %v6938_v47, %v6922_v17 }
 0x410   :  { %6939 = vrcp.f32 %v750_v48 }
 0x411   :  { %788 = vrot.lane.b32.xlu0 %v767_v49, %s7238_s16 }
 0x416   :  { %v6940_v50 = vpop.eup %6939 }
 0x417   :  { %v753_v51 = vpop.xlane.xlu0 %752  ;;  %v768_v52 = vmul.f32 %v6940_v50, %v6924_v23 }
 0x418   :  { %6941 = vrcp.f32 %v753_v51 }
 0x419   :  { %790 = vrot.lane.b32.xlu2 %v768_v52, %s7238_s16 }
 0x41e   :  { %v6942_v53 = vpop.eup %6941 }
 0x41f   :  { %v769_v54 = vmul.f32 %v6942_v53, %v6926_v27  ;;  %v925_v27 = vld [vmem:[%s10713_s3 + $0x58] sm:$0xff] }
 0x421   :  { %792 = vrot.lane.b32.xlu1 %v769_v54, %s7238_s16 }
 0x443   :  { %v779_v55 = vpop.permute.xlu2 %778 }
 0x444   :  { %v802_v56 = vsel %vm681_vm11, %v762_v34, %v779_v55  ;;  %v920_v34 = vld [vmem:[%s10713_s3 + $0x30] sm:$0xff] }
 0x445   :  { %v810_v57 = vmul.f32 %v802_v56, %v7505_v1 }
 0x447   :  { %5654 = vmatmul.msk.f32.vlgmr.msra.gmra.mxu2 %vm607_vm9, %v810_v57 }
 0x45b   :  { %v785_v0 = vpop.permute.xlu2 %784 }
 0x45c   :  { %v805_v2 = vsel %vm681_vm11, %v765_v43, %v785_v0 }
 0x45d   :  { %v813_v1 = vmul.f32 %v805_v2, %v7526_v12 }
 0x463   :  { %v781_v58 = vpop.permute.xlu1 %780 }
 0x464   :  { %v803_v59 = vsel %vm681_vm11, %v763_v37, %v781_v58  ;;  %v917_v37 = vld [vmem:[%s10713_s3 + $0x18] sm:$0xff] }
 0x465   :  { %v811_v60 = vmul.f32 %v803_v59, %v7512_v4  ;;  %v7242_v59 = vmov 32.0  }
 0x466   :  { %6943 = vrcp.f32 %v7242_v59 }
 0x467   :  { %5655 = vmatmul.msk.f32.gmra.mxu2 %vm607_vm9, %v811_v60 }
 0x46b   :  { %v783_v61 = vpop.permute.xlu0 %782 }
 0x46c   :  { %v804_v62 = vsel %vm681_vm11, %v764_v40, %v783_v61  ;;  %v914_v40 = vld [vmem:[%s10713_s3] sm:$0xff]  ;;  %v6944_v60 = vpop.eup %6943 }
 0x46d   :  { %v812_v63 = vmul.f32 %v804_v62, %v7519_v8  ;;  %v960_v61 = vmul.f32 32.0, %v6944_v60  ;;  %v5760_v62 = vld [vmem:[%s10714_s4 + $0xc0] sm:$0xf]  ;;  %vm964_vm13 = vweird.f32 %v6944_v60 }
 0x46f   :  { %5656 = vmatmul.msk.f32.gmra.mxu2 %vm607_vm9, %v812_v63  ;;  %v961_v0 = vsub.f32 1.0, %v960_v61  ;;  %v6681_v61 = vld [vmem:[%s10714_s4 + $0x24] sm:$0xf] }
 0x471   :  { %v962_v2 = vmul.f32 %v6944_v60, %v961_v0  ;;  %v5704_v0 = vld [vmem:[%s10714_s4 + $0x28] sm:$0xf] }
 0x473   :  { %v791_v10 = vpop.permute.xlu2 %790 }
 0x474   :  { %v808_v13 = vsel %vm681_vm11, %v768_v52, %v791_v10 }
 0x475   :  { %v816_v12 = vmul.f32 %v808_v13, %v7571_v29  ;;  %v929_v29 = vld [vmem:[%s10713_s3 + $0x78] sm:$0xff] }
 0x476   :  { %930 = vmatpush.msrb.mxu3 %v929_v29  ;;  %v5762_v29 = vld [vmem:[%s10714_s4 + $0x120] sm:$0xf0] }
 0x477   :  { %5657 = vmatmul.msk.f32.gmra.mxu2 %vm607_vm9, %v813_v1 }
 0x478   :  { %931 = vmatpush.msrb.mxu3 %v928_v20 }
 0x47b   :  { %v787_v3 = vpop.permute.xlu1 %786 }
 0x47c   :  { %v806_v5 = vsel %vm681_vm11, %v766_v46, %v787_v3 }
 0x47d   :  { %v814_v4 = vmul.f32 %v806_v5, %v7542_v18 }
 0x47f   :  { %5658 = vmatmul.msk.f32.gmra.mxu2 %vm607_vm9, %v814_v4 }
 0x483   :  { %v789_v6 = vpop.permute.xlu0 %788 }
 0x484   :  { %v807_v9 = vsel %vm681_vm11, %v767_v49, %v789_v6 }
 0x485   :  { %v815_v8 = vmul.f32 %v807_v9, %v7558_v24 }
 0x487   :  { %5659 = vmatmul.msk.f32.gmra.mxu2 %vm607_vm9, %v815_v8 }
 0x48f   :  { %5660 = vmatmul.msk.f32.gmra.mxu2 %vm607_vm9, %v816_v12 }
 0x493   :  { %v793_v14 = vpop.permute.xlu1 %792 }
 0x494   :  { %v809_v15 = vsel %vm681_vm11, %v769_v54, %v793_v14 }
 0x495   :  { %v817_v18 = vmul.f32 %v809_v15, %v7578_v32  ;;  %v927_v32 = vld [vmem:[%s10713_s3 + $0x68] sm:$0xff]  ;;  %v5784_v15 = vld [vmem:[%s10714_s4 + $0xd8] sm:$0xf] }
 0x496   :  { %932 = vmatpush.msrb.mxu3 %v927_v32 }
 0x497   :  { %5661 = vmatmul.msk.f32.gmra.mxu2 %vm607_vm9, %v817_v18  ;;  %v6716_v18 = vld [vmem:[%s10714_s4 + $0x134] sm:$0xf0] }
 0x498   :  { %933 = vmatpush.msrb.mxu3 %v926_v21 }
 0x49a   :  { %934 = vmatpush.msrb.mxu3 %v925_v27 }
 0x49c   :  { %935 = vmatpush.msrb.mxu3 %v924_v28 }
 0x49e   :  { %936 = vmatpush.msrb.mxu3 %v923_v30  ;;  %v5666_v30 = vld [vmem:[%s10714_s4 + $0x60] sm:$0xf0] }
 0x4a0   :  { %937 = vmatpush.msrb.mxu3 %v922_v31  ;;  %v6679_v31 = vld [vmem:[%s10714_s4 + $0x14] sm:$0xf] }
 0x4a2   :  { %938 = vmatpush.msrb.mxu3 %v921_v33 }
 0x4a4   :  { %939 = vmatpush.msrb.mxu3 %v920_v34  ;;  %v5682_v34 = vld [vmem:[%s10714_s4 + $0x70] sm:$0xf0] }
 0x4a6   :  { %940 = vmatpush.msrb.mxu3 %v919_v35  ;;  %v5688_v35 = vld [vmem:[%s10714_s4 + $0x18] sm:$0xf] }
 0x4a8   :  { %941 = vmatpush.msrb.mxu3 %v918_v36  ;;  %v6692_v36 = vld [vmem:[%s10714_s4 + $0x74] sm:$0xf0] }
 0x4aa   :  { %942 = vmatpush.msrb.mxu3 %v917_v37  ;;  %v5685_v37 = vor.u32 %v6679_v31, %v5682_v34  ;;  %v6720_v31 = vld [vmem:[%s10714_s4 + $0x154] sm:$0xf0] }
 0x4ac   :  { %943 = vmatpush.msrb.mxu3 %v916_v38  ;;  %v5689_v38 = vor.u32 %v6692_v36, %v5688_v35  ;;  %v5680_v36 = vld [vmem:[%s10714_s4 + $0x10] sm:$0xf] }
 0x4ae   :  { %944 = vmatpush.msrb.mxu3 %v915_v39 }
 0x4b0   :  { %945 = vmatpush.msrb.mxu3 %v914_v40  ;;  %v5768_v40 = vld [vmem:[%s10714_s4 + $0xc8] sm:$0xf] }
 0x4ca   :  { %v859_v16 = vpop.f32.mrf.mxu2 }
 0x4ea   :  { %v862_v17 = vpop.f32.mrf.mxu2 }
 0x4f2   :  { %v865_v19 = vpop.f32.mrf.mxu2 }
 0x4f3   :  { %885 = vrot.lane.b32.xlu0 %v865_v19, %s7239_s17  ;;  %v5778_v19 = vld [vmem:[%s10714_s4 + $0x130] sm:$0xf0] }
 0x4fa   :  { %v868_v24 = vpop.f32.mrf.mxu2 }
 0x4fb   :  { %887 = vrot.lane.b32.xlu0 %v868_v24, %s7239_s17  ;;  %v6701_v24 = vld [vmem:[%s10714_s4 + $0xc4] sm:$0xf] }
 0x4fc   :  { %v5765_v21 = vor.u32 %v6701_v24, %v5762_v29  ;;  %v6896_v29 = vld [vmem:[%s10711_s1 + $0x21b] ss:$0 sm:$0xff] }
 0x4fe   :  { %1376 = vmatpush.bf16.msra.mxu3 %v5765_v21 }
 0x502   :  { %v871_v22 = vpop.f32.mrf.mxu2 }
 0x503   :  { %893 = vrot.lane.b32.xlu2 %v871_v22, %s7240_s26 }
 0x50a   :  { %v874_v23 = vpop.f32.mrf.mxu2 }
 0x50b   :  { %895 = vrot.lane.b32.xlu2 %v874_v23, %s7240_s26  ;;  %v5664_v23 = vld [vmem:[%s10714_s4] sm:$0xf] }
 0x512   :  { %v877_v25 = vpop.f32.mrf.mxu2 }
 0x513   :  { %901 = vrot.lane.b32.xlu1 %v877_v25, %s7241_s27  ;;  %v6689_v25 = vld [vmem:[%s10714_s4 + $0x5c] sm:$0xf0] }
 0x514   :  { %v5665_v28 = vor.u32 %v6689_v25, %v5664_v23  ;;  %v6704_v23 = vld [vmem:[%s10714_s4 + $0xdc] sm:$0xf] }
 0x515   :  { %v5786_v25 = vld [vmem:[%s10714_s4 + $0x138] sm:$0xf0] }
 0x516   :  { %v5789_v35 = vor.u32 %v6704_v23, %v5786_v25  ;;  %v6684_v23 = vld [vmem:[%s10714_s4 + $0x3c] sm:$0xf] }
 0x517   :  { %v5722_v25 = vld [vmem:[%s10714_s4 + $0x98] sm:$0xf0] }
 0x51a   :  { %v880_v26 = vpop.f32.mrf.mxu2 }
 0x51b   :  { %903 = vrot.lane.b32.xlu1 %v880_v26, %s7241_s27  ;;  %v6677_v26 = vld [vmem:[%s10714_s4 + $0x4] sm:$0xf] }
 0x51c   :  { %v5669_v33 = vor.u32 %v6677_v26, %v5666_v30  ;;  %v5816_v30 = vld [vmem:[%s10714_s4 + $0xf8] sm:$0xf] }
 0x51e   :  { %1377 = vmatpush.bf16.msra.mxu3 %v5669_v33 }
 0x55d   :  { %v894_v42 = vpop.permute.xlu2 %893 }
 0x565   :  { %v886_v41 = vpop.permute.xlu0 %885  ;;  %v896_v49 = vpop.permute.xlu2 %895 }
 0x566   :  { %v907_v43 = vsel %vm202_vm8, %v859_v16, %v886_v41  ;;  %v6703_v16 = vld [vmem:[%s10714_s4 + $0xd4] sm:$0xf]  ;;  %v6714_v41 = vld [vmem:[%s10714_s4 + $0x124] sm:$0xf0] }
 0x567   :  { %v909_v44 = vsel %vm541_vm10, %v907_v43, %v894_v42  ;;  %v5781_v32 = vor.u32 %v6703_v16, %v5778_v19  ;;  %v6702_v42 = vld [vmem:[%s10714_s4 + $0xcc] sm:$0xf]  ;;  %v6895_v16 = vld [vmem:[%s10711_s1 + $0x21a] ss:$0 sm:$0xff] }
 0x569   :  { %1432 = vmatpush.bf16.msrb.mxu1 %v5781_v32 }
 0x56d   :  { %v888_v47 = vpop.permute.xlu0 %887  ;;  %1433 = vmatpush.bf16.msrb.mxu1 %v5685_v37  ;;  %v6691_v37 = vld [vmem:[%s10714_s4 + $0x6c] sm:$0xf0] }
 0x56e   :  { %v908_v48 = vsel %vm202_vm8, %v862_v17, %v888_v47  ;;  %v5785_v17 = vor.u32 %v6716_v18, %v5784_v15  ;;  %v5794_v47 = vld [vmem:[%s10714_s4 + $0x140] sm:$0xf0] }
 0x56f   :  { %v910_v51 = vsel %vm541_vm10, %v908_v48, %v896_v49 }
 0x570   :  { %1446 = vmatpush.bf16.msrb.mxu2 %v5785_v17 }
 0x574   :  { %1447 = vmatpush.bf16.msrb.mxu2 %v5689_v38 }
 0x585   :  { %v902_v45 = vpop.permute.xlu1 %901 }
 0x586   :  { %v912_v46 = vsel %vm911_vm12, %v909_v44, %v902_v45  ;;  %v5769_v44 = vor.u32 %v6714_v41, %v5768_v40  ;;  %v5770_v45 = vld [vmem:[%s10714_s4 + $0x128] sm:$0xf0]  ;;  %v6680_v40 = vld [vmem:[%s10714_s4 + $0x1c] sm:$0xf] }
 0x587   :  { %946 = vmatmul.f32.vlgmr.msrb.gmra.mxu3 %v912_v46  ;;  %v6705_v46 = vld [vmem:[%s10714_s4 + $0xe4] sm:$0xf]  ;;  %v5773_v48 = vor.u32 %v6702_v42, %v5770_v45  ;;  %v5690_v41 = vld [vmem:[%s10714_s4 + $0x78] sm:$0xf0]  ;;  %v6683_v42 = vld [vmem:[%s10714_s4 + $0x34] sm:$0xf] }
 0x588   :  { %v5797_v49 = vor.u32 %v6705_v46, %v5794_v47  ;;  %v6696_v45 = vld [vmem:[%s10714_s4 + $0x94] sm:$0xf0]  ;;  %v5681_v46 = vor.u32 %v6691_v37, %v5680_v36  ;;  %v5693_v47 = vor.u32 %v6680_v40, %v5690_v41  ;;  %v6710_v40 = vld [vmem:[%s10714_s4 + $0x10c] sm:$0xf] }
 0x589   :  { %1404 = vmatpush.bf16.msrb.mxu3 %v5773_v48  ;;  %v5834_v41 = vld [vmem:[%s10714_s4 + $0x168] sm:$0xf0] }
 0x58a   :  { %1488 = vmatpush.bf16.msra.mxu1 %v5797_v49 }
 0x58d   :  { %v904_v50 = vpop.permute.xlu1 %903 }
 0x58e   :  { %v913_v52 = vsel %vm911_vm12, %v910_v51, %v904_v50  ;;  %v5800_v50 = vld [vmem:[%s10714_s4 + $0xe8] sm:$0xf] }
 0x58f   :  { %949 = vmatmul.f32.gmra.mxu3 %v913_v52  ;;  %v6718_v51 = vld [vmem:[%s10714_s4 + $0x144] sm:$0xf0] }
 0x590   :  { %v5672_v52 = vld [vmem:[%s10714_s4 + $0x8] sm:$0xf] }
 0x60a   :  { %v947_v53 = vpop.f32.mrf.mxu3 }
 0x60b   :  { %v948_v54 = vadd.f32 %v947_v53, %v7389_v7  ;;  %v6713_v7 = vld [vmem:[%s10714_s4 + $0x11c] sm:$0xf0] }
 0x60c   :  { %v5761_v63 = vor.u32 %v6713_v7, %v5760_v62  ;;  %v5698_v62 = vld [vmem:[%s10714_s4 + $0x80] sm:$0xf0] }
 0x60d   :  { %v953_v55 = vsel %vm202_vm8, %v948_v54, 0.0 }
 0x60e   :  { %954 = vadd.xlane.f32.xlu0 %v953_v55  ;;  %1362 = vmatpush.bf16.msra.mxu0 %v5761_v63  ;;  %v5801_v55 = vor.u32 %v6718_v51, %v5800_v50  ;;  %v5701_v63 = vor.u32 %v6681_v61, %v5698_v62  ;;  %v5792_v50 = vld [vmem:[%s10714_s4 + $0xe0] sm:$0xf] }
 0x60f   :  { %v6717_v51 = vld [vmem:[%s10714_s4 + $0x13c] sm:$0xf0] }
 0x610   :  { %1502 = vmatpush.bf16.msra.mxu2 %v5801_v55  ;;  %1489 = vmatpush.bf16.msra.mxu1 %v5701_v63  ;;  %v5826_v55 = vld [vmem:[%s10714_s4 + $0x160] sm:$0xf0]  ;;  %v6693_v61 = vld [vmem:[%s10714_s4 + $0x7c] sm:$0xf0]  ;;  %v6682_v63 = vld [vmem:[%s10714_s4 + $0x2c] sm:$0xf] }
 0x612   :  { %v950_v56 = vpop.f32.mrf.mxu3  ;;  %1363 = vmatpush.bf16.msra.mxu0 %v5665_v28  ;;  %v5810_v28 = vld [vmem:[%s10714_s4 + $0x150] sm:$0xf0] }
 0x613   :  { %v951_v57 = vadd.f32 %v950_v56, %v7401_v11  ;;  %v963_v11 = vadd.f32 %v6944_v60, %v962_v2  ;;  %v6690_v56 = vld [vmem:[%s10714_s4 + $0x64] sm:$0xf0] }
 0x614   :  { %v5673_v59 = vor.u32 %v6690_v56, %v5672_v52  ;;  %v6694_v2 = vld [vmem:[%s10714_s4 + $0x84] sm:$0xf0]  ;;  %v6706_v52 = vld [vmem:[%s10714_s4 + $0xec] sm:$0xf] }
 0x615   :  { %v956_v58 = vsel %vm202_vm8, %v951_v57, 0.0  ;;  %v7732_v1 = vsel %vm964_vm13, %v6944_v60, %v963_v11  ;;  %v5674_v60 = vld [vmem:[%s10714_s4 + $0x68] sm:$0xf0]  ;;  %v5832_v56 = vld [vmem:[%s10714_s4 + $0x108] sm:$0xf] }
 0x616   :  { %957 = vadd.xlane.f32.xlu2 %v956_v58  ;;  %10736 = vst [vmem:[#allocation2_spill] sm:$0xff] %v7732_v1  ;;  %1390 = vmatpush.bf16.msrb.mxu0 %v5769_v44  ;;  %v5720_v44 = vld [vmem:[%s10714_s4 + $0x38] sm:$0xf] }
 0x617   :  { %v5721_v49 = vor.u32 %v6696_v45, %v5720_v44  ;;  %v5728_v44 = vld [vmem:[%s10714_s4 + $0x40] sm:$0xf] }
 0x618   :  { %v6697_v45 = vld [vmem:[%s10714_s4 + $0x9c] sm:$0xf0] }
 0x61a   :  { %1391 = vmatpush.bf16.msrb.mxu0 %v5673_v59 }
 0x681   :  { %v955_v3 = vpop.xlane.xlu0 %954 }
 0x682   :  { %v966_v5 = vmul.f32 %v7732_v1, %v955_v3  ;;  %v5705_v3 = vor.u32 %v6694_v2, %v5704_v0  ;;  %v5706_v0 = vld [vmem:[%s10714_s4 + $0x88] sm:$0xf0]  ;;  %v6685_v2 = vld [vmem:[%s10714_s4 + $0x44] sm:$0xf] }
 0x684   :  { %v7735_v4 = vsub.f32 %v948_v54, %v966_v5  ;;  %1503 = vmatpush.bf16.msra.mxu2 %v5705_v3  ;;  %v5736_v3 = vld [vmem:[%s10714_s4 + $0x48] sm:$0xf] }
 0x686   :  { %v970_v6 = vmul.f32 %v7735_v4, %v7735_v4 }
 0x688   :  { %v972_v9 = vsel %vm202_vm8, %v970_v6, 0.0 }
 0x689   :  { %973 = vadd.xlane.f32.xlu1 %v972_v9  ;;  %v958_v8 = vpop.xlane.xlu2 %957 }
 0x68a   :  { %v967_v10 = vmul.f32 %v7732_v1, %v958_v8 }
 0x68c   :  { %v7741_v13 = vsub.f32 %v951_v57, %v967_v10  ;;  %v6678_v57 = vld [vmem:[%s10714_s4 + $0xc] sm:$0xf] }
 0x68d   :  { %v5677_v7 = vor.u32 %v6678_v57, %v5674_v60  ;;  %v6722_v57 = vld [vmem:[%s10714_s4 + $0x164] sm:$0xf0]  ;;  %v5696_v60 = vld [vmem:[%s10714_s4 + $0x20] sm:$0xf] }
 0x68e   :  { %v971_v12 = vmul.f32 %v7741_v13, %v7741_v13 }
 0x68f   :  { %1405 = vmatpush.bf16.msrb.mxu3 %v5677_v7  ;;  %v5833_v7 = vor.u32 %v6722_v57, %v5832_v56  ;;  %v5744_v56 = vld [vmem:[%s10714_s4 + $0x50] sm:$0xf] }
 0x690   :  { %v975_v14 = vsel %vm202_vm8, %v971_v12, 0.0  ;;  %v6699_v57 = vld [vmem:[%s10714_s4 + $0xac] sm:$0xf0] }
 0x691   :  { %976 = vadd.xlane.f32.xlu0 %v975_v14 }
 0x6fc   :  { %v974_v20 = vpop.xlane.xlu1 %973 }
 0x6fd   :  { %v978_v22 = vmul.f32 %v974_v20, %v7732_v1 }
 0x6ff   :  { %v980_v27 = vadd.f32 1e-12, %v978_v22  ;;  %v5776_v22 = vld [vmem:[%s10714_s4 + $0xd0] sm:$0xf] }
 0x701   :  { %6945 = vrsqrt.f32 %v980_v27  ;;  %vm988_vm15 = vweird.f32 %v980_v27 }
 0x704   :  { %v977_v39 = vpop.xlane.xlu0 %976 }
 0x705   :  { %v979_v43 = vmul.f32 %v977_v39, %v7732_v1  ;;  %v5817_v39 = vor.u32 %v6720_v31, %v5816_v30  ;;  %v5752_v30 = vld [vmem:[%s10714_s4 + $0x58] sm:$0xf] }
 0x706   :  { %v6700_v31 = vld [vmem:[%s10714_s4 + $0xb4] sm:$0xf0] }
 0x707   :  { %v6946_v53 = vpop.eup %6945  ;;  %v981_v54 = vadd.f32 1e-12, %v979_v43  ;;  %v5714_v43 = vld [vmem:[%s10714_s4 + $0x90] sm:$0xf0]  ;;  %v5753_v37 = vor.u32 %v6700_v31, %v5752_v30 }
 0x708   :  { %v983_v58 = vmul.f32 %v6946_v53, %v980_v27  ;;  %vm989_vm14 = vweird.f32 %v6946_v53  ;;  %v5717_v48 = vor.u32 %v6683_v42, %v5714_v43  ;;  %v5837_v43 = vor.u32 %v6710_v40, %v5834_v41  ;;  %v6762_v40 = vld [vmem:[%s10715_s6 + $0x124] sm:$0xf0] }
 0x709   :  { %6947 = vrsqrt.f32 %v981_v54  ;;  %vm990_vm0 = vmor %vm988_vm15, %vm989_vm14  ;;  %vm998_vm2 = vweird.f32 %v981_v54 }
 0x70a   :  { %v984_v11 = vmul.f32 %v6946_v53, %v983_v58  ;;  %v5793_v58 = vor.u32 %v6717_v51, %v5792_v50  ;;  %v5840_v50 = vld [vmem:[%s10714_s4 + $0x110] sm:$0xf] }
 0x70b   :  { %v6723_v51 = vld [vmem:[%s10714_s4 + $0x16c] sm:$0xf0] }
 0x70c   :  { %v985_v5 = vmul.f32 0.5, %v984_v11  ;;  %v5730_v11 = vld [vmem:[%s10714_s4 + $0xa0] sm:$0xf0] }
 0x70e   :  { %v986_v6 = vsub.f32 1.5, %v985_v5  ;;  %v6698_v5 = vld [vmem:[%s10714_s4 + $0xa4] sm:$0xf0] }
 0x70f   :  { %v6948_v9 = vpop.eup %6947 }
 0x710   :  { %v987_v8 = vmul.f32 %v6946_v53, %v986_v6  ;;  %v993_v10 = vmul.f32 %v6948_v9, %v981_v54  ;;  %vm999_vm1 = vweird.f32 %v6948_v9  ;;  %v6709_v54 = vld [vmem:[%s10714_s4 + $0x104] sm:$0xf]  ;;  %v5697_v6 = vor.u32 %v6693_v61, %v5696_v60 }
 0x711   :  { %vm1000_vm3 = vmor %vm998_vm2, %vm999_vm1  ;;  %v5829_v62 = vor.u32 %v6709_v54, %v5826_v55  ;;  %v5841_v54 = vor.u32 %v6723_v51, %v5840_v50  ;;  %v5745_v60 = vor.u32 %v6699_v57, %v5744_v56 }
 0x712   :  { %v994_v12 = vmul.f32 %v6948_v9, %v993_v10  ;;  %v991_v14 = vsel %vm990_vm0, %v6946_v53, %v987_v8  ;;  %v5802_v53 = vld [vmem:[%s10714_s4 + $0x148] sm:$0xf0]  ;;  %v5733_v8 = vor.u32 %v6685_v2, %v5730_v11  ;;  %v5737_v10 = vor.u32 %v6698_v5, %v5736_v3  ;;  %v6749_v2 = vld [vmem:[%s10715_s6 + $0xc4] sm:$0xf]  ;;  %v5880_v5 = vld [vmem:[%s10715_s6] sm:$0xf] }
 0x713   :  { %v1002_v17 = vmul.f32 %v991_v14, %v7735_v4  ;;  %v6715_v4 = vld [vmem:[%s10714_s4 + $0x12c] sm:$0xf0]  ;;  %v5805_v59 = vor.u32 %v6706_v52, %v5802_v53  ;;  %v6712_v52 = vld [vmem:[%s10714_s4 + $0x11c] sm:$0xf] }
 0x714   :  { %v995_v15 = vmul.f32 0.5, %v994_v12  ;;  %v5777_v34 = vor.u32 %v6715_v4, %v5776_v22  ;;  %v5808_v12 = vld [vmem:[%s10714_s4 + $0xf0] sm:$0xf]  ;;  %v5850_v53 = vld [vmem:[%s10714_s4 + $0x178] sm:$0xf0] }
 0x715   :  { %v1005_v20 = vmul.f32 %v6895_v16, %v1002_v17  ;;  %v6719_v14 = vld [vmem:[%s10714_s4 + $0x14c] sm:$0xf0]  ;;  %v5842_v17 = vld [vmem:[%s10714_s4 + $0x170] sm:$0xf0]  ;;  %v5853_v55 = vor.u32 %v6712_v52, %v5850_v53 }
 0x716   :  { %v996_v18 = vsub.f32 1.5, %v995_v15  ;;  %v6708_v15 = vld [vmem:[%s10714_s4 + $0xfc] sm:$0xf] }
 0x717   :  { %v7861_v26 = vadd.f32 %v6896_v29, %v1005_v20 }
 0x718   :  { %v997_v19 = vmul.f32 %v6948_v9, %v996_v18  ;;  %v5818_v18 = vld [vmem:[%s10714_s4 + $0x158] sm:$0xf0] }
 0x719   :  { %10737 = vst [vmem:[#allocation3_spill] sm:$0xff] %v7861_v26  ;;  %v5821_v20 = vor.u32 %v6708_v15, %v5818_v18 }
 0x71a   :  { %v1001_v24 = vsel %vm1000_vm3, %v6948_v9, %v997_v19  ;;  %v5709_v9 = vor.u32 %v6682_v63, %v5706_v0  ;;  %v5848_v19 = vld [vmem:[%s10714_s4 + $0x118] sm:$0xf]  ;;  %v8103_v0 = vld [vmem:[%s10716_s5] sm:$0xff] }
 0x71b   :  { %v1003_v32 = vmul.f32 %v1001_v24, %v7741_v13  ;;  %v6707_v13 = vld [vmem:[%s10714_s4 + $0xf4] sm:$0xf]  ;;  %v6724_v24 = vld [vmem:[%s10714_s4 + $0x174] sm:$0xf0]  ;;  %v1065_v3 = vperm.slane %v8103_v0, 0  ;;  %v1067_v53 = vperm.slane %v8103_v0, 2 }
 0x71c   :  { %v5813_v38 = vor.u32 %v6707_v13, %v5810_v28  ;;  %v5849_v4 = vor.u32 %v6724_v24, %v5848_v19  ;;  %v6687_v13 = vld [vmem:[%s10714_s4 + $0x54] sm:$0xf]  ;;  %v1071_v24 = vperm.slane %v8103_v0, 6 }
 0x71d   :  { %v1006_v21 = vmul.f32 %v6895_v16, %v1003_v32  ;;  %v6711_v16 = vld [vmem:[%s10714_s4 + $0x114] sm:$0xf]  ;;  %v5712_v32 = vld [vmem:[%s10714_s4 + $0x30] sm:$0xf] }
 0x71e   :  { %v5845_v22 = vor.u32 %v6711_v16, %v5842_v17  ;;  %v5746_v28 = vld [vmem:[%s10714_s4 + $0xb0] sm:$0xf0]  ;;  %v1066_v16 = vperm.slane %v8103_v0, 1  ;;  %v6725_v17 = vld [vmem:[%s10715_s6 + $0x4] sm:$0xf] }
 0x71f   :  { %v7863_v27 = vadd.f32 %v6896_v29, %v1006_v21  ;;  %v5809_v29 = vor.u32 %v6719_v14, %v5808_v12  ;;  %v6695_v21 = vld [vmem:[%s10714_s4 + $0x8c] sm:$0xf0]  ;;  %v5749_v36 = vor.u32 %v6687_v13, %v5746_v28 }
 0x721   :  { %10738 = vst [vmem:[#allocation4_spill] sm:$0xff] %v7863_v27  ;;  %v7876_v33 = vpack.c.bf16 %v7863_v27, %v7861_v26 }
 0x723   :  { %5854 = vmatmul.msk.bf16.vlgmr.msra.gmra.mxu0 %vm202_vm8, %v7876_v33  ;;  %5855 = vmatmul.msk.bf16.vlgmr.msra.gmra.mxu3 %vm202_vm8, %v7876_v33 }
 0x724   :  { %5859 = vmatmul.msk.bf16.vlgmr.msrb.gmra.mxu1 %vm202_vm8, %v7876_v33  ;;  %5860 = vmatmul.msk.bf16.vlgmr.msrb.gmra.mxu2 %vm202_vm8, %v7876_v33 }
 0x725   :  { %1418 = vmatpush.bf16.msra.mxu0 %v5777_v34  ;;  %1460 = vmatpush.bf16.msra.mxu3 %v5789_v35  ;;  %v5713_v34 = vor.u32 %v6695_v21, %v5712_v32  ;;  %v5725_v35 = vor.u32 %v6684_v23, %v5722_v25 }
 0x726   :  { %1544 = vmatpush.bf16.msrb.mxu1 %v5813_v38  ;;  %1558 = vmatpush.bf16.msrb.mxu2 %v5817_v39  ;;  %v5824_v38 = vld [vmem:[%s10714_s4 + $0x100] sm:$0xf] }
 0x727   :  { %v6721_v39 = vld [vmem:[%s10714_s4 + $0x15c] sm:$0xf0] }
 0x728   :  { %v5825_v42 = vor.u32 %v6721_v39, %v5824_v38  ;;  %v5984_v39 = vld [vmem:[%s10715_s6 + $0xc8] sm:$0xf] }
 0x729   :  { %1419 = vmatpush.bf16.msra.mxu0 %v5681_v46  ;;  %1461 = vmatpush.bf16.msra.mxu3 %v5693_v47  ;;  %v6686_v46 = vld [vmem:[%s10714_s4 + $0x4c] sm:$0xf]  ;;  %v5985_v50 = vor.u32 %v6762_v40, %v5984_v39 }
 0x72a   :  { %1545 = vmatpush.bf16.msrb.mxu1 %v5717_v48  ;;  %1559 = vmatpush.bf16.msrb.mxu2 %v5721_v49  ;;  %v5738_v47 = vld [vmem:[%s10714_s4 + $0xa8] sm:$0xf0]  ;;  %v5729_v48 = vor.u32 %v6697_v45, %v5728_v44 }
 0x72b   :  { %v5741_v49 = vor.u32 %v6686_v46, %v5738_v47 }
 0x733   :  { %5856 = vmatmul.msk.bf16.vlgmr.msrb.gmra.mxu0 %vm202_vm8, %v7876_v33  ;;  %5857 = vmatmul.msk.bf16.vlgmr.msrb.gmra.mxu3 %vm202_vm8, %v7876_v33 }
 0x734   :  { %5863 = vmatmul.msk.bf16.vlgmr.msra.gmra.mxu1 %vm202_vm8, %v7876_v33  ;;  %5864 = vmatmul.msk.bf16.vlgmr.msra.gmra.mxu2 %vm202_vm8, %v7876_v33 }
 0x735   :  { %1474 = vmatpush.bf16.msrb.mxu0 %v5793_v58  ;;  %1516 = vmatpush.bf16.msrb.mxu3 %v5805_v59  ;;  %v6688_v58 = vld [vmem:[%s10714_s4 + $0x5c] sm:$0xf] }
 0x736   :  { %1600 = vmatpush.bf16.msra.mxu1 %v5829_v62  ;;  %1614 = vmatpush.bf16.msra.mxu2 %v5833_v7  ;;  %v5754_v59 = vld [vmem:[%s10714_s4 + $0xb8] sm:$0xf0]  ;;  %v5976_v62 = vld [vmem:[%s10715_s6 + $0xc0] sm:$0xf] }
 0x737   :  { %v5757_v61 = vor.u32 %v6688_v58, %v5754_v59  ;;  %v6761_v7 = vld [vmem:[%s10715_s6 + $0x11c] sm:$0xf0] }
 0x738   :  { %v5977_v63 = vor.u32 %v6761_v7, %v5976_v62  ;;  %v1068_v62 = vperm.slane %v8103_v0, 3 }
 0x739   :  { %1475 = vmatpush.bf16.msrb.mxu0 %v5697_v6  ;;  %1517 = vmatpush.bf16.msrb.mxu3 %v5709_v9  ;;  %v6737_v6 = vld [vmem:[%s10715_s6 + $0x5c] sm:$0xf0]  ;;  %v1070_v9 = vperm.slane %v8103_v0, 5 }
 0x73a   :  { %1601 = vmatpush.bf16.msra.mxu1 %v5733_v8  ;;  %1615 = vmatpush.bf16.msra.mxu2 %v5737_v10  ;;  %v5881_v8 = vor.u32 %v6737_v6, %v5880_v5 }
 0x743   :  { %5858 = vmatmul.msk.bf16.vlgmr.msra.gmra.mxu0 %vm202_vm8, %v7876_v33  ;;  %5861 = vmatmul.msk.bf16.vlgmr.msra.gmra.mxu3 %vm202_vm8, %v7876_v33 }
 0x744   :  { %5867 = vmatmul.msk.bf16.vlgmr.msrb.gmra.mxu1 %vm202_vm8, %v7876_v33  ;;  %5868 = vmatmul.msk.bf16.vlgmr.msrb.gmra.mxu2 %vm202_vm8, %v7876_v33 }
 0x745   :  { %1530 = vmatpush.bf16.msra.mxu0 %v5809_v29  ;;  %1572 = vmatpush.bf16.msra.mxu3 %v5821_v20  ;;  %v5882_v20 = vld [vmem:[%s10715_s6 + $0x60] sm:$0xf0] }
 0x746   :  { %1656 = vmatpush.bf16.msrb.mxu1 %v5845_v22  ;;  %1670 = vmatpush.bf16.msrb.mxu2 %v5849_v4  ;;  %v5885_v22 = vor.u32 %v6725_v17, %v5882_v20 }
 0x749   :  { %1531 = vmatpush.bf16.msra.mxu0 %v5713_v34  ;;  %1573 = vmatpush.bf16.msra.mxu3 %v5725_v35 }
 0x74a   :  { %1657 = vmatpush.bf16.msrb.mxu1 %v5749_v36  ;;  %1671 = vmatpush.bf16.msrb.mxu2 %v5753_v37 }
 0x753   :  { %5862 = vmatmul.msk.bf16.vlgmr.msrb.gmra.mxu0 %vm202_vm8, %v7876_v33  ;;  %5865 = vmatmul.msk.bf16.vlgmr.msrb.gmra.mxu3 %vm202_vm8, %v7876_v33 }
 0x754   :  { %5871 = vmatmul.msk.bf16.vlgmr.msra.gmra.mxu1 %vm202_vm8, %v7876_v33  ;;  %5872 = vmatmul.msk.bf16.vlgmr.msra.gmra.mxu2 %vm202_vm8, %v7876_v33 }
 0x755   :  { %1586 = vmatpush.bf16.msrb.mxu0 %v5825_v42  ;;  %1628 = vmatpush.bf16.msrb.mxu3 %v5837_v43 }
 0x756   :  { %2471 = vmatpush.bf16.xpose.msra.mxu2 %v5985_v50 }
 0x759   :  { %1587 = vmatpush.bf16.msrb.mxu0 %v5729_v48  ;;  %1629 = vmatpush.bf16.msrb.mxu3 %v5741_v49  ;;  %v8136_v49 = vld [vmem:[%s10716_s5 + $0x8] sm:$0xff] }
 0x763   :  { %5866 = vmatmul.msk.bf16.vlgmr.msra.gmra.mxu0 %vm202_vm8, %v7876_v33  ;;  %5869 = vmatmul.msk.bf16.vlgmr.msra.gmra.mxu3 %vm202_vm8, %v7876_v33 }
 0x764   :  { %5875 = vmatmul.msk.bf16.vlgmr.msrb.gmra.mxu1 %vm202_vm8, %v7876_v33  ;;  %5876 = vmatmul.msk.bf16.vlgmr.msrb.gmra.mxu2 %vm202_vm8, %v7876_v33 }
 0x765   :  { %1642 = vmatpush.bf16.msra.mxu0 %v5841_v54  ;;  %1684 = vmatpush.bf16.msra.mxu3 %v5853_v55 }
 0x769   :  { %1643 = vmatpush.bf16.msra.mxu0 %v5745_v60  ;;  %1685 = vmatpush.bf16.msra.mxu3 %v5757_v61  ;;  %v1074_v61 = vperm.slane %v8136_v49, 1 }
 0x773   :  { %5870 = vmatmul.msk.bf16.vlgmr.msrb.gmra.mxu0 %vm202_vm8, %v7876_v33  ;;  %5873 = vmatmul.msk.bf16.vlgmr.msrb.gmra.mxu3 %vm202_vm8, %v7876_v33 }
 0x774   :  { %2443 = vmatpush.bf16.xpose.msrb.mxu0 %v5977_v63 }
 0x77c   :  { %2444 = vmatpush.bf16.xpose.msrb.mxu0 %v5881_v8 }
 0x783   :  { %5874 = vmatmul.msk.bf16.vlgmr.msra.gmra.mxu0 %vm202_vm8, %v7876_v33  ;;  %5877 = vmatmul.msk.bf16.vlgmr.msra.gmra.mxu3 %vm202_vm8, %v7876_v33  ;;  %v5978_v33 = vld [vmem:[%s10715_s6 + $0x120] sm:$0xf0] }
 0x784   :  { %v5981_v11 = vor.u32 %v6749_v2, %v5978_v33 }
 0x786   :  { %2457 = vmatpush.bf16.xpose.msra.mxu1 %v5981_v11 }
 0x78e   :  { %2458 = vmatpush.bf16.xpose.msra.mxu1 %v5885_v22 }
 0x7a0   :  { %v1365_v10 = vpop.f32.mrf.mxu0 }
 0x7a1   :  { %v1366_v12 = vadd.f32 %v1365_v10, %v1065_v3  ;;  %v1435_v14 = vpop.f32.mrf.mxu1 }
 0x7a2   :  { %v1436_v15 = vadd.f32 %v1435_v14, %v1070_v9 }
 0x7a3   :  { %v1740_v18 = vmul.f32 0.044715, %v1366_v12 }
 0x7a4   :  { %v1745_v19 = vmul.f32 0.044715, %v1436_v15  ;;  %v8141_v5 = vmul.f32 0.5, %v1436_v15 }
 0x7a5   :  { %v1788_v29 = vmul.f32 %v1740_v18, %v1366_v12  ;;  %v1069_v18 = vperm.slane %v8103_v0, 4 }
 0x7a6   :  { %v1793_v32 = vmul.f32 %v1745_v19, %v1436_v15  ;;  %v1379_v21 = vpop.f32.mrf.mxu3 }
 0x7a7   :  { %v1836_v4 = vmul.f32 %v1788_v29, %v1366_v12  ;;  %v1380_v23 = vadd.f32 %v1379_v21, %v1066_v16  ;;  %v1449_v25 = vpop.f32.mrf.mxu2 }
 0x7a8   :  { %v1450_v13 = vadd.f32 %v1449_v25, %v1071_v24  ;;  %v1367_v28 = vpop.f32.mrf.mxu0  ;;  %v1841_v31 = vmul.f32 %v1793_v32, %v1436_v15 }
 0x7a9   :  { %v1884_v30 = vadd.f32 %v1836_v4, %v1366_v12  ;;  %v1741_v34 = vmul.f32 0.044715, %v1380_v23  ;;  %v1368_v35 = vadd.f32 %v1367_v28, %v1065_v3  ;;  %v1437_v36 = vpop.f32.mrf.mxu1  ;;  %v1692_v3 = vmul.f32 0.5, %v1366_v12 }
 0x7aa   :  { %v1746_v37 = vmul.f32 0.044715, %v1450_v13  ;;  %v1438_v38 = vadd.f32 %v1437_v36, %v1070_v9  ;;  %v1889_v46 = vadd.f32 %v1841_v31, %v1436_v15  ;;  %v1075_v9 = vperm.slane %v8136_v49, 2 }
 0x7ab   :  { %v1932_v41 = vmul.f32 0.7978846, %v1884_v30  ;;  %v1789_v42 = vmul.f32 %v1741_v34, %v1380_v23  ;;  %v1764_v43 = vmul.f32 0.044715, %v1368_v35  ;;  %v8153_v32 = vmul.f32 0.5, %v1450_v13 }
 0x7ac   :  { %v1794_v44 = vmul.f32 %v1746_v37, %v1450_v13  ;;  %v1769_v45 = vmul.f32 0.044715, %v1438_v38  ;;  %v1937_v7 = vmul.f32 0.7978846, %v1889_v46  ;;  %v8155_v21 = vmul.f32 0.5, %v1368_v35 }
 0x7ad   :  { %v1837_v47 = vmul.f32 %v1789_v42, %v1380_v23  ;;  %v1812_v48 = vmul.f32 %v1764_v43, %v1368_v35  ;;  %6949 = vtanh.f32 %v1932_v41  ;;  %v8159_v28 = vmul.f32 0.5, %v1438_v38 }
 0x7ae   :  { %v1817_v51 = vmul.f32 %v1769_v45, %v1438_v38  ;;  %v1381_v52 = vpop.f32.mrf.mxu3  ;;  %v1842_v54 = vmul.f32 %v1794_v44, %v1450_v13  ;;  %6951 = vtanh.f32 %v1937_v7  ;;  %v1072_v44 = vperm.slane %v8103_v0, 7  ;;  %v6726_v0 = vld [vmem:[%s10715_s6 + $0xc] sm:$0xf] }
 0x7af   :  { %v1860_v55 = vmul.f32 %v1812_v48, %v1368_v35  ;;  %v1382_v56 = vadd.f32 %v1381_v52, %v1066_v16  ;;  %v1451_v57 = vpop.f32.mrf.mxu2  ;;  %v1885_v58 = vadd.f32 %v1837_v47, %v1380_v23  ;;  %v8149_v16 = vmul.f32 0.5, %v1380_v23 }
 0x7b0   :  { %v1452_v59 = vadd.f32 %v1451_v57, %v1071_v24  ;;  %v1393_v60 = vpop.f32.mrf.mxu0  ;;  %v1865_v2 = vmul.f32 %v1817_v51, %v1438_v38  ;;  %v1890_v8 = vadd.f32 %v1842_v54, %v1450_v13  ;;  %v1078_v24 = vperm.slane %v8136_v49, 5 }
 0x7b1   :  { %v1908_v63 = vadd.f32 %v1860_v55, %v1368_v35  ;;  %v1765_v33 = vmul.f32 0.044715, %v1382_v56  ;;  %v1491_v11 = vpop.f32.mrf.mxu1  ;;  %v8146_v14 = vadd.f32 %v1393_v60, %v1067_v53  ;;  %v1933_v17 = vmul.f32 0.7978846, %v1885_v58 }
 0x7b2   :  { %v1770_v6 = vmul.f32 0.044715, %v1452_v59  ;;  %v1913_v29 = vadd.f32 %v1865_v2, %v1438_v38  ;;  %v8157_v4 = vadd.f32 %v1491_v11, %v1074_v61  ;;  %v1938_v23 = vmul.f32 0.7978846, %v1890_v8 }
 0x7b3   :  { %v1813_v10 = vmul.f32 %v1765_v33, %v1382_v56  ;;  %v6950_v12 = vpop.eup %6949  ;;  %v1956_v15 = vmul.f32 0.7978846, %v1908_v63  ;;  %v1742_v20 = vmul.f32 0.044715, %v8146_v14  ;;  %6953 = vtanh.f32 %v1933_v17 }
 0x7b4   :  { %v1818_v19 = vmul.f32 %v1770_v6, %v1452_v59  ;;  %v2028_v36 = vadd.f32 1.0, %v6950_v12  ;;  %v1749_v37 = vmul.f32 0.044715, %v8157_v4  ;;  %v1961_v39 = vmul.f32 0.7978846, %v1913_v29  ;;  %v6952_v46 = vpop.eup %6951 }
 0x7b5   :  { %v1861_v22 = vmul.f32 %v1813_v10, %v1382_v56  ;;  %6955 = vtanh.f32 %v1956_v15  ;;  %v1790_v40 = vmul.f32 %v1742_v20, %v8146_v14  ;;  %v8169_v42 = vmul.f32 0.5, %v1382_v56 }
 0x7b6   :  { %v1407_v25 = vpop.f32.mrf.mxu3  ;;  %v1866_v30 = vmul.f32 %v1818_v19, %v1452_v59  ;;  %v1079_v45 = vperm.slane %v8136_v49, 6  ;;  %v8173_v47 = vmul.f32 0.5, %v1452_v59  ;;  %v1797_v50 = vmul.f32 %v1749_v37, %v8157_v4 }
 0x7b7   :  { %v1408_v31 = vadd.f32 %v1407_v25, %v1068_v62  ;;  %v1505_v34 = vpop.f32.mrf.mxu2  ;;  %v1909_v43 = vadd.f32 %v1861_v22, %v1382_v56  ;;  %6957 = vtanh.f32 %v1938_v23  ;;  %v8182_v56 = vmul.f32 0.5, %v8146_v14 }
 0x7b8   :  { %v8166_v13 = vadd.f32 %v1505_v34, %v1075_v9  ;;  %v1395_v35 = vpop.f32.mrf.mxu0  ;;  %v1914_v48 = vadd.f32 %v1866_v30, %v1452_v59  ;;  %6959 = vtanh.f32 %v1961_v39  ;;  %v1838_v57 = vmul.f32 %v1790_v40, %v8146_v14 }
 0x7b9   :  { %v1743_v38 = vmul.f32 0.044715, %v1408_v31  ;;  %v1493_v41 = vpop.f32.mrf.mxu1  ;;  %v1396_v54 = vadd.f32 %v1395_v35, %v1067_v53  ;;  %v8185_v58 = vmul.f32 %v2028_v36, %v1692_v3  ;;  %v6954_v59 = vpop.eup %6953  ;;  %v1957_v60 = vmul.f32 0.7978846, %v1909_v43 }
 0x7ba   :  { %v1750_v51 = vmul.f32 0.044715, %v8166_v13  ;;  %v8179_v55 = vadd.f32 %v1493_v41, %v1074_v61  ;;  %v8188_v7 = vmul.f32 0.5, %v8157_v4  ;;  %v8190_v33 = vadd.f32 1.0, %v6952_v46 }
 0x7bb   :  { %v1791_v52 = vmul.f32 %v1743_v38, %v1408_v31  ;;  %v1766_v63 = vmul.f32 0.044715, %v1396_v54  ;;  %v6956_v53 = vpop.eup %6955  ;;  %v1962_v61 = vmul.f32 0.7978846, %v1914_v48  ;;  %v1845_v11 = vmul.f32 %v1797_v50, %v8157_v4 }
 0x7bc   :  { %v1798_v6 = vmul.f32 %v1750_v51, %v8166_v13  ;;  %v1773_v8 = vmul.f32 0.044715, %v8179_v55  ;;  %v1886_v29 = vadd.f32 %v1838_v57, %v8146_v14  ;;  %v8202_v20 = vmul.f32 0.5, %v1408_v31 }
 0x7bd   :  { %v1839_v3 = vmul.f32 %v1791_v52, %v1408_v31  ;;  %v1814_v17 = vmul.f32 %v1766_v63, %v1396_v54  ;;  %v8209_v30 = vpop.eup %6957  ;;  %v8211_v34 = vadd.f32 1.0, %v6954_v59  ;;  %6961 = vtanh.f32 %v1957_v60 }
 0x7be   :  { %v1409_v2 = vpop.f32.mrf.mxu3  ;;  %v1821_v22 = vmul.f32 %v1773_v8, %v8179_v55  ;;  %v8213_v36 = vpop.eup %6959  ;;  %6963 = vtanh.f32 %v1962_v61  ;;  %v1893_v14 = vadd.f32 %v1845_v11, %v8157_v4  ;;  %v8217_v37 = vmul.f32 0.5, %v8166_v13 }
 0x7bf   :  { %v1507_v10 = vpop.f32.mrf.mxu2  ;;  %v1410_v19 = vadd.f32 %v1409_v2, %v1068_v62  ;;  %v1846_v35 = vmul.f32 %v1798_v6, %v8166_v13  ;;  %v1887_v39 = vadd.f32 %v1839_v3, %v1408_v31  ;;  %v1862_v40 = vmul.f32 %v1814_v17, %v1396_v54 }
 0x7c0   :  { %v8199_v12 = vadd.f32 %v1507_v10, %v1075_v9  ;;  %v1421_v15 = vpop.f32.mrf.mxu0  ;;  %v2052_v9 = vadd.f32 1.0, %v6956_v53  ;;  %v1934_v43 = vmul.f32 0.7978846, %v1886_v29  ;;  %v1869_v46 = vmul.f32 %v1821_v22, %v8179_v55 }
 0x7c1   :  { %v8207_v25 = vadd.f32 %v1421_v15, %v1069_v18  ;;  %v1547_v23 = vpop.f32.mrf.mxu1  ;;  %v1767_v62 = vmul.f32 0.044715, %v1410_v19  ;;  %v8227_v4 = vmul.f32 0.5, %v1396_v54  ;;  %v1941_v59 = vmul.f32 0.7978846, %v1893_v14 }
 0x7c2   :  { %v1774_v41 = vmul.f32 0.044715, %v8199_v12  ;;  %v8225_v50 = vadd.f32 %v1547_v23, %v1078_v24  ;;  %v2100_v31 = vmul.f32 %v2052_v9, %v8155_v21  ;;  %v1894_v60 = vadd.f32 %v1846_v35, %v8166_v13 }
 0x7c3   :  { %v1815_v38 = vmul.f32 %v1767_v62, %v1410_v19  ;;  %v1744_v48 = vmul.f32 0.044715, %v8207_v25  ;;  %v8233_v63 = vmul.f32 0.5, %v8179_v55  ;;  %v6962_v61 = vpop.eup %6961  ;;  %v1935_v11 = vmul.f32 0.7978846, %v1887_v39 }
 0x7c4   :  { %v1822_v52 = vmul.f32 %v1774_v41, %v8199_v12  ;;  %v1753_v2 = vmul.f32 0.044715, %v8225_v50  ;;  %v1910_v6 = vadd.f32 %v1862_v40, %v1396_v54  ;;  %v2124_v10 = vpack.c.bf16 %v2100_v31, %v8185_v58  ;;  %v8238_v17 = vpop.eup %6963 }
 0x7c5   :  { %v1863_v51 = vmul.f32 %v1815_v38, %v1410_v19  ;;  %v1792_v8 = vmul.f32 %v1744_v48, %v8207_v25  ;;  %6965 = vtanh.f32 %v1934_v43  ;;  %v1917_v21 = vadd.f32 %v1869_v46, %v8179_v55 }
 0x7c6   :  { %v1463_v57 = vpop.f32.mrf.mxu3  ;;  %v1870_v29 = vmul.f32 %v1822_v52, %v8199_v12  ;;  %v1801_v22 = vmul.f32 %v1753_v2, %v8225_v50  ;;  %2445 = vmatmul.bf16.vlgmr.msrb.gmra.mxu0 %v2124_v10  ;;  %6967 = vtanh.f32 %v1941_v59  ;;  %v1942_v55 = vmul.f32 0.7978846, %v1894_v60  ;;  %v5986_v52 = vld [vmem:[%s10715_s6 + $0x128] sm:$0xf0]  ;;  %v5994_v60 = vld [vmem:[%s10715_s6 + $0x130] sm:$0xf0] }
 0x7c7   :  { %v1561_v53 = vpop.f32.mrf.mxu2  ;;  %v1911_v13 = vadd.f32 %v1863_v51, %v1410_v19  ;;  %v8243_v15 = vadd.f32 %v1463_v57, %v1072_v44  ;;  %v8255_v23 = vmul.f32 0.5, %v1410_v19  ;;  %6969 = vtanh.f32 %v1935_v11  ;;  %v6750_v51 = vld [vmem:[%s10715_s6 + $0xcc] sm:$0xf] }
 0x7c8   :  { %v1423_v3 = vpop.f32.mrf.mxu0  ;;  %v8249_v54 = vadd.f32 %v1561_v53, %v1079_v45  ;;  %v1958_v14 = vmul.f32 0.7978846, %v1910_v6  ;;  %v1840_v35 = vmul.f32 %v1792_v8, %v8207_v25  ;;  %v1965_v40 = vmul.f32 0.7978846, %v1917_v21  ;;  %v5888_v6 = vld [vmem:[%s10715_s6 + $0x8] sm:$0xf] }
 0x7c9   :  { %v8253_v58 = vadd.f32 %v1423_v3, %v1069_v18  ;;  %v1747_v62 = vmul.f32 0.044715, %v8243_v15  ;;  %v1549_v9 = vpop.f32.mrf.mxu1  ;;  %v1959_v38 = vmul.f32 0.7978846, %v1911_v13  ;;  %v8261_v41 = vmul.f32 0.5, %v8199_v12 }
 0x7ca   :  { %v1754_v39 = vmul.f32 0.044715, %v8249_v54  ;;  %v8264_v18 = vmul.f32 0.5, %v8207_v25  ;;  %v1918_v19 = vadd.f32 %v1870_v29, %v8199_v12  ;;  %v1849_v43 = vmul.f32 %v1801_v22, %v8225_v50 }
 0x7cb   :  { %v1768_v46 = vmul.f32 0.044715, %v8253_v58  ;;  %v8271_v48 = vadd.f32 %v1549_v9, %v1078_v24  ;;  %v8279_v31 = vpop.eup %6965  ;;  %6971 = vtanh.f32 %v1942_v55  ;;  %v8282_v12 = vmul.f32 0.5, %v8225_v50  ;;  %v6751_v24 = vld [vmem:[%s10715_s6 + $0xd4] sm:$0xf] }
 0x7cc   :  { %v1795_v57 = vmul.f32 %v1747_v62, %v8243_v15  ;;  %v2053_v59 = vadd.f32 1.0, %v6962_v61  ;;  %6973 = vtanh.f32 %v1958_v14  ;;  %v1888_v2 = vadd.f32 %v1840_v35, %v8207_v25  ;;  %v6738_v61 = vld [vmem:[%s10715_s6 + $0x64] sm:$0xf0]  ;;  %v8300_v8 = vpop.eup %6967  ;;  %v8312_v14 = vld [vmem:[%s10716_s5 + $0x10] sm:$0xff] }
 0x7cd   :  { %v1802_v53 = vmul.f32 %v1754_v39, %v8249_v54  ;;  %v1777_v11 = vmul.f32 0.044715, %v8271_v48  ;;  %6975 = vtanh.f32 %v1965_v40  ;;  %v1816_v10 = vmul.f32 %v1768_v46, %v8253_v58  ;;  %v8306_v13 = vpop.eup %6969 }
 0x7ce   :  { %v2077_v25 = vmul.f32 %v8211_v34, %v8149_v16  ;;  %v2101_v3 = vmul.f32 %v2053_v59, %v8169_v42  ;;  %v1465_v21 = vpop.f32.mrf.mxu3  ;;  %6977 = vtanh.f32 %v1959_v38  ;;  %v1966_v29 = vmul.f32 0.7978846, %v1918_v19 }
 0x7cf   :  { %v1897_v22 = vadd.f32 %v1849_v43, %v8225_v50  ;;  %v5989_v55 = vor.u32 %v6750_v51, %v5986_v52  ;;  %v1563_v62 = vpop.f32.mrf.mxu2  ;;  %v1843_v35 = vmul.f32 %v1795_v57, %v8243_v15  ;;  %v5997_v34 = vor.u32 %v6751_v24, %v5994_v60 }
 0x7d0   :  { %v1477_v9 = vpop.f32.mrf.mxu0  ;;  %v2125_v16 = vpack.c.bf16 %v2101_v3, %v2077_v25  ;;  %v5889_v42 = vor.u32 %v6738_v61, %v5888_v6  ;;  %v1936_v39 = vmul.f32 0.7978846, %v1888_v2  ;;  %v1850_v40 = vmul.f32 %v1802_v53, %v8249_v54  ;;  %v6727_v2 = vld [vmem:[%s10715_s6 + $0x14] sm:$0xf] }
 0x7d1   :  { %v1825_v38 = vmul.f32 %v1777_v11, %v8271_v48  ;;  %2485 = vmatpush.bf16.xpose.msrb.mxu3 %v5989_v55  ;;  %v8319_v50 = vadd.f32 %v1465_v21, %v1072_v44  ;;  %v8321_v19 = vpop.eup %6971  ;;  %v1864_v43 = vmul.f32 %v1816_v10, %v8253_v58  ;;  %v8326_v46 = vadd.f32 %v1563_v62, %v1079_v45  ;;  %v1603_v57 = vpop.f32.mrf.mxu1  ;;  %v5890_v44 = vld [vmem:[%s10715_s6 + $0x68] sm:$0xf0]  ;;  %v5898_v25 = vld [vmem:[%s10715_s6 + $0x70] sm:$0xf0]  ;;  %v6763_v55 = vld [vmem:[%s10715_s6 + $0x12c] sm:$0xf0] }
 0x7d2   :  { %2459 = vmatmul.bf16.vlgmr.msra.gmra.mxu1 %v2125_v16  ;;  %2472 = vmatpush.bf16.xpose.msra.mxu2 %v5889_v42  ;;  %v10719_v51 = vperm.slane %v8136_v49, 0  ;;  %v10718_v52 = vperm.slane %v8312_v14, 1  ;;  %v6974_v59 = vpop.eup %6973  ;;  %6979 = vtanh.f32 %v1966_v29  ;;  %v1945_v24 = vmul.f32 0.7978846, %v1897_v22  ;;  %v5992_v22 = vld [vmem:[%s10715_s6 + $0xd0] sm:$0xf] }
 0x7d3   :  { %v8337_v60 = vmul.f32 0.5, %v8243_v15  ;;  %v8340_v45 = vmul.f32 0.5, %v8249_v54  ;;  %2513 = vmatpush.bf16.xpose.msrb.mxu1 %v5997_v34  ;;  %v8345_v53 = vpop.eup %6975  ;;  %v1891_v11 = vadd.f32 %v1843_v35, %v8243_v15  ;;  %v1771_v6 = vmul.f32 0.044715, %v8319_v50  ;;  %v6000_v34 = vld [vmem:[%s10715_s6 + $0xd8] sm:$0xf] }
 0x7d4   :  { %v1778_v61 = vmul.f32 0.044715, %v8326_v46  ;;  %v8352_v10 = vadd.f32 %v1477_v9, %v10719_v51  ;;  %v8357_v3 = vpop.eup %6977  ;;  %6981 = vtanh.f32 %v1936_v39  ;;  %v1873_v21 = vmul.f32 %v1825_v38, %v8271_v48  ;;  %v6764_v42 = vld [vmem:[%s10715_s6 + $0x134] sm:$0xf0] }
 0x7d5   :  { %10739 = vst [vmem:[#allocation5_spill] sm:$0xff] %v8340_v45  ;;  %v8362_v15 = vadd.f32 %v1603_v57, %v10718_v52  ;;  %v5893_v29 = vor.u32 %v6726_v0, %v5890_v44  ;;  %v1898_v62 = vadd.f32 %v1850_v40, %v8249_v54  ;;  %v1912_v9 = vadd.f32 %v1864_v43, %v8253_v58 }
 0x7d6   :  { %v1819_v35 = vmul.f32 %v1771_v6, %v8319_v50  ;;  %v1748_v16 = vmul.f32 0.044715, %v8352_v10  ;;  %6983 = vtanh.f32 %v1945_v24  ;;  %v8381_v39 = vmul.f32 0.5, %v8253_v58  ;;  %v1519_v44 = vpop.f32.mrf.mxu3 }
 0x7d7   :  { %v8384_v54 = vmul.f32 0.5, %v8271_v48  ;;  %v5901_v40 = vor.u32 %v6727_v2, %v5898_v25  ;;  %v1939_v38 = vmul.f32 0.7978846, %v1891_v11  ;;  %v1826_v43 = vmul.f32 %v1778_v61, %v8326_v46  ;;  %v1617_v61 = vpop.f32.mrf.mxu2 }
 0x7d8   :  { %v1757_v57 = vmul.f32 0.044715, %v8362_v15  ;;  %v2030_v0 = vadd.f32 1.0, %v8279_v31  ;;  %v8389_v6 = vpop.eup %6979  ;;  %v1921_v52 = vadd.f32 %v1873_v21, %v8271_v48  ;;  %v2054_v24 = vadd.f32 1.0, %v6974_v59  ;;  %v1479_v1 = vpop.f32.mrf.mxu0 }
 0x7d9   :  { %2486 = vmatpush.bf16.xpose.msrb.mxu3 %v5893_v29  ;;  %v5993_v58 = vor.u32 %v6763_v55, %v5992_v22  ;;  %v6001_v51 = vor.u32 %v6764_v42, %v6000_v34  ;;  %v1946_v27 = vmul.f32 0.7978846, %v1898_v62  ;;  %v1960_v26 = vmul.f32 0.7978846, %v1912_v9  ;;  %v1605_v34 = vpop.f32.mrf.mxu1 }
 0x7da   :  { %v1867_v2 = vmul.f32 %v1819_v35, %v8319_v50  ;;  %v1796_v11 = vmul.f32 %v1748_v16, %v8352_v10  ;;  %v8394_v25 = vpop.eup %6981  ;;  %v2078_v31 = vmul.f32 %v2030_v0, %v8182_v56  ;;  %v2102_v45 = vmul.f32 %v2054_v24, %v8227_v4 }
 0x7db   :  { %2514 = vmatpush.bf16.xpose.msrb.mxu1 %v5901_v40  ;;  %2499 = vmatpush.bf16.xpose.msra.mxu0 %v5993_v58  ;;  %v10725_v48 = vperm.slane %v8136_v49, 3  ;;  %v10724_v59 = vperm.slane %v8312_v14, 2  ;;  %6985 = vtanh.f32 %v1939_v38  ;;  %v1874_v21 = vmul.f32 %v1826_v43, %v8326_v46 }
 0x7dc   :  { %v1805_v29 = vmul.f32 %v1757_v57, %v8362_v15  ;;  %2527 = vmatpush.bf16.xpose.msrb.mxu2 %v6001_v51  ;;  %v10740_v22 = vperm.slane %v8136_v49, 0  ;;  %v8406_v62 = vpop.eup %6983  ;;  %v1969_v56 = vmul.f32 0.7978846, %v1921_v52  ;;  %v2126_v9 = vpack.c.bf16 %v2102_v45, %v2078_v31  ;;  %v6010_v31 = vld [vmem:[%s10715_s6 + $0x140] sm:$0xf0] }
 0x7dd   :  { %v8410_v4 = vadd.f32 %v1519_v44, %v10725_v48  ;;  %v8414_v35 = vadd.f32 %v1617_v61, %v10724_v59  ;;  %6987 = vtanh.f32 %v1946_v27  ;;  %v8417_v16 = vmul.f32 0.5, %v8319_v50  ;;  %v6002_v44 = vld [vmem:[%s10715_s6 + $0x138] sm:$0xf0] }
 0x7de   :  { %v8404_v55 = vadd.f32 %v1479_v1, %v10740_v22  ;;  %v1844_v51 = vmul.f32 %v1796_v11, %v8352_v10  ;;  %6989 = vtanh.f32 %v1960_v26  ;;  %v1915_v52 = vadd.f32 %v1867_v2, %v8319_v50  ;;  %2473 = vmatmul.bf16.vlgmr.msra.gmra.mxu2 %v2126_v9 }
 0x7df   :  { %v8423_v45 = vmul.f32 0.5, %v8326_v46  ;;  %v1751_v42 = vmul.f32 0.044715, %v8410_v4  ;;  %v1922_v40 = vadd.f32 %v1874_v21, %v8326_v46  ;;  %v8428_v27 = vmul.f32 0.5, %v8352_v10  ;;  %v6752_v46 = vld [vmem:[%s10715_s6 + $0xdc] sm:$0xf]  ;;  %v1521_v21 = vpop.f32.mrf.mxu3 }
 0x7e0   :  { %v1772_v1 = vmul.f32 0.044715, %v8404_v55  ;;  %v1853_v38 = vmul.f32 %v1805_v29, %v8362_v15  ;;  %v1758_v43 = vmul.f32 0.044715, %v8414_v35  ;;  %6991 = vtanh.f32 %v1969_v56 }
 0x7e1   :  { %v10741_v50 = vperm.slane %v8312_v14, 1  ;;  %v2031_v0 = vadd.f32 1.0, %v8306_v13  ;;  %v8444_v24 = vpop.eup %6985  ;;  %v1892_v58 = vadd.f32 %v1844_v51, %v8352_v10  ;;  %v1799_v2 = vmul.f32 %v1751_v42, %v8410_v4  ;;  %v6753_v13 = vld [vmem:[%s10715_s6 + $0xe4] sm:$0xf] }
 0x7e2   :  { %v1820_v26 = vmul.f32 %v1772_v1, %v8404_v55  ;;  %v2055_v11 = vadd.f32 1.0, %v8357_v3  ;;  %v2057_v61 = vadd.f32 1.0, %v8213_v36  ;;  %v1963_v29 = vmul.f32 0.7978846, %v1915_v52  ;;  %v6739_v52 = vld [vmem:[%s10715_s6 + $0x6c] sm:$0xf0] }
 0x7e3   :  { %v8435_v57 = vadd.f32 %v1605_v34, %v10741_v50  ;;  %v8457_v22 = vmul.f32 0.5, %v8362_v15  ;;  %v1806_v10 = vmul.f32 %v1758_v43, %v8414_v35  ;;  %v8461_v3 = vpop.eup %6987  ;;  %v1970_v36 = vmul.f32 0.7978846, %v1922_v40  ;;  %v5896_v34 = vld [vmem:[%s10715_s6 + $0x10] sm:$0xf]  ;;  %v1533_v50 = vpop.f32.mrf.mxu0 }
 0x7e4   :  { %v1901_v9 = vadd.f32 %v1853_v38, %v8362_v15  ;;  %v2079_v51 = vmul.f32 %v2031_v0, %v8202_v20  ;;  %v2103_v1 = vmul.f32 %v2055_v11, %v8255_v23  ;;  %v8472_v42 = vpop.eup %6989  ;;  %v1868_v43 = vmul.f32 %v1820_v26, %v8404_v55  ;;  %v5904_v23 = vld [vmem:[%s10715_s6 + $0x18] sm:$0xf] }
 0x7e5   :  { %10742 = vst [vmem:[#allocation6_spill] sm:$0xff] %v8457_v22  ;;  %v1781_v56 = vmul.f32 0.044715, %v8435_v57  ;;  %v2081_v40 = vmul.f32 %v8190_v33, %v8141_v5  ;;  %v2105_v15 = vmul.f32 %v2057_v61, %v8159_v28  ;;  %v6005_v20 = vor.u32 %v6752_v46, %v6002_v44  ;;  %v6740_v38 = vld [vmem:[%s10715_s6 + $0x74] sm:$0xf0]  ;;  %v1619_v44 = vpop.f32.mrf.mxu2 }
 0x7e6   :  { %v1940_v0 = vmul.f32 0.7978846, %v1892_v58  ;;  %v1847_v11 = vmul.f32 %v1799_v2, %v8410_v4  ;;  %v2127_v59 = vpack.c.bf16 %v2103_v1, %v2079_v51  ;;  %v6013_v26 = vor.u32 %v6753_v13, %v6010_v31  ;;  %v8485_v48 = vpop.eup %6991  ;;  %v6728_v13 = vld [vmem:[%s10715_s6 + $0x1c] sm:$0xf] }
 0x7e7   :  { %v1854_v5 = vmul.f32 %v1806_v10, %v8414_v35  ;;  %v1829_v28 = vmul.f32 %v1781_v56, %v8435_v57  ;;  %v2129_v33 = vpack.c.bf16 %v2105_v15, %v2081_v40  ;;  %2541 = vmatpush.bf16.xpose.msra.mxu3 %v6005_v20  ;;  %v5897_v46 = vor.u32 %v6739_v52, %v5896_v34  ;;  %v5906_v31 = vld [vmem:[%s10715_s6 + $0x78] sm:$0xf0]  ;;  %v6729_v56 = vld [vmem:[%s10715_s6 + $0x24] sm:$0xf] }
 0x7e8   :  { %6993 = vtanh.f32 %v1963_v29  ;;  %v1949_v61 = vmul.f32 0.7978846, %v1901_v9  ;;  %2487 = vmatmul.bf16.vlgmr.msrb.gmra.mxu3 %v2127_v59  ;;  %2569 = vmatpush.bf16.xpose.msra.mxu1 %v6013_v26  ;;  %v5905_v22 = vor.u32 %v6740_v38, %v5904_v23  ;;  %v10743_v58 = vperm.slane %v8136_v49, 3  ;;  %v5914_v9 = vld [vmem:[%s10715_s6 + $0x80] sm:$0xf0]  ;;  %v1575_v26 = vpop.f32.mrf.mxu3 }
 0x7e9   :  { %6995 = vtanh.f32 %v1970_v36  ;;  %v8500_v10 = vmul.f32 0.5, %v8404_v55  ;;  %v1916_v59 = vadd.f32 %v1868_v43, %v8404_v55  ;;  %2515 = vmatmul.bf16.vlgmr.msrb.gmra.mxu1 %v2129_v33  ;;  %2500 = vmatpush.bf16.xpose.msra.mxu0 %v5897_v46  ;;  %v10727_v29 = vperm.slane %v8136_v49, 4  ;;  %v6016_v46 = vld [vmem:[%s10715_s6 + $0xe8] sm:$0xf] }
 0x7ea   :  { %v8491_v2 = vadd.f32 %v1521_v21, %v10743_v58  ;;  %v1659_v21 = vpop.f32.mrf.mxu1  ;;  %v8511_v36 = vmul.f32 0.5, %v8410_v4  ;;  %v8514_v51 = vmul.f32 0.5, %v8414_v35  ;;  %2528 = vmatpush.bf16.xpose.msrb.mxu2 %v5905_v22  ;;  %v10745_v55 = vperm.slane %v8312_v14, 2 }
 0x7eb   :  { %v10726_v34 = vperm.slane %v8312_v14, 5  ;;  %v1895_v52 = vadd.f32 %v1847_v11, %v8410_v4  ;;  %v1902_v43 = vadd.f32 %v1854_v5, %v8414_v35  ;;  %v1877_v40 = vmul.f32 %v1829_v28, %v8435_v57  ;;  %v6008_v35 = vld [vmem:[%s10715_s6 + $0xe0] sm:$0xf] }
 0x7ec   :  { %10744 = vst [vmem:[#allocation7_spill] sm:$0xff] %v8514_v51  ;;  %v8518_v1 = vadd.f32 %v1619_v44, %v10745_v55  ;;  %v8526_v15 = vadd.f32 %v1533_v50, %v10727_v29  ;;  %v1775_v20 = vmul.f32 0.044715, %v8491_v2  ;;  %v5909_v23 = vor.u32 %v6728_v13, %v5906_v31  ;;  %v6765_v50 = vld [vmem:[%s10715_s6 + $0x13c] sm:$0xf0] }
 0x7ed   :  { %v8531_v22 = vadd.f32 %v1659_v21, %v10726_v34  ;;  %v5917_v38 = vor.u32 %v6729_v56, %v5914_v9  ;;  %6997 = vtanh.f32 %v1940_v0  ;;  %v1964_v33 = vmul.f32 0.7978846, %v1916_v59  ;;  %v6766_v59 = vld [vmem:[%s10715_s6 + $0x144] sm:$0xf0]  ;;  %v1535_v21 = vpop.f32.mrf.mxu0 }
 0x7ee   :  { %v1752_v4 = vmul.f32 0.044715, %v8526_v15  ;;  %v8540_v11 = vpop.eup %6993  ;;  %6999 = vtanh.f32 %v1949_v61  ;;  %v8543_v5 = vmul.f32 0.5, %v8435_v57  ;;  %v1782_v28 = vmul.f32 0.044715, %v8518_v1 }
 0x7ef   :  { %v2032_v0 = vadd.f32 1.0, %v8394_v25  ;;  %v8550_v44 = vpop.eup %6995  ;;  %v1943_v58 = vmul.f32 0.7978846, %v1895_v52  ;;  %v1925_v13 = vadd.f32 %v1877_v40, %v8435_v57  ;;  %2542 = vmatpush.bf16.xpose.msra.mxu3 %v5909_v23  ;;  %v2056_v31 = vadd.f32 1.0, %v8472_v42  ;;  %v5920_v51 = vld [vmem:[%s10715_s6 + $0x28] sm:$0xf] }
 0x7f0   :  { %v2034_v61 = vadd.f32 1.0, %v8209_v30  ;;  %v1950_v25 = vmul.f32 0.7978846, %v1902_v43  ;;  %v1823_v56 = vmul.f32 %v1775_v20, %v8491_v2  ;;  %v1761_v9 = vmul.f32 0.044715, %v8531_v22  ;;  %2570 = vmatpush.bf16.xpose.msra.mxu1 %v5917_v38 }
 0x7f1   :  { %v2058_v55 = vadd.f32 1.0, %v8238_v17  ;;  %7001 = vtanh.f32 %v1964_v33  ;;  %v1800_v57 = vmul.f32 %v1752_v4, %v8526_v15  ;;  %v2080_v42 = vmul.f32 %v2032_v0, %v8264_v18 }
 0x7f2   :  { %v2104_v30 = vmul.f32 %v2056_v31, %v8381_v39  ;;  %v1830_v52 = vmul.f32 %v1782_v28, %v8518_v1  ;;  %v2082_v40 = vmul.f32 %v2034_v61, %v8153_v32  ;;  %v6009_v23 = vor.u32 %v6765_v50, %v6008_v35  ;;  %v1661_v33 = vpop.f32.mrf.mxu1  ;;  %v1673_v28 = vpop.f32.mrf.mxu2 }
 0x7f3   :  { %v2106_v43 = vmul.f32 %v2058_v55, %v8173_v47  ;;  %v8567_v20 = vpop.eup %6997  ;;  %7003 = vtanh.f32 %v1943_v58  ;;  %v1973_v38 = vmul.f32 0.7978846, %v1925_v13  ;;  %v6017_v17 = vor.u32 %v6766_v59, %v6016_v46  ;;  %v1577_v61 = vpop.f32.mrf.mxu3 }
 0x7f4   :  { %v2128_v34 = vpack.c.bf16 %v2104_v30, %v2080_v42  ;;  %v8569_v29 = vpop.eup %6999  ;;  %v1871_v18 = vmul.f32 %v1823_v56, %v8491_v2  ;;  %v1809_v39 = vmul.f32 %v1761_v9, %v8531_v22  ;;  %2555 = vmatpush.bf16.xpose.msrb.mxu0 %v6009_v23  ;;  %v10729_v32 = vperm.slane %v8136_v49, 7  ;;  %v6754_v42 = vld [vmem:[%s10715_s6 + $0xec] sm:$0xf] }
 0x7f5   :  { %v2130_v4 = vpack.c.bf16 %v2106_v43, %v2082_v40  ;;  %7005 = vtanh.f32 %v1950_v25  ;;  %v1848_v47 = vmul.f32 %v1800_v57, %v8526_v15  ;;  %2583 = vmatpush.bf16.xpose.msra.mxu2 %v6017_v17  ;;  %v10728_v35 = vperm.slane %v8312_v14, 6  ;;  %v6018_v23 = vld [vmem:[%s10715_s6 + $0x148] sm:$0xf0] }
 0x7f6   :  { %2501 = vmatmul.bf16.vlgmr.msra.gmra.mxu0 %v2128_v34  ;;  %v10746_v50 = vperm.slane %v8136_v49, 4  ;;  %v8581_v46 = vmul.f32 0.5, %v8491_v2  ;;  %v1878_v58 = vmul.f32 %v1830_v52, %v8518_v1  ;;  %v8586_v13 = vadd.f32 %v1575_v26, %v10729_v32 }
 0x7f7   :  { %2529 = vmatmul.bf16.vlgmr.msrb.gmra.mxu2 %v2130_v4  ;;  %v10747_v31 = vperm.slane %v8312_v14, 5  ;;  %v8592_v59 = vpop.eup %7001  ;;  %7007 = vtanh.f32 %v1973_v38  ;;  %v8599_v25 = vadd.f32 %v1673_v28, %v10728_v35  ;;  %v1919_v26 = vadd.f32 %v1871_v18, %v8491_v2  ;;  %v8618_v38 = vpop.f32.mrf.mxu0  ;;  %v6026_v4 = vld [vmem:[%s10715_s6 + $0x150] sm:$0xf0] }
 0x7f8   :  { %v8578_v0 = vadd.f32 %v1535_v21, %v10746_v50  ;;  %v8595_v21 = vmul.f32 0.5, %v8518_v1  ;;  %v1857_v9 = vmul.f32 %v1809_v39, %v8531_v22  ;;  %v1755_v55 = vmul.f32 0.044715, %v8586_v13  ;;  %v6755_v39 = vld [vmem:[%s10715_s6 + $0xf4] sm:$0xf] }
 0x7f9   :  { %v8590_v34 = vadd.f32 %v1661_v33, %v10747_v31  ;;  %v2035_v57 = vadd.f32 1.0, %v8444_v24  ;;  %v8609_v30 = vpop.eup %7003  ;;  %v1896_v52 = vadd.f32 %v1848_v47, %v8526_v15  ;;  %v1762_v40 = vmul.f32 0.044715, %v8599_v25 }
 0x7fa   :  { %v1776_v56 = vmul.f32 0.044715, %v8578_v0  ;;  %v1926_v24 = vadd.f32 %v1878_v58, %v8518_v1  ;;  %v1803_v17 = vmul.f32 %v1755_v55, %v8586_v13  ;;  %v2059_v33 = vadd.f32 1.0, %v8540_v11  ;;  %v6741_v58 = vld [vmem:[%s10715_s6 + $0x7c] sm:$0xf0] }
 0x7fb   :  { %v1785_v2 = vmul.f32 0.044715, %v8590_v34  ;;  %v2037_v18 = vadd.f32 1.0, %v8300_v8  ;;  %v8630_v28 = vpop.eup %7005  ;;  %v1810_v47 = vmul.f32 %v1762_v40, %v8599_v25  ;;  %v2061_v11 = vadd.f32 1.0, %v8345_v53  ;;  %v5912_v8 = vld [vmem:[%s10715_s6 + $0x20] sm:$0xf] }
 0x7fc   :  { %v1824_v43 = vmul.f32 %v1776_v56, %v8578_v0  ;;  %v1967_v31 = vmul.f32 0.7978846, %v1919_v26  ;;  %v2083_v56 = vmul.f32 %v2035_v57, %v8337_v60  ;;  %v2107_v55 = vmul.f32 %v2059_v33, %v8417_v16  ;;  %v6742_v60 = vld [vmem:[%s10715_s6 + $0x84] sm:$0xf0] }
 0x7fd   :  { %v1833_v50 = vmul.f32 %v1785_v2, %v8590_v34  ;;  %v6021_v40 = vor.u32 %v6754_v42, %v6018_v23  ;;  %v8644_v35 = vpop.eup %7007  ;;  %v1905_v2 = vadd.f32 %v1857_v9, %v8531_v22  ;;  %v1851_v53 = vmul.f32 %v1803_v17, %v8586_v13 }
 0x7fe   :  { %v1872_v1 = vmul.f32 %v1824_v43, %v8578_v0  ;;  %v1944_v43 = vmul.f32 0.7978846, %v1896_v52  ;;  %v2109_v32 = vmul.f32 %v2061_v11, %v8233_v63  ;;  %v2131_v26 = vpack.c.bf16 %v2107_v55, %v2083_v56  ;;  %v1675_v52 = vpop.f32.mrf.mxu2 }
 0x7ff   :  { %v2085_v16 = vmul.f32 %v2037_v18, %v8188_v7  ;;  %2597 = vmatpush.bf16.xpose.msrb.mxu3 %v6021_v40  ;;  %v6029_v57 = vor.u32 %v6755_v39, %v6026_v4  ;;  %v5913_v42 = vor.u32 %v6741_v58, %v5912_v8  ;;  %v8657_v9 = vmul.f32 0.5, %v8526_v15  ;;  %v6730_v15 = vld [vmem:[%s10715_s6 + $0x2c] sm:$0xf]  ;;  %v6731_v4 = vld [vmem:[%s10715_s6 + $0x34] sm:$0xf] }
 0x800   :  { %v1858_v63 = vmul.f32 %v1810_v47, %v8599_v25  ;;  %v1920_v23 = vadd.f32 %v1872_v1, %v8578_v0  ;;  %v1881_v17 = vmul.f32 %v1833_v50, %v8590_v34  ;;  %7009 = vtanh.f32 %v1967_v31  ;;  %2543 = vmatmul.bf16.vlgmr.msra.gmra.mxu3 %v2131_v26  ;;  %v5922_v39 = vld [vmem:[%s10715_s6 + $0x88] sm:$0xf0]  ;;  %v1631_v47 = vpop.f32.mrf.mxu3  ;;  %v5930_v1 = vld [vmem:[%s10715_s6 + $0x90] sm:$0xf0] }
 0x801   :  { %v2133_v33 = vpack.c.bf16 %v2109_v32, %v2085_v16  ;;  %2625 = vmatpush.bf16.xpose.msrb.mxu1 %v6029_v57  ;;  %v5921_v11 = vor.u32 %v6742_v60, %v5920_v51  ;;  %v10748_v7 = vperm.slane %v8136_v49, 7  ;;  %v8675_v32 = vmul.f32 0.7978846, %v1926_v24  ;;  %2556 = vmatpush.bf16.xpose.msrb.mxu0 %v5913_v42  ;;  %v6032_v16 = vld [vmem:[%s10715_s6 + $0xf8] sm:$0xf] }
 0x802   :  { %7011 = vtanh.f32 %v1944_v43  ;;  %v8677_v51 = vmul.f32 0.7978846, %v1905_v2  ;;  %v10749_v49 = vperm.slane %v8312_v14, 6  ;;  %v1899_v50 = vadd.f32 %v1851_v53, %v8586_v13  ;;  %v6024_v43 = vld [vmem:[%s10715_s6 + $0xf0] sm:$0xf]  ;;  %v1591_v2 = vpop.f32.mrf.mxu0 }
 0x803   :  { %v8664_v18 = vadd.f32 %v1577_v61, %v10748_v7  ;;  %v8688_v8 = vmul.f32 0.5, %v8578_v0  ;;  %2571 = vmatmul.bf16.vlgmr.msra.gmra.mxu1 %v2133_v33  ;;  %2584 = vmatpush.bf16.xpose.msra.mxu2 %v5921_v11  ;;  %v1081_v58 = vperm.slane %v8312_v14, 0  ;;  %v8693_v31 = vmul.f32 0.5, %v8586_v13  ;;  %v6767_v13 = vld [vmem:[%s10715_s6 + $0x14c] sm:$0xf0] }
 0x804   :  { %v8681_v61 = vadd.f32 %v1675_v52, %v10749_v49  ;;  %v1906_v56 = vadd.f32 %v1858_v63, %v8599_v25  ;;  %v1968_v55 = vmul.f32 0.7978846, %v1920_v23  ;;  %v5925_v40 = vor.u32 %v6730_v15, %v5922_v39  ;;  %v6768_v57 = vld [vmem:[%s10715_s6 + $0x154] sm:$0xf0] }
 0x805   :  { %v1779_v24 = vmul.f32 0.044715, %v8664_v18  ;;  %v1929_v0 = vadd.f32 %v1881_v17, %v8590_v34  ;;  %v8702_v60 = vadd.f32 %v8618_v38, %v1081_v58  ;;  %v5933_v26 = vor.u32 %v6731_v4, %v5930_v1 }
 0x806   :  { %v1786_v42 = vmul.f32 0.044715, %v8681_v61  ;;  %v2036_v52 = vadd.f32 1.0, %v8567_v20  ;;  %v2060_v38 = vadd.f32 1.0, %v8592_v59  ;;  %v2038_v63 = vadd.f32 1.0, %v8321_v19  ;;  %v7010_v23 = vpop.eup %7009 }
 0x807   :  { %v1827_v53 = vmul.f32 %v1779_v24, %v8664_v18  ;;  %v1947_v17 = vmul.f32 0.7978846, %v1899_v50  ;;  %v1756_v11 = vmul.f32 0.044715, %v8702_v60  ;;  %2598 = vmatpush.bf16.xpose.msrb.mxu3 %v5925_v40  ;;  %v2062_v7 = vadd.f32 1.0, %v8389_v6 }
 0x808   :  { %v8720_v15 = vpop.eup %7011  ;;  %v8722_v39 = vmul.f32 0.7978846, %v1906_v56  ;;  %v2084_v4 = vmul.f32 %v2036_v52, %v8428_v27  ;;  %v2108_v20 = vmul.f32 %v2060_v38, %v8500_v10  ;;  %v2086_v59 = vmul.f32 %v2038_v63, %v8217_v37  ;;  %v1633_v52 = vpop.f32.mrf.mxu3 }
 0x809   :  { %v1875_v33 = vmul.f32 %v1827_v53, %v8664_v18  ;;  %v1804_v49 = vmul.f32 %v1756_v11, %v8702_v60  ;;  %2626 = vmatpush.bf16.xpose.msrb.mxu1 %v5933_v26  ;;  %v2110_v1 = vmul.f32 %v2062_v7, %v8261_v41  ;;  %v6025_v50 = vor.u32 %v6767_v13, %v6024_v43  ;;  %v6756_v26 = vld [vmem:[%s10715_s6 + $0xfc] sm:$0xf]  ;;  %v5928_v11 = vld [vmem:[%s10715_s6 + $0x30] sm:$0xf] }
 0x80a   :  { %v1834_v6 = vmul.f32 %v1786_v42, %v8681_v61  ;;  %v2132_v24 = vpack.c.bf16 %v2108_v20, %v2084_v4  ;;  %v6033_v40 = vor.u32 %v6768_v57, %v6032_v16  ;;  %v1084_v56 = vperm.slane %v8312_v14, 3  ;;  %v6034_v16 = vld [vmem:[%s10715_s6 + $0x158] sm:$0xf0]  ;;  %v1645_v63 = vpop.f32.mrf.mxu0 }
 0x80b   :  { %v1923_v19 = vadd.f32 %v1875_v33, %v8664_v18  ;;  %v1852_v27 = vmul.f32 %v1804_v49, %v8702_v60  ;;  %v2134_v10 = vpack.c.bf16 %v2110_v1, %v2086_v59  ;;  %2611 = vmatpush.bf16.xpose.msra.mxu0 %v6025_v50  ;;  %v8733_v37 = vadd.f32 %v1591_v2, %v1081_v58  ;;  %v6757_v58 = vld [vmem:[%s10715_s6 + $0x104] sm:$0xf] }
 0x80c   :  { %7013 = vtanh.f32 %v1968_v55  ;;  %2557 = vmatmul.bf16.vlgmr.msrb.gmra.mxu0 %v2132_v24  ;;  %2639 = vmatpush.bf16.xpose.msrb.mxu2 %v6033_v40  ;;  %v8738_v41 = vadd.f32 %v1631_v47, %v1084_v56  ;;  %v2039_v43 = vadd.f32 1.0, %v8609_v30  ;;  %v2063_v13 = vadd.f32 1.0, %v7010_v23  ;;  %v6042_v30 = vld [vmem:[%s10715_s6 + $0x160] sm:$0xf0] }
 0x80d   :  { %v1971_v53 = vmul.f32 0.7978846, %v1923_v19  ;;  %7015 = vtanh.f32 %v1947_v17  ;;  %v8747_v2 = vmul.f32 0.7978846, %v1929_v0  ;;  %v1900_v55 = vadd.f32 %v1852_v27, %v8702_v60  ;;  %2585 = vmatmul.bf16.vlgmr.msra.gmra.mxu2 %v2134_v10  ;;  %v5938_v27 = vld [vmem:[%s10715_s6 + $0x98] sm:$0xf0] }
 0x80e   :  { %v1780_v47 = vmul.f32 0.044715, %v8733_v37  ;;  %v8755_v57 = vmul.f32 0.5, %v8664_v18  ;;  %v1882_v42 = vmul.f32 %v1834_v6, %v8681_v61  ;;  %v1759_v38 = vmul.f32 0.044715, %v8738_v41 }
 0x80f   :  { %7017 = vtanh.f32 %v1971_v53  ;;  %v2087_v23 = vmul.f32 %v2039_v43, %v8511_v36  ;;  %v2111_v17 = vmul.f32 %v2063_v13, %v8581_v46  ;;  %v2041_v33 = vadd.f32 1.0, %v8406_v62  ;;  %v6743_v18 = vld [vmem:[%s10715_s6 + $0x8c] sm:$0xf0]  ;;  %v5936_v36 = vld [vmem:[%s10715_s6 + $0x38] sm:$0xf] }
 0x810   :  { %v1828_v0 = vmul.f32 %v1780_v47, %v8733_v37  ;;  %v1807_v7 = vmul.f32 %v1759_v38, %v8738_v41  ;;  %v2065_v4 = vadd.f32 1.0, %v8485_v48  ;;  %v6037_v20 = vor.u32 %v6756_v26, %v6034_v16  ;;  %v6744_v62 = vld [vmem:[%s10715_s6 + $0x94] sm:$0xf0]  ;;  %v6732_v53 = vld [vmem:[%s10715_s6 + $0x3c] sm:$0xf] }
 0x811   :  { %v6045_v59 = vor.u32 %v6757_v58, %v6042_v30  ;;  %v1948_v46 = vmul.f32 0.7978846, %v1900_v55  ;;  %v2135_v49 = vpack.c.bf16 %v2111_v17, %v2087_v23  ;;  %v2089_v1 = vmul.f32 %v2041_v33, %v8282_v12  ;;  %v6733_v13 = vld [vmem:[%s10715_s6 + $0x44] sm:$0xf]  ;;  %v6048_v38 = vld [vmem:[%s10715_s6 + $0x108] sm:$0xf]  ;;  %v1687_v23 = vpop.f32.mrf.mxu3 }
 0x812   :  { %v1876_v19 = vmul.f32 %v1828_v0, %v8733_v37  ;;  %v7014_v50 = vpop.eup %7013  ;;  %v1855_v6 = vmul.f32 %v1807_v7, %v8738_v41  ;;  %v2113_v48 = vmul.f32 %v2065_v4, %v8384_v54  ;;  %2653 = vmatpush.bf16.xpose.msra.mxu3 %v6037_v20  ;;  %v5929_v24 = vor.u32 %v6743_v18, %v5928_v11  ;;  %v5946_v16 = vld [vmem:[%s10715_s6 + $0xa0] sm:$0xf0]  ;;  %v6770_v7 = vld [vmem:[%s10715_s6 + $0x164] sm:$0xf0] }
 0x813   :  { %2681 = vmatpush.bf16.xpose.msra.mxu1 %v6045_v59  ;;  %v1085_v40 = vperm.slane %v8312_v14, 4  ;;  %v7016_v10 = vpop.eup %7015  ;;  %v8789_v12 = vmul.f32 0.5, %v8702_v60  ;;  %2599 = vmatmul.bf16.vlgmr.msrb.gmra.mxu3 %v2135_v49  ;;  %v5937_v54 = vor.u32 %v6744_v62, %v5936_v36  ;;  %v8792_v43 = vadd.f32 %v1633_v52, %v1084_v56  ;;  %v6040_v56 = vld [vmem:[%s10715_s6 + $0x100] sm:$0xf] }
 0x814   :  { %v1924_v26 = vadd.f32 %v1876_v19, %v8733_v37  ;;  %v1930_v55 = vadd.f32 %v1882_v42, %v8681_v61  ;;  %v1903_v60 = vadd.f32 %v1855_v6, %v8738_v41  ;;  %v2137_v47 = vpack.c.bf16 %v2113_v48, %v2089_v1  ;;  %2612 = vmatpush.bf16.xpose.msra.mxu0 %v5929_v24  ;;  %v6769_v52 = vld [vmem:[%s10715_s6 + $0x15c] sm:$0xf0]  ;;  %v1647_v19 = vpop.f32.mrf.mxu0  ;;  %v10750_v1 = vld [vmem:[#allocation5_spill] sm:$0xff] }
 0x815   :  { %v7018_v58 = vpop.eup %7017  ;;  %v8802_v30 = vadd.f32 %v1645_v63, %v1085_v40  ;;  %7019 = vtanh.f32 %v1948_v46  ;;  %2640 = vmatpush.bf16.xpose.msrb.mxu2 %v5937_v54  ;;  %v1783_v0 = vmul.f32 0.044715, %v8792_v43  ;;  %v2040_v63 = vadd.f32 1.0, %v8720_v15 }
 0x816   :  { %v1972_v42 = vmul.f32 0.7978846, %v1924_v26  ;;  %2627 = vmatmul.bf16.vlgmr.msrb.gmra.mxu1 %v2137_v47  ;;  %v5941_v33 = vor.u32 %v6732_v53, %v5938_v27  ;;  %v5949_v11 = vor.u32 %v6733_v13, %v5946_v16  ;;  %v2064_v18 = vadd.f32 1.0, %v7014_v50  ;;  %v6758_v13 = vld [vmem:[%s10715_s6 + $0x10c] sm:$0xf] }
 0x817   :  { %v1760_v17 = vmul.f32 0.044715, %v8802_v30  ;;  %v1951_v4 = vmul.f32 0.7978846, %v1903_v60  ;;  %v1831_v20 = vmul.f32 %v1783_v0, %v8792_v43  ;;  %v2042_v59 = vadd.f32 1.0, %v8461_v3 }
 0x818   :  { %7021 = vtanh.f32 %v1972_v42  ;;  %v2088_v15 = vmul.f32 %v2040_v63, %v8657_v9  ;;  %v2112_v62 = vmul.f32 %v2064_v18, %v8688_v8  ;;  %v2066_v46 = vadd.f32 1.0, %v8550_v44  ;;  %v6050_v16 = vld [vmem:[%s10715_s6 + $0x168] sm:$0xf0]  ;;  %v6745_v63 = vld [vmem:[%s10715_s6 + $0x9c] sm:$0xf0] }
 0x819   :  { %v1808_v36 = vmul.f32 %v1760_v17, %v8802_v30  ;;  %v1879_v49 = vmul.f32 %v1831_v20, %v8792_v43  ;;  %v2090_v50 = vmul.f32 %v2042_v59, %v10750_v1  ;;  %v6041_v6 = vor.u32 %v6769_v52, %v6040_v56  ;;  %v5952_v17 = vld [vmem:[%s10715_s6 + $0x48] sm:$0xf]  ;;  %v6734_v20 = vld [vmem:[%s10715_s6 + $0x4c] sm:$0xf]  ;;  %v6056_v1 = vld [vmem:[%s10715_s6 + $0x110] sm:$0xf] }
 0x81a   :  { %v6049_v48 = vor.u32 %v6770_v7, %v6048_v38  ;;  %2654 = vmatpush.bf16.xpose.msra.mxu3 %v5941_v33  ;;  %v2136_v3 = vpack.c.bf16 %v2112_v62, %v2088_v15  ;;  %v2114_v53 = vmul.f32 %v2066_v46, %v8423_v45  ;;  %v1088_v9 = vperm.slane %v8312_v14, 7  ;;  %v5954_v59 = vld [vmem:[%s10715_s6 + $0xa8] sm:$0xf0]  ;;  %v10751_v15 = vld [vmem:[#allocation6_spill] sm:$0xff] }
 0x81b   :  { %v1856_v24 = vmul.f32 %v1808_v36, %v8802_v30  ;;  %2682 = vmatpush.bf16.xpose.msra.mxu1 %v5949_v11  ;;  %v7020_v27 = vpop.eup %7019  ;;  %v1927_v8 = vadd.f32 %v1879_v49, %v8792_v43  ;;  %v8831_v44 = vadd.f32 %v1647_v19, %v1085_v40  ;;  %v2043_v26 = vadd.f32 1.0, %v7016_v10  ;;  %v6759_v40 = vld [vmem:[%s10715_s6 + $0x114] sm:$0xf] }
 0x81c   :  { %2667 = vmatpush.bf16.xpose.msrb.mxu0 %v6041_v6  ;;  %v2067_v54 = vadd.f32 1.0, %v7018_v58  ;;  %7023 = vtanh.f32 %v8675_v32  ;;  %v2138_v14 = vpack.c.bf16 %v2114_v53, %v2090_v50  ;;  %v8840_v45 = vadd.f32 %v1687_v23, %v1088_v9  ;;  %v6058_v10 = vld [vmem:[%s10715_s6 + $0x170] sm:$0xf0]  ;;  %v5944_v58 = vld [vmem:[%s10715_s6 + $0x40] sm:$0xf] }
 0x81d   :  { %2695 = vmatpush.bf16.xpose.msra.mxu2 %v6049_v48  ;;  %2613 = vmatmul.bf16.vlgmr.msra.gmra.mxu0 %v2136_v3  ;;  %7025 = vtanh.f32 %v8677_v51  ;;  %v8852_v32 = vmul.f32 0.7978846, %v1930_v55  ;;  %v1975_v47 = vmul.f32 0.7978846, %v1927_v8  ;;  %v1784_v56 = vmul.f32 0.044715, %v8831_v44 }
 0x81e   :  { %v7022_v60 = vpop.eup %7021  ;;  %2641 = vmatmul.bf16.vlgmr.msrb.gmra.mxu2 %v2138_v14  ;;  %v1763_v52 = vmul.f32 0.044715, %v8840_v45  ;;  %v2091_v38 = vmul.f32 %v2043_v26, %v8693_v31  ;;  %v2115_v42 = vmul.f32 %v2067_v54, %v8755_v57  ;;  %v2045_v0 = vadd.f32 1.0, %v8569_v29  ;;  %v6746_v31 = vld [vmem:[%s10715_s6 + $0xa4] sm:$0xf0]  ;;  %v1689_v29 = vpop.f32.mrf.mxu3 }
 0x81f   :  { %7027 = vtanh.f32 %v1951_v4  ;;  %v1904_v51 = vadd.f32 %v1856_v24, %v8802_v30  ;;  %v1832_v55 = vmul.f32 %v1784_v56, %v8831_v44  ;;  %v2069_v23 = vadd.f32 1.0, %v8644_v35  ;;  %v5962_v49 = vld [vmem:[%s10715_s6 + $0xb0] sm:$0xf0]  ;;  %v6064_v53 = vld [vmem:[%s10715_s6 + $0x118] sm:$0xf] }
 0x820   :  { %7029 = vtanh.f32 %v1975_v47  ;;  %v1811_v57 = vmul.f32 %v1763_v52, %v8840_v45  ;;  %v2139_v33 = vpack.c.bf16 %v2115_v42, %v2091_v38  ;;  %v6053_v11 = vor.u32 %v6758_v13, %v6050_v16 }
 0x821   :  { %v1880_v18 = vmul.f32 %v1832_v55, %v8831_v44  ;;  %v2117_v7 = vmul.f32 %v2069_v23, %v8543_v5  ;;  %v6061_v4 = vor.u32 %v6759_v40, %v6058_v10  ;;  %v5945_v35 = vor.u32 %v6745_v63, %v5944_v58  ;;  %v6735_v5 = vld [vmem:[%s10715_s6 + $0x54] sm:$0xf] }
 0x822   :  { %v7024_v36 = vpop.eup %7023  ;;  %7031 = vtanh.f32 %v8747_v2  ;;  %v2093_v62 = vmul.f32 %v2045_v0, %v10751_v15  ;;  %2709 = vmatpush.bf16.xpose.msrb.mxu3 %v6053_v11  ;;  %v5953_v46 = vor.u32 %v6746_v31, %v5952_v17  ;;  %v8882_v19 = vadd.f32 %v1689_v29, %v1088_v9  ;;  %v6771_v2 = vld [vmem:[%s10715_s6 + $0x16c] sm:$0xf0]  ;;  %v6772_v9 = vld [vmem:[%s10715_s6 + $0x174] sm:$0xf0] }
 0x823   :  { %v8896_v50 = vpop.eup %7025  ;;  %v1732_v6 = vmul.f32 0.5, %v8733_v37  ;;  %v1859_v48 = vmul.f32 %v1811_v57, %v8840_v45  ;;  %v1928_v24 = vadd.f32 %v1880_v18, %v8831_v44  ;;  %2655 = vmatmul.bf16.vlgmr.msra.gmra.mxu3 %v2139_v33  ;;  %2737 = vmatpush.bf16.xpose.msrb.mxu1 %v6061_v4  ;;  %v2044_v3 = vadd.f32 1.0, %v7020_v27  ;;  %v5960_v29 = vld [vmem:[%s10715_s6 + $0x50] sm:$0xf]  ;;  %v10752_v33 = vld [vmem:[#allocation7_spill] sm:$0xff] }
 0x824   :  { %v1952_v8 = vmul.f32 0.7978846, %v1904_v51  ;;  %v2141_v26 = vpack.c.bf16 %v2117_v7, %v2093_v62  ;;  %2668 = vmatpush.bf16.xpose.msrb.mxu0 %v5945_v35  ;;  %v1787_v37 = vmul.f32 0.044715, %v8882_v19  ;;  %v2068_v54 = vadd.f32 1.0, %v7022_v60 }
 0x825   :  { %2696 = vmatpush.bf16.xpose.msra.mxu2 %v5953_v46  ;;  %v7028_v13 = vpop.eup %7027  ;;  %v1976_v16 = vmul.f32 0.7978846, %v1928_v24  ;;  %v5957_v14 = vor.u32 %v6734_v20, %v5954_v59  ;;  %v2092_v27 = vmul.f32 %v2044_v3, %v8789_v12  ;;  %v2070_v40 = vadd.f32 1.0, %v7024_v36  ;;  %v6760_v60 = vld [vmem:[%s10715_s6 + $0x11c] sm:$0xf] }
 0x826   :  { %v7030_v10 = vpop.eup %7029  ;;  %2683 = vmatmul.bf16.vlgmr.msra.gmra.mxu1 %v2141_v26  ;;  %v1835_v58 = vmul.f32 %v1787_v37, %v8882_v19  ;;  %v2116_v47 = vmul.f32 %v2068_v54, %v1732_v6  ;;  %v2046_v56 = vadd.f32 1.0, %v8630_v28  ;;  %v6057_v52 = vor.u32 %v6771_v2, %v6056_v1  ;;  %v6066_v12 = vld [vmem:[%s10715_s6 + $0x178] sm:$0xf0]  ;;  %v6747_v57 = vld [vmem:[%s10715_s6 + $0xac] sm:$0xf0] }
 0x827   :  { %v1907_v38 = vadd.f32 %v1859_v48, %v8840_v45  ;;  %7033 = vtanh.f32 %v1976_v16  ;;  %v5965_v42 = vor.u32 %v6735_v5, %v5962_v49  ;;  %v6065_v0 = vor.u32 %v6772_v9, %v6064_v53  ;;  %v6748_v7 = vld [vmem:[%s10715_s6 + $0xb4] sm:$0xf0] }
 0x828   :  { %v7032_v63 = vpop.eup %7031  ;;  %v1735_v51 = vmul.f32 0.5, %v8792_v43  ;;  %v1883_v55 = vmul.f32 %v1835_v58, %v8882_v19  ;;  %v2140_v28 = vpack.c.bf16 %v2116_v47, %v2092_v27  ;;  %v2118_v23 = vmul.f32 %v2070_v40, %v8595_v21  ;;  %v5968_v21 = vld [vmem:[%s10715_s6 + $0x58] sm:$0xf] }
 0x829   :  { %7035 = vtanh.f32 %v1952_v8  ;;  %v2047_v17 = vadd.f32 1.0, %v7028_v13  ;;  %v2071_v31 = vadd.f32 1.0, %v7030_v10  ;;  %v2094_v11 = vmul.f32 %v2046_v56, %v10752_v33 }
 0x82a   :  { %v1931_v43 = vadd.f32 %v1883_v55, %v8882_v19  ;;  %2710 = vmatpush.bf16.xpose.msrb.mxu3 %v5957_v14  ;;  %v6069_v18 = vor.u32 %v6760_v60, %v6066_v12  ;;  %7037 = vtanh.f32 %v8852_v32  ;;  %v1711_v4 = vmul.f32 0.5, %v8738_v41  ;;  %v6736_v32 = vld [vmem:[%s10715_s6 + $0x5c] sm:$0xf] }
 0x82b   :  { %v1955_v35 = vmul.f32 0.7978846, %v1907_v38  ;;  %2738 = vmatpush.bf16.xpose.msrb.mxu1 %v5965_v42  ;;  %v2119_v20 = vmul.f32 %v2071_v31, %v1735_v51  ;;  %v2142_v36 = vpack.c.bf16 %v2118_v23, %v2094_v11  ;;  %v2073_v15 = vadd.f32 1.0, %v7032_v63  ;;  %v5970_v41 = vld [vmem:[%s10715_s6 + $0xb8] sm:$0xf0] }
 0x82c   :  { %2723 = vmatpush.bf16.xpose.msra.mxu0 %v6057_v52  ;;  %v1979_v59 = vmul.f32 0.7978846, %v1931_v43  ;;  %v5961_v62 = vor.u32 %v6747_v57, %v5960_v29  ;;  %7039 = vtanh.f32 %v8722_v39  ;;  %v2095_v5 = vmul.f32 %v2047_v17, %v1711_v4 }
 0x82d   :  { %2751 = vmatpush.bf16.xpose.msrb.mxu2 %v6065_v0  ;;  %2669 = vmatmul.bf16.vlgmr.msrb.gmra.mxu0 %v2140_v28  ;;  %v7034_v46 = vpop.eup %7033  ;;  %v5969_v49 = vor.u32 %v6748_v7, %v5968_v21  ;;  %v2049_v1 = vadd.f32 1.0, %v8896_v50  ;;  %v1737_v2 = vmul.f32 0.5, %v8590_v34  ;;  %v1713_v48 = vmul.f32 0.5, %v8531_v22  ;;  %v6897_v7 = vld [vmem:[%s10711_s1 + $0x21c] ss:$0 sm:$0xff] }
 0x82e   :  { %7041 = vtanh.f32 %v1979_v59  ;;  %2697 = vmatmul.bf16.vlgmr.msra.gmra.mxu2 %v2142_v36  ;;  %v2143_v39 = vpack.c.bf16 %v2119_v20, %v2095_v5  ;;  %v5973_v3 = vor.u32 %v6736_v32, %v5970_v41  ;;  %v2072_v53 = vadd.f32 1.0, %v7034_v46 }
 0x82f   :  { %v7036_v6 = vpop.eup %7035  ;;  %7043 = vtanh.f32 %v1955_v35  ;;  %v2121_v24 = vmul.f32 %v2073_v15, %v1737_v2  ;;  %v1736_v8 = vmul.f32 0.5, %v8831_v44  ;;  %v2097_v26 = vmul.f32 %v2049_v1, %v1713_v48 }
 0x830   :  { %v7038_v9 = vpop.eup %7037  ;;  %v2048_v37 = vadd.f32 1.0, %v7036_v6  ;;  %v1712_v54 = vmul.f32 0.5, %v8802_v30  ;;  %v1738_v27 = vmul.f32 0.5, %v8681_v61  ;;  %v1714_v44 = vmul.f32 0.5, %v8599_v25 }
 0x831   :  { %v2145_v13 = vpack.c.bf16 %v2121_v24, %v2097_v26  ;;  %v2120_v22 = vmul.f32 %v2072_v53, %v1736_v8  ;;  %v2074_v16 = vadd.f32 1.0, %v7038_v9  ;;  %v1739_v52 = vmul.f32 0.5, %v8882_v19 }
 0x832   :  { %2765 = vmatpush.bf16.xpose.msra.mxu3 %v6069_v18  ;;  %v7040_v50 = vpop.eup %7039  ;;  %v2096_v40 = vmul.f32 %v2048_v37, %v1712_v54  ;;  %v1715_v30 = vmul.f32 0.5, %v8840_v45 }
 0x833   :  { %2711 = vmatmul.bf16.vlgmr.msrb.gmra.mxu3 %v2143_v39  ;;  %v2050_v10 = vadd.f32 1.0, %v7040_v50  ;;  %v2122_v56 = vmul.f32 %v2074_v16, %v1738_v27 }
 0x834   :  { %2724 = vmatpush.bf16.xpose.msra.mxu0 %v5961_v62  ;;  %v7042_v34 = vpop.eup %7041  ;;  %v2144_v47 = vpack.c.bf16 %v2120_v22, %v2096_v40 }
 0x835   :  { %2752 = vmatpush.bf16.xpose.msrb.mxu2 %v5969_v49  ;;  %v7044_v14 = vpop.eup %7043  ;;  %v2075_v58 = vadd.f32 1.0, %v7042_v34  ;;  %v2098_v42 = vmul.f32 %v2050_v10, %v1714_v44 }
 0x836   :  { %2739 = vmatmul.bf16.vlgmr.msrb.gmra.mxu1 %v2145_v13  ;;  %v2051_v38 = vadd.f32 1.0, %v7044_v14 }
 0x837   :  { %v2123_v0 = vmul.f32 %v2075_v58, %v1739_v52  ;;  %v2146_v60 = vpack.c.bf16 %v2122_v56, %v2098_v42 }
 0x838   :  { %v2099_v12 = vmul.f32 %v2051_v38, %v1715_v30 }
 0x83a   :  { %2766 = vmatpush.bf16.xpose.msra.mxu3 %v5973_v3  ;;  %v2147_v61 = vpack.c.bf16 %v2123_v0, %v2099_v12 }
 0x83d   :  { %2725 = vmatmul.bf16.vlgmr.msra.gmra.mxu0 %v2144_v47 }
 0x83e   :  { %2753 = vmatmul.bf16.vlgmr.msrb.gmra.mxu2 %v2146_v60 }
 0x843   :  { %2767 = vmatmul.bf16.vlgmr.msra.gmra.mxu3 %v2147_v61  ;;  %v2446_v51 = vpop.f32.mrf.mxu0 }
 0x844   :  { %v2447_v20 = vadd.f32 %v6897_v7, %v2446_v51 }
 0x84b   :  { %v2448_v25 = vpop.f32.mrf.mxu0 }
 0x84c   :  { %v2449_v49 = vadd.f32 %v6897_v7, %v2448_v25 }
 0x84f   :  { %v2460_v63 = vpop.f32.mrf.mxu1 }
 0x850   :  { %v2461_v36 = vadd.f32 %v2460_v63, %v2447_v20 }
 0x857   :  { %v2462_v55 = vpop.f32.mrf.mxu1 }
 0x858   :  { %v2463_v2 = vadd.f32 %v2462_v55, %v2449_v49  ;;  %v6085_v55 = vld [vmem:[%s10712_s2 + $0xf8] sm:$0xff] }
 0x859   :  { %2939 = vmatpush.msrb.mxu3 %v6085_v55  ;;  %v6077_v55 = vld [vmem:[%s10712_s2 + $0xb8] sm:$0xff] }
 0x85a   :  { %2893 = vmatpush.msra.mxu1 %v6077_v55 }
 0x861   :  { %v2474_v28 = vpop.f32.mrf.mxu2 }
 0x862   :  { %v2475_v62 = vadd.f32 %v2474_v28, %v2461_v36  ;;  %v6084_v28 = vld [vmem:[%s10712_s2 + $0xf0] sm:$0xff] }
 0x863   :  { %2940 = vmatpush.msrb.mxu3 %v6084_v28  ;;  %v7193_v36 = vld [vmem:[%s10711_s1 + $0x150] sm:$0xff]  ;;  %v6081_v28 = vld [vmem:[%s10712_s2 + $0xd8] sm:$0xff] }
 0x864   :  { %2916 = vmatpush.msra.mxu2 %v6081_v28 }
 0x866   :  { %v2516_v23 = vpop.f32.mrf.mxu1 }
 0x869   :  { %v2476_v31 = vpop.f32.mrf.mxu2 }
 0x86a   :  { %v2477_v48 = vadd.f32 %v2476_v31, %v2463_v2  ;;  %v6083_v31 = vld [vmem:[%s10712_s2 + $0xe8] sm:$0xff] }
 0x86b   :  { %v2488_v17 = vpop.f32.mrf.mxu3  ;;  %2941 = vmatpush.msrb.mxu3 %v6083_v31  ;;  %v6080_v31 = vld [vmem:[%s10712_s2 + $0xd0] sm:$0xff] }
 0x86c   :  { %v2489_v46 = vadd.f32 %v2488_v17, %v2475_v62  ;;  %2917 = vmatpush.msra.mxu2 %v6080_v31 }
 0x86e   :  { %v2518_v29 = vpop.f32.mrf.mxu1 }
 0x873   :  { %v2502_v19 = vpop.f32.mrf.mxu0  ;;  %v2490_v57 = vpop.f32.mrf.mxu3 }
 0x874   :  { %v2503_v32 = vadd.f32 %v2502_v19, %v2489_v46  ;;  %v2491_v24 = vadd.f32 %v2490_v57, %v2477_v48 }
 0x876   :  { %v2517_v39 = vadd.f32 %v2516_v23, %v2503_v32 }
 0x87a   :  { %v2530_v43 = vpop.f32.mrf.mxu2 }
 0x87b   :  { %v2504_v45 = vpop.f32.mrf.mxu0  ;;  %v2531_v3 = vadd.f32 %v2530_v43, %v2517_v39 }
 0x87c   :  { %v2505_v9 = vadd.f32 %v2504_v45, %v2491_v24  ;;  %v10753_v24 = vld [vmem:[#allocation3_spill] sm:$0xff] }
 0x87e   :  { %v2519_v54 = vadd.f32 %v2518_v29, %v2505_v9  ;;  %v6082_v29 = vld [vmem:[%s10712_s2 + $0xe0] sm:$0xff] }
 0x87f   :  { %2942 = vmatpush.msrb.mxu3 %v6082_v29  ;;  %v6071_v29 = vld [vmem:[%s10712_s2 + $0x88] sm:$0xff] }
 0x880   :  { %v2572_v33 = vpop.f32.mrf.mxu1 }
 0x882   :  { %v2532_v18 = vpop.f32.mrf.mxu2 }
 0x883   :  { %v2544_v11 = vpop.f32.mrf.mxu3  ;;  %v2533_v13 = vadd.f32 %v2532_v18, %v2519_v54 }
 0x884   :  { %v2545_v8 = vadd.f32 %v2544_v11, %v2531_v3 }
 0x888   :  { %v2574_v35 = vpop.f32.mrf.mxu1 }
 0x889   :  { %v2558_v21 = vpop.f32.mrf.mxu0 }
 0x88a   :  { %v2559_v26 = vadd.f32 %v2558_v21, %v2545_v8  ;;  %v7191_v21 = vld [vmem:[%s10711_s1 + $0x90] sm:$0xff] }
 0x88b   :  { %v2546_v4 = vpop.f32.mrf.mxu3  ;;  %6092 = vmatmul.msk.f32.vlgmr.msrb.gmra.mxu3 %vm202_vm8, %v7191_v21  ;;  %v6078_v21 = vld [vmem:[%s10712_s2 + $0xc0] sm:$0xff] }
 0x88c   :  { %v2573_v22 = vadd.f32 %v2572_v33, %v2559_v26  ;;  %v2547_v14 = vadd.f32 %v2546_v4, %v2533_v13  ;;  %v10754_v13 = vld [vmem:[#allocation4_spill] sm:$0xff] }
 0x890   :  { %v2586_v59 = vpop.f32.mrf.mxu2 }
 0x891   :  { %v2560_v15 = vpop.f32.mrf.mxu0  ;;  %v2587_v27 = vadd.f32 %v2586_v59, %v2573_v22 }
 0x892   :  { %v2561_v40 = vadd.f32 %v2560_v15, %v2547_v14  ;;  %v7196_v14 = vld [vmem:[%s10711_s1 + $0xa8] sm:$0xff] }
 0x893   :  { %v2628_v41 = vpop.f32.mrf.mxu1 }
 0x894   :  { %v2575_v52 = vadd.f32 %v2574_v35, %v2561_v40  ;;  %v7192_v35 = vld [vmem:[%s10711_s1 + $0x158] sm:$0xff] }
 0x895   :  { %3269 = vmatpush.msra.mxu3 %v7192_v35  ;;  %v7198_v40 = vld [vmem:[%s10711_s1 + $0xb8] sm:$0xff] }
 0x896   :  { %v2600_v5 = vpop.f32.mrf.mxu3 }
 0x897   :  { %v2601_v10 = vadd.f32 %v2600_v5, %v2587_v27  ;;  %3270 = vmatpush.msra.mxu3 %v7193_v36  ;;  %v7197_v27 = vld [vmem:[%s10711_s1 + $0xb0] sm:$0xff] }
 0x898   :  { %v2588_v1 = vpop.f32.mrf.mxu2 }
 0x899   :  { %v2589_v42 = vadd.f32 %v2588_v1, %v2575_v52 }
 0x89a   :  { %v2614_v6 = vpop.f32.mrf.mxu0 }
 0x89b   :  { %v2630_v34 = vpop.f32.mrf.mxu1  ;;  %v2615_v47 = vadd.f32 %v2614_v6, %v2601_v10  ;;  %v7199_v10 = vld [vmem:[%s10711_s1 + $0xc0] sm:$0xff] }
 0x89d   :  { %v2629_v30 = vadd.f32 %v2628_v41, %v2615_v47  ;;  %v7194_v41 = vld [vmem:[%s10711_s1 + $0x98] sm:$0xff]  ;;  %v10755_v47 = vld [vmem:[#allocation2_spill] sm:$0xff] }
 0x89e   :  { %v2602_v53 = vpop.f32.mrf.mxu3  ;;  %6093 = vmatmul.msk.f32.gmra.mxu3 %vm202_vm8, %v7194_v41  ;;  %v7205_v41 = vld [vmem:[%s10711_s1 + $0x1b8] sm:$0xff] }
 0x89f   :  { %v2603_v0 = vadd.f32 %v2602_v53, %v2589_v42 }
 0x8a1   :  { %v2642_v37 = vpop.f32.mrf.mxu2 }
 0x8a2   :  { %v2616_v50 = vpop.f32.mrf.mxu0  ;;  %v2643_v60 = vadd.f32 %v2642_v37, %v2629_v30  ;;  %v7195_v37 = vld [vmem:[%s10711_s1 + $0xa0] sm:$0xff] }
 0x8a3   :  { %v2684_v56 = vpop.f32.mrf.mxu1  ;;  %v2617_v63 = vadd.f32 %v2616_v50, %v2603_v0 }
 0x8a5   :  { %v2631_v19 = vadd.f32 %v2630_v34, %v2617_v63 }
 0x8a6   :  { %v2656_v16 = vpop.f32.mrf.mxu3  ;;  %6094 = vmatmul.msk.f32.gmra.mxu3 %vm202_vm8, %v7195_v37  ;;  %v6899_v37 = vld [vmem:[%s10711_s1 + $0x21e] ss:$0 sm:$0xff] }
 0x8a7   :  { %v2657_v51 = vadd.f32 %v2656_v16, %v2643_v60 }
 0x8a9   :  { %v2644_v58 = vpop.f32.mrf.mxu2 }
 0x8aa   :  { %v2670_v44 = vpop.f32.mrf.mxu0  ;;  %v2645_v57 = vadd.f32 %v2644_v58, %v2631_v19  ;;  %v7200_v58 = vld [vmem:[%s10711_s1 + $0xc8] sm:$0xff] }
 0x8ab   :  { %v2671_v25 = vadd.f32 %v2670_v44, %v2657_v51  ;;  %v2686_v23 = vpop.f32.mrf.mxu1  ;;  %v6073_v51 = vld [vmem:[%s10712_s2 + $0x98] sm:$0xff] }
 0x8ac   :  { %2870 = vmatpush.msrb.mxu0 %v6073_v51 }
 0x8ad   :  { %v2685_v43 = vadd.f32 %v2684_v56, %v2671_v25 }
 0x8ae   :  { %v2658_v38 = vpop.f32.mrf.mxu3  ;;  %6095 = vmatmul.msk.f32.gmra.mxu3 %vm202_vm8, %v7196_v14 }
 0x8af   :  { %v2659_v11 = vadd.f32 %v2658_v38, %v2645_v57  ;;  %v6075_v57 = vld [vmem:[%s10712_s2 + $0xa8] sm:$0xff] }
 0x8b1   :  { %v2698_v12 = vpop.f32.mrf.mxu2 }
 0x8b2   :  { %v2672_v61 = vpop.f32.mrf.mxu0  ;;  %v2699_v18 = vadd.f32 %v2698_v12, %v2685_v43  ;;  %v6079_v43 = vld [vmem:[%s10712_s2 + $0xc8] sm:$0xff] }
 0x8b3   :  { %v2673_v7 = vadd.f32 %v2672_v61, %v2659_v11  ;;  %v2740_v15 = vpop.f32.mrf.mxu1  ;;  %v6070_v11 = vld [vmem:[%s10712_s2 + $0x80] sm:$0xff]  ;;  %2918 = vmatpush.msra.mxu2 %v6079_v43 }
 0x8b5   :  { %v2687_v62 = vadd.f32 %v2686_v23, %v2673_v7  ;;  %v6072_v23 = vld [vmem:[%s10712_s2 + $0x90] sm:$0xff]  ;;  %2919 = vmatpush.msra.mxu2 %v6078_v21 }
 0x8b6   :  { %v2712_v17 = vpop.f32.mrf.mxu3  ;;  %6096 = vmatmul.msk.f32.gmra.mxu3 %vm202_vm8, %v7197_v27  ;;  %2871 = vmatpush.msrb.mxu0 %v6072_v23  ;;  %v7210_v23 = vld [vmem:[%s10711_s1 + $0xd8] sm:$0xff]  ;;  %v7213_v21 = vld [vmem:[%s10711_s1 + $0xf0] sm:$0xff] }
 0x8b7   :  { %v2713_v4 = vadd.f32 %v2712_v17, %v2699_v18  ;;  %v6076_v17 = vld [vmem:[%s10712_s2 + $0xb0] sm:$0xff]  ;;  %v6074_v18 = vld [vmem:[%s10712_s2 + $0xa0] sm:$0xff] }
 0x8b8   :  { %2894 = vmatpush.msra.mxu1 %v6076_v17  ;;  %2872 = vmatpush.msrb.mxu0 %v6071_v29 }
 0x8b9   :  { %v2700_v45 = vpop.f32.mrf.mxu2 }
 0x8ba   :  { %v2726_v33 = vpop.f32.mrf.mxu0  ;;  %v2701_v5 = vadd.f32 %v2700_v45, %v2687_v62  ;;  %2895 = vmatpush.msra.mxu1 %v6075_v57  ;;  %2873 = vmatpush.msrb.mxu0 %v6070_v11  ;;  %v7211_v57 = vld [vmem:[%s10711_s1 + $0xe0] sm:$0xff] }
 0x8bb   :  { %v2727_v59 = vadd.f32 %v2726_v33, %v2713_v4  ;;  %v2742_v53 = vpop.f32.mrf.mxu1  ;;  %v7201_v4 = vld [vmem:[%s10711_s1 + $0x1d8] sm:$0xff] }
 0x8bc   :  { %2896 = vmatpush.msra.mxu1 %v6074_v18  ;;  %3198 = vmatpush.msrb.mxu2 %v7201_v4 }
 0x8bd   :  { %v2741_v49 = vadd.f32 %v2740_v15, %v2727_v59 }
 0x8be   :  { %v2714_v20 = vpop.f32.mrf.mxu3  ;;  %6097 = vmatmul.msk.f32.gmra.mxu3 %vm202_vm8, %v7198_v40 }
 0x8bf   :  { %v2715_v1 = vadd.f32 %v2714_v20, %v2701_v5  ;;  %v7202_v20 = vld [vmem:[%s10711_s1 + $0x1d0] sm:$0xff] }
 0x8c0   :  { %3199 = vmatpush.msrb.mxu2 %v7202_v20 }
 0x8c1   :  { %v2754_v46 = vpop.f32.mrf.mxu2 }
 0x8c2   :  { %v2728_v32 = vpop.f32.mrf.mxu0  ;;  %v2755_v2 = vadd.f32 %v2754_v46, %v2741_v49  ;;  %v7203_v46 = vld [vmem:[%s10711_s1 + $0x1c8] sm:$0xff]  ;;  %v7204_v49 = vld [vmem:[%s10711_s1 + $0x1c0] sm:$0xff] }
 0x8c3   :  { %v2729_v48 = vadd.f32 %v2728_v32, %v2715_v1  ;;  %3200 = vmatpush.msrb.mxu2 %v7203_v46  ;;  %v7216_v46 = vld [vmem:[%s10711_s1 + $0x108] sm:$0xff] }
 0x8c5   :  { %v2743_v8 = vadd.f32 %v2742_v53, %v2729_v48  ;;  %3201 = vmatpush.msrb.mxu2 %v7204_v49  ;;  %v6898_v53 = vld [vmem:[%s10711_s1 + $0x21d] ss:$0 sm:$0xff] }
 0x8c6   :  { %v2768_v6 = vpop.f32.mrf.mxu3  ;;  %6098 = vmatmul.msk.f32.gmra.mxu3 %vm202_vm8, %v7199_v10 }
 0x8c7   :  { %v2769_v39 = vadd.f32 %v2768_v6, %v2755_v2  ;;  %3202 = vmatpush.msrb.mxu2 %v7205_v41  ;;  %v7206_v2 = vld [vmem:[%s10711_s1 + $0x1b0] sm:$0xff] }
 0x8c9   :  { %v2773_v3 = vadd.f32 %v2769_v39, %v10753_v24  ;;  %v2756_v9 = vpop.f32.mrf.mxu2  ;;  %3203 = vmatpush.msrb.mxu2 %v7206_v2 }
 0x8ca   :  { %v2757_v50 = vadd.f32 %v2756_v9, %v2743_v8 }
 0x8cb   :  { %v2775_v26 = vsel %vm202_vm8, %v2773_v3, 0.0 }
 0x8cc   :  { %2776 = vadd.xlane.f32.xlu2 %v2775_v26  ;;  %v7208_v26 = vld [vmem:[%s10711_s1 + $0x1a0] sm:$0xff] }
 0x8ce   :  { %v2770_v34 = vpop.f32.mrf.mxu3  ;;  %6099 = vmatmul.msk.f32.gmra.mxu3 %vm202_vm8, %v7200_v58 }
 0x8cf   :  { %v2771_v54 = vadd.f32 %v2770_v34, %v2757_v50 }
 0x8d1   :  { %v2774_v22 = vadd.f32 %v2771_v54, %v10754_v13 }
 0x8d3   :  { %v2778_v16 = vsel %vm202_vm8, %v2774_v22, 0.0 }
 0x8d4   :  { %2779 = vadd.xlane.f32.xlu1 %v2778_v16 }
 0x90e   :  { %v9022_v63 = vpop.f32.mrf.mxu3 }
 0x921   :  { %v9052_v33 = vpop.f32.mrf.mxu3 }
 0x929   :  { %v2950_v15 = vpop.f32.mrf.mxu3 }
 0x931   :  { %v2953_v48 = vpop.f32.mrf.mxu3 }
 0x939   :  { %v2956_v16 = vpop.f32.mrf.mxu3 }
 0x93f   :  { %v2777_v44 = vpop.xlane.xlu2 %2776 }
 0x940   :  { %v2781_v56 = vmul.f32 %v2777_v44, %v10755_v47 }
 0x941   :  { %v2959_v44 = vpop.f32.mrf.mxu3 }
 0x942   :  { %v9011_v52 = vsub.f32 %v2773_v3, %v2781_v56  ;;  %v7207_v3 = vld [vmem:[%s10711_s1 + $0x1a8] sm:$0xff] }
 0x943   :  { %3204 = vmatpush.msrb.mxu2 %v7207_v3  ;;  %v9181_v3 = vld [vmem:[%s10711_s1 + $0x110] sm:$0xff] }
 0x944   :  { %v2785_v38 = vmul.f32 %v9011_v52, %v9011_v52 }
 0x945   :  { %3205 = vmatpush.msrb.mxu2 %v7208_v26 }
 0x946   :  { %v2787_v42 = vsel %vm202_vm8, %v2785_v38, 0.0  ;;  %v6901_v38 = vld [vmem:[%s10711_s1 + $0x221] ss:$0 sm:$0xff] }
 0x947   :  { %v2780_v30 = vpop.xlane.xlu1 %2779  ;;  %2788 = vadd.xlane.f32.xlu0 %v2787_v42 }
 0x948   :  { %v2782_v0 = vmul.f32 %v2780_v30, %v10755_v47 }
 0x949   :  { %v2962_v56 = vpop.f32.mrf.mxu3 }
 0x94a   :  { %v9017_v60 = vsub.f32 %v2774_v22, %v2782_v0 }
 0x94c   :  { %v2786_v12 = vmul.f32 %v9017_v60, %v9017_v60 }
 0x94e   :  { %v2790_v61 = vsel %vm202_vm8, %v2786_v12, 0.0 }
 0x94f   :  { %2791 = vadd.xlane.f32.xlu2 %v2790_v61  ;;  %v6900_v61 = vld [vmem:[%s10711_s1 + $0x220] ss:$0 sm:$0xff] }
 0x9ba   :  { %v2789_v25 = vpop.xlane.xlu0 %2788 }
 0x9bb   :  { %v2793_v19 = vmul.f32 %v2789_v25, %v10755_v47 }
 0x9bd   :  { %v2795_v45 = vadd.f32 1e-12, %v2793_v19 }
 0x9bf   :  { %7045 = vrsqrt.f32 %v2795_v45  ;;  %vm2803_vm5 = vweird.f32 %v2795_v45 }
 0x9c2   :  { %v2792_v7 = vpop.xlane.xlu2 %2791 }
 0x9c3   :  { %v2794_v35 = vmul.f32 %v2792_v7, %v10755_v47 }
 0x9c5   :  { %v7046_v59 = vpop.eup %7045  ;;  %v2796_v36 = vadd.f32 1e-12, %v2794_v35  ;;  %v7214_v35 = vld [vmem:[%s10711_s1 + $0xf8] sm:$0xff] }
 0x9c6   :  { %v2798_v62 = vmul.f32 %v7046_v59, %v2795_v45  ;;  %vm2804_vm4 = vweird.f32 %v7046_v59 }
 0x9c7   :  { %7047 = vrsqrt.f32 %v2796_v36  ;;  %vm2805_vm6 = vmor %vm2803_vm5, %vm2804_vm4  ;;  %vm2813_vm13 = vweird.f32 %v2796_v36 }
 0x9c8   :  { %v2799_v5 = vmul.f32 %v7046_v59, %v2798_v62 }
 0x9ca   :  { %v2800_v32 = vmul.f32 0.5, %v2799_v5 }
 0x9cc   :  { %v2801_v1 = vsub.f32 1.5, %v2800_v32 }
 0x9cd   :  { %v7048_v6 = vpop.eup %7047 }
 0x9ce   :  { %v2802_v39 = vmul.f32 %v7046_v59, %v2801_v1  ;;  %v2808_v24 = vmul.f32 %v7048_v6, %v2796_v36  ;;  %vm2814_vm7 = vweird.f32 %v7048_v6  ;;  %v7215_v36 = vld [vmem:[%s10711_s1 + $0x100] sm:$0xff] }
 0x9cf   :  { %vm2815_vm14 = vmor %vm2813_vm13, %vm2814_vm7  ;;  %v7217_v1 = vld [vmem:[%s10711_s1 + $0x160] sm:$0xff] }
 0x9d0   :  { %v2806_v9 = vsel %vm2805_vm6, %v7046_v59, %v2802_v39  ;;  %v2809_v8 = vmul.f32 %v7048_v6, %v2808_v24 }
 0x9d1   :  { %v2817_v50 = vmul.f32 %v2806_v9, %v9011_v52  ;;  %v2965_v52 = vpop.f32.mrf.mxu3 }
 0x9d2   :  { %v2810_v34 = vmul.f32 0.5, %v2809_v8  ;;  %6110 = vmatpush.xpose.msk.msrb.mxu1 %vm202_vm8, %v2965_v52  ;;  %v7220_v8 = vld [vmem:[%s10711_s1 + $0x170] sm:$0xff] }
 0x9d3   :  { %v2820_v54 = vmul.f32 %v6898_v53, %v2817_v50  ;;  %v9192_v50 = vld [vmem:[%s10711_s1 + $0x118] sm:$0xff] }
 0x9d4   :  { %v2811_v13 = vsub.f32 1.5, %v2810_v34 }
 0x9d5   :  { %v9095_v22 = vadd.f32 %v6899_v37, %v2820_v54 }
 0x9d6   :  { %v2812_v14 = vmul.f32 %v7048_v6, %v2811_v13  ;;  %6111 = vmatpush.xpose.msk.msrb.mxu1 %vm202_vm8, %v2962_v56  ;;  %v7222_v13 = vld [vmem:[%s10711_s1 + $0x178] sm:$0xff] }
 0x9d7   :  { %6086 = vmatmul.msk.f32.vlgmr.msrb.gmra.mxu0 %vm202_vm8, %v9095_v22  ;;  %6088 = vmatmul.msk.f32.vlgmr.msra.gmra.mxu1 %vm202_vm8, %v9095_v22 }
 0x9d8   :  { %v2816_v27 = vsel %vm2815_vm14, %v7048_v6, %v2812_v14  ;;  %6090 = vmatmul.msk.f32.vlgmr.msra.gmra.mxu2 %vm202_vm8, %v9095_v22 }
 0x9d9   :  { %v2818_v40 = vmul.f32 %v2816_v27, %v9017_v60  ;;  %v7209_v60 = vld [vmem:[%s10711_s1 + $0xd0] sm:$0xff]  ;;  %v9203_v27 = vld [vmem:[%s10711_s1 + $0x120] sm:$0xff] }
 0x9da   :  { %6112 = vmatpush.xpose.msk.msrb.mxu1 %vm202_vm8, %v2959_v44  ;;  %v7224_v44 = vld [vmem:[%s10711_s1 + $0x180] sm:$0xff] }
 0x9db   :  { %v2821_v10 = vmul.f32 %v6898_v53, %v2818_v40 }
 0x9dd   :  { %v9104_v58 = vadd.f32 %v6899_v37, %v2821_v10 }
 0x9de   :  { %6113 = vmatpush.xpose.msk.msrb.mxu1 %vm202_vm8, %v2956_v16 }
 0x9df   :  { %6087 = vmatmul.msk.f32.gmra.mxu0 %vm202_vm8, %v9104_v58  ;;  %6089 = vmatmul.msk.f32.gmra.mxu1 %vm202_vm8, %v9104_v58 }
 0x9e0   :  { %6091 = vmatmul.msk.f32.gmra.mxu2 %vm202_vm8, %v9104_v58 }
 0x9e2   :  { %6114 = vmatpush.xpose.msk.msrb.mxu1 %vm202_vm8, %v2953_v48  ;;  %v7218_v48 = vld [vmem:[%s10711_s1 + $0x168] sm:$0xff] }
 0x9e6   :  { %6115 = vmatpush.xpose.msk.msrb.mxu1 %vm202_vm8, %v2950_v15 }
 0x9ea   :  { %6116 = vmatpush.xpose.msk.msrb.mxu1 %vm202_vm8, %v9052_v33  ;;  %v7212_v33 = vld [vmem:[%s10711_s1 + $0xe8] sm:$0xff] }
 0x9ee   :  { %6117 = vmatpush.xpose.msk.msrb.mxu1 %vm202_vm8, %v9022_v63 }
 0xa54   :  { %v2875_v42 = vpop.f32.mrf.mxu0  ;;  %v2898_v30 = vpop.f32.mrf.mxu1 }
 0xa55   :  { %v2980_v0 = vadd.f32 %v6901_v38, %v2875_v42  ;;  %v2969_v25 = vadd.f32 %v6900_v61, %v2875_v42 }
 0xa57   :  { %v2982_v12 = vmul.f32 %v7209_v60, %v2980_v0  ;;  %v2971_v31 = vmul.f32 %v7209_v60, %v2969_v25  ;;  %v2984_v43 = vmul.f32 %v7211_v57, %v2980_v0  ;;  %v2973_v18 = vmul.f32 %v7211_v57, %v2969_v25 }
 0xa58   :  { %v2986_v7 = vmul.f32 %v7213_v21, %v2980_v0  ;;  %v2975_v59 = vmul.f32 %v7213_v21, %v2969_v25  ;;  %v2988_v15 = vmul.f32 %v7215_v36, %v2980_v0  ;;  %v2977_v49 = vmul.f32 %v7215_v36, %v2969_v25  ;;  %v7226_v0 = vld [vmem:[%s10711_s1 + $0x188] sm:$0xff] }
 0xa59   :  { %6118 = vmatmul.msk.f32.vlgmr.msrb.gmra.mxu1 %vm202_vm8, %v2982_v12 }
 0xa5b   :  { %v2921_v51 = vpop.f32.mrf.mxu2 }
 0xa5c   :  { %v2878_v63 = vpop.f32.mrf.mxu0  ;;  %v2901_v55 = vpop.f32.mrf.mxu1 }
 0xa5d   :  { %v2981_v28 = vadd.f32 %v6901_v38, %v2878_v63  ;;  %6100 = vmatpush.xpose.msk.msra.mxu0 %vm202_vm8, %v2901_v55  ;;  %v2970_v29 = vadd.f32 %v6900_v61, %v2878_v63  ;;  %v9214_v38 = vld [vmem:[%s10711_s1 + $0x128] sm:$0xff]  ;;  %v9225_v61 = vld [vmem:[%s10711_s1 + $0x130] sm:$0xff] }
 0xa5e   :  { %v7228_v55 = vld [vmem:[%s10711_s1 + $0x190] sm:$0xff] }
 0xa5f   :  { %v2983_v17 = vmul.f32 %v7210_v23, %v2981_v28  ;;  %v2972_v45 = vmul.f32 %v7210_v23, %v2970_v29  ;;  %v2985_v11 = vmul.f32 %v7212_v33, %v2981_v28  ;;  %v2974_v4 = vmul.f32 %v7212_v33, %v2970_v29  ;;  %v9236_v23 = vld [vmem:[%s10711_s1 + $0x138] sm:$0xff] }
 0xa60   :  { %v2987_v20 = vmul.f32 %v7214_v35, %v2981_v28  ;;  %v2976_v62 = vmul.f32 %v7214_v35, %v2970_v29  ;;  %v2989_v5 = vmul.f32 %v7216_v46, %v2981_v28  ;;  %v2978_v32 = vmul.f32 %v7216_v46, %v2970_v29 }
 0xa61   :  { %6101 = vmatpush.xpose.msk.msra.mxu0 %vm202_vm8, %v2898_v30  ;;  %6119 = vmatmul.msk.f32.gmra.mxu1 %vm202_vm8, %v2983_v17 }
 0xa63   :  { %v2924_v19 = vpop.f32.mrf.mxu2 }
 0xa64   :  { %6102 = vmatmul.msk.f32.vlgmr.msra.gmra.mxu0 %vm202_vm8, %v2971_v31 }
 0xa65   :  { %3478 = vmatpush.msrb.mxu0 %v2924_v19  ;;  %v7230_v19 = vld [vmem:[%s10711_s1 + $0x198] sm:$0xff] }
 0xa67   :  { %3479 = vmatpush.msrb.mxu0 %v2921_v51 }
 0xa69   :  { %6120 = vmatmul.msk.f32.gmra.mxu1 %vm202_vm8, %v2984_v43  ;;  %v9247_v43 = vld [vmem:[%s10711_s1 + $0x140] sm:$0xff] }
 0xa6c   :  { %6103 = vmatmul.msk.f32.gmra.mxu0 %vm202_vm8, %v2972_v45 }
 0xa71   :  { %6121 = vmatmul.msk.f32.gmra.mxu1 %vm202_vm8, %v2985_v11  ;;  %v9254_v11 = vld [vmem:[%s10711_s1 + $0x148] sm:$0xff] }
 0xa74   :  { %6104 = vmatmul.msk.f32.gmra.mxu0 %vm202_vm8, %v2973_v18 }
 0xa79   :  { %6122 = vmatmul.msk.f32.gmra.mxu1 %vm202_vm8, %v2986_v7 }
 0xa7c   :  { %6105 = vmatmul.msk.f32.gmra.mxu0 %vm202_vm8, %v2974_v4 }
 0xa81   :  { %6123 = vmatmul.msk.f32.gmra.mxu1 %vm202_vm8, %v2987_v20 }
 0xa84   :  { %6106 = vmatmul.msk.f32.gmra.mxu0 %vm202_vm8, %v2975_v59 }
 0xa89   :  { %6124 = vmatmul.msk.f32.gmra.mxu1 %vm202_vm8, %v2988_v15 }
 0xa8c   :  { %6107 = vmatmul.msk.f32.gmra.mxu0 %vm202_vm8, %v2976_v62 }
 0xa91   :  { %6125 = vmatmul.msk.f32.gmra.mxu1 %vm202_vm8, %v2989_v5 }
 0xa94   :  { %6108 = vmatmul.msk.f32.gmra.mxu0 %vm202_vm8, %v2977_v49 }
 0xa9c   :  { %6109 = vmatmul.msk.f32.gmra.mxu0 %vm202_vm8, %v2978_v32 }
 0xad6   :  { %v3134_v41 = vpop.f32.mrf.mxu1 }
 0xad7   :  { %v3158_v2 = vmul.f32 %v7217_v1, %v3134_v41 }
 0xad9   :  { %6126 = vmatmul.msk.f32.vlgmr.msrb.gmra.mxu2 %vm541_vm10, %v3158_v2 }
 0xade   :  { %v3137_v6 = vpop.f32.mrf.mxu1 }
 0xadf   :  { %v3159_v39 = vmul.f32 %v7218_v48, %v3137_v6 }
 0xae1   :  { %6127 = vmatmul.msk.f32.gmra.mxu2 %vm541_vm10, %v3159_v39  ;;  %v3037_v24 = vpop.f32.mrf.mxu0 }
 0xae2   :  { %v3061_v53 = vmul.f32 %v9181_v3, %v3037_v24 }
 0xae4   :  { %6134 = vmatmul.msk.f32.vlgmr.msra.gmra.mxu3 %vm607_vm9, %v3061_v53 }
 0xae6   :  { %v3140_v9 = vpop.f32.mrf.mxu1 }
 0xae7   :  { %v3160_v26 = vmul.f32 %v7220_v8, %v3140_v9 }
 0xae9   :  { %6128 = vmatmul.msk.f32.gmra.mxu2 %vm541_vm10, %v3160_v26  ;;  %v3040_v37 = vpop.f32.mrf.mxu0 }
 0xaea   :  { %v3062_v34 = vmul.f32 %v9192_v50, %v3040_v37 }
 0xaec   :  { %6135 = vmatmul.msk.f32.gmra.mxu3 %vm607_vm9, %v3062_v34 }
 0xaee   :  { %v3143_v54 = vpop.f32.mrf.mxu1 }
 0xaef   :  { %v3161_v16 = vmul.f32 %v7222_v13, %v3143_v54 }
 0xaf1   :  { %6129 = vmatmul.msk.f32.gmra.mxu2 %vm541_vm10, %v3161_v16  ;;  %v3043_v14 = vpop.f32.mrf.mxu0 }
 0xaf2   :  { %v3063_v40 = vmul.f32 %v9203_v27, %v3043_v14 }
 0xaf4   :  { %6136 = vmatmul.msk.f32.gmra.mxu3 %vm607_vm9, %v3063_v40 }
 0xaf6   :  { %v3146_v10 = vpop.f32.mrf.mxu1 }
 0xaf7   :  { %v3162_v56 = vmul.f32 %v7224_v44, %v3146_v10 }
 0xaf9   :  { %6130 = vmatmul.msk.f32.gmra.mxu2 %vm541_vm10, %v3162_v56  ;;  %v3046_v52 = vpop.f32.mrf.mxu0 }
 0xafa   :  { %v3064_v42 = vmul.f32 %v9214_v38, %v3046_v52 }
 0xafc   :  { %6137 = vmatmul.msk.f32.gmra.mxu3 %vm607_vm9, %v3064_v42 }
 0xafe   :  { %v3149_v30 = vpop.f32.mrf.mxu1 }
 0xaff   :  { %v3163_v60 = vmul.f32 %v7226_v0, %v3149_v30 }
 0xb01   :  { %6131 = vmatmul.msk.f32.gmra.mxu2 %vm541_vm10, %v3163_v60  ;;  %v3049_v12 = vpop.f32.mrf.mxu0 }
 0xb02   :  { %v3065_v51 = vmul.f32 %v9225_v61, %v3049_v12 }
 0xb04   :  { %6138 = vmatmul.msk.f32.gmra.mxu3 %vm607_vm9, %v3065_v51 }
 0xb06   :  { %v3152_v63 = vpop.f32.mrf.mxu1 }
 0xb07   :  { %v3164_v28 = vmul.f32 %v7228_v55, %v3152_v63 }
 0xb09   :  { %6132 = vmatmul.msk.f32.gmra.mxu2 %vm541_vm10, %v3164_v28  ;;  %v3052_v25 = vpop.f32.mrf.mxu0 }
 0xb0a   :  { %v3066_v17 = vmul.f32 %v9236_v23, %v3052_v25 }
 0xb0c   :  { %6139 = vmatmul.msk.f32.gmra.mxu3 %vm607_vm9, %v3066_v17 }
 0xb0e   :  { %v3155_v31 = vpop.f32.mrf.mxu1 }
 0xb0f   :  { %v3165_v29 = vmul.f32 %v7230_v19, %v3155_v31 }
 0xb11   :  { %6133 = vmatmul.msk.f32.gmra.mxu2 %vm541_vm10, %v3165_v29  ;;  %v3055_v57 = vpop.f32.mrf.mxu0 }
 0xb12   :  { %v3067_v45 = vmul.f32 %v9247_v43, %v3055_v57 }
 0xb14   :  { %6140 = vmatmul.msk.f32.gmra.mxu3 %vm607_vm9, %v3067_v45 }
 0xb19   :  { %v3058_v33 = vpop.f32.mrf.mxu0 }
 0xb1a   :  { %v3068_v18 = vmul.f32 %v9254_v11, %v3058_v33 }
 0xb1c   :  { %6141 = vmatmul.msk.f32.gmra.mxu3 %vm607_vm9, %v3068_v18 }
 0xb5c   :  { %v3207_v21 = vpop.f32.mrf.mxu2 }
 0xb64   :  { %v3210_v7 = vpop.f32.mrf.mxu2 }
 0xb67   :  { %v3272_v4 = vpop.f32.mrf.mxu3 }
 0xb68   :  { %v3273_v35 = vadd.f32 %v3272_v4, %v3207_v21 }
 0xb6a   :  { %v3296_v20 = vmul.f32 0.35355338, %v3273_v35 }
 0xb6c   :  { %v3304_v59 = vsel %vm681_vm11, %v3296_v20, -inf  ;;  %v3213_v36 = vpop.f32.mrf.mxu2 }
 0xb6d   :  { %3305 = vmax.xlane.f32.xlu1 %v3304_v59 }
 0xb6f   :  { %v3275_v15 = vpop.f32.mrf.mxu3 }
 0xb70   :  { %v3276_v62 = vadd.f32 %v3275_v15, %v3210_v7 }
 0xb72   :  { %v3297_v46 = vmul.f32 0.35355338, %v3276_v62 }
 0xb74   :  { %v3307_v5 = vsel %vm681_vm11, %v3297_v46, -inf  ;;  %v3216_v49 = vpop.f32.mrf.mxu2 }
 0xb75   :  { %3308 = vmax.xlane.f32.xlu0 %v3307_v5 }
 0xb77   :  { %v3278_v32 = vpop.f32.mrf.mxu3 }
 0xb78   :  { %v3279_v41 = vadd.f32 %v3278_v32, %v3213_v36 }
 0xb7a   :  { %v3298_v1 = vmul.f32 0.35355338, %v3279_v41 }
 0xb7c   :  { %v3310_v2 = vsel %vm681_vm11, %v3298_v1, -inf  ;;  %v3219_v39 = vpop.f32.mrf.mxu2 }
 0xb7d   :  { %3311 = vmax.xlane.f32.xlu2 %v3310_v2 }
 0xb7f   :  { %v3281_v6 = vpop.f32.mrf.mxu3 }
 0xb80   :  { %v3282_v48 = vadd.f32 %v3281_v6, %v3216_v49 }
 0xb82   :  { %v3299_v24 = vmul.f32 0.35355338, %v3282_v48 }
 0xb84   :  { %v3313_v53 = vsel %vm681_vm11, %v3299_v24, -inf  ;;  %v3222_v37 = vpop.f32.mrf.mxu2 }
 0xb85   :  { %3314 = vmax.xlane.f32.xlu1 %v3313_v53 }
 0xb87   :  { %v3284_v9 = vpop.f32.mrf.mxu3 }
 0xb88   :  { %v3285_v8 = vadd.f32 %v3284_v9, %v3219_v39 }
 0xb8a   :  { %v3300_v26 = vmul.f32 0.35355338, %v3285_v8 }
 0xb8c   :  { %v3316_v34 = vsel %vm681_vm11, %v3300_v26, -inf  ;;  %v3225_v40 = vpop.f32.mrf.mxu2 }
 0xb8d   :  { %3317 = vmax.xlane.f32.xlu0 %v3316_v34 }
 0xb8f   :  { %v3287_v54 = vpop.f32.mrf.mxu3 }
 0xb90   :  { %v3288_v13 = vadd.f32 %v3287_v54, %v3222_v37 }
 0xb92   :  { %v3301_v16 = vmul.f32 0.35355338, %v3288_v13 }
 0xb94   :  { %v3319_v14 = vsel %vm681_vm11, %v3301_v16, -inf  ;;  %v3228_v42 = vpop.f32.mrf.mxu2 }
 0xb95   :  { %3320 = vmax.xlane.f32.xlu2 %v3319_v14 }
 0xb97   :  { %v3290_v10 = vpop.f32.mrf.mxu3 }
 0xb98   :  { %v3291_v44 = vadd.f32 %v3290_v10, %v3225_v40 }
 0xb9a   :  { %v3302_v56 = vmul.f32 0.35355338, %v3291_v44 }
 0xb9c   :  { %v3322_v52 = vsel %vm681_vm11, %v3302_v56, -inf }
 0xb9d   :  { %3323 = vmax.xlane.f32.xlu1 %v3322_v52 }
 0xb9f   :  { %v3293_v30 = vpop.f32.mrf.mxu3 }
 0xba0   :  { %v3294_v0 = vadd.f32 %v3293_v30, %v3228_v42 }
 0xba2   :  { %v3303_v60 = vmul.f32 0.35355338, %v3294_v0 }
 0xba4   :  { %v3325_v12 = vsel %vm681_vm11, %v3303_v60, -inf }
 0xba5   :  { %3326 = vmax.xlane.f32.xlu2 %v3325_v12 }
 0xbe0   :  { %v3306_v51 = vpop.xlane.xlu1 %3305 }
 0xbe1   :  { %v3328_v63 = vsub.f32 %v3296_v20, %v3306_v51 }
 0xbe3   :  { %v3336_v55 = vmul.f32 1.442695, %v3328_v63 }
 0xbe5   :  { %7049 = vpow2.f32 %v3336_v55 }
 0xbe8   :  { %v3309_v28 = vpop.xlane.xlu0 %3308 }
 0xbe9   :  { %v3329_v25 = vsub.f32 %v3297_v46, %v3309_v28 }
 0xbeb   :  { %v7050_v17 = vpop.eup %7049  ;;  %v3338_v31 = vmul.f32 1.442695, %v3329_v25 }
 0xbec   :  { %v3352_v19 = vsel %vm681_vm11, %v7050_v17, 0.0 }
 0xbed   :  { %7051 = vpow2.f32 %v3338_v31  ;;  %3353 = vadd.xlane.f32.xlu0 %v3352_v19 }
 0xbf0   :  { %v3312_v29 = vpop.xlane.xlu2 %3311 }
 0xbf1   :  { %v3330_v57 = vsub.f32 %v3298_v1, %v3312_v29 }
 0xbf3   :  { %v7052_v45 = vpop.eup %7051  ;;  %v3340_v33 = vmul.f32 1.442695, %v3330_v57 }
 0xbf4   :  { %v3355_v18 = vsel %vm681_vm11, %v7052_v45, 0.0 }
 0xbf5   :  { %7053 = vpow2.f32 %v3340_v33  ;;  %3356 = vadd.xlane.f32.xlu1 %v3355_v18 }
 0xbf8   :  { %v3315_v21 = vpop.xlane.xlu1 %3314 }
 0xbf9   :  { %v3331_v7 = vsub.f32 %v3299_v24, %v3315_v21 }
 0xbfb   :  { %v7054_v4 = vpop.eup %7053  ;;  %v3342_v35 = vmul.f32 1.442695, %v3331_v7 }
 0xbfc   :  { %v3358_v20 = vsel %vm681_vm11, %v7054_v4, 0.0 }
 0xbfd   :  { %7055 = vpow2.f32 %v3342_v35  ;;  %3359 = vadd.xlane.f32.xlu0 %v3358_v20 }
 0xc00   :  { %v3318_v59 = vpop.xlane.xlu0 %3317 }
 0xc01   :  { %v3332_v36 = vsub.f32 %v3300_v26, %v3318_v59 }
 0xc03   :  { %v7056_v15 = vpop.eup %7055  ;;  %v3344_v62 = vmul.f32 1.442695, %v3332_v36 }
 0xc04   :  { %v3361_v46 = vsel %vm681_vm11, %v7056_v15, 0.0 }
 0xc05   :  { %7057 = vpow2.f32 %v3344_v62  ;;  %3362 = vadd.xlane.f32.xlu2 %v3361_v46 }
 0xc08   :  { %v3321_v5 = vpop.xlane.xlu2 %3320 }
 0xc09   :  { %v3333_v49 = vsub.f32 %v3301_v16, %v3321_v5 }
 0xc0b   :  { %v7058_v32 = vpop.eup %7057  ;;  %v3346_v41 = vmul.f32 1.442695, %v3333_v49 }
 0xc0c   :  { %v3364_v1 = vsel %vm681_vm11, %v7058_v32, 0.0 }
 0xc0d   :  { %7059 = vpow2.f32 %v3346_v41  ;;  %3365 = vadd.xlane.f32.xlu1 %v3364_v1 }
 0xc10   :  { %v3324_v2 = vpop.xlane.xlu1 %3323 }
 0xc11   :  { %v3334_v6 = vsub.f32 %v3302_v56, %v3324_v2 }
 0xc13   :  { %v7060_v48 = vpop.eup %7059  ;;  %v3348_v39 = vmul.f32 1.442695, %v3334_v6 }
 0xc14   :  { %v3367_v24 = vsel %vm681_vm11, %v7060_v48, 0.0 }
 0xc15   :  { %7061 = vpow2.f32 %v3348_v39  ;;  %3368 = vadd.xlane.f32.xlu0 %v3367_v24 }
 0xc18   :  { %v3327_v53 = vpop.xlane.xlu2 %3326 }
 0xc19   :  { %v3335_v9 = vsub.f32 %v3303_v60, %v3327_v53  ;;  %v6164_v53 = vld [vmem:[%s10713_s3 + $0xf0] sm:$0xff] }
 0xc1b   :  { %v7062_v8 = vpop.eup %7061  ;;  %v3350_v26 = vmul.f32 1.442695, %v3335_v9  ;;  %v6162_v9 = vld [vmem:[%s10713_s3 + $0xe0] sm:$0xff] }
 0xc1c   :  { %v3370_v37 = vsel %vm681_vm11, %v7062_v8, 0.0 }
 0xc1d   :  { %7063 = vpow2.f32 %v3350_v26  ;;  %3371 = vadd.xlane.f32.xlu2 %v3370_v37  ;;  %v6160_v37 = vld [vmem:[%s10713_s3 + $0xd0] sm:$0xff] }
 0xc23   :  { %v7064_v34 = vpop.eup %7063 }
 0xc24   :  { %v3373_v54 = vsel %vm681_vm11, %v7064_v34, 0.0 }
 0xc25   :  { %3374 = vadd.xlane.f32.xlu0 %v3373_v54  ;;  %v6158_v54 = vld [vmem:[%s10713_s3 + $0xc0] sm:$0xff] }
 0xc60   :  { %v3354_v13 = vpop.xlane.xlu0 %3353 }
 0xc61   :  { %7065 = vrcp.f32 %v3354_v13  ;;  %v6157_v13 = vld [vmem:[%s10713_s3 + $0xb8] sm:$0xff] }
 0xc67   :  { %v7066_v16 = vpop.eup %7065 }
 0xc68   :  { %v3357_v14 = vpop.xlane.xlu1 %3356  ;;  %v3384_v40 = vmul.f32 %v7066_v16, %v7050_v17 }
 0xc69   :  { %7067 = vrcp.f32 %v3357_v14  ;;  %v6156_v14 = vld [vmem:[%s10713_s3 + $0xb0] sm:$0xff] }
 0xc6a   :  { %3400 = vrot.lane.b32.xlu1 %v3384_v40, %s7238_s16 }
 0xc6f   :  { %v7068_v10 = vpop.eup %7067 }
 0xc70   :  { %v3360_v44 = vpop.xlane.xlu0 %3359  ;;  %v3385_v56 = vmul.f32 %v7068_v10, %v7052_v45 }
 0xc71   :  { %7069 = vrcp.f32 %v3360_v44  ;;  %v6155_v44 = vld [vmem:[%s10713_s3 + $0xa8] sm:$0xff] }
 0xc72   :  { %3402 = vrot.lane.b32.xlu2 %v3385_v56, %s7238_s16 }
 0xc77   :  { %v7070_v52 = vpop.eup %7069 }
 0xc78   :  { %v3363_v42 = vpop.xlane.xlu2 %3362  ;;  %v3386_v30 = vmul.f32 %v7070_v52, %v7054_v4  ;;  %v6153_v52 = vld [vmem:[%s10713_s3 + $0x98] sm:$0xff] }
 0xc79   :  { %7071 = vrcp.f32 %v3363_v42  ;;  %v6152_v42 = vld [vmem:[%s10713_s3 + $0x90] sm:$0xff] }
 0xc7a   :  { %3404 = vrot.lane.b32.xlu0 %v3386_v30, %s7238_s16 }
 0xc7f   :  { %v7072_v0 = vpop.eup %7071 }
 0xc80   :  { %v3366_v60 = vpop.xlane.xlu1 %3365  ;;  %v3387_v12 = vmul.f32 %v7072_v0, %v7056_v15  ;;  %v6150_v0 = vld [vmem:[%s10713_s3 + $0x80] sm:$0xff] }
 0xc81   :  { %7073 = vrcp.f32 %v3366_v60 }
 0xc82   :  { %3406 = vrot.lane.b32.xlu1 %v3387_v12, %s7238_s16 }
 0xc87   :  { %v7074_v51 = vpop.eup %7073 }
 0xc88   :  { %v3369_v63 = vpop.xlane.xlu0 %3368  ;;  %v3388_v55 = vmul.f32 %v7074_v51, %v7058_v32 }
 0xc89   :  { %7075 = vrcp.f32 %v3369_v63 }
 0xc8a   :  { %3408 = vrot.lane.b32.xlu2 %v3388_v55, %s7238_s16 }
 0xc8f   :  { %v7076_v28 = vpop.eup %7075 }
 0xc90   :  { %v3372_v25 = vpop.xlane.xlu2 %3371  ;;  %v3389_v17 = vmul.f32 %v7076_v28, %v7060_v48 }
 0xc91   :  { %7077 = vrcp.f32 %v3372_v25 }
 0xc92   :  { %3410 = vrot.lane.b32.xlu0 %v3389_v17, %s7238_s16 }
 0xc97   :  { %v7078_v31 = vpop.eup %7077 }
 0xc98   :  { %v3375_v19 = vpop.xlane.xlu0 %3374  ;;  %v3390_v29 = vmul.f32 %v7078_v31, %v7062_v8  ;;  %v6161_v8 = vld [vmem:[%s10713_s3 + $0xd8] sm:$0xff] }
 0xc99   :  { %7079 = vrcp.f32 %v3375_v19 }
 0xc9a   :  { %3412 = vrot.lane.b32.xlu1 %v3390_v29, %s7238_s16 }
 0xc9f   :  { %v7080_v57 = vpop.eup %7079 }
 0xca0   :  { %v3391_v45 = vmul.f32 %v7080_v57, %v7064_v34  ;;  %v6159_v34 = vld [vmem:[%s10713_s3 + $0xc8] sm:$0xff] }
 0xca2   :  { %3414 = vrot.lane.b32.xlu2 %v3391_v45, %s7238_s16 }
 0xccc   :  { %v3403_v7 = vpop.permute.xlu2 %3402 }
 0xccd   :  { %v3425_v4 = vsel %vm681_vm11, %v3385_v56, %v3403_v7  ;;  %v6154_v56 = vld [vmem:[%s10713_s3 + $0xa0] sm:$0xff] }
 0xcce   :  { %v3433_v35 = vmul.f32 %v9192_v50, %v3425_v4 }
 0xcdc   :  { %v3401_v33 = vpop.permute.xlu1 %3400 }
 0xcdd   :  { %v3424_v18 = vsel %vm681_vm11, %v3384_v40, %v3401_v33 }
 0xcde   :  { %v3432_v21 = vmul.f32 %v9181_v3, %v3424_v18 }
 0xce0   :  { %6142 = vmatmul.msk.f32.vlgmr.msrb.gmra.mxu0 %vm607_vm9, %v3432_v21 }
 0xce4   :  { %v3409_v46 = vpop.permute.xlu2 %3408 }
 0xce5   :  { %v3428_v5 = vsel %vm681_vm11, %v3388_v55, %v3409_v46 }
 0xce6   :  { %v3436_v50 = vmul.f32 %v9225_v61, %v3428_v5 }
 0xce8   :  { %6143 = vmatmul.msk.f32.gmra.mxu0 %vm607_vm9, %v3433_v35  ;;  %v6315_v35 = vld [vmem:[%s10714_s4 + $0x240] sm:$0xf] }
 0xcec   :  { %v3405_v20 = vpop.permute.xlu0 %3404 }
 0xced   :  { %v3426_v59 = vsel %vm681_vm11, %v3386_v30, %v3405_v20  ;;  %v6151_v30 = vld [vmem:[%s10713_s3 + $0x88] sm:$0xff]  ;;  %v6809_v20 = vld [vmem:[%s10714_s4 + $0x29c] sm:$0xf0] }
 0xcee   :  { %v3434_v36 = vmul.f32 %v9203_v27, %v3426_v59  ;;  %v6316_v59 = vor.u32 %v6809_v20, %v6315_v35  ;;  %v6778_v20 = vld [vmem:[%s10714_s4 + $0x1ac] sm:$0xf] }
 0xcf0   :  { %6144 = vmatmul.msk.f32.gmra.mxu0 %vm607_vm9, %v3434_v36  ;;  %3979 = vmatpush.bf16.msra.mxu1 %v6316_v59  ;;  %v6261_v59 = vld [vmem:[%s10714_s4 + $0x208] sm:$0xf0] }
 0xcf4   :  { %v3407_v15 = vpop.permute.xlu1 %3406 }
 0xcf5   :  { %v3427_v62 = vsel %vm681_vm11, %v3387_v12, %v3407_v15 }
 0xcf6   :  { %v3435_v3 = vmul.f32 %v9214_v38, %v3427_v62 }
 0xcf8   :  { %6145 = vmatmul.msk.f32.gmra.mxu0 %vm607_vm9, %v3435_v3 }
 0xcfc   :  { %v3415_v2 = vpop.permute.xlu2 %3414 }
 0xcfd   :  { %v3431_v6 = vsel %vm681_vm11, %v3391_v45, %v3415_v2  ;;  %v6219_v2 = vld [vmem:[%s10714_s4 + $0x180] sm:$0xf] }
 0xcfe   :  { %v3439_v61 = vmul.f32 %v9254_v11, %v3431_v6  ;;  %v6163_v11 = vld [vmem:[%s10713_s3 + $0xe8] sm:$0xff] }
 0xd00   :  { %6146 = vmatmul.msk.f32.gmra.mxu0 %vm607_vm9, %v3436_v50 }
 0xd04   :  { %v3411_v49 = vpop.permute.xlu0 %3410 }
 0xd05   :  { %v3429_v32 = vsel %vm681_vm11, %v3389_v17, %v3411_v49 }
 0xd06   :  { %v3437_v27 = vmul.f32 %v9236_v23, %v3429_v32 }
 0xd08   :  { %6147 = vmatmul.msk.f32.gmra.mxu0 %vm607_vm9, %v3437_v27 }
 0xd0c   :  { %v3413_v41 = vpop.permute.xlu1 %3412 }
 0xd0d   :  { %v3430_v1 = vsel %vm681_vm11, %v3390_v29, %v3413_v41 }
 0xd0e   :  { %v3438_v38 = vmul.f32 %v9247_v43, %v3430_v1  ;;  %v6165_v43 = vld [vmem:[%s10713_s3 + $0xf8] sm:$0xff] }
 0xd0f   :  { %3552 = vmatpush.msra.mxu2 %v6165_v43  ;;  %v6339_v1 = vld [vmem:[%s10714_s4 + $0x258] sm:$0xf]  ;;  %v6800_v43 = vld [vmem:[%s10714_s4 + $0x25c] sm:$0xf] }
 0xd10   :  { %6148 = vmatmul.msk.f32.gmra.mxu0 %vm607_vm9, %v3438_v38  ;;  %v6812_v38 = vld [vmem:[%s10714_s4 + $0x2b4] sm:$0xf0] }
 0xd11   :  { %3553 = vmatpush.msra.mxu2 %v6164_v53  ;;  %v6340_v6 = vor.u32 %v6812_v38, %v6339_v1  ;;  %v6341_v53 = vld [vmem:[%s10714_s4 + $0x2b8] sm:$0xf0]  ;;  %v6902_v1 = vld [vmem:[%s10711_s1 + $0x222] ss:$0 sm:$0xff] }
 0xd13   :  { %3554 = vmatpush.msra.mxu2 %v6163_v11  ;;  %v6773_v11 = vld [vmem:[%s10714_s4 + $0x184] sm:$0xf]  ;;  %4063 = vmatpush.bf16.msrb.mxu3 %v6340_v6 }
 0xd15   :  { %3555 = vmatpush.msra.mxu2 %v6162_v9 }
 0xd17   :  { %3556 = vmatpush.msra.mxu2 %v6161_v8  ;;  %v6344_v8 = vor.u32 %v6800_v43, %v6341_v53  ;;  %v6333_v43 = vld [vmem:[%s10714_s4 + $0x2b0] sm:$0xf0] }
 0xd18   :  { %6149 = vmatmul.msk.f32.gmra.mxu0 %vm607_vm9, %v3439_v61  ;;  %v6785_v61 = vld [vmem:[%s10714_s4 + $0x1dc] sm:$0xf0] }
 0xd19   :  { %3557 = vmatpush.msra.mxu2 %v6160_v37  ;;  %v6243_v37 = vld [vmem:[%s10714_s4 + $0x198] sm:$0xf]  ;;  %4077 = vmatpush.bf16.msra.mxu0 %v6344_v8  ;;  %v6804_v8 = vld [vmem:[%s10714_s4 + $0x27c] sm:$0xf] }
 0xd1b   :  { %3558 = vmatpush.msra.mxu2 %v6159_v34  ;;  %v6788_v34 = vld [vmem:[%s10714_s4 + $0x1f4] sm:$0xf0] }
 0xd1d   :  { %3559 = vmatpush.msra.mxu2 %v6158_v54 }
 0xd1f   :  { %3560 = vmatpush.msra.mxu2 %v6157_v13 }
 0xd21   :  { %3561 = vmatpush.msra.mxu2 %v6156_v14  ;;  %v6776_v14 = vld [vmem:[%s10714_s4 + $0x19c] sm:$0xf] }
 0xd23   :  { %3562 = vmatpush.msra.mxu2 %v6155_v44 }
 0xd25   :  { %3563 = vmatpush.msra.mxu2 %v6154_v56  ;;  %v6810_v56 = vld [vmem:[%s10714_s4 + $0x2a4] sm:$0xf0] }
 0xd27   :  { %3564 = vmatpush.msra.mxu2 %v6153_v52  ;;  %v6798_v52 = vld [vmem:[%s10714_s4 + $0x24c] sm:$0xf] }
 0xd29   :  { %3565 = vmatpush.msra.mxu2 %v6152_v42  ;;  %v6325_v42 = vld [vmem:[%s10714_s4 + $0x2a8] sm:$0xf0] }
 0xd2b   :  { %3566 = vmatpush.msra.mxu2 %v6151_v30 }
 0xd2d   :  { %3567 = vmatpush.msra.mxu2 %v6150_v0 }
 0xd5d   :  { %v3481_v48 = vpop.f32.mrf.mxu0 }
 0xd65   :  { %v3484_v39 = vpop.f32.mrf.mxu0 }
 0xd6d   :  { %v3487_v24 = vpop.f32.mrf.mxu0 }
 0xd6e   :  { %3507 = vrot.lane.b32.xlu0 %v3487_v24, %s7239_s17  ;;  %v6220_v24 = vor.u32 %v6785_v61, %v6219_v2 }
 0xd70   :  { %3980 = vmatpush.bf16.msra.mxu1 %v6220_v24  ;;  %v6331_v24 = vld [vmem:[%s10714_s4 + $0x250] sm:$0xf] }
 0xd75   :  { %v3490_v23 = vpop.f32.mrf.mxu0 }
 0xd76   :  { %3509 = vrot.lane.b32.xlu0 %v3490_v23, %s7239_s17 }
 0xd7d   :  { %v3493_v26 = vpop.f32.mrf.mxu0 }
 0xd7e   :  { %3515 = vrot.lane.b32.xlu1 %v3493_v26, %s7240_s26  ;;  %v6221_v26 = vld [vmem:[%s10714_s4 + $0x1e0] sm:$0xf0] }
 0xd7f   :  { %v6224_v13 = vor.u32 %v6773_v11, %v6221_v26  ;;  %v6373_v26 = vld [vmem:[%s10714_s4 + $0x2d8] sm:$0xf0] }
 0xd85   :  { %v3496_v16 = vpop.f32.mrf.mxu0 }
 0xd86   :  { %3517 = vrot.lane.b32.xlu1 %v3496_v16, %s7240_s26  ;;  %v6244_v16 = vor.u32 %v6788_v34, %v6243_v37 }
 0xd88   :  { %4064 = vmatpush.bf16.msrb.mxu3 %v6244_v16  ;;  %v6787_v16 = vld [vmem:[%s10714_s4 + $0x1ec] sm:$0xf0] }
 0xd8d   :  { %v3499_v40 = vpop.f32.mrf.mxu0 }
 0xd8e   :  { %3523 = vrot.lane.b32.xlu2 %v3499_v40, %s7241_s27  ;;  %v6245_v40 = vld [vmem:[%s10714_s4 + $0x1f8] sm:$0xf0] }
 0xd8f   :  { %v6248_v44 = vor.u32 %v6776_v14, %v6245_v40  ;;  %v6376_v40 = vor.u32 %v6804_v8, %v6373_v26  ;;  %v6784_v8 = vld [vmem:[%s10714_s4 + $0x1dc] sm:$0xf] }
 0xd90   :  { %v6309_v26 = vld [vmem:[%s10714_s4 + $0x238] sm:$0xf0] }
 0xd91   :  { %4078 = vmatpush.bf16.msra.mxu0 %v6248_v44  ;;  %v6237_v44 = vld [vmem:[%s10714_s4 + $0x1f0] sm:$0xf0] }
 0xd95   :  { %v3502_v10 = vpop.f32.mrf.mxu0 }
 0xd96   :  { %3525 = vrot.lane.b32.xlu2 %v3502_v10, %s7241_s27  ;;  %v6323_v10 = vld [vmem:[%s10714_s4 + $0x248] sm:$0xf] }
 0xde0   :  { %v3508_v60 = vpop.permute.xlu0 %3507 }
 0xde1   :  { %v3529_v51 = vsel %vm202_vm8, %v3481_v48, %v3508_v60  ;;  %v6797_v48 = vld [vmem:[%s10714_s4 + $0x244] sm:$0xf]  ;;  %v6324_v60 = vor.u32 %v6810_v56, %v6323_v10  ;;  %v6775_v10 = vld [vmem:[%s10714_s4 + $0x194] sm:$0xf]  ;;  %v6275_v56 = vld [vmem:[%s10714_s4 + $0x1b8] sm:$0xf] }
 0xde3   :  { %4007 = vmatpush.bf16.msrb.mxu1 %v6324_v60  ;;  %v6240_v60 = vor.u32 %v6775_v10, %v6237_v44  ;;  %v6805_v10 = vld [vmem:[%s10714_s4 + $0x284] sm:$0xf] }
 0xde4   :  { %v6381_v44 = vld [vmem:[%s10714_s4 + $0x2e0] sm:$0xf0] }
 0xde8   :  { %v3524_v12 = vpop.permute.xlu2 %3523  ;;  %v3510_v25 = vpop.permute.xlu0 %3509 }
 0xde9   :  { %v3530_v17 = vsel %vm202_vm8, %v3484_v39, %v3510_v25  ;;  %v6317_v39 = vld [vmem:[%s10714_s4 + $0x2a0] sm:$0xf0]  ;;  %v6802_v25 = vld [vmem:[%s10714_s4 + $0x26c] sm:$0xf] }
 0xdea   :  { %v6320_v23 = vor.u32 %v6797_v48, %v6317_v39 }
 0xdec   :  { %3993 = vmatpush.bf16.msrb.mxu2 %v6320_v23  ;;  %v6799_v23 = vld [vmem:[%s10714_s4 + $0x254] sm:$0xf] }
 0xdf0   :  { %v3516_v63 = vpop.permute.xlu1 %3515  ;;  %v3526_v19 = vpop.permute.xlu2 %3525  ;;  %3994 = vmatpush.bf16.msrb.mxu2 %v6224_v13  ;;  %v6235_v13 = vld [vmem:[%s10714_s4 + $0x190] sm:$0xf] }
 0xdf1   :  { %v3531_v55 = vsel %vm541_vm10, %v3529_v51, %v3516_v63  ;;  %v6355_v51 = vld [vmem:[%s10714_s4 + $0x268] sm:$0xf] }
 0xdf2   :  { %v3533_v28 = vsel %vm911_vm12, %v3531_v55, %v3524_v12  ;;  %v6328_v12 = vor.u32 %v6798_v52, %v6325_v42  ;;  %v6814_v63 = vld [vmem:[%s10714_s4 + $0x2c4] sm:$0xf0]  ;;  %v6792_v52 = vld [vmem:[%s10714_s4 + $0x214] sm:$0xf0]  ;;  %v6780_v42 = vld [vmem:[%s10714_s4 + $0x1bc] sm:$0xf] }
 0xdf3   :  { %3568 = vmatmul.f32.vlgmr.msra.gmra.mxu2 %v3533_v28  ;;  %v6356_v28 = vor.u32 %v6814_v63, %v6355_v51  ;;  %v6347_v63 = vld [vmem:[%s10714_s4 + $0x260] sm:$0xf] }
 0xdf4   :  { %4021 = vmatpush.bf16.msra.mxu2 %v6328_v12  ;;  %v6276_v12 = vor.u32 %v6792_v52, %v6275_v56  ;;  %v6384_v52 = vor.u32 %v6805_v10, %v6381_v44 }
 0xdf5   :  { %4119 = vmatpush.bf16.msra.mxu3 %v6356_v28  ;;  %v6801_v28 = vld [vmem:[%s10714_s4 + $0x264] sm:$0xf] }
 0xdf8   :  { %v3518_v31 = vpop.permute.xlu1 %3517 }
 0xdf9   :  { %v3532_v29 = vsel %vm541_vm10, %v3530_v17, %v3518_v31  ;;  %v6357_v17 = vld [vmem:[%s10714_s4 + $0x2c8] sm:$0xf0]  ;;  %v6227_v31 = vld [vmem:[%s10714_s4 + $0x188] sm:$0xf] }
 0xdfa   :  { %v3534_v57 = vsel %vm911_vm12, %v3532_v29, %v3526_v19  ;;  %v6360_v19 = vor.u32 %v6802_v25, %v6357_v17  ;;  %v6786_v29 = vld [vmem:[%s10714_s4 + $0x1e4] sm:$0xf0]  ;;  %v6349_v25 = vld [vmem:[%s10714_s4 + $0x2c0] sm:$0xf0] }
 0xdfb   :  { %3571 = vmatmul.f32.gmra.mxu2 %v3534_v57  ;;  %v6774_v57 = vld [vmem:[%s10714_s4 + $0x18c] sm:$0xf]  ;;  %v6387_v17 = vld [vmem:[%s10714_s4 + $0x288] sm:$0xf] }
 0xdfc   :  { %4133 = vmatpush.bf16.msrb.mxu0 %v6360_v19  ;;  %v6806_v19 = vld [vmem:[%s10714_s4 + $0x28c] sm:$0xf] }
 0xe76   :  { %v3569_v45 = vpop.f32.mrf.mxu2 }
 0xe77   :  { %v3570_v33 = vadd.f32 %v3569_v45, %v9095_v22 }
 0xe79   :  { %v3575_v18 = vsel %vm202_vm8, %v3570_v33, 0.0 }
 0xe7a   :  { %3576 = vadd.xlane.f32.xlu0 %v3575_v18  ;;  %v6229_v18 = vld [vmem:[%s10714_s4 + $0x1e8] sm:$0xf0] }
 0xe7e   :  { %v3572_v21 = vpop.f32.mrf.mxu2 }
 0xe7f   :  { %v3573_v7 = vadd.f32 %v3572_v21, %v9104_v58  ;;  %v6259_v21 = vld [vmem:[%s10714_s4 + $0x1a8] sm:$0xf] }
 0xe81   :  { %v3578_v4 = vsel %vm202_vm8, %v3573_v7, 0.0 }
 0xe82   :  { %3579 = vadd.xlane.f32.xlu1 %v3578_v4  ;;  %v6232_v4 = vor.u32 %v6774_v57, %v6229_v18  ;;  %v6789_v18 = vld [vmem:[%s10714_s4 + $0x1fc] sm:$0xf0] }
 0xe84   :  { %4022 = vmatpush.bf16.msra.mxu2 %v6232_v4  ;;  %v6777_v4 = vld [vmem:[%s10714_s4 + $0x1a4] sm:$0xf] }
 0xeed   :  { %v3577_v22 = vpop.xlane.xlu0 %3576 }
 0xeee   :  { %v3581_v36 = vmul.f32 %v3577_v22, %v10755_v47 }
 0xef0   :  { %v9377_v15 = vsub.f32 %v3570_v33, %v3581_v36  ;;  %v6228_v33 = vor.u32 %v6786_v29, %v6227_v31  ;;  %v6264_v36 = vor.u32 %v6778_v20, %v6261_v59  ;;  %v6818_v31 = vld [vmem:[%s10714_s4 + $0x2e4] sm:$0xf0]  ;;  %v6389_v29 = vld [vmem:[%s10714_s4 + $0x2e8] sm:$0xf0] }
 0xef1   :  { %v6291_v20 = vld [vmem:[%s10714_s4 + $0x1c8] sm:$0xf] }
 0xef2   :  { %v3585_v58 = vmul.f32 %v9377_v15, %v9377_v15  ;;  %4008 = vmatpush.bf16.msrb.mxu1 %v6228_v33  ;;  %4134 = vmatpush.bf16.msrb.mxu0 %v6264_v36  ;;  %v6251_v33 = vld [vmem:[%s10714_s4 + $0x1a0] sm:$0xf]  ;;  %v6794_v59 = vld [vmem:[%s10714_s4 + $0x224] sm:$0xf0]  ;;  %v6293_v36 = vld [vmem:[%s10714_s4 + $0x228] sm:$0xf0] }
 0xef4   :  { %v3587_v62 = vsel %vm202_vm8, %v3585_v58, 0.0 }
 0xef5   :  { %3588 = vadd.xlane.f32.xlu2 %v3587_v62  ;;  %v3580_v3 = vpop.xlane.xlu1 %3579 }
 0xef6   :  { %v3582_v46 = vmul.f32 %v3580_v3, %v10755_v47 }
 0xef8   :  { %v9383_v5 = vsub.f32 %v3573_v7, %v3582_v46  ;;  %v6790_v7 = vld [vmem:[%s10714_s4 + $0x204] sm:$0xf0] }
 0xef9   :  { %v6260_v35 = vor.u32 %v6790_v7, %v6259_v21  ;;  %v6388_v21 = vor.u32 %v6818_v31, %v6387_v17  ;;  %v6392_v7 = vor.u32 %v6806_v19, %v6389_v29  ;;  %v6299_v19 = vld [vmem:[%s10714_s4 + $0x1d0] sm:$0xf] }
 0xefa   :  { %v3586_v50 = vmul.f32 %v9383_v5, %v9383_v5  ;;  %v6795_v29 = vld [vmem:[%s10714_s4 + $0x22c] sm:$0xf0] }
 0xefb   :  { %4120 = vmatpush.bf16.msra.mxu3 %v6260_v35  ;;  %v6253_v35 = vld [vmem:[%s10714_s4 + $0x200] sm:$0xf0] }
 0xefc   :  { %v3590_v49 = vsel %vm202_vm8, %v3586_v50, 0.0 }
 0xefd   :  { %3591 = vadd.xlane.f32.xlu0 %v3590_v49 }
 0xf68   :  { %v3589_v32 = vpop.xlane.xlu2 %3588 }
 0xf69   :  { %v3593_v27 = vmul.f32 %v3589_v32, %v10755_v47 }
 0xf6b   :  { %v9389_v41 = vadd.f32 1e-12, %v3593_v27 }
 0xf6d   :  { %7081 = vrsqrt.f32 %v9389_v41  ;;  %vm3603_vm11 = vweird.f32 %v9389_v41 }
 0xf70   :  { %v3592_v9 = vpop.xlane.xlu0 %3591 }
 0xf71   :  { %v3594_v54 = vmul.f32 %v3592_v9, %v10755_v47  ;;  %v6816_v9 = vld [vmem:[%s10714_s4 + $0x2d4] sm:$0xf0] }
 0xf73   :  { %v7082_v30 = vpop.eup %7081  ;;  %v3596_v0 = vadd.f32 1e-12, %v3594_v54  ;;  %v6336_v54 = vor.u32 %v6799_v23, %v6333_v43  ;;  %v6779_v23 = vld [vmem:[%s10714_s4 + $0x1b4] sm:$0xf] }
 0xf74   :  { %v3598_v55 = vmul.f32 %v7082_v30, %v9389_v41  ;;  %vm3604_vm10 = vweird.f32 %v7082_v30  ;;  %v6903_v41 = vld [vmem:[%s10711_s1 + $0x223] ss:$0 sm:$0xff]  ;;  %v6269_v43 = vld [vmem:[%s10714_s4 + $0x210] sm:$0xf0] }
 0xf75   :  { %7083 = vrsqrt.f32 %v3596_v0  ;;  %vm3605_vm12 = vmor %vm3603_vm11, %vm3604_vm10  ;;  %vm3613_vm0 = vweird.f32 %v3596_v0 }
 0xf76   :  { %v3599_v45 = vmul.f32 %v7082_v30, %v3598_v55  ;;  %v6813_v55 = vld [vmem:[%s10714_s4 + $0x2bc] sm:$0xf0] }
 0xf77   :  { %v6348_v57 = vor.u32 %v6813_v55, %v6347_v63  ;;  %v6395_v63 = vld [vmem:[%s10714_s4 + $0x290] sm:$0xf] }
 0xf78   :  { %v3600_v22 = vmul.f32 0.5, %v3599_v45  ;;  %v6352_v45 = vor.u32 %v6801_v28, %v6349_v25  ;;  %v6819_v55 = vld [vmem:[%s10714_s4 + $0x2ec] sm:$0xf0]  ;;  %v6807_v28 = vld [vmem:[%s10714_s4 + $0x294] sm:$0xf] }
 0xf79   :  { %v6397_v25 = vld [vmem:[%s10714_s4 + $0x2f0] sm:$0xf0]  ;;  %v6396_v17 = vor.u32 %v6819_v55, %v6395_v63 }
 0xf7a   :  { %v3601_v58 = vsub.f32 1.5, %v3600_v22  ;;  %v6782_v22 = vld [vmem:[%s10714_s4 + $0x1cc] sm:$0xf]  ;;  %v6400_v31 = vor.u32 %v6807_v28, %v6397_v25 }
 0xf7b   :  { %v7084_v62 = vpop.eup %7083 }
 0xf7c   :  { %v3602_v3 = vmul.f32 %v7082_v30, %v3601_v58  ;;  %v3608_v46 = vmul.f32 %v7084_v62, %v3596_v0  ;;  %vm3614_vm15 = vweird.f32 %v7084_v62  ;;  %v6236_v0 = vor.u32 %v6787_v16, %v6235_v13 }
 0xf7d   :  { %vm3615_vm1 = vmor %vm3613_vm0, %vm3614_vm15  ;;  %v6252_v58 = vor.u32 %v6789_v18, %v6251_v33  ;;  %v6312_v16 = vor.u32 %v6784_v8, %v6309_v26  ;;  %v6300_v33 = vor.u32 %v6795_v29, %v6299_v19 }
 0xf7e   :  { %v3609_v50 = vmul.f32 %v7084_v62, %v3608_v46  ;;  %v3606_v49 = vsel %vm3605_vm12, %v7082_v30, %v3602_v3  ;;  %v6277_v30 = vld [vmem:[%s10714_s4 + $0x218] sm:$0xf0]  ;;  %v6292_v3 = vor.u32 %v6794_v59, %v6291_v20  ;;  %v6296_v46 = vor.u32 %v6782_v22, %v6293_v36 }
 0xf7f   :  { %v3617_v38 = vmul.f32 %v3606_v49, %v9377_v15  ;;  %v6811_v15 = vld [vmem:[%s10714_s4 + $0x2ac] sm:$0xf0]  ;;  %v6280_v51 = vor.u32 %v6780_v42, %v6277_v30  ;;  %v6283_v42 = vld [vmem:[%s10714_s4 + $0x1c0] sm:$0xf] }
 0xf80   :  { %v3610_v32 = vmul.f32 0.5, %v3609_v50  ;;  %v6332_v34 = vor.u32 %v6811_v15, %v6331_v24  ;;  %v6363_v50 = vld [vmem:[%s10714_s4 + $0x270] sm:$0xf]  ;;  %v6793_v30 = vld [vmem:[%s10714_s4 + $0x21c] sm:$0xf0] }
 0xf81   :  { %v3620_v61 = vmul.f32 %v6902_v1, %v3617_v38  ;;  %v6815_v49 = vld [vmem:[%s10714_s4 + $0x2cc] sm:$0xf0]  ;;  %v6820_v38 = vld [vmem:[%s10714_s4 + $0x2f4] sm:$0xf0] }
 0xf82   :  { %v3611_v27 = vsub.f32 1.5, %v3610_v32  ;;  %v6803_v32 = vld [vmem:[%s10714_s4 + $0x274] sm:$0xf] }
 0xf83   :  { %v9508_v53 = vadd.f32 %v6903_v41, %v3620_v61 }
 0xf84   :  { %v3612_v2 = vmul.f32 %v7084_v62, %v3611_v27  ;;  %v6365_v27 = vld [vmem:[%s10714_s4 + $0x2d0] sm:$0xf0] }
 0xf85   :  { %10756 = vst [vmem:[#allocation5_spill] sm:$0xff] %v9508_v53  ;;  %v6368_v61 = vor.u32 %v6803_v32, %v6365_v27 }
 0xf86   :  { %v3616_v6 = vsel %vm3615_vm1, %v7084_v62, %v3612_v2  ;;  %v6256_v62 = vor.u32 %v6777_v4, %v6253_v35  ;;  %v6808_v2 = vld [vmem:[%s10714_s4 + $0x29c] sm:$0xf] }
 0xf87   :  { %v3618_v48 = vmul.f32 %v3616_v6, %v9383_v5  ;;  %v6371_v5 = vld [vmem:[%s10714_s4 + $0x278] sm:$0xf]  ;;  %v6405_v6 = vld [vmem:[%s10714_s4 + $0x2f8] sm:$0xf0] }
 0xf88   :  { %v6372_v14 = vor.u32 %v6816_v9, %v6371_v5  ;;  %v6408_v15 = vor.u32 %v6808_v2, %v6405_v6  ;;  %v6307_v5 = vld [vmem:[%s10714_s4 + $0x1d8] sm:$0xf] }
 0xf89   :  { %v3621_v39 = vmul.f32 %v6902_v1, %v3618_v48  ;;  %v6403_v1 = vld [vmem:[%s10714_s4 + $0x298] sm:$0xf]  ;;  %v6267_v48 = vld [vmem:[%s10714_s4 + $0x1b0] sm:$0xf] }
 0xf8a   :  { %v6404_v24 = vor.u32 %v6820_v38, %v6403_v1  ;;  %v6796_v9 = vld [vmem:[%s10714_s4 + $0x234] sm:$0xf0] }
 0xf8b   :  { %v9510_v11 = vadd.f32 %v6903_v41, %v3621_v39  ;;  %v6364_v41 = vor.u32 %v6815_v49, %v6363_v50  ;;  %v6791_v39 = vld [vmem:[%s10714_s4 + $0x20c] sm:$0xf0]  ;;  %v6308_v13 = vor.u32 %v6796_v9, %v6307_v5 }
 0xf8d   :  { %10757 = vst [vmem:[#allocation6_spill] sm:$0xff] %v9510_v11  ;;  %v9523_v37 = vpack.c.bf16 %v9510_v11, %v9508_v53 }
 0xf8f   :  { %6409 = vmatmul.msk.bf16.vlgmr.msra.gmra.mxu1 %vm202_vm8, %v9523_v37  ;;  %6410 = vmatmul.msk.bf16.vlgmr.msrb.gmra.mxu2 %vm202_vm8, %v9523_v37 }
 0xf90   :  { %6415 = vmatmul.msk.bf16.vlgmr.msrb.gmra.mxu3 %vm202_vm8, %v9523_v37  ;;  %6416 = vmatmul.msk.bf16.vlgmr.msra.gmra.mxu0 %vm202_vm8, %v9523_v37 }
 0xf91   :  { %4035 = vmatpush.bf16.msra.mxu1 %v6332_v34  ;;  %4049 = vmatpush.bf16.msrb.mxu2 %v6336_v54  ;;  %v6268_v34 = vor.u32 %v6791_v39, %v6267_v48  ;;  %v6272_v54 = vor.u32 %v6779_v23, %v6269_v43  ;;  %v6579_v39 = vld [vmem:[%s10715_s6 + $0x240] sm:$0xf] }
 0xf92   :  { %4175 = vmatpush.bf16.msrb.mxu3 %v6372_v14  ;;  %4189 = vmatpush.bf16.msra.mxu0 %v6376_v40  ;;  %v6379_v14 = vld [vmem:[%s10714_s4 + $0x280] sm:$0xf] }
 0xf93   :  { %v6817_v40 = vld [vmem:[%s10714_s4 + $0x2dc] sm:$0xf0] }
 0xf94   :  { %v6380_v56 = vor.u32 %v6817_v40, %v6379_v14 }
 0xf95   :  { %4036 = vmatpush.bf16.msra.mxu1 %v6236_v0  ;;  %4050 = vmatpush.bf16.msrb.mxu2 %v6240_v60  ;;  %v6781_v0 = vld [vmem:[%s10714_s4 + $0x1c4] sm:$0xf] }
 0xf96   :  { %4176 = vmatpush.bf16.msrb.mxu3 %v6276_v12  ;;  %4190 = vmatpush.bf16.msra.mxu0 %v6280_v51  ;;  %v6285_v60 = vld [vmem:[%s10714_s4 + $0x220] sm:$0xf0]  ;;  %v6284_v12 = vor.u32 %v6793_v30, %v6283_v42 }
 0xf97   :  { %v6288_v51 = vor.u32 %v6781_v0, %v6285_v60  ;;  %v9792_v30 = vld [vmem:[%s10716_s5 + $0x20] sm:$0xff] }
 0xf9f   :  { %6411 = vmatmul.msk.bf16.vlgmr.msrb.gmra.mxu1 %vm202_vm8, %v9523_v37  ;;  %6412 = vmatmul.msk.bf16.vlgmr.msra.gmra.mxu2 %vm202_vm8, %v9523_v37 }
 0xfa0   :  { %6419 = vmatmul.msk.bf16.vlgmr.msra.gmra.mxu3 %vm202_vm8, %v9523_v37  ;;  %6420 = vmatmul.msk.bf16.vlgmr.msrb.gmra.mxu0 %vm202_vm8, %v9523_v37 }
 0xfa1   :  { %4091 = vmatpush.bf16.msrb.mxu1 %v6348_v57  ;;  %4105 = vmatpush.bf16.msra.mxu2 %v6352_v45  ;;  %v6783_v57 = vld [vmem:[%s10714_s4 + $0x1d4] sm:$0xf] }
 0xfa2   :  { %4231 = vmatpush.bf16.msra.mxu3 %v6388_v21  ;;  %4245 = vmatpush.bf16.msrb.mxu0 %v6392_v7  ;;  %v6301_v45 = vld [vmem:[%s10714_s4 + $0x230] sm:$0xf0]  ;;  %v9744_v21 = vld [vmem:[%s10716_s5 + $0x18] sm:$0xff] }
 0xfa3   :  { %v6304_v18 = vor.u32 %v6783_v57, %v6301_v45  ;;  %v3682_v7 = vperm.slane %v9744_v21, 0  ;;  %v3689_v4 = vperm.slane %v9744_v21, 7  ;;  %v6845_v57 = vld [vmem:[%s10715_s6 + $0x244] sm:$0xf] }
 0xfa4   :  { %v6581_v45 = vld [vmem:[%s10715_s6 + $0x2a0] sm:$0xf0] }
 0xfa5   :  { %4092 = vmatpush.bf16.msrb.mxu1 %v6252_v58  ;;  %4106 = vmatpush.bf16.msra.mxu2 %v6256_v62  ;;  %v3683_v58 = vperm.slane %v9744_v21, 1  ;;  %v3688_v62 = vperm.slane %v9744_v21, 6 }
 0xfa6   :  { %4232 = vmatpush.bf16.msra.mxu3 %v6292_v3  ;;  %4246 = vmatpush.bf16.msrb.mxu0 %v6296_v46 }
 0xfaf   :  { %6413 = vmatmul.msk.bf16.vlgmr.msra.gmra.mxu1 %vm202_vm8, %v9523_v37  ;;  %6414 = vmatmul.msk.bf16.vlgmr.msrb.gmra.mxu2 %vm202_vm8, %v9523_v37 }
 0xfb0   :  { %6423 = vmatmul.msk.bf16.vlgmr.msrb.gmra.mxu3 %vm202_vm8, %v9523_v37  ;;  %6424 = vmatmul.msk.bf16.vlgmr.msra.gmra.mxu0 %vm202_vm8, %v9523_v37 }
 0xfb1   :  { %4147 = vmatpush.bf16.msra.mxu1 %v6364_v41  ;;  %4161 = vmatpush.bf16.msrb.mxu2 %v6368_v61 }
 0xfb2   :  { %4287 = vmatpush.bf16.msrb.mxu3 %v6404_v24  ;;  %4301 = vmatpush.bf16.msra.mxu0 %v6408_v15  ;;  %v6857_v24 = vld [vmem:[%s10715_s6 + $0x29c] sm:$0xf0] }
 0xfb3   :  { %v6580_v26 = vor.u32 %v6857_v24, %v6579_v39 }
 0xfb5   :  { %4148 = vmatpush.bf16.msra.mxu1 %v6268_v34  ;;  %4162 = vmatpush.bf16.msrb.mxu2 %v6272_v54 }
 0xfb6   :  { %4288 = vmatpush.bf16.msrb.mxu3 %v6308_v13  ;;  %4302 = vmatpush.bf16.msra.mxu0 %v6312_v16 }
 0xfbf   :  { %6417 = vmatmul.msk.bf16.vlgmr.msrb.gmra.mxu1 %vm202_vm8, %v9523_v37  ;;  %6418 = vmatmul.msk.bf16.vlgmr.msra.gmra.mxu2 %vm202_vm8, %v9523_v37 }
 0xfc0   :  { %6427 = vmatmul.msk.bf16.vlgmr.msra.gmra.mxu3 %vm202_vm8, %v9523_v37  ;;  %6428 = vmatmul.msk.bf16.vlgmr.msrb.gmra.mxu0 %vm202_vm8, %v9523_v37 }
 0xfc1   :  { %4203 = vmatpush.bf16.msrb.mxu1 %v6380_v56  ;;  %4217 = vmatpush.bf16.msra.mxu2 %v6384_v52  ;;  %v3684_v52 = vperm.slane %v9744_v21, 2 }
 0xfc5   :  { %4204 = vmatpush.bf16.msrb.mxu1 %v6284_v12  ;;  %4218 = vmatpush.bf16.msra.mxu2 %v6288_v51 }
 0xfcf   :  { %6421 = vmatmul.msk.bf16.vlgmr.msra.gmra.mxu1 %vm202_vm8, %v9523_v37  ;;  %6422 = vmatmul.msk.bf16.vlgmr.msrb.gmra.mxu2 %vm202_vm8, %v9523_v37 }
 0xfd0   :  { %6431 = vmatmul.msk.bf16.vlgmr.msrb.gmra.mxu3 %vm202_vm8, %v9523_v37  ;;  %6432 = vmatmul.msk.bf16.vlgmr.msra.gmra.mxu0 %vm202_vm8, %v9523_v37 }
 0xfd1   :  { %4259 = vmatpush.bf16.msra.mxu1 %v6396_v17  ;;  %4273 = vmatpush.bf16.msrb.mxu2 %v6400_v31  ;;  %v3693_v31 = vperm.slane %v9792_v30, 3 }
 0xfd5   :  { %4260 = vmatpush.bf16.msra.mxu1 %v6300_v33  ;;  %4274 = vmatpush.bf16.msrb.mxu2 %v6304_v18  ;;  %v6483_v33 = vld [vmem:[%s10715_s6 + $0x180] sm:$0xf]  ;;  %v3692_v18 = vperm.slane %v9792_v30, 2 }
 0xfdf   :  { %6425 = vmatmul.msk.bf16.vlgmr.msrb.gmra.mxu1 %vm202_vm8, %v9523_v37  ;;  %6426 = vmatmul.msk.bf16.vlgmr.msra.gmra.mxu2 %vm202_vm8, %v9523_v37 }
 0xfe0   :  { %5061 = vmatpush.bf16.xpose.msrb.mxu1 %v6580_v26 }
 0xfef   :  { %6429 = vmatmul.msk.bf16.vlgmr.msra.gmra.mxu1 %vm202_vm8, %v9523_v37  ;;  %6430 = vmatmul.msk.bf16.vlgmr.msrb.gmra.mxu2 %vm202_vm8, %v9523_v37 }
0x100c   :  { %v3982_v35 = vpop.f32.mrf.mxu1 }
0x100d   :  { %v9748_v20 = vadd.f32 %v3982_v35, %v3682_v7  ;;  %v4080_v59 = vpop.f32.mrf.mxu0 }
0x100e   :  { %v9750_v22 = vadd.f32 %v4080_v59, %v3689_v4 }
0x100f   :  { %v4357_v36 = vmul.f32 0.044715, %v9748_v20 }
0x1010   :  { %v4364_v37 = vmul.f32 0.044715, %v9750_v22 }
0x1011   :  { %v4405_v3 = vmul.f32 %v4357_v36, %v9748_v20  ;;  %v3685_v36 = vperm.slane %v9744_v21, 3 }
0x1012   :  { %v3996_v46 = vpop.f32.mrf.mxu2  ;;  %v4412_v50 = vmul.f32 %v4364_v37, %v9750_v22 }
0x1013   :  { %v9758_v49 = vadd.f32 %v3996_v46, %v3683_v58  ;;  %v4066_v32 = vpop.f32.mrf.mxu3  ;;  %v4453_v38 = vmul.f32 %v4405_v3, %v9748_v20  ;;  %v6584_v46 = vor.u32 %v6845_v57, %v6581_v45 }
0x1014   :  { %v9760_v27 = vadd.f32 %v4066_v32, %v3688_v62  ;;  %v3984_v1 = vpop.f32.mrf.mxu1  ;;  %v4460_v15 = vmul.f32 %v4412_v50, %v9750_v22 }
0x1015   :  { %v4358_v2 = vmul.f32 0.044715, %v9758_v49  ;;  %v9764_v6 = vadd.f32 %v3984_v1, %v3682_v7  ;;  %v4082_v41 = vpop.f32.mrf.mxu0  ;;  %v4501_v8 = vadd.f32 %v4453_v38, %v9748_v20  ;;  %v6833_v7 = vld [vmem:[%s10715_s6 + $0x1dc] sm:$0xf0]  ;;  %5075 = vmatpush.bf16.xpose.msra.mxu2 %v6584_v46  ;;  %v9831_v24 = vmul.f32 0.5, %v9758_v49 }
0x1016   :  { %v4363_v61 = vmul.f32 0.044715, %v9760_v27  ;;  %v9767_v48 = vadd.f32 %v4082_v41, %v3689_v4  ;;  %v4508_v14 = vadd.f32 %v4460_v15, %v9750_v22  ;;  %v6484_v50 = vor.u32 %v6833_v7, %v6483_v33 }
0x1017   :  { %v4406_v23 = vmul.f32 %v4358_v2, %v9758_v49  ;;  %v4381_v43 = vmul.f32 0.044715, %v9764_v6  ;;  %v4549_v0 = vmul.f32 0.7978846, %v4501_v8  ;;  %v9823_v41 = vmul.f32 0.5, %v9748_v20 }
0x1018   :  { %v4411_v5 = vmul.f32 %v4363_v61, %v9760_v27  ;;  %v4388_v9 = vmul.f32 0.044715, %v9767_v48  ;;  %v4556_v28 = vmul.f32 0.7978846, %v4508_v14  ;;  %v9826_v61 = vmul.f32 0.5, %v9750_v22  ;;  %5062 = vmatpush.bf16.xpose.msrb.mxu1 %v6484_v50 }
0x1019   :  { %v4454_v34 = vmul.f32 %v4406_v23, %v9758_v49  ;;  %v4429_v13 = vmul.f32 %v4381_v43, %v9764_v6  ;;  %7085 = vtanh.f32 %v4549_v0  ;;  %v9838_v20 = vmul.f32 0.5, %v9760_v27  ;;  %v6821_v50 = vld [vmem:[%s10715_s6 + $0x184] sm:$0xf] }
0x101a   :  { %v4459_v54 = vmul.f32 %v4411_v5, %v9760_v27  ;;  %v3998_v16 = vpop.f32.mrf.mxu2  ;;  %v4436_v40 = vmul.f32 %v4388_v9, %v9767_v48  ;;  %7087 = vtanh.f32 %v4556_v28  ;;  %v9842_v8 = vmul.f32 0.5, %v9764_v6 }
0x101b   :  { %v3999_v10 = vadd.f32 %v3998_v16, %v3683_v58  ;;  %v4068_v44 = vpop.f32.mrf.mxu3  ;;  %v4502_v51 = vadd.f32 %v4454_v34, %v9758_v49  ;;  %v4477_v55 = vmul.f32 %v4429_v13, %v9764_v6 }
0x101c   :  { %v9786_v56 = vadd.f32 %v4068_v44, %v3688_v62  ;;  %v4010_v42 = vpop.f32.mrf.mxu1  ;;  %v4507_v63 = vadd.f32 %v4459_v54, %v9760_v27  ;;  %v4484_v25 = vmul.f32 %v4436_v40, %v9767_v48  ;;  %v9847_v54 = vmul.f32 0.5, %v9767_v48 }
0x101d   :  { %v4382_v60 = vmul.f32 0.044715, %v3999_v10  ;;  %v4136_v12 = vpop.f32.mrf.mxu0  ;;  %v9800_v29 = vadd.f32 %v4010_v42, %v3684_v52  ;;  %v4550_v4 = vmul.f32 0.7978846, %v4502_v51  ;;  %v4525_v59 = vadd.f32 %v4477_v55, %v9764_v6 }
0x101e   :  { %v4387_v17 = vmul.f32 0.044715, %v9786_v56  ;;  %v4555_v35 = vmul.f32 0.7978846, %v4507_v63  ;;  %v4532_v58 = vadd.f32 %v4484_v25, %v9767_v48  ;;  %v9820_v38 = vadd.f32 %v4136_v12, %v3693_v31 }
0x101f   :  { %v4430_v19 = vmul.f32 %v4382_v60, %v3999_v10  ;;  %v4359_v1 = vmul.f32 0.044715, %v9800_v29  ;;  %7089 = vtanh.f32 %v4550_v4  ;;  %v4573_v15 = vmul.f32 0.7978846, %v4525_v59  ;;  %v7086_v5 = vpop.eup %7085 }
0x1020   :  { %v4435_v37 = vmul.f32 %v4387_v17, %v9786_v56  ;;  %7091 = vtanh.f32 %v4555_v35  ;;  %v4580_v22 = vmul.f32 0.7978846, %v4532_v58  ;;  %v4368_v34 = vmul.f32 0.044715, %v9820_v38  ;;  %v7088_v14 = vpop.eup %7087 }
0x1021   :  { %v4478_v32 = vmul.f32 %v4430_v19, %v3999_v10  ;;  %v4407_v26 = vmul.f32 %v4359_v1, %v9800_v29  ;;  %v9849_v13 = vmul.f32 0.5, %v3999_v10  ;;  %7093 = vtanh.f32 %v4573_v15 }
0x1022   :  { %v4024_v62 = vpop.f32.mrf.mxu2  ;;  %v4483_v9 = vmul.f32 %v4435_v37, %v9786_v56  ;;  %v3686_v44 = vperm.slane %v9744_v21, 4  ;;  %v9858_v42 = vadd.f32 1.0, %v7086_v5  ;;  %7095 = vtanh.f32 %v4580_v22 }
0x1023   :  { %v4122_v3 = vpop.f32.mrf.mxu3  ;;  %v9835_v23 = vadd.f32 %v4024_v62, %v3685_v36  ;;  %v4526_v49 = vadd.f32 %v4478_v32, %v3999_v10  ;;  %v9861_v48 = vmul.f32 0.5, %v9786_v56  ;;  %v4455_v51 = vmul.f32 %v4407_v26, %v9800_v29  ;;  %v6485_v32 = vld [vmem:[%s10715_s6 + $0x1e0] sm:$0xf0] }
0x1024   :  { %v4012_v2 = vpop.f32.mrf.mxu1  ;;  %v9828_v39 = vadd.f32 %v4122_v3, %v3692_v18  ;;  %v4531_v10 = vadd.f32 %v4483_v9, %v9786_v56  ;;  %v4416_v63 = vmul.f32 %v4368_v34, %v9820_v38  ;;  %v9867_v25 = vadd.f32 1.0, %v7088_v14 }
0x1025   :  { %v4138_v43 = vpop.f32.mrf.mxu0  ;;  %v4360_v40 = vmul.f32 0.044715, %v9835_v23  ;;  %v9855_v6 = vadd.f32 %v4012_v2, %v3684_v52  ;;  %v7090_v60 = vpop.eup %7089  ;;  %v4574_v12 = vmul.f32 0.7978846, %v4526_v49  ;;  %v9870_v17 = vmul.f32 0.5, %v9800_v29 }
0x1026   :  { %v4367_v27 = vmul.f32 0.044715, %v9828_v39  ;;  %v9852_v16 = vadd.f32 %v4138_v43, %v3693_v31  ;;  %v7092_v28 = vpop.eup %7091  ;;  %v9882_v4 = vadd.f32 1.0, %v7090_v60  ;;  %v4579_v35 = vmul.f32 0.7978846, %v4531_v10 }
0x1027   :  { %v4408_v57 = vmul.f32 %v4360_v40, %v9835_v23  ;;  %v4383_v45 = vmul.f32 0.044715, %v9855_v6  ;;  %v9885_v59 = vmul.f32 0.5, %v9820_v38  ;;  %v9888_v58 = vmul.f32 0.5, %v9835_v23 }
0x1028   :  { %v4392_v52 = vmul.f32 0.044715, %v9852_v16  ;;  %v4415_v31 = vmul.f32 %v4367_v27, %v9828_v39  ;;  %v9890_v37 = vadd.f32 1.0, %v7092_v28  ;;  %7097 = vtanh.f32 %v4574_v12 }
0x1029   :  { %v4503_v62 = vadd.f32 %v4455_v51, %v9800_v29  ;;  %v4464_v3 = vmul.f32 %v4416_v63, %v9820_v38  ;;  %v4456_v5 = vmul.f32 %v4408_v57, %v9835_v23  ;;  %v4431_v22 = vmul.f32 %v4383_v45, %v9855_v6 }
0x102a   :  { %v4026_v19 = vpop.f32.mrf.mxu2  ;;  %v4440_v33 = vmul.f32 %v4392_v52, %v9852_v16  ;;  %v4463_v2 = vmul.f32 %v4415_v31, %v9828_v39  ;;  %v3697_v49 = vperm.slane %v9792_v30, 7  ;;  %7099 = vtanh.f32 %v4579_v35  ;;  %v6858_v52 = vld [vmem:[%s10715_s6 + $0x2a4] sm:$0xf0] }
0x102b   :  { %v4124_v0 = vpop.f32.mrf.mxu3  ;;  %v9903_v15 = vadd.f32 %v4026_v19, %v3685_v36  ;;  %v9912_v26 = vmul.f32 0.5, %v9828_v39  ;;  %v6488_v36 = vor.u32 %v6821_v50, %v6485_v32  ;;  %v4512_v14 = vadd.f32 %v4464_v3, %v9820_v38 }
0x102c   :  { %v4038_v55 = vpop.f32.mrf.mxu1  ;;  %v9873_v56 = vadd.f32 %v4124_v0, %v3692_v18  ;;  %v7094_v18 = vpop.eup %7093  ;;  %v4488_v9 = vmul.f32 %v4440_v33, %v9852_v16  ;;  %v6587_v0 = vld [vmem:[%s10715_s6 + $0x248] sm:$0xf]  ;;  %v4551_v60 = vmul.f32 0.7978846, %v4503_v62  ;;  %v4511_v12 = vadd.f32 %v4463_v2, %v9828_v39 }
0x102d   :  { %v9880_v7 = vadd.f32 %v4038_v55, %v3686_v44  ;;  %v4192_v46 = vpop.f32.mrf.mxu0  ;;  %v7096_v1 = vpop.eup %7095  ;;  %v4669_v10 = vadd.f32 1.0, %v7094_v18  ;;  %v4384_v51 = vmul.f32 0.044715, %v9903_v15  ;;  %5076 = vmatpush.bf16.xpose.msra.mxu2 %v6488_v36  ;;  %v4504_v55 = vadd.f32 %v4456_v5, %v9835_v23 }
0x102e   :  { %v4391_v29 = vmul.f32 0.044715, %v9873_v56  ;;  %v9915_v27 = vadd.f32 1.0, %v7096_v1  ;;  %v9918_v40 = vadd.f32 %v4192_v46, %v3697_v49  ;;  %v7098_v38 = vpop.eup %7097  ;;  %v9931_v28 = vmul.f32 0.5, %v9855_v6 }
0x102f   :  { %v4361_v43 = vmul.f32 0.044715, %v9880_v7  ;;  %v4479_v31 = vmul.f32 %v4431_v22, %v9855_v6  ;;  %v4536_v19 = vadd.f32 %v4488_v9, %v9852_v16  ;;  %v4693_v45 = vmul.f32 %v9858_v42, %v9823_v41 }
0x1030   :  { %v4439_v34 = vmul.f32 %v4391_v29, %v9873_v56  ;;  %v4372_v57 = vmul.f32 0.044715, %v9918_v40  ;;  %v4717_v33 = vmul.f32 %v4669_v10, %v9842_v8  ;;  %v4560_v18 = vmul.f32 0.7978846, %v4512_v14  ;;  %v7100_v46 = vpop.eup %7099 }
0x1031   :  { %v4409_v63 = vmul.f32 %v4361_v43, %v9880_v7  ;;  %v9941_v23 = vmul.f32 0.5, %v9852_v16  ;;  %v6588_v62 = vor.u32 %v6858_v52, %v6587_v0  ;;  %v3687_v3 = vperm.slane %v9744_v21, 5  ;;  %v6491_v52 = vld [vmem:[%s10715_s6 + $0x188] sm:$0xf] }
0x1032   :  { %v4487_v39 = vmul.f32 %v4439_v34, %v9873_v56  ;;  %v4052_v35 = vpop.f32.mrf.mxu2  ;;  %v4559_v50 = vmul.f32 0.7978846, %v4511_v12  ;;  %v4432_v32 = vmul.f32 %v4384_v51, %v9903_v15  ;;  %v4741_v2 = vpack.c.bf16 %v4717_v33, %v4693_v45  ;;  %v6846_v12 = vld [vmem:[%s10715_s6 + $0x24c] sm:$0xf] }
0x1033   :  { %10758 = vst [vmem:[#allocation7_spill] sm:$0xff] %v9941_v23  ;;  %v4457_v1 = vmul.f32 %v4409_v63, %v9880_v7  ;;  %v4178_v29 = vpop.f32.mrf.mxu3  ;;  %7101 = vtanh.f32 %v4551_v60  ;;  %v4527_v41 = vadd.f32 %v4479_v31, %v9855_v6  ;;  %v4584_v8 = vmul.f32 0.7978846, %v4536_v19  ;;  %5089 = vmatpush.bf16.xpose.msra.mxu3 %v6588_v62  ;;  %v6589_v51 = vld [vmem:[%s10715_s6 + $0x2a8] sm:$0xf0] }
0x1034   :  { %v4040_v43 = vpop.f32.mrf.mxu1  ;;  %v9949_v16 = vadd.f32 %v4052_v35, %v3687_v3  ;;  %v4552_v5 = vmul.f32 0.7978846, %v4504_v55  ;;  %v4535_v22 = vadd.f32 %v4487_v39, %v9873_v56  ;;  %v4420_v9 = vmul.f32 %v4372_v57, %v9918_v40  ;;  %5063 = vmatmul.bf16.vlgmr.msrb.gmra.mxu1 %v4741_v2 }
0x1035   :  { %v4194_v42 = vpop.f32.mrf.mxu0  ;;  %v3696_v34 = vperm.slane %v9792_v30, 6  ;;  %7103 = vtanh.f32 %v4560_v18  ;;  %v9957_v6 = vadd.f32 %v4040_v43, %v3686_v44  ;;  %v4670_v14 = vadd.f32 1.0, %v7098_v38  ;;  %v6834_v38 = vld [vmem:[%s10715_s6 + $0x1e4] sm:$0xf0] }
0x1036   :  { %v4362_v36 = vmul.f32 0.044715, %v9949_v16  ;;  %v9959_v10 = vadd.f32 1.0, %v7100_v46  ;;  %7105 = vtanh.f32 %v4559_v50  ;;  %v4480_v0 = vmul.f32 %v4432_v32, %v9903_v15 }
0x1037   :  { %v4505_v60 = vadd.f32 %v4457_v1, %v9880_v7  ;;  %v4575_v63 = vmul.f32 0.7978846, %v4527_v41  ;;  %7107 = vtanh.f32 %v4584_v8  ;;  %v9969_v44 = vadd.f32 %v4194_v42, %v3697_v49 }
0x1038   :  { %7109 = vtanh.f32 %v4552_v5  ;;  %v4583_v55 = vmul.f32 0.7978846, %v4535_v22  ;;  %v4468_v31 = vmul.f32 %v4420_v9, %v9918_v40  ;;  %v9978_v19 = vadd.f32 %v4178_v29, %v3696_v34 }
0x1039   :  { %v7102_v39 = vpop.eup %7101  ;;  %v4410_v57 = vmul.f32 %v4362_v36, %v9949_v16  ;;  %v4385_v49 = vmul.f32 0.044715, %v9957_v6  ;;  %v4694_v45 = vmul.f32 %v9882_v4, %v9831_v24  ;;  %v4718_v33 = vmul.f32 %v4670_v14, %v9849_v13 }
0x103a   :  { %v4528_v35 = vadd.f32 %v4480_v0, %v9903_v15  ;;  %v4553_v18 = vmul.f32 0.7978846, %v4505_v60  ;;  %v6592_v62 = vor.u32 %v6846_v12, %v6589_v51  ;;  %v6492_v46 = vor.u32 %v6834_v38, %v6491_v52  ;;  %v4054_v50 = vpop.f32.mrf.mxu2  ;;  %v6822_v52 = vld [vmem:[%s10715_s6 + $0x18c] sm:$0xf] }
0x103b   :  { %v7104_v32 = vpop.eup %7103  ;;  %7111 = vtanh.f32 %v4575_v63  ;;  %v9987_v1 = vmul.f32 0.5, %v9903_v15  ;;  %v4396_v2 = vmul.f32 0.044715, %v9969_v44  ;;  %v4742_v29 = vpack.c.bf16 %v4718_v33, %v4694_v45  ;;  %v4180_v4 = vpop.f32.mrf.mxu3  ;;  %v6493_v38 = vld [vmem:[%s10715_s6 + $0x1e8] sm:$0xf0] }
0x103c   :  { %v7106_v43 = vpop.eup %7105  ;;  %v9991_v41 = vmul.f32 0.5, %v9873_v56  ;;  %7113 = vtanh.f32 %v4583_v55  ;;  %v9994_v24 = vmul.f32 0.5, %v9880_v7  ;;  %v4371_v13 = vmul.f32 0.044715, %v9978_v19  ;;  %5103 = vmatpush.bf16.xpose.msrb.mxu0 %v6592_v62  ;;  %5090 = vmatpush.bf16.xpose.msra.mxu3 %v6492_v46  ;;  %v4094_v8 = vpop.f32.mrf.mxu1 }
0x103d   :  { %v7108_v42 = vpop.eup %7107  ;;  %v4516_v15 = vadd.f32 %v4468_v31, %v9918_v40  ;;  %v4458_v5 = vmul.f32 %v4410_v57, %v9949_v16  ;;  %v4433_v22 = vmul.f32 %v4385_v49, %v9957_v6  ;;  %5077 = vmatmul.bf16.vlgmr.msra.gmra.mxu2 %v4742_v29  ;;  %v10730_v56 = vperm.slane %v9792_v30, 0  ;;  %v4248_v9 = vpop.f32.mrf.mxu0 }
0x103e   :  { %v10001_v36 = vpop.eup %7109  ;;  %v10003_v7 = vadd.f32 1.0, %v7104_v32  ;;  %v4576_v14 = vmul.f32 0.7978846, %v4528_v35  ;;  %7115 = vtanh.f32 %v4553_v18  ;;  %v10006_v0 = vmul.f32 0.5, %v9918_v40  ;;  %v6595_v35 = vld [vmem:[%s10715_s6 + $0x250] sm:$0xf] }
0x103f   :  { %v10008_v60 = vadd.f32 1.0, %v7106_v43  ;;  %v4444_v12 = vmul.f32 %v4396_v2, %v9969_v44  ;;  %v10013_v51 = vadd.f32 %v4054_v50, %v3687_v3  ;;  %v10015_v63 = vadd.f32 %v4180_v4, %v3696_v34  ;;  %v10035_v3 = vld [vmem:[%s10716_s5 + $0x28] sm:$0xff]  ;;  %v6859_v18 = vld [vmem:[%s10715_s6 + $0x2ac] sm:$0xf0]  ;;  %v6603_v2 = vld [vmem:[%s10715_s6 + $0x258] sm:$0xf] }
0x1040   :  { %10759 = vst [vmem:[#allocation3_spill] sm:$0xff] %v10006_v0  ;;  %v10023_v40 = vadd.f32 1.0, %v7108_v42  ;;  %v10026_v55 = vmul.f32 0.5, %v9949_v16  ;;  %v4419_v31 = vmul.f32 %v4371_v13, %v9978_v19  ;;  %v10030_v21 = vmul.f32 0.5, %v9957_v6  ;;  %v6860_v4 = vld [vmem:[%s10715_s6 + $0x2b4] sm:$0xf0] }
0x1041   :  { %v7112_v34 = vpop.eup %7111  ;;  %v4564_v57 = vmul.f32 0.7978846, %v4516_v15  ;;  %v4506_v49 = vadd.f32 %v4458_v5, %v9949_v16  ;;  %v4481_v45 = vmul.f32 %v4433_v22, %v9957_v6  ;;  %v10041_v33 = vadd.f32 %v4094_v8, %v10730_v56 }
0x1042   :  { %10760 = vst [vmem:[#allocation4_spill] sm:$0xff] %v10023_v40  ;;  %v7114_v62 = vpop.eup %7113  ;;  %v10050_v46 = vmul.f32 0.5, %v9978_v19  ;;  %v10053_v16 = vmul.f32 0.5, %v9969_v44  ;;  %v6496_v50 = vor.u32 %v6822_v52, %v6493_v38  ;;  %v4647_v32 = vadd.f32 1.0, %v7102_v39  ;;  %v4108_v22 = vpop.f32.mrf.mxu2 }
0x1043   :  { %7117 = vtanh.f32 %v4576_v14  ;;  %v4492_v29 = vmul.f32 %v4444_v12, %v9969_v44  ;;  %v4386_v43 = vmul.f32 0.044715, %v10013_v51  ;;  %v4395_v13 = vmul.f32 0.044715, %v10015_v63 }
0x1044   :  { %10761 = vst [vmem:[#allocation8_spill] sm:$0xff] %v10050_v46  ;;  %v7116_v8 = vpop.eup %7115  ;;  %v4467_v42 = vmul.f32 %v4419_v31, %v9978_v19  ;;  %v3701_v39 = vperm.slane %v10035_v3, 3  ;;  %5104 = vmatpush.bf16.xpose.msrb.mxu0 %v6496_v50  ;;  %v4671_v15 = vadd.f32 1.0, %v7112_v34  ;;  %v6596_v5 = vor.u32 %v6859_v18, %v6595_v35  ;;  %v4096_v11 = vpop.f32.mrf.mxu1 }
0x1045   :  { %10762 = vst [vmem:[#allocation9_spill] sm:$0xff] %v10053_v16  ;;  %7119 = vtanh.f32 %v4564_v57  ;;  %v4554_v14 = vmul.f32 0.7978846, %v4506_v49  ;;  %v4529_v12 = vadd.f32 %v4481_v45, %v9957_v6  ;;  %v4365_v52 = vmul.f32 0.044715, %v10041_v33  ;;  %v4250_v6 = vpop.f32.mrf.mxu0 }
0x1046   :  { %v10068_v38 = vadd.f32 1.0, %v7114_v62  ;;  %v4695_v56 = vmul.f32 %v4647_v32, %v9870_v17  ;;  %v4719_v47 = vmul.f32 %v4671_v15, %v9931_v28  ;;  %5117 = vmatpush.bf16.xpose.msra.mxu1 %v6596_v5  ;;  %v6604_v31 = vor.u32 %v6860_v4, %v6603_v2  ;;  %v4234_v28 = vpop.f32.mrf.mxu3 }
0x1047   :  { %v10072_v53 = vadd.f32 1.0, %v7116_v8  ;;  %v4540_v34 = vadd.f32 %v4492_v29, %v9969_v44  ;;  %v4434_v57 = vmul.f32 %v4386_v43, %v10013_v51  ;;  %v4443_v49 = vmul.f32 %v4395_v13, %v10015_v63 }
0x1048   :  { %v4515_v45 = vadd.f32 %v4467_v42, %v9978_v19  ;;  %v10078_v35 = vadd.f32 %v4248_v9, %v3701_v39  ;;  %v4743_v18 = vpack.c.bf16 %v4719_v47, %v4695_v56  ;;  %5145 = vmatpush.bf16.xpose.msrb.mxu3 %v6604_v31  ;;  %v10735_v17 = vperm.slane %v9792_v30, 1 }
0x1049   :  { %v7118_v62 = vpop.eup %7117  ;;  %7121 = vtanh.f32 %v4554_v14  ;;  %v4577_v50 = vmul.f32 0.7978846, %v4529_v12  ;;  %v10082_v32 = vmul.f32 0.5, %v10013_v51  ;;  %v4413_v44 = vmul.f32 %v4365_v52, %v10041_v33  ;;  %v6848_v14 = vld [vmem:[%s10715_s6 + $0x25c] sm:$0xf] }
0x104a   :  { %5091 = vmatmul.bf16.vlgmr.msra.gmra.mxu3 %v4743_v18  ;;  %v10087_v2 = vadd.f32 %v4108_v22, %v10735_v17  ;;  %v10734_v19 = vperm.slane %v10035_v3, 2  ;;  %v10763_v47 = vperm.slane %v9792_v30, 0  ;;  %v10094_v9 = vadd.f32 %v4250_v6, %v3701_v39  ;;  %v6847_v39 = vld [vmem:[%s10715_s6 + $0x254] sm:$0xf]  ;;  %v6605_v6 = vld [vmem:[%s10715_s6 + $0x2b8] sm:$0xf0]  ;;  %v4110_v18 = vpop.f32.mrf.mxu2 }
0x104b   :  { %v7120_v29 = vpop.eup %7119  ;;  %v4588_v43 = vmul.f32 0.7978846, %v4540_v34  ;;  %v4482_v13 = vmul.f32 %v4434_v57, %v10013_v51  ;;  %v10098_v4 = vmul.f32 0.5, %v10015_v63  ;;  %v4491_v8 = vmul.f32 %v4443_v49, %v10015_v63  ;;  %v6597_v22 = vld [vmem:[%s10715_s6 + $0x2b0] sm:$0xf0] }
0x104c   :  { %v10092_v56 = vadd.f32 %v4096_v11, %v10763_v47  ;;  %v4376_v42 = vmul.f32 0.044715, %v10078_v35  ;;  %v4366_v15 = vmul.f32 0.044715, %v10087_v2  ;;  %v10105_v5 = vadd.f32 %v4234_v28, %v10734_v19  ;;  %v6835_v47 = vld [vmem:[%s10715_s6 + $0x1ec] sm:$0xf0] }
0x104d   :  { %10764 = vst [vmem:[#allocation10_spill] sm:$0xff] %v10098_v4  ;;  %v4648_v11 = vadd.f32 1.0, %v10001_v36  ;;  %v4563_v12 = vmul.f32 0.7978846, %v4515_v45  ;;  %7123 = vtanh.f32 %v4577_v50  ;;  %v4672_v31 = vadd.f32 1.0, %v7118_v62 }
0x104e   :  { %v4389_v52 = vmul.f32 0.044715, %v10092_v56  ;;  %v4461_v34 = vmul.f32 %v4413_v44, %v10041_v33  ;;  %v4414_v36 = vmul.f32 %v4366_v15, %v10087_v2  ;;  %v4375_v57 = vmul.f32 0.044715, %v10105_v5  ;;  %v6499_v44 = vld [vmem:[%s10715_s6 + $0x190] sm:$0xf]  ;;  %v4236_v16 = vpop.f32.mrf.mxu3 }
0x104f   :  { %v4400_v49 = vmul.f32 0.044715, %v10094_v9  ;;  %v7122_v28 = vpop.eup %7121  ;;  %7125 = vtanh.f32 %v4588_v43  ;;  %v4530_v45 = vadd.f32 %v4482_v13, %v10013_v51  ;;  %v4539_v50 = vadd.f32 %v4491_v8, %v10015_v63  ;;  %v6507_v63 = vld [vmem:[%s10715_s6 + $0x198] sm:$0xf]  ;;  %v4150_v8 = vpop.f32.mrf.mxu1 }
0x1050   :  { %v4437_v62 = vmul.f32 %v4389_v52, %v10092_v56  ;;  %v4424_v15 = vmul.f32 %v4376_v42, %v10078_v35  ;;  %v4462_v19 = vmul.f32 %v4414_v36, %v10087_v2  ;;  %v4423_v43 = vmul.f32 %v4375_v57, %v10105_v5  ;;  %v6836_v13 = vld [vmem:[%s10715_s6 + $0x1f4] sm:$0xf0] }
0x1051   :  { %v4696_v51 = vmul.f32 %v4648_v11, %v9888_v58  ;;  %v4448_v52 = vmul.f32 %v4400_v49, %v10094_v9  ;;  %v4720_v17 = vmul.f32 %v4672_v31, %v9987_v1  ;;  %v6600_v42 = vor.u32 %v6847_v39, %v6597_v22 }
0x1052   :  { %v6608_v0 = vor.u32 %v6848_v14, %v6605_v6  ;;  %v4509_v36 = vadd.f32 %v4461_v34, %v10041_v33  ;;  %v4510_v57 = vadd.f32 %v4462_v19, %v10087_v2  ;;  %v4485_v58 = vmul.f32 %v4437_v62, %v10092_v56 }
0x1053   :  { %v6500_v11 = vor.u32 %v6835_v47, %v6499_v44  ;;  %v7124_v4 = vpop.eup %7123  ;;  %v4471_v46 = vmul.f32 %v4423_v43, %v10105_v5  ;;  %v4744_v40 = vpack.c.bf16 %v4720_v17, %v4696_v51  ;;  %5131 = vmatpush.bf16.xpose.msrb.mxu2 %v6600_v42  ;;  %v6508_v23 = vor.u32 %v6836_v13, %v6507_v63  ;;  %v6509_v47 = vld [vmem:[%s10715_s6 + $0x1f8] sm:$0xf0]  ;;  %v4164_v13 = vpop.f32.mrf.mxu2 }
0x1054   :  { %5159 = vmatpush.bf16.xpose.msra.mxu0 %v6608_v0  ;;  %v3694_v49 = vperm.slane %v9792_v30, 4  ;;  %v10151_v1 = vadd.f32 1.0, %v7120_v29  ;;  %7127 = vtanh.f32 %v4563_v12  ;;  %v4578_v39 = vmul.f32 0.7978846, %v4530_v45  ;;  %v6501_v12 = vld [vmem:[%s10715_s6 + $0x1f0] sm:$0xf0] }
0x1055   :  { %v10154_v22 = vmul.f32 0.5, %v10041_v33  ;;  %5118 = vmatpush.bf16.xpose.msra.mxu1 %v6500_v11  ;;  %v7126_v19 = vpop.eup %7125  ;;  %v4587_v14 = vmul.f32 0.7978846, %v4539_v50  ;;  %v4496_v31 = vmul.f32 %v4448_v52, %v10094_v9  ;;  %5105 = vmatmul.bf16.vlgmr.msrb.gmra.mxu0 %v4744_v40  ;;  %v10765_v17 = vperm.slane %v9792_v30, 1  ;;  %v6823_v33 = vld [vmem:[%s10715_s6 + $0x194] sm:$0xf] }
0x1056   :  { %5146 = vmatpush.bf16.xpose.msrb.mxu3 %v6508_v23  ;;  %v10766_v34 = vperm.slane %v10035_v3, 2  ;;  %v4557_v6 = vmul.f32 0.7978846, %v4509_v36  ;;  %v10172_v40 = vmul.f32 0.5, %v10078_v35  ;;  %v4533_v23 = vadd.f32 %v4485_v58, %v10092_v56 }
0x1057   :  { %v10159_v0 = vadd.f32 %v4110_v18, %v10765_v17  ;;  %v10177_v18 = vadd.f32 %v4150_v8, %v3694_v49  ;;  %v4673_v45 = vadd.f32 1.0, %v7124_v4  ;;  %v4472_v50 = vmul.f32 %v4424_v15, %v10078_v35  ;;  %v4152_v58 = vpop.f32.mrf.mxu1 }
0x1058   :  { %v10163_v29 = vadd.f32 %v4236_v16, %v10766_v34  ;;  %v6824_v16 = vld [vmem:[%s10715_s6 + $0x19c] sm:$0xf]  ;;  %v4558_v62 = vmul.f32 0.7978846, %v4510_v57  ;;  %v4519_v44 = vadd.f32 %v4471_v46, %v10105_v5  ;;  %v10187_v43 = vadd.f32 1.0, %v7122_v28 }
0x1059   :  { %v10189_v51 = vadd.f32 1.0, %v7126_v19  ;;  %7129 = vtanh.f32 %v4578_v39  ;;  %v4390_v63 = vmul.f32 0.044715, %v10159_v0  ;;  %v4544_v4 = vadd.f32 %v4496_v31, %v10094_v9  ;;  %v6611_v46 = vld [vmem:[%s10715_s6 + $0x260] sm:$0xf] }
0x105a   :  { %7131 = vtanh.f32 %v4587_v14  ;;  %v4399_v15 = vmul.f32 0.044715, %v10163_v29  ;;  %v6504_v8 = vor.u32 %v6823_v33, %v6501_v12  ;;  %v6861_v28 = vld [vmem:[%s10715_s6 + $0x2bc] sm:$0xf0]  ;;  %v7128_v52 = vpop.eup %7127  ;;  %v4581_v42 = vmul.f32 0.7978846, %v4533_v23 }
0x105b   :  { %7133 = vtanh.f32 %v4557_v6  ;;  %v4369_v36 = vmul.f32 0.044715, %v10177_v18  ;;  %v6512_v57 = vor.u32 %v6824_v16, %v6509_v47  ;;  %v4520_v11 = vadd.f32 %v4472_v50, %v10078_v35  ;;  %v6862_v6 = vld [vmem:[%s10715_s6 + $0x2c4] sm:$0xf0] }
0x105c   :  { %7135 = vtanh.f32 %v4558_v62  ;;  %v4567_v39 = vmul.f32 0.7978846, %v4519_v44  ;;  %5132 = vmatpush.bf16.xpose.msrb.mxu2 %v6504_v8  ;;  %v4721_v19 = vmul.f32 %v4673_v45, %v10030_v21  ;;  %v4438_v14 = vmul.f32 %v4390_v63, %v10159_v0  ;;  %v6619_v21 = vld [vmem:[%s10715_s6 + $0x268] sm:$0xf] }
0x105d   :  { %5160 = vmatpush.bf16.xpose.msra.mxu0 %v6512_v57  ;;  %v4697_v31 = vmul.f32 %v10072_v53, %v9994_v24  ;;  %v4723_v17 = vmul.f32 %v9959_v10, %v9861_v48  ;;  %v6612_v34 = vor.u32 %v6861_v28, %v6611_v46  ;;  %v4592_v33 = vmul.f32 0.7978846, %v4544_v4  ;;  %v4304_v10 = vpop.f32.mrf.mxu0  ;;  %v10230_v4 = vpop.f32.mrf.mxu3 }
0x105e   :  { %v4447_v12 = vmul.f32 %v4399_v15, %v10163_v29  ;;  %v4699_v35 = vmul.f32 %v9890_v37, %v9838_v20  ;;  %7137 = vtanh.f32 %v4581_v42  ;;  %v4417_v53 = vmul.f32 %v4369_v36, %v10177_v18 }
0x105f   :  { %v7130_v23 = vpop.eup %7129  ;;  %v3705_v48 = vperm.slane %v10035_v3, 7  ;;  %v4745_v24 = vpack.c.bf16 %v4721_v19, %v4697_v31  ;;  %5173 = vmatpush.bf16.xpose.msrb.mxu1 %v6612_v34  ;;  %v10219_v45 = vadd.f32 1.0, %v7128_v52  ;;  %v10222_v20 = vmul.f32 0.5, %v10087_v2 }
0x1060   :  { %v7132_v16 = vpop.eup %7131  ;;  %7139 = vtanh.f32 %v4567_v39  ;;  %v4747_v37 = vpack.c.bf16 %v4723_v17, %v4699_v35  ;;  %v10224_v62 = vmul.f32 0.7978846, %v4520_v11  ;;  %v10227_v44 = vmul.f32 0.5, %v10092_v56  ;;  %v4206_v17 = vpop.f32.mrf.mxu1 }
0x1061   :  { %v7134_v50 = vpop.eup %7133  ;;  %v4486_v47 = vmul.f32 %v4438_v14, %v10159_v0  ;;  %5119 = vmatmul.bf16.vlgmr.msra.gmra.mxu1 %v4745_v24  ;;  %v6620_v63 = vor.u32 %v6862_v6, %v6619_v21  ;;  %v10233_v8 = vmul.f32 0.5, %v10094_v9  ;;  %7141 = vtanh.f32 %v4592_v33  ;;  %v4166_v9 = vpop.f32.mrf.mxu2 }
0x1062   :  { %v7136_v15 = vpop.eup %7135  ;;  %v4495_v2 = vmul.f32 %v4447_v12, %v10163_v29  ;;  %5147 = vmatmul.bf16.vlgmr.msrb.gmra.mxu3 %v4747_v37  ;;  %v3695_v46 = vperm.slane %v9792_v30, 5  ;;  %v4674_v28 = vadd.f32 1.0, %v7130_v23  ;;  %v4465_v56 = vmul.f32 %v4417_v53, %v10177_v18  ;;  %v6849_v23 = vld [vmem:[%s10715_s6 + $0x264] sm:$0xf]  ;;  %v6621_v37 = vld [vmem:[%s10715_s6 + $0x2c8] sm:$0xf0] }
0x1063   :  { %v10240_v52 = vadd.f32 %v4304_v10, %v3705_v48  ;;  %5201 = vmatpush.bf16.xpose.msra.mxu3 %v6620_v63  ;;  %v10244_v42 = vadd.f32 %v4152_v58, %v3694_v49  ;;  %v10246_v36 = vadd.f32 1.0, %v7132_v16  ;;  %v10248_v57 = vadd.f32 1.0, %v7134_v50  ;;  %v6850_v16 = vld [vmem:[%s10715_s6 + $0x26c] sm:$0xf] }
0x1064   :  { %v10251_v11 = vmul.f32 0.5, %v10105_v5  ;;  %v10255_v39 = vadd.f32 %v4164_v13, %v3695_v46  ;;  %v7138_v19 = vpop.eup %7137  ;;  %v10258_v14 = vmul.f32 0.5, %v10159_v0  ;;  %v4534_v31 = vadd.f32 %v4486_v47, %v10159_v0 }
0x1065   :  { %v10262_v49 = vmul.f32 0.5, %v10163_v29  ;;  %v4393_v58 = vmul.f32 0.044715, %v10244_v42  ;;  %v10265_v33 = vadd.f32 1.0, %v7136_v15  ;;  %v4543_v5 = vadd.f32 %v4495_v2, %v10163_v29  ;;  %v6837_v2 = vld [vmem:[%s10715_s6 + $0x1fc] sm:$0xf0] }
0x1066   :  { %v7140_v34 = vpop.eup %7139  ;;  %v10269_v13 = vmul.f32 0.5, %v10177_v18  ;;  %v4370_v12 = vmul.f32 0.044715, %v10255_v39  ;;  %v4513_v35 = vadd.f32 %v4465_v56, %v10177_v18  ;;  %v10274_v0 = vmul.f32 0.044715, %v10240_v52 }
0x1067   :  { %v4441_v21 = vmul.f32 %v4393_v58, %v10244_v42  ;;  %v4722_v6 = vmul.f32 %v4674_v28, %v10082_v32  ;;  %v7142_v53 = vpop.eup %7141  ;;  %v4698_v10 = vmul.f32 %v10187_v43, %v10026_v55  ;;  %v4700_v18 = vmul.f32 %v9867_v25, %v9826_v61  ;;  %v6613_v32 = vld [vmem:[%s10715_s6 + $0x2c0] sm:$0xf0]  ;;  %v6523_v28 = vld [vmem:[%s10715_s6 + $0x1a8] sm:$0xf] }
0x1068   :  { %v4418_v29 = vmul.f32 %v4370_v12, %v10255_v39  ;;  %v4724_v24 = vmul.f32 %v9915_v27, %v9847_v54  ;;  %v10297_v50 = vadd.f32 1.0, %v7140_v34  ;;  %v10299_v55 = vadd.f32 1.0, %v7138_v19  ;;  %v4306_v54 = vpop.f32.mrf.mxu0  ;;  %v6515_v27 = vld [vmem:[%s10715_s6 + $0x1a0] sm:$0xf]  ;;  %v6838_v34 = vld [vmem:[%s10715_s6 + $0x204] sm:$0xf0] }
0x1069   :  { %v4582_v61 = vmul.f32 0.7978846, %v4534_v31  ;;  %v4489_v25 = vmul.f32 %v4441_v21, %v10244_v42  ;;  %v4591_v43 = vmul.f32 0.7978846, %v4543_v5  ;;  %v4746_v63 = vpack.c.bf16 %v4722_v6, %v4698_v10  ;;  %v4292_v5 = vpop.f32.mrf.mxu3 }
0x106a   :  { %v4466_v47 = vmul.f32 %v4418_v29, %v10255_v39  ;;  %v4748_v15 = vpack.c.bf16 %v4724_v24, %v4700_v18  ;;  %v10312_v56 = vadd.f32 1.0, %v7142_v53  ;;  %v4561_v19 = vmul.f32 0.7978846, %v4513_v35  ;;  %v10325_v18 = vpop.f32.mrf.mxu2 }
0x106b   :  { %v3704_v31 = vperm.slane %v10035_v3, 6  ;;  %v4537_v58 = vadd.f32 %v4489_v25, %v10244_v42  ;;  %v10321_v12 = vadd.f32 %v4306_v54, %v3705_v48  ;;  %5133 = vmatmul.bf16.vlgmr.msrb.gmra.mxu2 %v4746_v63  ;;  %v6616_v21 = vor.u32 %v6849_v23, %v6613_v32  ;;  %v6825_v23 = vld [vmem:[%s10715_s6 + $0x1a4] sm:$0xf]  ;;  %v4208_v54 = vpop.f32.mrf.mxu1 }
0x106c   :  { %5161 = vmatmul.bf16.vlgmr.msra.gmra.mxu0 %v4748_v15  ;;  %v6624_v6 = vor.u32 %v6850_v16, %v6621_v37  ;;  %v3698_v53 = vperm.slane %v10035_v3, 0  ;;  %7143 = vtanh.f32 %v4582_v61  ;;  %v4514_v35 = vadd.f32 %v4466_v47, %v10255_v39  ;;  %v6517_v32 = vld [vmem:[%s10715_s6 + $0x200] sm:$0xf0]  ;;  %v6826_v16 = vld [vmem:[%s10715_s6 + $0x1ac] sm:$0xf] }
0x106d   :  { %v4585_v29 = vmul.f32 0.7978846, %v4537_v58  ;;  %v6516_v10 = vor.u32 %v6837_v2, %v6515_v27  ;;  %7145 = vtanh.f32 %v4591_v43  ;;  %5187 = vmatpush.bf16.xpose.msra.mxu2 %v6616_v21  ;;  %v6524_v24 = vor.u32 %v6838_v34, %v6523_v28  ;;  %v6863_v61 = vld [vmem:[%s10715_s6 + $0x2cc] sm:$0xf0] }
0x106e   :  { %5215 = vmatpush.bf16.xpose.msrb.mxu0 %v6624_v6  ;;  %v10329_v48 = vadd.f32 %v4166_v9, %v3695_v46  ;;  %v10331_v25 = vadd.f32 %v4292_v5, %v3704_v31  ;;  %v10343_v37 = vadd.f32 %v10230_v4, %v3704_v31  ;;  %v10347_v30 = vadd.f32 %v4206_v17, %v3698_v53  ;;  %v6525_v46 = vld [vmem:[%s10715_s6 + $0x208] sm:$0xf0]  ;;  %v6627_v9 = vld [vmem:[%s10715_s6 + $0x270] sm:$0xf]  ;;  %v6864_v31 = vld [vmem:[%s10715_s6 + $0x2d4] sm:$0xf0] }
0x106f   :  { %5174 = vmatpush.bf16.xpose.msrb.mxu1 %v6516_v10  ;;  %7147 = vtanh.f32 %v4561_v19  ;;  %v10359_v4 = vmul.f32 0.5, %v10244_v42  ;;  %v10362_v17 = vmul.f32 0.044715, %v10321_v12  ;;  %5202 = vmatpush.bf16.xpose.msra.mxu3 %v6524_v24  ;;  %v10366_v43 = vmul.f32 0.5, %v10255_v39  ;;  %v6635_v19 = vld [vmem:[%s10715_s6 + $0x278] sm:$0xf] }
0x1070   :  { %v4394_v27 = vmul.f32 0.044715, %v10329_v48  ;;  %7149 = vtanh.f32 %v4585_v29  ;;  %v4403_v47 = vmul.f32 0.044715, %v10331_v25  ;;  %v4373_v63 = vmul.f32 0.044715, %v10347_v30 }
0x1071   :  { %v4562_v15 = vmul.f32 0.7978846, %v4514_v35  ;;  %v6520_v28 = vor.u32 %v6825_v23, %v6517_v32  ;;  %v6528_v42 = vor.u32 %v6826_v16, %v6525_v46  ;;  %v10378_v58 = vmul.f32 0.044715, %v10343_v37 }
0x1072   :  { %v4442_v2 = vmul.f32 %v4394_v27, %v10329_v48  ;;  %v7144_v39 = vpop.eup %7143  ;;  %v4421_v34 = vmul.f32 %v4373_v63, %v10347_v30  ;;  %v4701_v5 = vmul.f32 %v10248_v57, %v10154_v22  ;;  %v4725_v21 = vmul.f32 %v10299_v55, %v10227_v44 }
0x1073   :  { %v7146_v6 = vpop.eup %7145  ;;  %v4703_v29 = vmul.f32 %v10008_v60, %v9912_v26  ;;  %v4727_v10 = vmul.f32 %v10068_v38, %v9991_v41  ;;  %v6628_v24 = vor.u32 %v6863_v61, %v6627_v9  ;;  %v4451_v23 = vmul.f32 %v4403_v47, %v10331_v25  ;;  %v6851_v38 = vld [vmem:[%s10715_s6 + $0x274] sm:$0xf]  ;;  %v4222_v61 = vpop.f32.mrf.mxu2 }
0x1074   :  { %v4490_v35 = vmul.f32 %v4442_v2, %v10329_v48  ;;  %v4469_v32 = vmul.f32 %v4421_v34, %v10347_v30  ;;  %v4749_v16 = vpack.c.bf16 %v4725_v21, %v4701_v5  ;;  %v6636_v46 = vor.u32 %v6864_v31, %v6635_v19  ;;  %v6629_v9 = vld [vmem:[%s10715_s6 + $0x2d0] sm:$0xf0]  ;;  %v6839_v19 = vld [vmem:[%s10715_s6 + $0x20c] sm:$0xf0]  ;;  %v4262_v31 = vpop.f32.mrf.mxu1 }
0x1075   :  { %v7148_v22 = vpop.eup %7147  ;;  %7151 = vtanh.f32 %v4562_v15  ;;  %5188 = vmatpush.bf16.xpose.msra.mxu2 %v6520_v28  ;;  %v4751_v57 = vpack.c.bf16 %v4727_v10, %v4703_v29  ;;  %v3699_v55 = vperm.slane %v10035_v3, 1  ;;  %v4678_v60 = vadd.f32 1.0, %v7144_v39  ;;  %v6539_v10 = vld [vmem:[%s10715_s6 + $0x1b8] sm:$0xf] }
0x1076   :  { %v4538_v44 = vadd.f32 %v4490_v35, %v10329_v48  ;;  %5216 = vmatpush.bf16.xpose.msrb.mxu0 %v6528_v42  ;;  %v7150_v26 = vpop.eup %7149  ;;  %v10394_v27 = vadd.f32 1.0, %v7146_v6  ;;  %5175 = vmatmul.bf16.vlgmr.msrb.gmra.mxu1 %v4749_v16  ;;  %v10398_v41 = vadd.f32 %v4208_v54, %v3698_v53  ;;  %v4517_v63 = vadd.f32 %v4469_v32, %v10347_v30  ;;  %v6852_v53 = vld [vmem:[%s10715_s6 + $0x27c] sm:$0xf]  ;;  %v10767_v6 = vld [vmem:[#allocation7_spill] sm:$0xff]  ;;  %v10768_v35 = vld [vmem:[#allocation4_spill] sm:$0xff] }
0x1077   :  { %5257 = vmatpush.bf16.xpose.msrb.mxu3 %v6636_v46  ;;  %5229 = vmatpush.bf16.xpose.msra.mxu1 %v6628_v24  ;;  %v10408_v15 = vadd.f32 %v10325_v18, %v3699_v55  ;;  %v6637_v54 = vld [vmem:[%s10715_s6 + $0x2d8] sm:$0xf0]  ;;  %7153 = vtanh.f32 %v10224_v62  ;;  %v4657_v2 = vadd.f32 1.0, %v7148_v22  ;;  %v10418_v28 = vmul.f32 0.5, %v10329_v48  ;;  %v6531_v18 = vld [vmem:[%s10715_s6 + $0x1b0] sm:$0xf] }
0x1078   :  { %v4586_v47 = vmul.f32 0.7978846, %v4538_v44  ;;  %5203 = vmatmul.bf16.vlgmr.msra.gmra.mxu3 %v4751_v57  ;;  %v4499_v42 = vmul.f32 %v4451_v23, %v10331_v25  ;;  %v4681_v39 = vadd.f32 1.0, %v7150_v26  ;;  %v4397_v62 = vmul.f32 0.044715, %v10398_v41 }
0x1079   :  { %v4374_v34 = vmul.f32 0.044715, %v10408_v15  ;;  %v4702_v48 = vmul.f32 %v10265_v33, %v10222_v20  ;;  %v4726_v5 = vmul.f32 %v4678_v60, %v10258_v14  ;;  %v4704_v21 = vmul.f32 %v10003_v7, %v9885_v59  ;;  %v6840_v24 = vld [vmem:[%s10715_s6 + $0x214] sm:$0xf0]  ;;  %v6827_v60 = vld [vmem:[%s10715_s6 + $0x1b4] sm:$0xf] }
0x107a   :  { %7155 = vtanh.f32 %v4586_v47  ;;  %v4728_v29 = vmul.f32 %v10768_v35, %v10767_v6  ;;  %v4565_v32 = vmul.f32 0.7978846, %v4517_v63  ;;  %v4445_v14 = vmul.f32 %v4397_v62, %v10398_v41 }
0x107b   :  { %v7152_v23 = vpop.eup %7151  ;;  %v4422_v20 = vmul.f32 %v4374_v34, %v10408_v15  ;;  %v6632_v33 = vor.u32 %v6851_v38, %v6629_v9  ;;  %v4750_v16 = vpack.c.bf16 %v4726_v5, %v4702_v48  ;;  %v6640_v7 = vor.u32 %v6852_v53, %v6637_v54  ;;  %v6533_v38 = vld [vmem:[%s10715_s6 + $0x210] sm:$0xf0]  ;;  %v6828_v53 = vld [vmem:[%s10715_s6 + $0x1bc] sm:$0xf]  ;;  %v4276_v6 = vpop.f32.mrf.mxu2 }
0x107c   :  { %v4752_v59 = vpack.c.bf16 %v4728_v29, %v4704_v21  ;;  %v6532_v46 = vor.u32 %v6839_v19, %v6531_v18  ;;  %v4493_v44 = vmul.f32 %v4445_v14, %v10398_v41  ;;  %v6540_v57 = vor.u32 %v6840_v24, %v6539_v10  ;;  %v6541_v54 = vld [vmem:[%s10715_s6 + $0x218] sm:$0xf0]  ;;  %v6865_v21 = vld [vmem:[%s10715_s6 + $0x2dc] sm:$0xf0] }
0x107d   :  { %v4470_v22 = vmul.f32 %v4422_v20, %v10408_v15  ;;  %5243 = vmatpush.bf16.xpose.msrb.mxu2 %v6632_v33  ;;  %v10446_v26 = vadd.f32 %v4222_v61, %v3699_v55  ;;  %v10454_v9 = vpop.eup %7153  ;;  %v10456_v47 = vadd.f32 1.0, %v7152_v23  ;;  %v10460_v63 = vmul.f32 %v10378_v58, %v10343_v37  ;;  %v10769_v23 = vld [vmem:[#allocation8_spill] sm:$0xff]  ;;  %v4264_v20 = vpop.f32.mrf.mxu1 }
0x107e   :  { %v4452_v55 = vmul.f32 %v10362_v17, %v10321_v12  ;;  %5189 = vmatmul.bf16.vlgmr.msra.gmra.mxu2 %v4750_v16  ;;  %5217 = vmatmul.bf16.vlgmr.msrb.gmra.mxu0 %v4752_v59  ;;  %v3702_v61 = vperm.slane %v10035_v3, 4  ;;  %v4547_v19 = vadd.f32 %v4499_v42, %v10331_v25  ;;  %v4541_v34 = vadd.f32 %v4493_v44, %v10398_v41  ;;  %v6643_v42 = vld [vmem:[%s10715_s6 + $0x280] sm:$0xf] }
0x107f   :  { %v4518_v58 = vadd.f32 %v4470_v22, %v10408_v15  ;;  %5271 = vmatpush.bf16.xpose.msra.mxu0 %v6640_v7  ;;  %5230 = vmatpush.bf16.xpose.msra.mxu1 %v6532_v46  ;;  %v4398_v17 = vmul.f32 0.044715, %v10446_v26  ;;  %7157 = vtanh.f32 %v4565_v32  ;;  %v4705_v48 = vmul.f32 %v4657_v2, %v10269_v13  ;;  %v6651_v13 = vld [vmem:[%s10715_s6 + $0x288] sm:$0xf]  ;;  %v10770_v16 = vld [vmem:[#allocation10_spill] sm:$0xff] }
0x1080   :  { %v7156_v18 = vpop.eup %7155  ;;  %5258 = vmatpush.bf16.xpose.msrb.mxu3 %v6540_v57  ;;  %v10475_v62 = vadd.f32 %v4262_v31, %v3702_v61  ;;  %v4729_v5 = vmul.f32 %v4681_v39, %v10359_v4  ;;  %v4589_v35 = vmul.f32 0.7978846, %v4541_v34  ;;  %v6536_v10 = vor.u32 %v6827_v60, %v6533_v38  ;;  %v6866_v4 = vld [vmem:[%s10715_s6 + $0x2e4] sm:$0xf0] }
0x1081   :  { %v4446_v29 = vmul.f32 %v4398_v17, %v10446_v26  ;;  %v6544_v24 = vor.u32 %v6828_v53, %v6541_v54  ;;  %v4682_v2 = vadd.f32 1.0, %v7156_v18  ;;  %v4707_v32 = vmul.f32 %v10219_v45, %v10769_v23  ;;  %v6854_v17 = vld [vmem:[%s10715_s6 + $0x28c] sm:$0xf] }
0x1082   :  { %v4377_v31 = vmul.f32 0.044715, %v10475_v62  ;;  %v4753_v39 = vpack.c.bf16 %v4729_v5, %v4705_v48  ;;  %v4566_v14 = vmul.f32 0.7978846, %v4518_v58  ;;  %v4731_v59 = vmul.f32 %v10246_v36, %v10770_v16 }
0x1083   :  { %v4494_v33 = vmul.f32 %v4446_v29, %v10446_v26  ;;  %v6644_v7 = vor.u32 %v6865_v21, %v6643_v42  ;;  %7159 = vtanh.f32 %v4589_v35  ;;  %v6652_v22 = vor.u32 %v6866_v4, %v6651_v13  ;;  %v6842_v29 = vld [vmem:[%s10715_s6 + $0x224] sm:$0xf0] }
0x1084   :  { %v4425_v46 = vmul.f32 %v4377_v31, %v10475_v62  ;;  %v3703_v44 = vperm.slane %v10035_v3, 5  ;;  %v10500_v57 = vmul.f32 0.7978846, %v4547_v19  ;;  %v4755_v45 = vpack.c.bf16 %v4731_v59, %v4707_v32  ;;  %v6853_v19 = vld [vmem:[%s10715_s6 + $0x284] sm:$0xf]  ;;  %v10772_v13 = vld [vmem:[#allocation3_spill] sm:$0xff] }
0x1085   :  { %v4542_v60 = vadd.f32 %v4494_v33, %v10446_v26  ;;  %5244 = vmatpush.bf16.xpose.msrb.mxu2 %v6536_v10  ;;  %v10503_v38 = vadd.f32 %v4264_v20, %v3702_v61  ;;  %v7158_v53 = vpop.eup %7157  ;;  %v10506_v54 = vmul.f32 0.5, %v10347_v30  ;;  %v4349_v36 = vmul.f32 0.5, %v10398_v41  ;;  %v6645_v61 = vld [vmem:[%s10715_s6 + $0x2e0] sm:$0xf0] }
0x1086   :  { %v4473_v18 = vmul.f32 %v4425_v46, %v10475_v62  ;;  %5231 = vmatmul.bf16.vlgmr.msra.gmra.mxu1 %v4753_v39  ;;  %v10510_v3 = vadd.f32 %v4276_v6, %v3703_v44  ;;  %v4428_v30 = vmul.f32 %v10274_v0, %v10240_v52  ;;  %v4730_v34 = vmul.f32 %v4682_v2, %v10418_v28  ;;  %v6653_v0 = vld [vmem:[%s10715_s6 + $0x2e8] sm:$0xf0]  ;;  %v6547_v28 = vld [vmem:[%s10715_s6 + $0x1c0] sm:$0xf]  ;;  %v10771_v6 = vld [vmem:[#allocation9_spill] sm:$0xff]  ;;  %v4278_v2 = vpop.f32.mrf.mxu2 }
0x1087   :  { %5285 = vmatpush.bf16.xpose.msrb.mxu1 %v6644_v7  ;;  %v4590_v58 = vmul.f32 0.7978846, %v4542_v60  ;;  %5272 = vmatpush.bf16.xpose.msra.mxu0 %v6544_v24  ;;  %v4401_v41 = vmul.f32 0.044715, %v10503_v38  ;;  %v4500_v48 = vmul.f32 %v4452_v55, %v10321_v12  ;;  %7161 = vtanh.f32 %v4566_v14  ;;  %v6829_v59 = vld [vmem:[%s10715_s6 + $0x1c4] sm:$0xf] }
0x1088   :  { %5313 = vmatpush.bf16.xpose.msra.mxu3 %v6652_v22  ;;  %v4378_v5 = vmul.f32 0.044715, %v10510_v3  ;;  %v4706_v42 = vmul.f32 %v10456_v47, %v10366_v43  ;;  %v4475_v21 = vmul.f32 %v10460_v63, %v10343_v37  ;;  %v4732_v35 = vmul.f32 %v10189_v51, %v10771_v6  ;;  %v6841_v43 = vld [vmem:[%s10715_s6 + $0x21c] sm:$0xf0]  ;;  %v6555_v47 = vld [vmem:[%s10715_s6 + $0x1c8] sm:$0xf] }
0x1089   :  { %5259 = vmatmul.bf16.vlgmr.msrb.gmra.mxu3 %v4755_v45  ;;  %7163 = vtanh.f32 %v4590_v58  ;;  %v4449_v55 = vmul.f32 %v4401_v41, %v10503_v38  ;;  %v7160_v10 = vpop.eup %7159  ;;  %v4521_v63 = vadd.f32 %v4473_v18, %v10475_v62  ;;  %v4708_v4 = vmul.f32 %v10151_v1, %v10772_v13  ;;  %v6549_v1 = vld [vmem:[%s10715_s6 + $0x220] sm:$0xf0]  ;;  %v6830_v60 = vld [vmem:[%s10715_s6 + $0x1cc] sm:$0xf]  ;;  %v6667_v58 = vld [vmem:[%s10715_s6 + $0x298] sm:$0xf] }
0x108a   :  { %v4754_v24 = vpack.c.bf16 %v4730_v34, %v4706_v42  ;;  %v6648_v51 = vor.u32 %v6853_v19, %v6645_v61  ;;  %v4685_v31 = vadd.f32 1.0, %v7160_v10  ;;  %v4426_v39 = vmul.f32 %v4378_v5, %v10510_v3  ;;  %v6557_v45 = vld [vmem:[%s10715_s6 + $0x228] sm:$0xf0]  ;;  %v6868_v41 = vld [vmem:[%s10715_s6 + $0x2f4] sm:$0xf0] }
0x108b   :  { %v4497_v23 = vmul.f32 %v4449_v55, %v10503_v38  ;;  %v6656_v32 = vor.u32 %v6854_v17, %v6653_v0  ;;  %v4661_v20 = vadd.f32 1.0, %v7158_v53  ;;  %v4756_v14 = vpack.c.bf16 %v4732_v35, %v4708_v4  ;;  %v6659_v53 = vld [vmem:[%s10715_s6 + $0x290] sm:$0xf]  ;;  %v6855_v55 = vld [vmem:[%s10715_s6 + $0x294] sm:$0xf] }
0x108c   :  { %v6548_v33 = vor.u32 %v6841_v43, %v6547_v28  ;;  %v6556_v16 = vor.u32 %v6842_v29, %v6555_v47  ;;  %v4476_v7 = vmul.f32 %v4428_v30, %v10240_v52  ;;  %v10562_v22 = vadd.f32 %v4278_v2, %v3703_v44  ;;  %v6867_v30 = vld [vmem:[%s10715_s6 + $0x2ec] sm:$0xf0]  ;;  %v6661_v47 = vld [vmem:[%s10715_s6 + $0x2f0] sm:$0xf0] }
0x108d   :  { %5299 = vmatpush.bf16.xpose.msra.mxu2 %v6648_v51  ;;  %v4545_v46 = vadd.f32 %v4497_v23, %v10503_v38  ;;  %v7162_v18 = vpop.eup %7161  ;;  %v4523_v19 = vadd.f32 %v4475_v21, %v10343_v37  ;;  %v4548_v61 = vadd.f32 %v4500_v48, %v10321_v12  ;;  %v4733_v44 = vmul.f32 %v4685_v31, %v4349_v36  ;;  %v6563_v4 = vld [vmem:[%s10715_s6 + $0x1d0] sm:$0xf] }
0x108e   :  { %5245 = vmatmul.bf16.vlgmr.msrb.gmra.mxu2 %v4754_v24  ;;  %5273 = vmatmul.bf16.vlgmr.msra.gmra.mxu0 %v4756_v14  ;;  %v4569_v17 = vmul.f32 0.7978846, %v4521_v63  ;;  %v4474_v5 = vmul.f32 %v4426_v39, %v10510_v3  ;;  %v4402_v36 = vmul.f32 0.044715, %v10562_v22  ;;  %v6552_v42 = vor.u32 %v6829_v59, %v6549_v1 }
0x108f   :  { %5327 = vmatpush.bf16.xpose.msrb.mxu0 %v6656_v32  ;;  %v7164_v34 = vpop.eup %7163  ;;  %v4593_v48 = vmul.f32 0.7978846, %v4545_v46  ;;  %5286 = vmatpush.bf16.xpose.msrb.mxu1 %v6548_v33  ;;  %v6560_v0 = vor.u32 %v6830_v60, %v6557_v45  ;;  %v4709_v28 = vmul.f32 %v4661_v20, %v10506_v54  ;;  %v4735_v21 = vmul.f32 %v10394_v27, %v10262_v49  ;;  %v6856_v54 = vld [vmem:[%s10715_s6 + $0x29c] sm:$0xf] }
0x1090   :  { %5314 = vmatpush.bf16.xpose.msra.mxu3 %v6556_v16  ;;  %v4450_v6 = vmul.f32 %v4402_v36, %v10562_v22  ;;  %v6660_v35 = vor.u32 %v6867_v30, %v6659_v53  ;;  %v6668_v43 = vor.u32 %v6868_v41, %v6667_v58  ;;  %v6669_v49 = vld [vmem:[%s10715_s6 + $0x2f8] sm:$0xf0]  ;;  %v4571_v27 = vmul.f32 0.7978846, %v4523_v19 }
0x1091   :  { %7165 = vtanh.f32 %v4593_v48  ;;  %v4686_v29 = vadd.f32 1.0, %v7164_v34  ;;  %v4757_v10 = vpack.c.bf16 %v4733_v44, %v4709_v28  ;;  %v4522_v63 = vadd.f32 %v4474_v5, %v10510_v3  ;;  %v6832_v19 = vld [vmem:[%s10715_s6 + $0x1dc] sm:$0xf] }
0x1092   :  { %7167 = vtanh.f32 %v10500_v57  ;;  %v4498_v24 = vmul.f32 %v4450_v6, %v10562_v22  ;;  %v4711_v13 = vmul.f32 %v10297_v50, %v10251_v11  ;;  %v6843_v57 = vld [vmem:[%s10715_s6 + $0x22c] sm:$0xf0]  ;;  %v4662_v51 = vadd.f32 1.0, %v7162_v18  ;;  %v6571_v11 = vld [vmem:[%s10715_s6 + $0x1d8] sm:$0xf] }
0x1093   :  { %7169 = vtanh.f32 %v4569_v17  ;;  %v4350_v2 = vmul.f32 0.5, %v10446_v26  ;;  %v6664_v31 = vor.u32 %v6855_v55, %v6661_v47  ;;  %v6672_v39 = vor.u32 %v6856_v54, %v6669_v49  ;;  %v6844_v50 = vld [vmem:[%s10715_s6 + $0x234] sm:$0xf0] }
0x1094   :  { %v4664_v23 = vadd.f32 1.0, %v10454_v9  ;;  %v4524_v32 = vadd.f32 %v4476_v7, %v10240_v52  ;;  %v4546_v20 = vadd.f32 %v4498_v24, %v10562_v22  ;;  %v4759_v14 = vpack.c.bf16 %v4735_v21, %v4711_v13  ;;  %v6831_v7 = vld [vmem:[%s10715_s6 + $0x1d4] sm:$0xf] }
0x1095   :  { %5300 = vmatpush.bf16.xpose.msra.mxu2 %v6552_v42  ;;  %7171 = vtanh.f32 %v4571_v27  ;;  %v4596_v26 = vmul.f32 0.7978846, %v4548_v61  ;;  %v4326_v33 = vmul.f32 0.5, %v10408_v15  ;;  %v4734_v16 = vmul.f32 %v4686_v29, %v4350_v2  ;;  %v6565_v15 = vld [vmem:[%s10715_s6 + $0x230] sm:$0xf0] }
0x1096   :  { %5287 = vmatmul.bf16.vlgmr.msrb.gmra.mxu1 %v4757_v10  ;;  %v4570_v1 = vmul.f32 0.7978846, %v4522_v63  ;;  %v4594_v46 = vmul.f32 0.7978846, %v4546_v20  ;;  %v6564_v60 = vor.u32 %v6843_v57, %v6563_v4  ;;  %v6572_v9 = vor.u32 %v6844_v50, %v6571_v11  ;;  %v6573_v61 = vld [vmem:[%s10715_s6 + $0x238] sm:$0xf0] }
0x1097   :  { %5341 = vmatpush.bf16.xpose.msra.mxu1 %v6660_v35  ;;  %5328 = vmatpush.bf16.xpose.msrb.mxu0 %v6560_v0  ;;  %v7166_v59 = vpop.eup %7165  ;;  %v4710_v53 = vmul.f32 %v4662_v51, %v4326_v33  ;;  %v4736_v18 = vmul.f32 %v10312_v56, %v10233_v8  ;;  %v4572_v30 = vmul.f32 0.7978846, %v4524_v32  ;;  %v4712_v8 = vmul.f32 %v4664_v23, %v10172_v40 }
0x1098   :  { %5369 = vmatpush.bf16.xpose.msrb.mxu3 %v6668_v43  ;;  %v7168_v45 = vpop.eup %7167  ;;  %7173 = vtanh.f32 %v4594_v46  ;;  %v4689_v58 = vadd.f32 1.0, %v7166_v59  ;;  %v6568_v56 = vor.u32 %v6831_v7, %v6565_v15  ;;  %v6576_v34 = vor.u32 %v6832_v19, %v6573_v61 }
0x1099   :  { %5315 = vmatmul.bf16.vlgmr.msra.gmra.mxu3 %v4759_v14  ;;  %v7170_v44 = vpop.eup %7169  ;;  %7175 = vtanh.f32 %v4596_v26  ;;  %v4758_v41 = vpack.c.bf16 %v4734_v16, %v4710_v53  ;;  %v4353_v48 = vmul.f32 0.5, %v10503_v38  ;;  %v4760_v36 = vpack.c.bf16 %v4736_v18, %v4712_v8 }
0x109a   :  { %7177 = vtanh.f32 %v4570_v1  ;;  %v4665_v5 = vadd.f32 1.0, %v7170_v44  ;;  %v4691_v42 = vadd.f32 1.0, %v7168_v45  ;;  %v4329_v0 = vmul.f32 0.5, %v10475_v62 }
0x109b   :  { %v7172_v17 = vpop.eup %7171  ;;  %7179 = vtanh.f32 %v4572_v30  ;;  %v4737_v28 = vmul.f32 %v4689_v58, %v4353_v48  ;;  %v4355_v40 = vmul.f32 0.5, %v10331_v25  ;;  %v4331_v47 = vmul.f32 0.5, %v10343_v37 }
0x109c   :  { %v4667_v55 = vadd.f32 1.0, %v7172_v17  ;;  %v4713_v35 = vmul.f32 %v4665_v5, %v4329_v0  ;;  %v4354_v63 = vmul.f32 0.5, %v10562_v22  ;;  %v4356_v25 = vmul.f32 0.5, %v10321_v12 }
0x109d   :  { %5355 = vmatpush.bf16.xpose.msrb.mxu2 %v6664_v31  ;;  %v4739_v38 = vmul.f32 %v4691_v42, %v4355_v40  ;;  %v4330_v4 = vmul.f32 0.5, %v10510_v3  ;;  %v4332_v37 = vmul.f32 0.5, %v10240_v52  ;;  %v6904_v52 = vld [vmem:[%s10711_s1 + $0x224] ss:$0 sm:$0xff] }
0x109e   :  { %5301 = vmatmul.bf16.vlgmr.msra.gmra.mxu2 %v4758_v41  ;;  %5329 = vmatmul.bf16.vlgmr.msrb.gmra.mxu0 %v4760_v36  ;;  %v7174_v21 = vpop.eup %7173  ;;  %v4761_v49 = vpack.c.bf16 %v4737_v28, %v4713_v35  ;;  %v4715_v29 = vmul.f32 %v4667_v55, %v4331_v47 }
0x109f   :  { %5383 = vmatpush.bf16.xpose.msra.mxu0 %v6672_v39  ;;  %5342 = vmatpush.bf16.xpose.msra.mxu1 %v6564_v60  ;;  %v7176_v6 = vpop.eup %7175  ;;  %v4690_v54 = vadd.f32 1.0, %v7174_v21 }
0x10a0   :  { %5370 = vmatpush.bf16.xpose.msrb.mxu3 %v6572_v9  ;;  %v7178_v43 = vpop.eup %7177  ;;  %v4692_v62 = vadd.f32 1.0, %v7176_v6  ;;  %v4763_v24 = vpack.c.bf16 %v4739_v38, %v4715_v29 }
0x10a1   :  { %v7180_v27 = vpop.eup %7179  ;;  %v4666_v10 = vadd.f32 1.0, %v7178_v43  ;;  %v4738_v57 = vmul.f32 %v4690_v54, %v4354_v63 }
0x10a2   :  { %v4668_v13 = vadd.f32 1.0, %v7180_v27  ;;  %v4740_v2 = vmul.f32 %v4692_v62, %v4356_v25 }
0x10a3   :  { %v4714_v51 = vmul.f32 %v4666_v10, %v4330_v4 }
0x10a4   :  { %v4716_v39 = vmul.f32 %v4668_v13, %v4332_v37 }
0x10a5   :  { %5356 = vmatpush.bf16.xpose.msrb.mxu2 %v6568_v56  ;;  %v4762_v31 = vpack.c.bf16 %v4738_v57, %v4714_v51 }
0x10a6   :  { %5343 = vmatmul.bf16.vlgmr.msra.gmra.mxu1 %v4761_v49  ;;  %v4764_v11 = vpack.c.bf16 %v4740_v2, %v4716_v39 }
0x10a7   :  { %5384 = vmatpush.bf16.xpose.msra.mxu0 %v6576_v34 }
0x10a9   :  { %5371 = vmatmul.bf16.vlgmr.msrb.gmra.mxu3 %v4763_v24 }
0x10ae   :  { %5357 = vmatmul.bf16.vlgmr.msrb.gmra.mxu2 %v4762_v31  ;;  %5385 = vmatmul.bf16.vlgmr.msra.gmra.mxu0 %v4764_v11 }
0x10b1   :  { %v5064_v50 = vpop.f32.mrf.mxu1 }
0x10b2   :  { %v5065_v1 = vadd.f32 %v6904_v52, %v5064_v50 }
0x10b9   :  { %v5066_v32 = vpop.f32.mrf.mxu1 }
0x10ba   :  { %v5067_v18 = vadd.f32 %v6904_v52, %v5066_v32 }
0x10c0   :  { %v5078_v20 = vpop.f32.mrf.mxu2 }
0x10c1   :  { %v5079_v60 = vadd.f32 %v5078_v20, %v5065_v1 }
0x10c8   :  { %v5080_v26 = vpop.f32.mrf.mxu2 }
0x10c9   :  { %v5081_v61 = vadd.f32 %v5080_v26, %v5067_v18 }
0x10cd   :  { %v5092_v22 = vpop.f32.mrf.mxu3 }
0x10ce   :  { %v5093_v45 = vadd.f32 %v5092_v22, %v5079_v60 }
0x10d2   :  { %v5106_v23 = vpop.f32.mrf.mxu0 }
0x10d3   :  { %v5107_v15 = vadd.f32 %v5106_v23, %v5093_v45 }
0x10d5   :  { %v5094_v12 = vpop.f32.mrf.mxu3 }
0x10d6   :  { %v5095_v30 = vadd.f32 %v5094_v12, %v5081_v61 }
0x10da   :  { %v5108_v14 = vpop.f32.mrf.mxu0 }
0x10db   :  { %v5109_v34 = vadd.f32 %v5108_v14, %v5095_v30 }
0x10de   :  { %v5120_v3 = vpop.f32.mrf.mxu1 }
0x10df   :  { %v5121_v44 = vadd.f32 %v5120_v3, %v5107_v15 }
0x10e5   :  { %v5148_v33 = vpop.f32.mrf.mxu3 }
0x10e6   :  { %v5122_v59 = vpop.f32.mrf.mxu1 }
0x10e7   :  { %v5123_v5 = vadd.f32 %v5122_v59, %v5109_v34 }
0x10e9   :  { %v5162_v16 = vpop.f32.mrf.mxu0 }
0x10ed   :  { %v5150_v9 = vpop.f32.mrf.mxu3 }
0x10ee   :  { %v5134_v46 = vpop.f32.mrf.mxu2 }
0x10ef   :  { %v5135_v58 = vadd.f32 %v5134_v46, %v5121_v44 }
0x10f1   :  { %v5164_v7 = vpop.f32.mrf.mxu0  ;;  %v5149_v17 = vadd.f32 %v5148_v33, %v5135_v58 }
0x10f3   :  { %v5176_v53 = vpop.f32.mrf.mxu1  ;;  %v5163_v36 = vadd.f32 %v5162_v16, %v5149_v17 }
0x10f5   :  { %v5177_v55 = vadd.f32 %v5176_v53, %v5163_v36 }
0x10f6   :  { %v5136_v19 = vpop.f32.mrf.mxu2 }
0x10f7   :  { %v5137_v42 = vadd.f32 %v5136_v19, %v5123_v5 }
0x10f9   :  { %v5151_v40 = vadd.f32 %v5150_v9, %v5137_v42 }
0x10fb   :  { %v5204_v41 = vpop.f32.mrf.mxu3  ;;  %v5218_v8 = vpop.f32.mrf.mxu0  ;;  %v5165_v43 = vadd.f32 %v5164_v7, %v5151_v40  ;;  %v10775_v40 = vld [vmem:[#allocation2_spill] sm:$0xff] }
0x10fc   :  { %v5178_v56 = vpop.f32.mrf.mxu1 }
0x10fd   :  { %v5179_v49 = vadd.f32 %v5178_v56, %v5165_v43 }
0x1101   :  { %v5190_v48 = vpop.f32.mrf.mxu2 }
0x1102   :  { %v5191_v6 = vadd.f32 %v5190_v48, %v5177_v55 }
0x1103   :  { %v5206_v0 = vpop.f32.mrf.mxu3  ;;  %v5220_v28 = vpop.f32.mrf.mxu0 }
0x1104   :  { %v5232_v21 = vpop.f32.mrf.mxu1  ;;  %v5205_v54 = vadd.f32 %v5204_v41, %v5191_v6  ;;  %v10773_v41 = vld [vmem:[#allocation5_spill] sm:$0xff] }
0x1106   :  { %v5219_v29 = vadd.f32 %v5218_v8, %v5205_v54 }
0x1108   :  { %v5233_v24 = vadd.f32 %v5232_v21, %v5219_v29 }
0x1109   :  { %v5192_v35 = vpop.f32.mrf.mxu2 }
0x110a   :  { %v5193_v62 = vadd.f32 %v5192_v35, %v5179_v49 }
0x110b   :  { %v5274_v38 = vpop.f32.mrf.mxu0 }
0x110c   :  { %v5260_v47 = vpop.f32.mrf.mxu3  ;;  %v5234_v27 = vpop.f32.mrf.mxu1  ;;  %v5207_v13 = vadd.f32 %v5206_v0, %v5193_v62  ;;  %v10774_v0 = vld [vmem:[#allocation6_spill] sm:$0xff]  ;;  %v5446_v62 = vld [vmem:[%s10711_s1 + $0x1f8] sm:$0xff] }
0x110d   :  { %5472 = vmatpush.msrb.mxu1 %v5446_v62 }
0x110e   :  { %v5221_v57 = vadd.f32 %v5220_v28, %v5207_v13  ;;  %v5444_v13 = vld [vmem:[%s10711_s1 + $0x1e8] sm:$0xff] }
0x1110   :  { %v5235_v31 = vadd.f32 %v5234_v27, %v5221_v57 }
0x1111   :  { %v5246_v10 = vpop.f32.mrf.mxu2 }
0x1112   :  { %v5247_v4 = vadd.f32 %v5246_v10, %v5233_v24  ;;  %v5445_v10 = vld [vmem:[%s10711_s1 + $0x1f0] sm:$0xff] }
0x1113   :  { %v5276_v25 = vpop.f32.mrf.mxu0  ;;  %5473 = vmatpush.msrb.mxu1 %v5445_v10 }
0x1114   :  { %v5262_v63 = vpop.f32.mrf.mxu3  ;;  %v5288_v37 = vpop.f32.mrf.mxu1  ;;  %v5261_v2 = vadd.f32 %v5260_v47, %v5247_v4  ;;  %v5443_v4 = vld [vmem:[%s10711_s1 + $0x1e0] sm:$0xff] }
0x1115   :  { %5474 = vmatpush.msrb.mxu1 %v5444_v13 }
0x1116   :  { %v5275_v11 = vadd.f32 %v5274_v38, %v5261_v2 }
0x1117   :  { %5475 = vmatpush.msrb.mxu1 %v5443_v4 }
0x1118   :  { %v5289_v32 = vadd.f32 %v5288_v37, %v5275_v11 }
0x1119   :  { %v5248_v51 = vpop.f32.mrf.mxu2 }
0x111a   :  { %v5249_v50 = vadd.f32 %v5248_v51, %v5235_v31 }
0x111b   :  { %v5330_v22 = vpop.f32.mrf.mxu0 }
0x111c   :  { %v5316_v39 = vpop.f32.mrf.mxu3  ;;  %v5263_v20 = vadd.f32 %v5262_v63, %v5249_v50  ;;  %v5290_v12 = vpop.f32.mrf.mxu1 }
0x111e   :  { %v5277_v3 = vadd.f32 %v5276_v25, %v5263_v20  ;;  %v6905_v20 = vld [vmem:[%s10711_s1 + $0x225] ss:$0 sm:$0xff] }
0x1120   :  { %v5291_v52 = vadd.f32 %v5290_v12, %v5277_v3  ;;  %v6906_v3 = vld [vmem:[%s10711_s1 + $0x226] ss:$0 sm:$0xff] }
0x1121   :  { %v5302_v23 = vpop.f32.mrf.mxu2 }
0x1122   :  { %v5303_v14 = vadd.f32 %v5302_v23, %v5289_v32 }
0x1123   :  { %v5332_v16 = vpop.f32.mrf.mxu0 }
0x1124   :  { %v5318_v26 = vpop.f32.mrf.mxu3  ;;  %v5317_v33 = vadd.f32 %v5316_v39, %v5303_v14  ;;  %v5344_v60 = vpop.f32.mrf.mxu1 }
0x1126   :  { %v5331_v1 = vadd.f32 %v5330_v22, %v5317_v33 }
0x1128   :  { %v5345_v9 = vadd.f32 %v5344_v60, %v5331_v1 }
0x1129   :  { %v5304_v59 = vpop.f32.mrf.mxu2 }
0x112a   :  { %v5305_v46 = vadd.f32 %v5304_v59, %v5291_v52 }
0x112b   :  { %v5386_v15 = vpop.f32.mrf.mxu0 }
0x112c   :  { %v5319_v7 = vadd.f32 %v5318_v26, %v5305_v46  ;;  %v5372_v45 = vpop.f32.mrf.mxu3  ;;  %v5346_v30 = vpop.f32.mrf.mxu1 }
0x112e   :  { %v5333_v19 = vadd.f32 %v5332_v16, %v5319_v7 }
0x1130   :  { %v5347_v58 = vadd.f32 %v5346_v30, %v5333_v19  ;;  %v7243_v30 = vmov 16.0  }
0x1131   :  { %v5358_v53 = vpop.f32.mrf.mxu2 }
0x1132   :  { %v5359_v18 = vadd.f32 %v5358_v53, %v5345_v9 }
0x1133   :  { %v5388_v36 = vpop.f32.mrf.mxu0 }
0x1134   :  { %v5373_v61 = vadd.f32 %v5372_v45, %v5359_v18  ;;  %v5374_v5 = vpop.f32.mrf.mxu3  ;;  %v6907_v45 = vld [vmem:[%s10711_s1 + $0x210] ss:$0 sm:$0xff] }
0x1136   :  { %v5387_v44 = vadd.f32 %v5386_v15, %v5373_v61 }
0x1138   :  { %v5391_v8 = vadd.f32 %v5387_v44, %v10773_v41 }
0x1139   :  { %v5360_v56 = vpop.f32.mrf.mxu2 }
0x113a   :  { %v5361_v34 = vadd.f32 %v5360_v56, %v5347_v58  ;;  %v5393_v17 = vsel %vm202_vm8, %v5391_v8, 0.0 }
0x113b   :  { %5394 = vadd.xlane.f32.xlu1 %v5393_v17 }
0x113c   :  { %v5375_v48 = vadd.f32 %v5374_v5, %v5361_v34 }
0x113e   :  { %v5389_v42 = vadd.f32 %v5388_v36, %v5375_v48 }
0x1140   :  { %v5392_v28 = vadd.f32 %v5389_v42, %v10774_v0 }
0x1142   :  { %v5396_v21 = vsel %vm202_vm8, %v5392_v28, 0.0 }
0x1143   :  { %5397 = vadd.xlane.f32.xlu2 %v5396_v21 }
0x11ae   :  { %v5395_v55 = vpop.xlane.xlu1 %5394 }
0x11af   :  { %v5399_v6 = vmul.f32 %v5395_v55, %v10775_v40 }
0x11b1   :  { %v5401_v35 = vsub.f32 %v5391_v8, %v5399_v6 }
0x11b3   :  { %v5403_v43 = vmul.f32 %v5401_v35, %v5401_v35 }
0x11b5   :  { %v5405_v47 = vsel %vm202_vm8, %v5403_v43, 0.0  ;;  %v5447_v43 = vld [vmem:[%s10711_s1 + $0x200] sm:$0xff] }
0x11b6   :  { %v5398_v38 = vpop.xlane.xlu2 %5397  ;;  %5406 = vadd.xlane.f32.xlu0 %v5405_v47 }
0x11b7   :  { %v5400_v54 = vmul.f32 %v5398_v38, %v10775_v40 }
0x11b9   :  { %v5402_v49 = vsub.f32 %v5392_v28, %v5400_v54 }
0x11bb   :  { %v5404_v27 = vmul.f32 %v5402_v49, %v5402_v49 }
0x11bd   :  { %v5408_v29 = vsel %vm202_vm8, %v5404_v27, 0.0 }
0x11be   :  { %5409 = vadd.xlane.f32.xlu1 %v5408_v29 }
0x1229   :  { %v5407_v63 = vpop.xlane.xlu0 %5406 }
0x122a   :  { %v5411_v24 = vmul.f32 %v5407_v63, %v10775_v40 }
0x122c   :  { %v5413_v25 = vadd.f32 1e-12, %v5411_v24 }
0x122e   :  { %7181 = vrsqrt.f32 %v5413_v25  ;;  %vm5421_vm3 = vweird.f32 %v5413_v25 }
0x1231   :  { %v5410_v57 = vpop.xlane.xlu1 %5409 }
0x1232   :  { %v5412_v37 = vmul.f32 %v5410_v57, %v10775_v40 }
0x1234   :  { %v7182_v51 = vpop.eup %7181  ;;  %v5414_v2 = vadd.f32 1e-12, %v5412_v37  ;;  %v6908_v37 = vld [vmem:[%s10711_s1 + $0x211] ss:$0 sm:$0xff] }
0x1235   :  { %v5416_v31 = vmul.f32 %v7182_v51, %v5413_v25  ;;  %vm5422_vm2 = vweird.f32 %v7182_v51 }
0x1236   :  { %7183 = vrsqrt.f32 %v5414_v2  ;;  %vm5423_vm4 = vmor %vm5421_vm3, %vm5422_vm2  ;;  %vm5431_vm6 = vweird.f32 %v5414_v2 }
0x1237   :  { %v5417_v39 = vmul.f32 %v7182_v51, %v5416_v31  ;;  %7185 = vrcp.f32 %v7243_v30  ;;  %v6909_v31 = vld [vmem:[%s10711_s1 + $0x212] ss:$0 sm:$0xff] }
0x1239   :  { %v5418_v11 = vmul.f32 0.5, %v5417_v39 }
0x123b   :  { %v5419_v50 = vsub.f32 1.5, %v5418_v11 }
0x123c   :  { %v7184_v22 = vpop.eup %7183 }
0x123d   :  { %v5420_v23 = vmul.f32 %v7182_v51, %v5419_v50  ;;  %v5426_v32 = vmul.f32 %v7184_v22, %v5414_v2  ;;  %vm5432_vm5 = vweird.f32 %v7184_v22  ;;  %v7186_v58 = vpop.eup %7185 }
0x123e   :  { %vm5433_vm7 = vmor %vm5431_vm6, %vm5432_vm5  ;;  %v5490_v41 = vmul.f32 16.0, %v7186_v58 }
0x123f   :  { %v5424_v12 = vsel %vm5423_vm4, %v7182_v51, %v5420_v23  ;;  %v5427_v14 = vmul.f32 %v7184_v22, %v5426_v32 }
0x1240   :  { %v5435_v26 = vmul.f32 %v5424_v12, %v5401_v35  ;;  %v5491_v8 = vsub.f32 1.0, %v5490_v41  ;;  %v5448_v35 = vld [vmem:[%s10711_s1 + $0x208] sm:$0xff] }
0x1241   :  { %v5428_v33 = vmul.f32 0.5, %v5427_v14  ;;  %5563 = vmatpush.msra.mxu2 %v5448_v35 }
0x1242   :  { %v5438_v16 = vmul.f32 %v6905_v20, %v5435_v26  ;;  %v5492_v56 = vmul.f32 %v7186_v58, %v5491_v8 }
0x1243   :  { %v5429_v59 = vsub.f32 1.5, %v5428_v33  ;;  %5564 = vmatpush.msra.mxu2 %v5447_v43 }
0x1244   :  { %v5441_v52 = vadd.f32 %v6906_v3, %v5438_v16  ;;  %v5493_v34 = vadd.f32 %v7186_v58, %v5492_v56  ;;  %v6910_v16 = vld [vmem:[%s10711_s1 + $0x213] ss:$0 sm:$0xff] }
0x1245   :  { %v5430_v1 = vmul.f32 %v7184_v22, %v5429_v59 }
0x1246   :  { %6673 = vmatmul.msk.f32.vlgmr.msrb.gmra.mxu1 %vm202_vm8, %v5441_v52 }
0x1247   :  { %v5434_v46 = vsel %vm5433_vm7, %v7184_v22, %v5430_v1 }
0x1248   :  { %v5436_v60 = vmul.f32 %v5434_v46, %v5402_v49 }
0x124a   :  { %v5439_v9 = vmul.f32 %v6905_v20, %v5436_v60 }
0x124c   :  { %v5442_v7 = vadd.f32 %v6906_v3, %v5439_v9 }
0x124e   :  { %6674 = vmatmul.msk.f32.gmra.mxu1 %vm202_vm8, %v5442_v7  ;;  %vm5494_vm8 = vweird.f32 %v7186_v58 }
0x124f   :  { %v5495_v17 = vsel %vm5494_vm8, %v7186_v58, %v5493_v34 }
0x12c3   :  { %v5477_v53 = vpop.f32.mrf.mxu1 }
0x12c4   :  { %v5478_v18 = vadd.f32 %v6907_v45, %v5477_v53 }
0x12c6   :  { %v5483_v15 = vsel %vm607_vm9, %v5478_v18, 0.0 }
0x12c7   :  { %5484 = vadd.xlane.f32.xlu2 %v5483_v15 }
0x12cb   :  { %v5480_v19 = vpop.f32.mrf.mxu1 }
0x12cc   :  { %v5481_v61 = vadd.f32 %v6907_v45, %v5480_v19 }
0x12ce   :  { %v5486_v44 = vsel %vm607_vm9, %v5481_v61, 0.0 }
0x12cf   :  { %5487 = vadd.xlane.f32.xlu0 %v5486_v44 }
0x133a   :  { %v5485_v5 = vpop.xlane.xlu2 %5484 }
0x133b   :  { %v5496_v48 = vmul.f32 %v5495_v17, %v5485_v5 }
0x133d   :  { %v5498_v36 = vsub.f32 %v5478_v18, %v5496_v48 }
0x133f   :  { %v5500_v42 = vmul.f32 %v5498_v36, %v5498_v36 }
0x1341   :  { %v5502_v0 = vsel %vm607_vm9, %v5500_v42, 0.0 }
0x1342   :  { %5503 = vadd.xlane.f32.xlu1 %v5502_v0  ;;  %v5488_v28 = vpop.xlane.xlu0 %5487 }
0x1343   :  { %v5497_v21 = vmul.f32 %v5495_v17, %v5488_v28 }
0x1345   :  { %v5499_v55 = vsub.f32 %v5481_v61, %v5497_v21 }
0x1347   :  { %v5501_v40 = vmul.f32 %v5499_v55, %v5499_v55 }
0x1349   :  { %v5505_v6 = vsel %vm607_vm9, %v5501_v40, 0.0 }
0x134a   :  { %5506 = vadd.xlane.f32.xlu2 %v5505_v6 }
0x13b5   :  { %v5504_v47 = vpop.xlane.xlu1 %5503 }
0x13b6   :  { %v5508_v38 = vmul.f32 %v5504_v47, %v5495_v17 }
0x13b8   :  { %v5510_v54 = vadd.f32 1e-05, %v5508_v38 }
0x13ba   :  { %7187 = vrsqrt.f32 %v5510_v54  ;;  %vm5518_vm14 = vweird.f32 %v5510_v54 }
0x13bd   :  { %v5507_v49 = vpop.xlane.xlu2 %5506 }
0x13be   :  { %v5509_v27 = vmul.f32 %v5507_v49, %v5495_v17 }
0x13c0   :  { %v7188_v29 = vpop.eup %7187  ;;  %v5511_v62 = vadd.f32 1e-05, %v5509_v27 }
0x13c1   :  { %v5513_v10 = vmul.f32 %v7188_v29, %v5510_v54  ;;  %vm5519_vm13 = vweird.f32 %v7188_v29 }
0x13c2   :  { %7189 = vrsqrt.f32 %v5511_v62  ;;  %vm5520_vm10 = vmor %vm5518_vm14, %vm5519_vm13  ;;  %vm5528_vm12 = vweird.f32 %v5511_v62 }
0x13c3   :  { %v5514_v63 = vmul.f32 %v7188_v29, %v5513_v10 }
0x13c5   :  { %v5515_v24 = vmul.f32 0.5, %v5514_v63 }
0x13c7   :  { %v5516_v13 = vsub.f32 1.5, %v5515_v24 }
0x13c8   :  { %v7190_v25 = vpop.eup %7189 }
0x13c9   :  { %v5517_v4 = vmul.f32 %v7188_v29, %v5516_v13  ;;  %v5523_v57 = vmul.f32 %v7190_v25, %v5511_v62  ;;  %vm5529_vm11 = vweird.f32 %v7190_v25 }
0x13ca   :  { %vm5530_vm15 = vmor %vm5528_vm12, %vm5529_vm11 }
0x13cb   :  { %v5521_v51 = vsel %vm5520_vm10, %v7188_v29, %v5517_v4  ;;  %v5524_v2 = vmul.f32 %v7190_v25, %v5523_v57 }
0x13cc   :  { %v5532_v39 = vmul.f32 %v5521_v51, %v5498_v36 }
0x13cd   :  { %v5525_v11 = vmul.f32 0.5, %v5524_v2 }
0x13ce   :  { %v5535_v50 = vmul.f32 %v6908_v37, %v5532_v39 }
0x13cf   :  { %v5526_v22 = vsub.f32 1.5, %v5525_v11 }
0x13d0   :  { %v5538_v23 = vadd.f32 %v6909_v31, %v5535_v50 }
0x13d1   :  { %v5527_v32 = vmul.f32 %v7190_v25, %v5526_v22 }
0x13d2   :  { %v5540_v20 = vmax.f32 %v5538_v23, 0.0 }
0x13d3   :  { %v5531_v12 = vsel %vm5530_vm15, %v7190_v25, %v5527_v32 }
0x13d4   :  { %v5533_v14 = vmul.f32 %v5531_v12, %v5499_v55  ;;  %6675 = vmatmul.msk.f32.vlgmr.msra.gmra.mxu2 %vm607_vm9, %v5540_v20 }
0x13d6   :  { %v5536_v3 = vmul.f32 %v6908_v37, %v5533_v14 }
0x13d8   :  { %v5539_v26 = vadd.f32 %v6909_v31, %v5536_v3 }
0x13da   :  { %v5541_v33 = vmax.f32 %v5539_v26, 0.0 }
0x13dc   :  { %6676 = vmatmul.msk.f32.gmra.mxu2 %vm607_vm9, %v5541_v33 }
0x1457   :  { %v5566_v59 = vpop.f32.mrf.mxu2 }
0x1458   :  { %v5567_v52 = vadd.f32 %v6910_v16, %v5566_v59 }
0x145a   :  { %5572 = vst [vmem:[%s10717_s7] sm:$0xff] %v5567_v52 }
0x145f   :  { %v5569_v1 = vpop.f32.mrf.mxu2 }
0x1460   :  { %v5570_v46 = vadd.f32 %v6910_v16, %v5569_v1 }
0x1462   :  { %5573 = vst [vmem:[%s10717_s7 + $0x8] sm:$0xff] %v5570_v46 }

</bundles_post_ra>
